<compile_context>
chip_gen: v7x
topology: tpu7x:2x2x1
jax: 0.10.0
libtpu: 0.0.40
codegen_flags: <defaults>
</compile_context>

<pallas_src>
import functools

import jax
import jax.numpy as jnp
from jax import lax
from jax.experimental import pallas as pl
from jax.experimental.pallas import tpu as pltpu


# bf16 matmul operands / scratches (MXU-native on all generations); all
# accumulation and transcendental math stays in f32 (v5e-safe).
MATMUL_DTYPE = jnp.bfloat16


# ------------------------------ Pallas kernel -------------------------------

def _gated_resblock_kernel(*refs, H, W, kh, kw, top, left, has_aux):
    """Fused GatedResBlock forward for one batch element (NHWC, channel-last)."""
    if has_aux:
        (x_ref, w1_ref, b1_ref, w2_ref, b2_ref, aux_ref,
         o_ref, ex_ref, cols1_ref, act_ref, cols2_ref) = refs
    else:
        (x_ref, w1_ref, b1_ref, w2_ref, b2_ref,
         o_ref, ex_ref, cols1_ref, act_ref, cols2_ref) = refs
        aux_ref = None

    HW = H * W
    Cin = x_ref.shape[-1]
    Cmid = w1_ref.shape[-1]
    Hp, Wp = act_ref.shape[0], act_ref.shape[1]
    bot = Hp - top - H
    right = Wp - left - W
    taps = kh * kw
    mmt = w1_ref.dtype

    def elu(v):
        # ELU(0) == 0, so zero padding commutes with the activation.
        return jnp.where(v > 0, v, jnp.exp(jnp.minimum(v, 0.0)) - 1.0)

    # ---- ELU(padded x) once: f32 math, bf16 store for the MXU ---------------
    ex_ref[...] = elu(x_ref[...]).astype(mmt)

    # ---- conv1 im2col: lane-dense (HW, kh*kw*Cin [+ Caux]) LHS in VMEM ------
    for i in range(kh):
        for j in range(kw):
            t = i * kw + j
            cols1_ref[:, pl.ds(t * Cin, Cin)] = (
                ex_ref[pl.ds(i, H), pl.ds(j, W), :].reshape(HW, Cin))
    if has_aux:
        Caux = aux_ref.shape[-1]
        cols1_ref[:, pl.ds(taps * Cin, Caux)] = elu(aux_ref[...]).astype(mmt)

    # ---- conv1 (+ fused aux 1x1) as ONE K=taps*Cin(+Caux) MXU matmul --------
    # weight-norm scale is already folded into w1 in the wrapper.
    mid = jnp.dot(cols1_ref[...], w1_ref[...],
                  preferred_element_type=jnp.float32) + b1_ref[...]

    # dropout: identity (eval mode)

    # ---- ELU(mid) into the zero-padded conv2 scratch (border-only zeroing) --
    if top:
        act_ref[pl.ds(0, top), :, :] = jnp.zeros((top, Wp, Cmid), mmt)
    if bot:
        act_ref[pl.ds(top + H, bot), :, :] = jnp.zeros((bot, Wp, Cmid), mmt)
    if left:
        act_ref[:, pl.ds(0, left), :] = jnp.zeros((Hp, left, Cmid), mmt)
    if right:
        act_ref[:, pl.ds(left + W, right), :] = jnp.zeros((Hp, right, Cmid), mmt)
    act_ref[pl.ds(top, H), pl.ds(left, W), :] = (
        elu(mid).reshape(H, W, Cmid).astype(mmt))

    # ---- conv2 im2col + ONE Cout=2*Cin matmul (GLU halves kept combined) ----
    for i in range(kh):
        for j in range(kw):
            t = i * kw + j
            cols2_ref[:, pl.ds(t * Cmid, Cmid)] = (
                act_ref[pl.ds(i, H), pl.ds(j, W), :].reshape(HW, Cmid))
    out2 = jnp.dot(cols2_ref[...], w2_ref[...],
                   preferred_element_type=jnp.float32) + b2_ref[...]

    # ---- GLU gate (EUP reciprocal) + residual add, fused epilogue -----------
    a_half = out2[:, :Cin]
    b_half = out2[:, Cin:]
    gate = pl.reciprocal(1.0 + jnp.exp(-b_half), approx=True)
    res = x_ref[pl.ds(top, H), pl.ds(left, W), :].reshape(HW, Cin)
    o_ref[...] = (a_half * gate + res).astype(o_ref.dtype)


# ------------------------------- wrapper -------------------------------------

def _pad_for(conv, ksz):
    """(left, right, top, bottom) zero padding used by the reference convs."""
    if conv == 'wnconv2d':
        return (ksz // 2, ksz // 2, ksz // 2, ksz // 2)
    if conv == 'causal':
        return (ksz // 2, ksz // 2, ksz - 1, 0)
    if conv == 'causal_downright':
        return (ksz - 1, 0, ksz - 1, 0)
    raise ValueError(f'Wrong conv: {conv}')


def _prep_conv(p, dtype):
    """torch OIHW weight-norm conv -> im2col weight matrix with the per-output
    channel scale g/||v|| folded in (one-time trace-cost), plus a bias row."""
    v, g, b = p['v'], p['g'], p['b']                       # v: (Cout, Cin, kh, kw)
    cout, cin, kh, kw = v.shape
    scale = g / jnp.sqrt(jnp.sum(v * v, axis=(1, 2, 3)))   # (Cout,)
    # row index = (i*kw + j)*Cin + c  -> matches the kernel's im2col layout
    w = jnp.transpose(v, (2, 3, 1, 0)).reshape(kh * kw * cin, cout) * scale[None, :]
    return w.astype(dtype), b.reshape(1, cout).astype(jnp.float32)


@functools.partial(jax.jit, static_argnames=('conv', 'kernel_size'))
def gated_resblock(params, x, aux=None, *, conv='wnconv2d', kernel_size=3):
    """GatedResBlock forward (eval mode). x/aux are NCHW float32 like PyTorch."""
    N, Cin, H, W = x.shape
    ksz = kernel_size
    left, right, top, bot = _pad_for(conv, ksz)
    Hp, Wp = H + top + bot, W + left + right
    assert Hp - ksz + 1 == H and Wp - ksz + 1 == W

    # channel-last + zero pad exactly once at the module boundary
    xp = jnp.pad(jnp.transpose(x, (0, 2, 3, 1)),
                 ((0, 0), (top, bot), (left, right), (0, 0)))

    w1, b1 = _prep_conv(params['conv1'], MATMUL_DTYPE)     # (T*Cin, Cmid)
    Cmid = w1.shape[-1]
    w2, b2 = _prep_conv(params['conv2'], MATMUL_DTYPE)     # (T*Cmid, 2*Cin)

    has_aux = aux is not None
    if has_aux:
        Caux = aux.shape[1]
        auxf = jnp.transpose(aux, (0, 2, 3, 1)).reshape(N, H * W, Caux)
        wa, ba = _prep_conv(params['aux_conv'], MATMUL_DTYPE)   # (Caux, Cmid)
        w1 = jnp.concatenate([w1, wa], axis=0)             # fuse aux 1x1 into conv1
        b1 = b1 + ba
    K1 = w1.shape[0]
    K2 = w2.shape[0]

    inputs = [xp, w1, b1, w2, b2]
    in_specs = [
        pl.BlockSpec((None, Hp, Wp, Cin), lambda n: (n, 0, 0, 0)),
        pl.BlockSpec((K1, Cmid), lambda n: (0, 0)),
        pl.BlockSpec((1, Cmid), lambda n: (0, 0)),
        pl.BlockSpec((K2, 2 * Cin), lambda n: (0, 0)),
        pl.BlockSpec((1, 2 * Cin), lambda n: (0, 0)),
    ]
    if has_aux:
        inputs.append(auxf)
        in_specs.append(pl.BlockSpec((None, H * W, Caux), lambda n: (n, 0, 0)))

    kernel = functools.partial(
        _gated_resblock_kernel, H=H, W=W, kh=ksz, kw=ksz,
        top=top, left=left, has_aux=has_aux)

    out = pl.pallas_call(
        kernel,
        out_shape=jax.ShapeDtypeStruct((N, H * W, Cin), jnp.float32),
        grid=(N,),
        in_specs=in_specs,
        out_specs=pl.BlockSpec((None, H * W, Cin), lambda n: (n, 0, 0)),
        scratch_shapes=[
            pltpu.VMEM((Hp, Wp, Cin), MATMUL_DTYPE),    # ELU(padded x)
            pltpu.VMEM((H * W, K1), MATMUL_DTYPE),      # conv1(+aux) im2col
            pltpu.VMEM((Hp, Wp, Cmid), MATMUL_DTYPE),   # padded ELU(mid)
            pltpu.VMEM((H * W, K2), MATMUL_DTYPE),      # conv2 im2col
        ],
        compiler_params=pltpu.CompilerParams(
            dimension_semantics=("parallel",)),
    )(*inputs)

    # back to NCHW only at the module boundary
    return jnp.transpose(out.reshape(N, H, W, Cin), (0, 3, 1, 2))


# --------------------------- pure-JAX reference ------------------------------

def _elu(x):
    return jnp.where(x > 0, x, jnp.exp(jnp.minimum(x, 0.0)) - 1.0)


def _conv_ref(x, p, pad):
    v, g, b = p['v'], p['g'], p['b']
    w = v * (g / jnp.sqrt(jnp.sum(v * v, axis=(1, 2, 3)))).reshape(-1, 1, 1, 1)
    left, right, top, bot = pad
    xp = jnp.pad(x, ((0, 0), (0, 0), (top, bot), (left, right)))
    y = lax.conv_general_dilated(xp, w, (1, 1), 'VALID',
                                 dimension_numbers=('NCHW', 'OIHW', 'NCHW'))
    return y + b.reshape(1, -1, 1, 1)


def gated_resblock_ref(params, x, aux=None, *, conv='wnconv2d', kernel_size=3):
    pad = _pad_for(conv, kernel_size)
    out = _conv_ref(_elu(x), params['conv1'], pad)
    if aux is not None:
        out = out + _conv_ref(_elu(aux), params['aux_conv'], (0, 0, 0, 0))
    out = _conv_ref(_elu(out), params['conv2'], pad)      # dropout = identity
    cin = x.shape[1]
    a, b = out[:, :cin], out[:, cin:]
    return a * (1.0 / (1.0 + jnp.exp(-b))) + x


# ----------------------------- parameter init --------------------------------

def init_gated_resblock(key, in_channel, channel, kernel_size,
                        conv='wnconv2d', auxiliary_channel=0):
    keys = iter(jax.random.split(key, 12))
    causal = kernel_size // 2 if conv == 'causal' else 0

    def conv_p(cin, cout, kh, kw, causal_col=0):
        v = 0.1 * jax.random.normal(next(keys), (cout, cin, kh, kw), jnp.float32)
        if causal_col > 0:
            # CausalConv2d('causal'): zero last kernel row from column `causal`
            # on weight_v (weight-norm is recomputed from the zeroed v).
            v = v.at[:, :, -1, causal_col:].set(0.0)
        g = 1.0 + 0.05 * jax.random.normal(next(keys), (cout,), jnp.float32)
        b = 0.05 * jax.random.normal(next(keys), (cout,), jnp.float32)
        return {'v': v, 'g': g, 'b': b}

    p = {'conv1': conv_p(in_channel, channel, kernel_size, kernel_size, causal),
         'conv2': conv_p(channel, in_channel * 2, kernel_size, kernel_size, causal)}
    if auxiliary_channel > 0:
        p['aux_conv'] = conv_p(auxiliary_channel, channel, 1, 1)
    return p


# ----------------------------------- main -------------------------------------

if __name__ == "__main__":
    key = jax.random.PRNGKey(0)
    k1, k2, k3, k4 = jax.random.split(key, 4)

    N, Cin, H, W = 2, 32, 16, 16          # batch=2, in_channel=32, 16x16 map
    channel, ksz, aux_ch = 32, 3, 16

    x = jax.random.normal(k1, (N, Cin, H, W), jnp.float32)
    aux = jax.random.normal(k2, (N, aux_ch, H, W), jnp.float32)

    p_plain = init_gated_resblock(k3, Cin, channel, ksz, conv='wnconv2d')
    p_causal = init_gated_resblock(k4, Cin, channel, ksz, conv='causal',
                                   auxiliary_channel=aux_ch)

    # plain wnconv2d resblock (module defaults) + causal resblock with aux input
    out1 = jax.block_until_ready(gated_resblock(p_plain, x))
    out2 = jax.block_until_ready(
        gated_resblock(p_causal, x, aux, conv='causal', kernel_size=ksz))

    ref1 = gated_resblock_ref(p_plain, x)
    ref2 = gated_resblock_ref(p_causal, x, aux, conv='causal', kernel_size=ksz)

    assert out1.shape == (N, Cin, H, W) and out2.shape == (N, Cin, H, W)
    assert bool(jnp.all(jnp.isfinite(out1))) and bool(jnp.all(jnp.isfinite(out2)))
    # bf16 MXU operands through two stacked convs + approx-reciprocal gate:
    # measured max-abs error vs the f32 reference is well under 5e-2.
    tol = 1e-3 if MATMUL_DTYPE == jnp.float32 else 5e-2
    err1 = float(jnp.max(jnp.abs(out1 - ref1)))
    err2 = float(jnp.max(jnp.abs(out2 - ref2)))
    assert err1 < tol and err2 < tol, (err1, err2)
    print("KERNEL_OK")
</pallas_src>

<mosaic_0001>
module attributes {stable_mosaic.version = 11 : i64} {
  func.func @_gated_resblock_kernel(%arg0: i32, %arg1: memref<1x18x18x32xf32, #tpu.memory_space<vmem>>, %arg2: memref<288x32xbf16, #tpu.memory_space<vmem>>, %arg3: memref<1x32xf32, #tpu.memory_space<vmem>>, %arg4: memref<288x64xbf16, #tpu.memory_space<vmem>>, %arg5: memref<1x64xf32, #tpu.memory_space<vmem>>, %arg6: memref<1x256x32xf32, #tpu.memory_space<vmem>>, %arg7: memref<18x18x32xbf16, #tpu.memory_space<vmem>>, %arg8: memref<256x288xbf16, #tpu.memory_space<vmem>>, %arg9: memref<18x18x32xbf16, #tpu.memory_space<vmem>>, %arg10: memref<256x288xbf16, #tpu.memory_space<vmem>>) attributes {dimension_semantics = [#tpu.dimension_semantics<parallel>], iteration_bounds = array<i64: 2>, scalar_prefetch = 0 : i64, scratch_operands = 4 : i64, tpu.core_type = #tpu.core_type<tc>, window_params = [{transform_indices = @transform_0, window_bounds = array<i64: 1, 18, 18, 32>}, {pipeline_mode = #tpu.pipeline_mode<synchronous>, transform_indices = @transform_1, window_bounds = array<i64: 288, 32>}, {pipeline_mode = #tpu.pipeline_mode<synchronous>, transform_indices = @transform_2, window_bounds = array<i64: 1, 32>}, {pipeline_mode = #tpu.pipeline_mode<synchronous>, transform_indices = @transform_3, window_bounds = array<i64: 288, 64>}, {pipeline_mode = #tpu.pipeline_mode<synchronous>, transform_indices = @transform_4, window_bounds = array<i64: 1, 64>}, {transform_indices = @transform_5, window_bounds = array<i64: 1, 256, 32>}]} {
    %c0 = arith.constant 0 : index
    %c0_0 = arith.constant 0 : index
    %c0_1 = arith.constant 0 : index
    %c0_2 = arith.constant 0 : index
    %0 = vector.load %arg1[%c0, %c0_0, %c0_1, %c0_2] : memref<1x18x18x32xf32, #tpu.memory_space<vmem>>, vector<1x18x18x32xf32>
    %1 = vector.shape_cast %0 : vector<1x18x18x32xf32> to vector<18x18x32xf32>
    %cst = arith.constant 0.000000e+00 : f32
    %2 = vector.broadcast %cst : f32 to vector<18x18x32xf32>
    %3 = arith.cmpf ogt, %1, %2 : vector<18x18x32xf32>
    %cst_3 = arith.constant 0.000000e+00 : f32
    %4 = vector.broadcast %cst_3 : f32 to vector<18x18x32xf32>
    %5 = arith.minimumf %1, %4 : vector<18x18x32xf32>
    %6 = math.exp %5 : vector<18x18x32xf32>
    %cst_4 = arith.constant 1.000000e+00 : f32
    %7 = vector.broadcast %cst_4 : f32 to vector<18x18x32xf32>
    %8 = arith.subf %6, %7 : vector<18x18x32xf32>
    %9 = arith.select %3, %1, %8 : vector<18x18x32xi1>, vector<18x18x32xf32>
    %10 = arith.truncf %9 : vector<18x18x32xf32> to vector<18x18x32xbf16>
    %c0_5 = arith.constant 0 : index
    %c0_6 = arith.constant 0 : index
    %c0_7 = arith.constant 0 : index
    %11 = vector.load %arg7[%c0_5, %c0_6, %c0_7] : memref<18x18x32xbf16, #tpu.memory_space<vmem>>, vector<18x18x32xbf16>
    tpu.vector_store %arg7[%c0_5, %c0_6, %c0_7], %10 {strides = array<i32>} : memref<18x18x32xbf16, #tpu.memory_space<vmem>>, vector<18x18x32xbf16>,
    %c0_8 = arith.constant 0 : index
    %c0_9 = arith.constant 0 : index
    %c0_10 = arith.constant 0 : index
    %12 = vector.load %arg7[%c0_8, %c0_9, %c0_10] : memref<18x18x32xbf16, #tpu.memory_space<vmem>>, vector<16x16x32xbf16>
    %13 = vector.shape_cast %12 : vector<16x16x32xbf16> to vector<256x32xbf16>
    %c0_11 = arith.constant 0 : index
    %c0_12 = arith.constant 0 : index
    %14 = vector.load %arg8[%c0_11, %c0_12] : memref<256x288xbf16, #tpu.memory_space<vmem>>, vector<256x32xbf16>
    tpu.vector_store %arg8[%c0_11, %c0_12], %13 {strides = array<i32>} : memref<256x288xbf16, #tpu.memory_space<vmem>>, vector<256x32xbf16>,
    %c0_13 = arith.constant 0 : index
    %c1 = arith.constant 1 : index
    %c0_14 = arith.constant 0 : index
    %15 = vector.load %arg7[%c0_13, %c1, %c0_14] : memref<18x18x32xbf16, #tpu.memory_space<vmem>>, vector<16x16x32xbf16>
    %16 = vector.shape_cast %15 : vector<16x16x32xbf16> to vector<256x32xbf16>
    %c0_15 = arith.constant 0 : index
    %c32 = arith.constant 32 : index
    %17 = vector.load %arg8[%c0_15, %c32] : memref<256x288xbf16, #tpu.memory_space<vmem>>, vector<256x32xbf16>
    tpu.vector_store %arg8[%c0_15, %c32], %16 {strides = array<i32>} : memref<256x288xbf16, #tpu.memory_space<vmem>>, vector<256x32xbf16>,
    %c0_16 = arith.constant 0 : index
    %c2 = arith.constant 2 : index
    %c0_17 = arith.constant 0 : index
    %18 = vector.load %arg7[%c0_16, %c2, %c0_17] : memref<18x18x32xbf16, #tpu.memory_space<vmem>>, vector<16x16x32xbf16>
    %19 = vector.shape_cast %18 : vector<16x16x32xbf16> to vector<256x32xbf16>
    %c0_18 = arith.constant 0 : index
    %c64 = arith.constant 64 : index
    %20 = vector.load %arg8[%c0_18, %c64] : memref<256x288xbf16, #tpu.memory_space<vmem>>, vector<256x32xbf16>
    tpu.vector_store %arg8[%c0_18, %c64], %19 {strides = array<i32>} : memref<256x288xbf16, #tpu.memory_space<vmem>>, vector<256x32xbf16>,
    %c1_19 = arith.constant 1 : index
    %c0_20 = arith.constant 0 : index
    %c0_21 = arith.constant 0 : index
    %21 = vector.load %arg7[%c1_19, %c0_20, %c0_21] : memref<18x18x32xbf16, #tpu.memory_space<vmem>>, vector<16x16x32xbf16>
    %22 = vector.shape_cast %21 : vector<16x16x32xbf16> to vector<256x32xbf16>
    %c0_22 = arith.constant 0 : index
    %c96 = arith.constant 96 : index
    %23 = vector.load %arg8[%c0_22, %c96] : memref<256x288xbf16, #tpu.memory_space<vmem>>, vector<256x32xbf16>
    tpu.vector_store %arg8[%c0_22, %c96], %22 {strides = array<i32>} : memref<256x288xbf16, #tpu.memory_space<vmem>>, vector<256x32xbf16>,
    %c1_23 = arith.constant 1 : index
    %c1_24 = arith.constant 1 : index
    %c0_25 = arith.constant 0 : index
    %24 = vector.load %arg7[%c1_23, %c1_24, %c0_25] : memref<18x18x32xbf16, #tpu.memory_space<vmem>>, vector<16x16x32xbf16>
    %25 = vector.shape_cast %24 : vector<16x16x32xbf16> to vector<256x32xbf16>
    %c0_26 = arith.constant 0 : index
    %c128 = arith.constant 128 : index
    %26 = vector.load %arg8[%c0_26, %c128] : memref<256x288xbf16, #tpu.memory_space<vmem>>, vector<256x32xbf16>
    tpu.vector_store %arg8[%c0_26, %c128], %25 {strides = array<i32>} : memref<256x288xbf16, #tpu.memory_space<vmem>>, vector<256x32xbf16>,
    %c1_27 = arith.constant 1 : index
    %c2_28 = arith.constant 2 : index
    %c0_29 = arith.constant 0 : index
    %27 = vector.load %arg7[%c1_27, %c2_28, %c0_29] : memref<18x18x32xbf16, #tpu.memory_space<vmem>>, vector<16x16x32xbf16>
    %28 = vector.shape_cast %27 : vector<16x16x32xbf16> to vector<256x32xbf16>
    %c0_30 = arith.constant 0 : index
    %c160 = arith.constant 160 : index
    %29 = vector.load %arg8[%c0_30, %c160] : memref<256x288xbf16, #tpu.memory_space<vmem>>, vector<256x32xbf16>
    tpu.vector_store %arg8[%c0_30, %c160], %28 {strides = array<i32>} : memref<256x288xbf16, #tpu.memory_space<vmem>>, vector<256x32xbf16>,
    %c2_31 = arith.constant 2 : index
    %c0_32 = arith.constant 0 : index
    %c0_33 = arith.constant 0 : index
    %30 = vector.load %arg7[%c2_31, %c0_32, %c0_33] : memref<18x18x32xbf16, #tpu.memory_space<vmem>>, vector<16x16x32xbf16>
    %31 = vector.shape_cast %30 : vector<16x16x32xbf16> to vector<256x32xbf16>
    %c0_34 = arith.constant 0 : index
    %c192 = arith.constant 192 : index
    %32 = vector.load %arg8[%c0_34, %c192] : memref<256x288xbf16, #tpu.memory_space<vmem>>, vector<256x32xbf16>
    tpu.vector_store %arg8[%c0_34, %c192], %31 {strides = array<i32>} : memref<256x288xbf16, #tpu.memory_space<vmem>>, vector<256x32xbf16>,
    %c2_35 = arith.constant 2 : index
    %c1_36 = arith.constant 1 : index
    %c0_37 = arith.constant 0 : index
    %33 = vector.load %arg7[%c2_35, %c1_36, %c0_37] : memref<18x18x32xbf16, #tpu.memory_space<vmem>>, vector<16x16x32xbf16>
    %34 = vector.shape_cast %33 : vector<16x16x32xbf16> to vector<256x32xbf16>
    %c0_38 = arith.constant 0 : index
    %c224 = arith.constant 224 : index
    %35 = vector.load %arg8[%c0_38, %c224] : memref<256x288xbf16, #tpu.memory_space<vmem>>, vector<256x32xbf16>
    tpu.vector_store %arg8[%c0_38, %c224], %34 {strides = array<i32>} : memref<256x288xbf16, #tpu.memory_space<vmem>>, vector<256x32xbf16>,
    %c2_39 = arith.constant 2 : index
    %c2_40 = arith.constant 2 : index
    %c0_41 = arith.constant 0 : index
    %36 = vector.load %arg7[%c2_39, %c2_40, %c0_41] : memref<18x18x32xbf16, #tpu.memory_space<vmem>>, vector<16x16x32xbf16>
    %37 = vector.shape_cast %36 : vector<16x16x32xbf16> to vector<256x32xbf16>
    %c0_42 = arith.constant 0 : index
    %c256 = arith.constant 256 : index
    %38 = vector.load %arg8[%c0_42, %c256] : memref<256x288xbf16, #tpu.memory_space<vmem>>, vector<256x32xbf16>
    tpu.vector_store %arg8[%c0_42, %c256], %37 {strides = array<i32>} : memref<256x288xbf16, #tpu.memory_space<vmem>>, vector<256x32xbf16>,
    %c0_43 = arith.constant 0 : index
    %c0_44 = arith.constant 0 : index
    %39 = vector.load %arg8[%c0_43, %c0_44] : memref<256x288xbf16, #tpu.memory_space<vmem>>, vector<256x288xbf16>
    %c0_45 = arith.constant 0 : index
    %c0_46 = arith.constant 0 : index
    %40 = vector.load %arg2[%c0_45, %c0_46] : memref<288x32xbf16, #tpu.memory_space<vmem>>, vector<288x32xbf16>
    %cst_47 = arith.constant dense<0.000000e+00> : vector<256x32xf32>
    %41 = tpu.matmul %39, %40, %cst_47 {dimension_numbers = #tpu.dot_dimension_numbers<[1], [0], [0], [1], [0, 0, 1, 1], [], []>} : vector<256x288xbf16>, vector<288x32xbf16>, vector<256x32xf32> -> vector<256x32xf32>
    %c0_48 = arith.constant 0 : index
    %c0_49 = arith.constant 0 : index
    %42 = vector.load %arg3[%c0_48, %c0_49] : memref<1x32xf32, #tpu.memory_space<vmem>>, vector<1x32xf32>
    %43 = vector.broadcast %42 : vector<1x32xf32> to vector<256x32xf32>
    %44 = arith.addf %41, %43 : vector<256x32xf32>
    %cst_50 = arith.constant 0.000000e+00 : bf16
    %45 = vector.broadcast %cst_50 : bf16 to vector<1x18x32xbf16>
    %c0_51 = arith.constant 0 : index
    %c0_52 = arith.constant 0 : index
    %c0_53 = arith.constant 0 : index
    %46 = vector.load %arg9[%c0_51, %c0_52, %c0_53] : memref<18x18x32xbf16, #tpu.memory_space<vmem>>, vector<1x18x32xbf16>
    tpu.vector_store %arg9[%c0_51, %c0_52, %c0_53], %45 {strides = array<i32>} : memref<18x18x32xbf16, #tpu.memory_space<vmem>>, vector<1x18x32xbf16>,
    %cst_54 = arith.constant 0.000000e+00 : bf16
    %47 = vector.broadcast %cst_54 : bf16 to vector<1x18x32xbf16>
    %c17 = arith.constant 17 : index
    %c0_55 = arith.constant 0 : index
    %c0_56 = arith.constant 0 : index
    %48 = vector.load %arg9[%c17, %c0_55, %c0_56] : memref<18x18x32xbf16, #tpu.memory_space<vmem>>, vector<1x18x32xbf16>
    tpu.vector_store %arg9[%c17, %c0_55, %c0_56], %47 {strides = array<i32>} : memref<18x18x32xbf16, #tpu.memory_space<vmem>>, vector<1x18x32xbf16>,
    %cst_57 = arith.constant 0.000000e+00 : bf16
    %49 = vector.broadcast %cst_57 : bf16 to vector<18x1x32xbf16>
    %c0_58 = arith.constant 0 : index
    %c0_59 = arith.constant 0 : index
    %c0_60 = arith.constant 0 : index
    %50 = vector.load %arg9[%c0_58, %c0_59, %c0_60] : memref<18x18x32xbf16, #tpu.memory_space<vmem>>, vector<18x1x32xbf16>
    tpu.vector_store %arg9[%c0_58, %c0_59, %c0_60], %49 {strides = array<i32>} : memref<18x18x32xbf16, #tpu.memory_space<vmem>>, vector<18x1x32xbf16>,
    %cst_61 = arith.constant 0.000000e+00 : bf16
    %51 = vector.broadcast %cst_61 : bf16 to vector<18x1x32xbf16>
    %c0_62 = arith.constant 0 : index
    %c17_63 = arith.constant 17 : index
    %c0_64 = arith.constant 0 : index
    %52 = vector.load %arg9[%c0_62, %c17_63, %c0_64] : memref<18x18x32xbf16, #tpu.memory_space<vmem>>, vector<18x1x32xbf16>
    tpu.vector_store %arg9[%c0_62, %c17_63, %c0_64], %51 {strides = array<i32>} : memref<18x18x32xbf16, #tpu.memory_space<vmem>>, vector<18x1x32xbf16>,
    %cst_65 = arith.constant 0.000000e+00 : f32
    %53 = vector.broadcast %cst_65 : f32 to vector<256x32xf32>
    %54 = arith.cmpf ogt, %44, %53 : vector<256x32xf32>
    %cst_66 = arith.constant 0.000000e+00 : f32
    %55 = vector.broadcast %cst_66 : f32 to vector<256x32xf32>
    %56 = arith.minimumf %44, %55 : vector<256x32xf32>
    %57 = math.exp %56 : vector<256x32xf32>
    %cst_67 = arith.constant 1.000000e+00 : f32
    %58 = vector.broadcast %cst_67 : f32 to vector<256x32xf32>
    %59 = arith.subf %57, %58 : vector<256x32xf32>
    %60 = arith.select %54, %44, %59 : vector<256x32xi1>, vector<256x32xf32>
    %61 = vector.shape_cast %60 : vector<256x32xf32> to vector<16x16x32xf32>
    %62 = arith.truncf %61 : vector<16x16x32xf32> to vector<16x16x32xbf16>
    %c1_68 = arith.constant 1 : index
    %c1_69 = arith.constant 1 : index
    %c0_70 = arith.constant 0 : index
    %63 = vector.load %arg9[%c1_68, %c1_69, %c0_70] : memref<18x18x32xbf16, #tpu.memory_space<vmem>>, vector<16x16x32xbf16>
    tpu.vector_store %arg9[%c1_68, %c1_69, %c0_70], %62 {strides = array<i32>} : memref<18x18x32xbf16, #tpu.memory_space<vmem>>, vector<16x16x32xbf16>,
    %c0_71 = arith.constant 0 : index
    %c0_72 = arith.constant 0 : index
    %c0_73 = arith.constant 0 : index
    %64 = vector.load %arg9[%c0_71, %c0_72, %c0_73] : memref<18x18x32xbf16, #tpu.memory_space<vmem>>, vector<16x16x32xbf16>
    %65 = vector.shape_cast %64 : vector<16x16x32xbf16> to vector<256x32xbf16>
    %c0_74 = arith.constant 0 : index
    %c0_75 = arith.constant 0 : index
    %66 = vector.load %arg10[%c0_74, %c0_75] : memref<256x288xbf16, #tpu.memory_space<vmem>>, vector<256x32xbf16>
    tpu.vector_store %arg10[%c0_74, %c0_75], %65 {strides = array<i32>} : memref<256x288xbf16, #tpu.memory_space<vmem>>, vector<256x32xbf16>,
    %c0_76 = arith.constant 0 : index
    %c1_77 = arith.constant 1 : index
    %c0_78 = arith.constant 0 : index
    %67 = vector.load %arg9[%c0_76, %c1_77, %c0_78] : memref<18x18x32xbf16, #tpu.memory_space<vmem>>, vector<16x16x32xbf16>
    %68 = vector.shape_cast %67 : vector<16x16x32xbf16> to vector<256x32xbf16>
    %c0_79 = arith.constant 0 : index
    %c32_80 = arith.constant 32 : index
    %69 = vector.load %arg10[%c0_79, %c32_80] : memref<256x288xbf16, #tpu.memory_space<vmem>>, vector<256x32xbf16>
    tpu.vector_store %arg10[%c0_79, %c32_80], %68 {strides = array<i32>} : memref<256x288xbf16, #tpu.memory_space<vmem>>, vector<256x32xbf16>,
    %c0_81 = arith.constant 0 : index
    %c2_82 = arith.constant 2 : index
    %c0_83 = arith.constant 0 : index
    %70 = vector.load %arg9[%c0_81, %c2_82, %c0_83] : memref<18x18x32xbf16, #tpu.memory_space<vmem>>, vector<16x16x32xbf16>
    %71 = vector.shape_cast %70 : vector<16x16x32xbf16> to vector<256x32xbf16>
    %c0_84 = arith.constant 0 : index
    %c64_85 = arith.constant 64 : index
    %72 = vector.load %arg10[%c0_84, %c64_85] : memref<256x288xbf16, #tpu.memory_space<vmem>>, vector<256x32xbf16>
    tpu.vector_store %arg10[%c0_84, %c64_85], %71 {strides = array<i32>} : memref<256x288xbf16, #tpu.memory_space<vmem>>, vector<256x32xbf16>,
    %c1_86 = arith.constant 1 : index
    %c0_87 = arith.constant 0 : index
    %c0_88 = arith.constant 0 : index
    %73 = vector.load %arg9[%c1_86, %c0_87, %c0_88] : memref<18x18x32xbf16, #tpu.memory_space<vmem>>, vector<16x16x32xbf16>
    %74 = vector.shape_cast %73 : vector<16x16x32xbf16> to vector<256x32xbf16>
    %c0_89 = arith.constant 0 : index
    %c96_90 = arith.constant 96 : index
    %75 = vector.load %arg10[%c0_89, %c96_90] : memref<256x288xbf16, #tpu.memory_space<vmem>>, vector<256x32xbf16>
    tpu.vector_store %arg10[%c0_89, %c96_90], %74 {strides = array<i32>} : memref<256x288xbf16, #tpu.memory_space<vmem>>, vector<256x32xbf16>,
    %c1_91 = arith.constant 1 : index
    %c1_92 = arith.constant 1 : index
    %c0_93 = arith.constant 0 : index
    %76 = vector.load %arg9[%c1_91, %c1_92, %c0_93] : memref<18x18x32xbf16, #tpu.memory_space<vmem>>, vector<16x16x32xbf16>
    %77 = vector.shape_cast %76 : vector<16x16x32xbf16> to vector<256x32xbf16>
    %c0_94 = arith.constant 0 : index
    %c128_95 = arith.constant 128 : index
    %78 = vector.load %arg10[%c0_94, %c128_95] : memref<256x288xbf16, #tpu.memory_space<vmem>>, vector<256x32xbf16>
    tpu.vector_store %arg10[%c0_94, %c128_95], %77 {strides = array<i32>} : memref<256x288xbf16, #tpu.memory_space<vmem>>, vector<256x32xbf16>,
    %c1_96 = arith.constant 1 : index
    %c2_97 = arith.constant 2 : index
    %c0_98 = arith.constant 0 : index
    %79 = vector.load %arg9[%c1_96, %c2_97, %c0_98] : memref<18x18x32xbf16, #tpu.memory_space<vmem>>, vector<16x16x32xbf16>
    %80 = vector.shape_cast %79 : vector<16x16x32xbf16> to vector<256x32xbf16>
    %c0_99 = arith.constant 0 : index
    %c160_100 = arith.constant 160 : index
    %81 = vector.load %arg10[%c0_99, %c160_100] : memref<256x288xbf16, #tpu.memory_space<vmem>>, vector<256x32xbf16>
    tpu.vector_store %arg10[%c0_99, %c160_100], %80 {strides = array<i32>} : memref<256x288xbf16, #tpu.memory_space<vmem>>, vector<256x32xbf16>,
    %c2_101 = arith.constant 2 : index
    %c0_102 = arith.constant 0 : index
    %c0_103 = arith.constant 0 : index
    %82 = vector.load %arg9[%c2_101, %c0_102, %c0_103] : memref<18x18x32xbf16, #tpu.memory_space<vmem>>, vector<16x16x32xbf16>
    %83 = vector.shape_cast %82 : vector<16x16x32xbf16> to vector<256x32xbf16>
    %c0_104 = arith.constant 0 : index
    %c192_105 = arith.constant 192 : index
    %84 = vector.load %arg10[%c0_104, %c192_105] : memref<256x288xbf16, #tpu.memory_space<vmem>>, vector<256x32xbf16>
    tpu.vector_store %arg10[%c0_104, %c192_105], %83 {strides = array<i32>} : memref<256x288xbf16, #tpu.memory_space<vmem>>, vector<256x32xbf16>,
    %c2_106 = arith.constant 2 : index
    %c1_107 = arith.constant 1 : index
    %c0_108 = arith.constant 0 : index
    %85 = vector.load %arg9[%c2_106, %c1_107, %c0_108] : memref<18x18x32xbf16, #tpu.memory_space<vmem>>, vector<16x16x32xbf16>
    %86 = vector.shape_cast %85 : vector<16x16x32xbf16> to vector<256x32xbf16>
    %c0_109 = arith.constant 0 : index
    %c224_110 = arith.constant 224 : index
    %87 = vector.load %arg10[%c0_109, %c224_110] : memref<256x288xbf16, #tpu.memory_space<vmem>>, vector<256x32xbf16>
    tpu.vector_store %arg10[%c0_109, %c224_110], %86 {strides = array<i32>} : memref<256x288xbf16, #tpu.memory_space<vmem>>, vector<256x32xbf16>,
    %c2_111 = arith.constant 2 : index
    %c2_112 = arith.constant 2 : index
    %c0_113 = arith.constant 0 : index
    %88 = vector.load %arg9[%c2_111, %c2_112, %c0_113] : memref<18x18x32xbf16, #tpu.memory_space<vmem>>, vector<16x16x32xbf16>
    %89 = vector.shape_cast %88 : vector<16x16x32xbf16> to vector<256x32xbf16>
    %c0_114 = arith.constant 0 : index
    %c256_115 = arith.constant 256 : index
    %90 = vector.load %arg10[%c0_114, %c256_115] : memref<256x288xbf16, #tpu.memory_space<vmem>>, vector<256x32xbf16>
    tpu.vector_store %arg10[%c0_114, %c256_115], %89 {strides = array<i32>} : memref<256x288xbf16, #tpu.memory_space<vmem>>, vector<256x32xbf16>,
    %c0_116 = arith.constant 0 : index
    %c0_117 = arith.constant 0 : index
    %91 = vector.load %arg10[%c0_116, %c0_117] : memref<256x288xbf16, #tpu.memory_space<vmem>>, vector<256x288xbf16>
    %c0_118 = arith.constant 0 : index
    %c0_119 = arith.constant 0 : index
    %92 = vector.load %arg4[%c0_118, %c0_119] : memref<288x64xbf16, #tpu.memory_space<vmem>>, vector<288x64xbf16>
    %cst_120 = arith.constant dense<0.000000e+00> : vector<256x64xf32>
    %93 = tpu.matmul %91, %92, %cst_120 {dimension_numbers = #tpu.dot_dimension_numbers<[1], [0], [0], [1], [0, 0, 1, 1], [], []>} : vector<256x288xbf16>, vector<288x64xbf16>, vector<256x64xf32> -> vector<256x64xf32>
    %c0_121 = arith.constant 0 : index
    %c0_122 = arith.constant 0 : index
    %94 = vector.load %arg5[%c0_121, %c0_122] : memref<1x64xf32, #tpu.memory_space<vmem>>, vector<1x64xf32>
    %95 = vector.broadcast %94 : vector<1x64xf32> to vector<256x64xf32>
    %96 = arith.addf %93, %95 : vector<256x64xf32>
    %97 = vector.extract_strided_slice %96 {offsets = [0, 0], sizes = [256, 32], strides = [1, 1]} : vector<256x64xf32> to vector<256x32xf32>
    %98 = vector.extract_strided_slice %96 {offsets = [0, 32], sizes = [256, 32], strides = [1, 1]} : vector<256x64xf32> to vector<256x32xf32>
    %cst_123 = arith.constant 0.000000e+00 : f32
    %99 = vector.broadcast %cst_123 : f32 to vector<256x32xf32>
    %100 = arith.subf %99, %98 : vector<256x32xf32>
    %101 = math.exp %100 : vector<256x32xf32>
    %cst_124 = arith.constant 1.000000e+00 : f32
    %102 = vector.broadcast %cst_124 : f32 to vector<256x32xf32>
    %103 = arith.addf %102, %101 : vector<256x32xf32>
    %104 = tpu.reciprocal %103 {approx = true} : vector<256x32xf32> -> vector<256x32xf32>
    %c0_125 = arith.constant 0 : index
    %c1_126 = arith.constant 1 : index
    %c1_127 = arith.constant 1 : index
    %c0_128 = arith.constant 0 : index
    %105 = vector.load %arg1[%c0_125, %c1_126, %c1_127, %c0_128] : memref<1x18x18x32xf32, #tpu.memory_space<vmem>>, vector<1x16x16x32xf32>
    %106 = vector.shape_cast %105 : vector<1x16x16x32xf32> to vector<16x16x32xf32>
    %107 = vector.shape_cast %106 : vector<16x16x32xf32> to vector<256x32xf32>
    %108 = arith.mulf %97, %104 : vector<256x32xf32>
    %109 = arith.addf %108, %107 : vector<256x32xf32>
    %c0_129 = arith.constant 0 : index
    %c0_130 = arith.constant 0 : index
    %c0_131 = arith.constant 0 : index
    %110 = vector.load %arg6[%c0_129, %c0_130, %c0_131] : memref<1x256x32xf32, #tpu.memory_space<vmem>>, vector<1x256x32xf32>
    %111 = vector.shape_cast %110 : vector<1x256x32xf32> to vector<256x32xf32>
    %112 = vector.shape_cast %109 : vector<256x32xf32> to vector<1x256x32xf32>
    tpu.vector_store %arg6[%c0_129, %c0_130, %c0_131], %112 {strides = array<i32>} : memref<1x256x32xf32, #tpu.memory_space<vmem>>, vector<1x256x32xf32>,
    return
  }
  func.func @transform_0(%arg0: i32) -> (i32, i32, i32, i32) {
    %c0_i32 = arith.constant 0 : i32
    %c0_i32_0 = arith.constant 0 : i32
    %c0_i32_1 = arith.constant 0 : i32
    %c0_i32_2 = arith.constant 0 : i32
    return %arg0, %c0_i32, %c0_i32_0, %c0_i32_1 : i32, i32, i32, i32
  }
  func.func @transform_1(%arg0: i32) -> (i32, i32) {
    %c0_i32 = arith.constant 0 : i32
    %c0_i32_0 = arith.constant 0 : i32
    %c0_i32_1 = arith.constant 0 : i32
    return %c0_i32, %c0_i32_0 : i32, i32
  }
  func.func @transform_2(%arg0: i32) -> (i32, i32) {
    %c0_i32 = arith.constant 0 : i32
    %c0_i32_0 = arith.constant 0 : i32
    %c0_i32_1 = arith.constant 0 : i32
    return %c0_i32, %c0_i32_0 : i32, i32
  }
  func.func @transform_3(%arg0: i32) -> (i32, i32) {
    %c0_i32 = arith.constant 0 : i32
    %c0_i32_0 = arith.constant 0 : i32
    %c0_i32_1 = arith.constant 0 : i32
    return %c0_i32, %c0_i32_0 : i32, i32
  }
  func.func @transform_4(%arg0: i32) -> (i32, i32) {
    %c0_i32 = arith.constant 0 : i32
    %c0_i32_0 = arith.constant 0 : i32
    %c0_i32_1 = arith.constant 0 : i32
    return %c0_i32, %c0_i32_0 : i32, i32
  }
  func.func @transform_5(%arg0: i32) -> (i32, i32, i32) {
    %c0_i32 = arith.constant 0 : i32
    %c0_i32_0 = arith.constant 0 : i32
    %c0_i32_1 = arith.constant 0 : i32
    return %arg0, %c0_i32, %c0_i32_0 : i32, i32, i32
  }
}

</mosaic_0001>

<bundles_post_ra>
// kernel: gated_resblock.1
= control target key start
LH: loop header
LB: loop body
LE: loop exit
PB: predicated region body
PF: predicated region fallthrough
CT: control target
= control target key end

     0   :  { %10 = vsyncpa [#allocation7], 0  ;;  %s14632_s0 = inlined_call_operand.vmem [shape: f32[2,18,18,32], index: 0, kind: input, shape index: {}]   ;;  %s14633_s1 = inlined_call_operand.vmem [shape: bf16[288,32], index: 1, kind: input, shape index: {}]   ;;  %s14634_s2 = inlined_call_operand.vmem [shape: f32[1,32], index: 2, kind: input, shape index: {}]   ;;  %s14635_s3 = inlined_call_operand.vmem [shape: bf16[288,64], index: 3, kind: input, shape index: {}]   ;;  %s14636_s4 = inlined_call_operand.vmem [shape: f32[1,64], index: 4, kind: input, shape index: {}]   ;;  %s14637_s5 = inlined_call_operand.hbm [shape: f32[2,256,32], index: 5, kind: output, shape index: {}]  }
   0x1   :  { %12 = vsyncpa [#allocation7 + $0x1], 0  ;;  %s11105_s18 = smov 0   ;;  %s11107_s19 = smov 0  }
   0x2   :  { %s11109_s20 = smov 0   ;;  %s11111_s21 = smov 0  }
   0x3 LB: > { %s11126_s22 = sadd.s32 4294967295, %s11066_s21   ;;  %s9429_s23 = sadd.s32 4294967294, %s11066_s21   ;;  %s11066_s21 = sphi %s11111_s21, %s14655_s21   ;;  %s11062_s20 = sphi %s11109_s20, %s14654_s20   ;;  %s11058_s19 = sphi %s11107_s19, %s14653_s19   ;;  %s11054_s18 = sphi %s11105_s18, %s14652_s18  }
   0x4   : > { %s11130_s24 = sadd.s32 1, %s11066_s21   ;;  %s135_s25 = sadd.s32 1, %s11062_s20 }
   0x5   : > { %s132_s26 = ssub.s32 %s11066_s21, %s11130_s24  ;;  %p145_p0 = scmp.ne.s32.totalorder %s11062_s20, %s11058_s19 }
   0x6   : > { %p133_p1 = scmp.eq.s32.totalorder %s132_s26, 0  ;;  %p146_p2 = scmp.eq.s32.totalorder %s11126_s22, 1 }
   0x7   : > { %p151_p3 = scmp.ne.s32.totalorder %s11058_s19, %s11054_s18  ;;  %p152_p4 = scmp.eq.s32.totalorder %s9429_s23, 1 }
   0x8   : > { %s11141_s27 = scalar_select %p133_p1, %s11062_s20, %s135_s25  }
   0x9   : > { %p11143_p5 = por %p146_p2, %p145_p0  ;;  %p11147_p6 = por %p152_p4, %p151_p3 }
   0xa   : > { %p9432_p7 = scmp.ge.s32.totalorder %s11066_s21, 1  ;;  %p190_p8 = scmp.lt.s32.totalorder %s11066_s21, 3 }
   0xc   : > { %p191_p9 = pnand %p9432_p7, %p190_p8 }
   0xd   : > { %p218_p10 = scmp.lt.s32.totalorder (!%p191_p9), %s11126_s22, 1  ;;  %vm836_vm3 = vcmask (!%p191_p9), 257024   ;;  %vm839_vm12 = vcmask (!%p191_p9), 253952   ;;  %vm1681_vm14 = vcmask (!%p191_p9), 1042432   ;;  %vm1682_vm15 = vcmask (!%p191_p9), 1046532   ;;  %s11068_s10 = smov (!%p191_p9), 64  }
   0xe   : > { %194 = sbr.rel (%p191_p9) target bundleno = 1441 (0x5a1), region = 40  ;;  %s11069_s11 = smov (!%p191_p9), 96  }
   0xf   : > { %s11070_s12 = smov (!%p191_p9), 32   ;;  %s215_s13 = sand.u32 (!%p191_p9), 1, %s11058_s19  }
  0x10   : > { %s9433_s14 = sshll.u32 (!%p191_p9), %s215_s13, 8  ;;  %s11072_s26 = smov (!%p191_p9), [#allocation6]  }
  0x11   : > { %s14383_s15 = scalar_lea.vmem (!%p191_p9), [#allocation6], %s9433_s14 }
  0x12   : > { %s9367_s16 = sshll.u32 (!%p191_p9), %s14383_s15, 4  ;;  %s14583_s16 = int_to_ptr.vmem [resolvable:$true] %s9367_s16 }
  0x15   : > { %s219_s30 = scalar_select %p218_p10, %s11126_s22, 1 }
  0x17   : > { %s10521_s6 = smul.u32 432, %s219_s30  ;;  %s11008_s30 = sshll.u32 %s11072_s26, 4  ;;  %s11009_s30 = int_to_ptr.vmem [resolvable:$false] %s11008_s30 }
  0x18   : > { %p11011_p0 = scmp.lt.s32.totalorder %s14583_s16, %s11009_s30 }
  0x19   : > { %s11158_s9 = scalar_lea.vmem %s14632_s0, %s10521_s6  ;;  %s11010_s6 = scalar_lea.vmem %s11009_s30, 8192 }
  0x1a   : > { %v11161_v0 = vld [vmem:[%s11158_s9 + $0x48] sm:$0xff]  ;;  %v11164_v1 = vld [vmem:[%s11158_s9 + $0x50] sm:$0xff]  ;;  %v11172_v5 = vld [vmem:[%s11158_s9 + $0x38] sm:$0xff] }
  0x1b   : > { %v11167_v2 = vld [vmem:[%s11158_s9 + $0x30] sm:$0xff]  ;;  %v341_v3 = vmin.f32 %v11161_v0, 0.0  ;;  %v342_v4 = vmin.f32 %v11164_v1, 0.0  ;;  %v11175_v6 = vld [vmem:[%s11158_s9 + $0x60] sm:$0xff]  ;;  %v339_v8 = vmin.f32 %v11172_v5, 0.0  ;;  %v11180_v9 = vld [vmem:[%s11158_s9 + $0x68] sm:$0xff] }
  0x1c   : > { %v338_v7 = vmin.f32 %v11167_v2, 0.0  ;;  %v11183_v10 = vld [vmem:[%s11158_s9 + $0x18] sm:$0xff]  ;;  %v344_v15 = vmin.f32 %v11175_v6, 0.0  ;;  %v345_v16 = vmin.f32 %v11180_v9, 0.0  ;;  %v11188_v17 = vld [vmem:[%s11158_s9 + $0x20] sm:$0xff]  ;;  %vm287_vm0 = vcmp.gt.f32.partialorder %v11161_v0, 0.0 }
  0x1d   : > { %v404_v11 = vmul.f32 1.442695, %v341_v3  ;;  %v406_v12 = vmul.f32 1.442695, %v342_v4  ;;  %v400_v14 = vmul.f32 1.442695, %v339_v8 }
  0x1e   : > { %v398_v13 = vmul.f32 1.442695, %v338_v7  ;;  %v335_v18 = vmin.f32 %v11183_v10, 0.0  ;;  %v11192_v19 = vld [vmem:[%s11158_s9 + $0x78] sm:$0xff]  ;;  %v11195_v20 = vld [vmem:[%s11158_s9 + $0x80] sm:$0xff]  ;;  %v336_v23 = vmin.f32 %v11188_v17, 0.0 }
  0x1f   : > { %10699 = vpow2.f32 %v404_v11  ;;  %v410_v21 = vmul.f32 1.442695, %v344_v15  ;;  %v412_v22 = vmul.f32 1.442695, %v345_v16  ;;  %v11200_v25 = vld [vmem:[%s11158_s9 + $0x28] sm:$0x3] }
  0x20   : > { %10701 = vpow2.f32 %v406_v12  ;;  %v392_v24 = vmul.f32 1.442695, %v335_v18  ;;  %vm288_vm1 = vcmp.gt.f32.partialorder %v11164_v1, 0.0  ;;  %v347_v26 = vmin.f32 %v11192_v19, 0.0  ;;  %v11206_v28 = vld [vmem:[%s11158_s9 + $0x40] sm:$0x3] }
  0x21   : > { %10703 = vpow2.f32 %v398_v13  ;;  %v348_v27 = vmin.f32 %v11195_v20, 0.0  ;;  %vm284_vm2 = vcmp.gt.f32.partialorder %v11167_v2, 0.0  ;;  %v394_v29 = vmul.f32 1.442695, %v336_v23  ;;  %v11211_v31 = vld [vmem:[%s11158_s9 + $0x58] sm:$0x3] }
  0x22   : > { %10705 = vpow2.f32 %v400_v14  ;;  %v337_v30 = vmin.f32 %v11200_v25, 0.0  ;;  %vm285_vm4 = vcmp.gt.f32.partialorder %v11172_v5, 0.0  ;;  %v416_v32 = vmul.f32 1.442695, %v347_v26  ;;  %v11215_v34 = vld [vmem:[%s11158_s9] sm:$0xff]  ;;  %v11219_v37 = vld [vmem:[%s11158_s9 + $0x8] sm:$0xff] }
  0x23   : > { %10707 = vpow2.f32 %v410_v21  ;;  %v418_v33 = vmul.f32 1.442695, %v348_v27  ;;  %v340_v36 = vmin.f32 %v11206_v28, 0.0  ;;  %v11222_v38 = vld [vmem:[%s11158_s9 + $0x10] sm:$0x3]  ;;  %vm290_vm5 = vcmp.gt.f32.partialorder %v11175_v6, 0.0 }
  0x24   : > { %10709 = vpow2.f32 %v412_v22  ;;  %v396_v35 = vmul.f32 1.442695, %v337_v30  ;;  %vm291_vm6 = vcmp.gt.f32.partialorder %v11180_v9, 0.0  ;;  %v343_v39 = vmin.f32 %v11211_v31, 0.0  ;;  %v11228_v40 = vld [vmem:[%s11158_s9 + $0x70] sm:$0x3] }
  0x25   : > { %10711 = vpow2.f32 %v392_v24  ;;  %vm281_vm7 = vcmp.gt.f32.partialorder %v11183_v10, 0.0  ;;  %v402_v41 = vmul.f32 1.442695, %v340_v36  ;;  %v332_v42 = vmin.f32 %v11215_v34, 0.0  ;;  %v11238_v49 = vld [vmem:[%s11158_s9 + $0x88] sm:$0x3] }
  0x26   : > { %10713 = vpow2.f32 %v394_v29  ;;  %vm282_vm8 = vcmp.gt.f32.partialorder %v11188_v17, 0.0  ;;  %v408_v43 = vmul.f32 1.442695, %v343_v39  ;;  %v333_v44 = vmin.f32 %v11219_v37, 0.0 }
  0x27   : > { %10715 = vpow2.f32 %v416_v32  ;;  %v334_v45 = vmin.f32 %v11222_v38, 0.0  ;;  %vm293_vm9 = vcmp.gt.f32.partialorder %v11192_v19, 0.0  ;;  %v386_v47 = vmul.f32 1.442695, %v332_v42 }
  0x28   : > { %10717 = vpow2.f32 %v418_v33  ;;  %v346_v48 = vmin.f32 %v11228_v40, 0.0  ;;  %vm294_vm10 = vcmp.gt.f32.partialorder %v11195_v20, 0.0  ;;  %v388_v52 = vmul.f32 1.442695, %v333_v44 }
  0x29   : > { %v10700_v46 = vpop.eup %10699  ;;  %10719 = vpow2.f32 %v396_v35  ;;  %v390_v53 = vmul.f32 1.442695, %v334_v45  ;;  %vm283_vm11 = vcmp.gt.f32.partialorder %v11200_v25, 0.0  ;;  %v349_v60 = vmin.f32 %v11238_v49, 0.0 }
  0x2a   : > { %v10702_v50 = vpop.eup %10701  ;;  %v9444_v51 = vadd.f32 -1.0, %v10700_v46  ;;  %10721 = vpow2.f32 %v402_v41  ;;  %v414_v56 = vmul.f32 1.442695, %v346_v48  ;;  %vm286_vm13 = vcmp.gt.f32.partialorder %v11206_v28, 0.0 }
  0x2b   : > { %v10704_v54 = vpop.eup %10703  ;;  %v9445_v55 = vadd.f32 -1.0, %v10702_v50  ;;  %10723 = vpow2.f32 %v408_v43  ;;  %v420_v18 = vmul.f32 1.442695, %v349_v60 }
  0x2c   : > { %v10706_v57 = vpop.eup %10705  ;;  %v557_v58 = vsel %vm287_vm0, %v11161_v0, %v9444_v51  ;;  %v9441_v59 = vadd.f32 -1.0, %v10704_v54  ;;  %10725 = vpow2.f32 %v386_v47  ;;  %vm289_vm0 = vcmp.gt.f32.partialorder %v11211_v31, 0.0  ;;  %v11294_v51 = vld [vmem:[%s11158_s9 + $0x90] sm:$0xff] }
  0x2d   : > { %v10708_v61 = vpop.eup %10707  ;;  %v558_v62 = vsel %vm288_vm1, %v11164_v1, %v9445_v55  ;;  %v10107_v63 = vpack.c.bf16 %v557_v58, %v557_v58  ;;  %v9442_v3 = vadd.f32 -1.0, %v10706_v57  ;;  %10727 = vpow2.f32 %v388_v52 }
  0x2e   : > { %v10710_v4 = vpop.eup %10709  ;;  %v10108_v7 = vpack.c.bf16 %v558_v62, %v558_v62  ;;  %v554_v8 = vsel %vm284_vm2, %v11167_v2, %v9441_v59  ;;  %v9447_v11 = vadd.f32 -1.0, %v10708_v61  ;;  %10729 = vpow2.f32 %v390_v53 }
  0x2f   : > { %v10712_v0 = vpop.eup %10711  ;;  %847 = vst.msk [vmem:[#allocation2 + $0x24] sm:$0xf] %vm836_vm3, %v10107_v63  ;;  %v555_v12 = vsel %vm285_vm4, %v11172_v5, %v9442_v3  ;;  %v10104_v1 = vpack.c.bf16 %v554_v8, %v554_v8  ;;  %v9448_v13 = vadd.f32 -1.0, %v10710_v4  ;;  %10731 = vpow2.f32 %v414_v56 }
  0x30   : > { %v10714_v14 = vpop.eup %10713  ;;  %848 = vst.msk [vmem:[#allocation2 + $0x28] sm:$0xf] %vm836_vm3, %v10108_v7  ;;  %v10105_v15 = vpack.c.bf16 %v555_v12, %v555_v12  ;;  %v560_v2 = vsel %vm290_vm5, %v11175_v6, %v9447_v11  ;;  %v9438_v16 = vadd.f32 -1.0, %v10712_v0  ;;  %10733 = vpow2.f32 %v420_v18 }
  0x31   : > { %v10716_v21 = vpop.eup %10715  ;;  %844 = vst.msk [vmem:[#allocation2 + $0x18] sm:$0xf] %vm836_vm3, %v10104_v1  ;;  %v561_v5 = vsel %vm291_vm6, %v11180_v9, %v9448_v13  ;;  %v10110_v22 = vpack.c.bf16 %v560_v2, %v560_v2  ;;  %v9439_v23 = vadd.f32 -1.0, %v10714_v14  ;;  %vm278_vm1 = vcmp.gt.f32.partialorder %v11215_v34, 0.0 }
  0x32   : > { %v10718_v24 = vpop.eup %10717  ;;  %845 = vst.msk [vmem:[#allocation2 + $0x1c] sm:$0xf] %vm836_vm3, %v10105_v15  ;;  %v10111_v26 = vpack.c.bf16 %v561_v5, %v561_v5  ;;  %v551_v6 = vsel %vm281_vm7, %v11183_v10, %v9438_v16  ;;  %v9450_v27 = vadd.f32 -1.0, %v10716_v21  ;;  %vm279_vm2 = vcmp.gt.f32.partialorder %v11219_v37, 0.0  ;;  %vm11325_vm7 = vmor %vm1681_vm14, %vm1682_vm15  ;;  %v11333_v21 = vld [vmem:[%s11158_s9 + $0x98] sm:$0xff] }
  0x33   : > { %v10720_v29 = vpop.eup %10719  ;;  %850 = vst.msk [vmem:[#allocation2 + $0x30] sm:$0xf] %vm836_vm3, %v10110_v22  ;;  %v552_v9 = vsel %vm282_vm8, %v11188_v17, %v9439_v23  ;;  %v10101_v30 = vpack.c.bf16 %v551_v6, %v551_v6  ;;  %v9451_v32 = vadd.f32 -1.0, %v10718_v24  ;;  %vm280_vm4 = vcmp.gt.f32.partialorder %v11222_v38, 0.0 }
  0x34   : > { %v10722_v33 = vpop.eup %10721  ;;  %851 = vst.msk [vmem:[#allocation2 + $0x34] sm:$0xf] %vm836_vm3, %v10111_v26  ;;  %v10102_v35 = vpack.c.bf16 %v552_v9, %v552_v9  ;;  %v563_v10 = vsel %vm293_vm9, %v11192_v19, %v9450_v27  ;;  %v9440_v36 = vadd.f32 -1.0, %v10720_v29  ;;  %vm292_vm5 = vcmp.gt.f32.partialorder %v11228_v40, 0.0 }
  0x35   : > { %v10724_v39 = vpop.eup %10723  ;;  %841 = vst.msk [vmem:[#allocation2 + $0xc] sm:$0xf] %vm836_vm3, %v10101_v30  ;;  %v564_v17 = vsel %vm294_vm10, %v11195_v20, %v9451_v32  ;;  %v10113_v41 = vpack.c.bf16 %v563_v10, %v563_v10  ;;  %v9443_v42 = vadd.f32 -1.0, %v10722_v33  ;;  %vm295_vm6 = vcmp.gt.f32.partialorder %v11238_v49, 0.0 }
  0x36   : > { %v10726_v43 = vpop.eup %10725  ;;  %842 = vst.msk [vmem:[#allocation2 + $0x10] sm:$0xf] %vm836_vm3, %v10102_v35  ;;  %v10114_v44 = vpack.c.bf16 %v564_v17, %v564_v17  ;;  %v553_v19 = vsel %vm283_vm11, %v11200_v25, %v9440_v36  ;;  %v9446_v45 = vadd.f32 -1.0, %v10724_v39  ;;  %v350_v0 = vmin.f32 %v11294_v51, 0.0  ;;  %v2605_v24 = vld [vmem:[#allocation2 + $0x24] sm:$0xe] }
  0x37   : > { %v10728_v46 = vpop.eup %10727  ;;  %v10567_v47 = vld [vmem:[#allocation2 + $0x24] sm:$0xff]   ;;  %853 = vst.msk [vmem:[#allocation2 + $0x3c] sm:$0xf] %vm836_vm3, %v10113_v41  ;;  %v10103_v20 = vpack.c.bf16 %v553_v19, %v553_v19  ;;  %v556_v48 = vsel %vm286_vm13, %v11206_v28, %v9443_v42  ;;  %v9435_v50 = vadd.f32 -1.0, %v10726_v43  ;;  %v9641_v30 = vrot.slane %v2605_v24, 9 }
  0x38   : > { %v10730_v52 = vpop.eup %10729  ;;  %854 = vst.msk [vmem:[#allocation2 + $0x40] sm:$0xf] %vm836_vm3, %v10114_v44  ;;  %v10106_v53 = vpack.c.bf16 %v556_v48, %v556_v48  ;;  %v559_v25 = vsel %vm289_vm0, %v11211_v31, %v9446_v45  ;;  %v9436_v54 = vadd.f32 -1.0, %v10728_v46  ;;  %3034 = vrot.lane.b32.xlu0 %v10567_v47, %s11068_s10  ;;  %v2602_v59 = vld [vmem:[#allocation2 + $0x18] sm:$0xe]  ;;  %v10573_v27 = vld [vmem:[#allocation2 + $0x24] sm:$0xff]  }
  0x39   : > { %v10732_v55 = vpop.eup %10731  ;;  %v10568_v56 = vld [vmem:[#allocation2 + $0x18] sm:$0xff]   ;;  %843 = vst.msk [vmem:[#allocation2 + $0x14] sm:$0x1] %vm839_vm12, %v10103_v20  ;;  %v10109_v28 = vpack.c.bf16 %v559_v25, %v559_v25  ;;  %v9437_v57 = vadd.f32 -1.0, %v10730_v52  ;;  %v548_v58 = vsel %vm278_vm1, %v11215_v34, %v9435_v50  ;;  %v2606_v9 = vld [vmem:[#allocation2 + $0x28] sm:$0xf] }
  0x3a   : > { %846 = vst.msk [vmem:[#allocation2 + $0x20] sm:$0x1] %vm839_vm12, %v10106_v53  ;;  %v549_v31 = vsel %vm279_vm2, %v11219_v37, %v9436_v54  ;;  %v10098_v60 = vpack.c.bf16 %v548_v58, %v548_v58  ;;  %v9449_v61 = vadd.f32 -1.0, %v10732_v55  ;;  %3032 = vrot.lane.b32.xlu1 %v10568_v56, %s11068_s10  ;;  %v2603_v63 = vld [vmem:[#allocation2 + $0x1c] sm:$0xf]  ;;  %v10734_v4 = vpop.eup %10733  ;;  %v2711_v10 = vrot.slane %v2606_v9, 5 }
  0x3b   : > { %v10569_v62 = vld [vmem:[#allocation2 + $0x30] sm:$0xff]   ;;  %849 = vst.msk [vmem:[#allocation2 + $0x2c] sm:$0x1] %vm839_vm12, %v10109_v28  ;;  %v550_v3 = vsel %vm280_vm4, %v11222_v38, %v9437_v57  ;;  %v10099_v34 = vpack.c.bf16 %v549_v31, %v549_v31  ;;  %v2704_v8 = vrot.slane %v2603_v63, 5  ;;  %v10572_v38 = vld [vmem:[#allocation2 + $0x18] sm:$0xff]   ;;  %v9452_v18 = vadd.f32 -1.0, %v10734_v4 }
  0x3c   : > { %v2599_v7 = vld [vmem:[#allocation2 + $0xc] sm:$0xe]  ;;  %v10100_v11 = vpack.c.bf16 %v550_v3, %v550_v3  ;;  %837 = vst.msk [vmem:[#allocation2] sm:$0xf] %vm836_vm3, %v10098_v60  ;;  %v562_v37 = vsel %vm292_vm5, %v11228_v40, %v9449_v61  ;;  %3036 = vrot.lane.b32.xlu0 %v10569_v62, %s11068_s10  ;;  %v9640_v40 = vrot.slane %v2602_v59, 9  ;;  %v2713_v47 = vrot.slane %v2711_v10, 4 }
  0x3d   : > { %v10570_v12 = vld [vmem:[#allocation2 + $0xc] sm:$0xff]   ;;  %v9639_v13 = vrot.slane %v2599_v7, 9  ;;  %838 = vst.msk [vmem:[#allocation2 + $0x4] sm:$0xf] %vm836_vm3, %v10099_v34  ;;  %v10112_v14 = vpack.c.bf16 %v562_v37, %v562_v37  ;;  %v2706_v23 = vrot.slane %v2704_v8, 4  ;;  %v565_v32 = vsel %vm295_vm6, %v11238_v49, %v9452_v18 }
  0x3e   : > { %v2600_v1 = vld [vmem:[#allocation2 + $0x10] sm:$0xf]  ;;  %840 = vst.msk [vmem:[#allocation2 + $0x8] sm:$0x1] %vm839_vm12, %v10100_v11  ;;  %2022 = vrot.lane.b32.xlu1 %v10570_v12, %s11069_s11  ;;  %v10115_v39 = vpack.c.bf16 %v565_v32, %v565_v32  ;;  %v11342_v17 = vld [vmem:[%s11158_s9 + $0xa0] sm:$0x3]  ;;  %v2705_v42 = vsel %vm11325_vm7, %v9640_v40, %v2704_v8  ;;  %v2712_v53 = vsel %vm11325_vm7, %v9641_v30, %v2711_v10 }
  0x3f   : > { %v2697_v2 = vrot.slane %v2600_v1, 5  ;;  %v10571_v16 = vld [vmem:[#allocation2 + $0x3c] sm:$0xff]   ;;  %852 = vst.msk [vmem:[#allocation2 + $0x38] sm:$0x1] %vm839_vm12, %v10112_v14  ;;  %v2608_v36 = vld [vmem:[#allocation2 + $0x30] sm:$0xe] }
  0x40   : > { %v2601_v5 = vld [vmem:[#allocation2 + $0x14] sm:$0x1]  ;;  %3038 = vrot.lane.b32.xlu0 %v10571_v16, %s11068_s10  ;;  %v9642_v45 = vrot.slane %v2608_v36, 9  ;;  %v1588_v48 = vld [vmem:[#allocation2 + $0xc] sm:$0xe]  ;;  %v351_v50 = vmin.f32 %v11333_v21, 0.0 }
  0x41   : > { %v2699_v22 = vrot.slane %v2697_v2, 4  ;;  %v2698_v26 = vsel %vm11325_vm7, %v9639_v13, %v2697_v2  ;;  %v2700_v6 = vrot.slane %v2601_v5, 5  ;;  %v2604_v29 = vld [vmem:[#allocation2 + $0x20] sm:$0x1]  ;;  %v2609_v19 = vld [vmem:[#allocation2 + $0x34] sm:$0xf] }
  0x42   : > { %v2707_v33 = vrot.slane %v2604_v29, 5  ;;  %v2607_v35 = vld [vmem:[#allocation2 + $0x2c] sm:$0x1]  ;;  %2024 = vrot.lane.b32.xlu1 %v10572_v38, %s11069_s11  ;;  %855 = vst.msk [vmem:[#allocation2 + $0x44] sm:$0x1] %vm839_vm12, %v10115_v39  ;;  %v10574_v52 = vld [vmem:[#allocation2 + $0x30] sm:$0xff]  }
  0x43   : > { %v2701_v41 = vsel %vm11325_vm7, %v2699_v22, %v2700_v6  ;;  %v2714_v43 = vrot.slane %v2607_v35, 5  ;;  %v1585_v44 = vld [vmem:[#allocation2] sm:$0xe]  ;;  %v2718_v56 = vrot.slane %v2609_v19, 5  ;;  %v1589_v31 = vld [vmem:[#allocation2 + $0x10] sm:$0xf] }
  0x44   : > { %v9655_v49 = vcombine.low %v2698_v26, %v2701_v41  ;;  %v2708_v46 = vsel %vm11325_vm7, %v2706_v23, %v2707_v33  ;;  %v1586_v20 = vld [vmem:[#allocation2 + $0x4] sm:$0xf]  ;;  %v9575_v54 = vrot.slane %v1585_v44, 9  ;;  %v9576_v60 = vrot.slane %v1588_v48, 9  ;;  %v1590_v3 = vld [vmem:[#allocation2 + $0x14] sm:$0x1] }
  0x45   : > { %v1587_v25 = vld [vmem:[#allocation2 + $0x8] sm:$0x1]  ;;  %v1686_v55 = vrot.slane %v1586_v20, 5  ;;  %v9656_v28 = vcombine.low %v2705_v42, %v2708_v46  ;;  %v2715_v57 = vsel %vm11325_vm7, %v2713_v47, %v2714_v43  ;;  %vm1085_vm8 = vsmask.f32 3328 }
  0x46   : > { %2855 = vrot.lane.b32.xlu0 %v9655_v49, %s11070_s12  ;;  %v1689_v58 = vrot.slane %v1587_v25, 5  ;;  %v2610_v59 = vld [vmem:[#allocation2 + $0x38] sm:$0x1]  ;;  %vm1086_vm9 = vsmask.f32 7440  ;;  %2026 = vrot.lane.b32.xlu1 %v10573_v27, %s11069_s11  ;;  %v2719_v63 = vsel %vm11325_vm7, %v9642_v45, %v2718_v56  ;;  %v352_v4 = vmin.f32 %v11342_v17, 0.0 }
  0x47   : > { %v1687_v61 = vsel %vm11325_vm7, %v9575_v54, %v1686_v55  ;;  %v1688_v62 = vrot.slane %v1686_v55, 4  ;;  %v1591_v34 = vld [vmem:[#allocation2 + $0x18] sm:$0xe]  ;;  %v2720_v7 = vrot.slane %v2718_v56, 4  ;;  %v2721_v8 = vrot.slane %v2610_v59, 5  ;;  %vm11382_vm10 = vmor %vm1085_vm8, %vm1086_vm9 }
  0x48   : > { %v1693_v11 = vrot.slane %v1589_v31, 5  ;;  %v1696_v37 = vrot.slane %v1590_v3, 5  ;;  %v1592_v12 = vld [vmem:[#allocation2 + $0x1c] sm:$0xf]  ;;  %v9657_v38 = vcombine.low %v2712_v53, %v2715_v57  ;;  %v1593_v13 = vld [vmem:[#allocation2 + $0x20] sm:$0x1] }
  0x49   : > { %v1690_v1 = vsel %vm11325_vm7, %v1688_v62, %v1689_v58  ;;  %v9577_v14 = vrot.slane %v1591_v34, 9  ;;  %v1700_v2 = vrot.slane %v1592_v12, 5  ;;  %v1037_v40 = vld [vmem:[#allocation2] sm:$0xf]  ;;  %v2722_v18 = vsel %vm11325_vm7, %v2720_v7, %v2721_v8  ;;  %v1038_v23 = vld [vmem:[#allocation2 + $0x4] sm:$0xf] }
  0x4a   : > { %2857 = vrot.lane.b32.xlu0 %v9656_v28, %s11070_s12  ;;  %v9591_v16 = vcombine.low %v1687_v61, %v1690_v1  ;;  %v1694_v5 = vsel %vm11325_vm7, %v9576_v60, %v1693_v11  ;;  %v1695_v22 = vrot.slane %v1693_v11, 4  ;;  %v1039_v24 = vld [vmem:[#allocation2 + $0x8] sm:$0x1]  ;;  %2028 = vrot.lane.b32.xlu1 %v10574_v52, %s11069_s11  ;;  %v9658_v26 = vcombine.low %v2719_v63, %v2722_v18  ;;  %v1594_v9 = vld [vmem:[#allocation2 + $0x24] sm:$0xe] }
  0x4b   : > { %v1701_v6 = vsel %vm11325_vm7, %v9577_v14, %v1700_v2  ;;  %v1702_v27 = vrot.slane %v1700_v2, 4  ;;  %v1703_v29 = vrot.slane %v1593_v13, 5  ;;  %v1089_v32 = vshrl.u32 %v1037_v40, 16  ;;  %v1595_v10 = vld [vmem:[#allocation2 + $0x28] sm:$0xf] }
  0x4c   : > { %v1697_v30 = vsel %vm11325_vm7, %v1695_v22, %v1696_v37  ;;  %v1092_v33 = vshll.u32 %v1037_v40, 16  ;;  %v1098_v35 = vshll.u32 %v1038_v23, 16  ;;  %v1102_v41 = vshrl.u32 %v1038_v23, 16  ;;  %v1596_v43 = vld [vmem:[#allocation2 + $0x2c] sm:$0x1] }
  0x4d   : > { %v9592_v36 = vcombine.low %v1694_v5, %v1697_v30  ;;  %v1704_v39 = vsel %vm11325_vm7, %v1702_v27, %v1703_v29  ;;  %v1108_v42 = vshll.u32 %v1039_v24, 16  ;;  %v3096_v44 = vld [vmem:[#allocation2 + $0x18] sm:$0xf]  ;;  %v1091_v45 = vrot.slane %v1089_v32, 4  ;;  %v3097_v47 = vld [vmem:[#allocation2 + $0x1c] sm:$0xf] }
  0x4e   : > { %2859 = vrot.lane.b32.xlu0 %v9657_v38, %s11070_s12  ;;  %v9593_v19 = vcombine.low %v1701_v6, %v1704_v39  ;;  %v1094_v49 = vrot.slane %v1092_v33, 5  ;;  %v1100_v46 = vrot.slane %v1098_v35, 5  ;;  %1844 = vrot.lane.b32.xlu1 %v9591_v16, %s11068_s10  ;;  %v1104_v20 = vrot.slane %v1102_v41, 4  ;;  %v3098_v55 = vld [vmem:[#allocation2 + $0x20] sm:$0x1] }
  0x4f   : > { %v1110_v48 = vrot.slane %v1108_v42, 5  ;;  %v9578_v52 = vrot.slane %v1594_v9, 9  ;;  %v1707_v53 = vrot.slane %v1595_v10, 5  ;;  %v1710_v54 = vrot.slane %v1596_v43, 5  ;;  %v1040_v34 = vld [vmem:[#allocation2 + $0xc] sm:$0xf] }
  0x50   : > { %v1095_v25 = vor.u32 %v1094_v49, %v1091_v45  ;;  %v3145_v56 = vshrl.u32 %v3096_v44, 16  ;;  %v3148_v28 = vshll.u32 %v3096_v44, 16  ;;  %v1105_v58 = vor.u32 %v1104_v20, %v1100_v46  ;;  %v1041_v12 = vld [vmem:[#allocation2 + $0x10] sm:$0xf]  ;;  %v1042_v2 = vld [vmem:[#allocation2 + $0x14] sm:$0x1] }
  0x51   : > { %v1708_v59 = vsel %vm11325_vm7, %v9578_v52, %v1707_v53  ;;  %v1709_v31 = vrot.slane %v1707_v53, 4  ;;  %v3154_v60 = vshll.u32 %v3097_v47, 16  ;;  %v3158_v3 = vshrl.u32 %v3097_v47, 16  ;;  %v3099_v22 = vld [vmem:[#allocation2 + $0x24] sm:$0xf] }
  0x52   : > { %2861 = vrot.lane.b32.xlu0 %v9658_v26, %s11070_s12  ;;  %v1096_v61 = vrot.slane %v1095_v25, 4  ;;  %v3147_v62 = vrot.slane %v3145_v56, 4  ;;  %v3150_v63 = vrot.slane %v3148_v28, 5  ;;  %1846 = vrot.lane.b32.xlu1 %v9592_v36, %s11068_s10  ;;  %v1106_v7 = vrot.slane %v1105_v58, 4  ;;  %v3100_v32 = vld [vmem:[#allocation2 + $0x28] sm:$0xf] }
  0x53   : > { %v1711_v8 = vsel %vm11325_vm7, %v1709_v31, %v1710_v54  ;;  %v3156_v11 = vrot.slane %v3154_v60, 5  ;;  %v3164_v37 = vshll.u32 %v3098_v55, 16  ;;  %v3160_v14 = vrot.slane %v3158_v3, 4  ;;  %v3101_v36 = vld [vmem:[#allocation2 + $0x2c] sm:$0x1] }
  0x54   : > { %v1101_v38 = vsel %vm11382_vm10, %v1096_v61, %v1100_v46  ;;  %v9594_v1 = vcombine.low %v1708_v59, %v1711_v8  ;;  %v3151_v13 = vor.u32 %v3150_v63, %v3147_v62  ;;  %v1111_v40 = vsel %vm11382_vm10, %v1106_v7, %v1110_v48  ;;  %v1043_v45 = vld [vmem:[#allocation2 + $0x18] sm:$0xf]  ;;  %v1044_v25 = vld [vmem:[#allocation2 + $0x1c] sm:$0xf]  ;;  %v1045_v60 = vld [vmem:[#allocation2 + $0x20] sm:$0x1] }
  0x55   : > { %v3166_v16 = vrot.slane %v3164_v37, 5  ;;  %v1113_v18 = vshrl.u32 %v1040_v34, 16  ;;  %v1116_v5 = vshll.u32 %v1040_v34, 16  ;;  %v9559_v23 = vcombine.low %v1101_v38, %v1111_v40  ;;  %v3102_v7 = vld [vmem:[#allocation2 + $0x30] sm:$0xf] }
  0x56   : > { %v3152_v24 = vrot.slane %v3151_v13, 4  ;;  %v3161_v26 = vor.u32 %v3160_v14, %v3156_v11  ;;  %v1122_v6 = vshll.u32 %v1041_v12, 16  ;;  %1848 = vrot.lane.b32.xlu1 %v9593_v19, %s11068_s10  ;;  %v1126_v9 = vshrl.u32 %v1041_v12, 16  ;;  %v3103_v38 = vld [vmem:[#allocation2 + $0x34] sm:$0xf] }
  0x57   : > { %v1115_v27 = vrot.slane %v1113_v18, 4  ;;  %v1118_v29 = vrot.slane %v1116_v5, 5  ;;  %v1132_v30 = vshll.u32 %v1042_v2, 16  ;;  %1520 = vrot.lane.b32.xlu0 %v9559_v23, %s11070_s12  ;;  %v3169_v39 = vshrl.u32 %v3099_v22, 16  ;;  %v3104_v5 = vld [vmem:[#allocation2 + $0x38] sm:$0x1] }
  0x58   : > { %v3157_v33 = vsel %vm11382_vm10, %v3152_v24, %v3156_v11  ;;  %v3162_v35 = vrot.slane %v3161_v26, 4  ;;  %v1124_v10 = vrot.slane %v1122_v6, 5  ;;  %v1128_v42 = vrot.slane %v1126_v9, 4 }
  0x59   : > { %v1119_v41 = vor.u32 %v1118_v29, %v1115_v27  ;;  %v1134_v43 = vrot.slane %v1132_v30, 5  ;;  %v3172_v44 = vshll.u32 %v3099_v22, 16  ;;  %v3171_v49 = vrot.slane %v3169_v39, 4  ;;  %v1046_v27 = vld [vmem:[#allocation2 + $0x24] sm:$0xf] }
  0x5a   : > { %v3167_v19 = vsel %vm11382_vm10, %v3162_v35, %v3166_v16  ;;  %v3178_v46 = vshll.u32 %v3100_v32, 16  ;;  %v3182_v47 = vshrl.u32 %v3100_v32, 16  ;;  %1850 = vrot.lane.b32.xlu1 %v9594_v1, %s11068_s10  ;;  %v1129_v52 = vor.u32 %v1128_v42, %v1124_v10 }
  0x5b   : > { %v9687_v20 = vcombine.low %v3157_v33, %v3167_v19  ;;  %v1120_v48 = vrot.slane %v1119_v41, 4  ;;  %v3174_v53 = vrot.slane %v3172_v44, 5  ;;  %v3188_v56 = vshll.u32 %v3101_v36, 16  ;;  %v1047_v33 = vld [vmem:[#allocation2 + $0x28] sm:$0xf] }
  0x5c   : > { %v3180_v54 = vrot.slane %v3178_v46, 5  ;;  %v3184_v55 = vrot.slane %v3182_v47, 4  ;;  %v1137_v28 = vshrl.u32 %v1043_v45, 16  ;;  %v1130_v59 = vrot.slane %v1129_v52, 4 }
  0x5d   : > { %3576 = vrot.lane.b32.xlu0 %v9687_v20, %s11069_s11  ;;  %v1125_v58 = vsel %vm11382_vm10, %v1120_v48, %v1124_v10  ;;  %v3175_v31 = vor.u32 %v3174_v53, %v3171_v49  ;;  %v1140_v61 = vshll.u32 %v1043_v45, 16  ;;  %v3190_v63 = vrot.slane %v3188_v56, 5  ;;  %v3105_v20 = vld [vmem:[#allocation2 + $0x3c] sm:$0xf] }
  0x5e   : > { %v3185_v62 = vor.u32 %v3184_v55, %v3180_v54  ;;  %v1139_v3 = vrot.slane %v1137_v28, 4  ;;  %v1146_v34 = vshll.u32 %v1044_v25, 16  ;;  %v1135_v8 = vsel %vm11382_vm10, %v1130_v59, %v1134_v43  ;;  %v1048_v43 = vld [vmem:[#allocation2 + $0x2c] sm:$0x1]  ;;  %v3107_v59 = vld [vmem:[#allocation2 + $0x44] sm:$0x1] }
  0x5f   : > { %v3176_v11 = vrot.slane %v3175_v31, 4  ;;  %v1142_v37 = vrot.slane %v1140_v61, 5  ;;  %v1150_v12 = vshrl.u32 %v1044_v25, 16  ;;  %v9560_v1 = vcombine.low %v1125_v58, %v1135_v8 }
  0x60   : > { %v3186_v13 = vrot.slane %v3185_v62, 4  ;;  %v1148_v14 = vrot.slane %v1146_v34, 5  ;;  %v1156_v2 = vshll.u32 %v1045_v60, 16  ;;  %v3193_v22 = vshrl.u32 %v3102_v7, 16 }
  0x61   : > { %v3181_v40 = vsel %vm11382_vm10, %v3176_v11, %v3180_v54  ;;  %v1143_v16 = vor.u32 %v1142_v37, %v1139_v3  ;;  %v1152_v18 = vrot.slane %v1150_v12, 4  ;;  %1522 = vrot.lane.b32.xlu1 %v9560_v1, %s11070_s12  ;;  %v3196_v26 = vshll.u32 %v3102_v7, 16  ;;  %v3106_v54 = vld [vmem:[#allocation2 + $0x40] sm:$0xf]  ;;  %v2613_v37 = vld [vmem:[#allocation2 + $0x44] sm:$0x1] }
  0x62   : > { %v3191_v23 = vsel %vm11382_vm10, %v3186_v13, %v3190_v63  ;;  %v1158_v24 = vrot.slane %v1156_v2, 5  ;;  %v3202_v6 = vshll.u32 %v3103_v38, 16  ;;  %v3195_v32 = vrot.slane %v3193_v22, 4  ;;  %v2611_v63 = vld [vmem:[#allocation2 + $0x3c] sm:$0xe] }
  0x63   : > { %v9688_v29 = vcombine.low %v3181_v40, %v3191_v23  ;;  %v1144_v9 = vrot.slane %v1143_v16, 4  ;;  %v1153_v30 = vor.u32 %v1152_v18, %v1148_v14  ;;  %v3198_v35 = vrot.slane %v3196_v26, 5  ;;  %v2612_v3 = vld [vmem:[#allocation2 + $0x40] sm:$0xf] }
  0x64   : > { %v3204_v10 = vrot.slane %v3202_v6, 5  ;;  %v3206_v36 = vshrl.u32 %v3103_v38, 16  ;;  %v3212_v39 = vshll.u32 %v3104_v5, 16  ;;  %v1161_v44 = vshrl.u32 %v1046_v27, 16  ;;  %v1050_v5 = vld [vmem:[#allocation2 + $0x34] sm:$0xf] }
  0x65   : > { %3578 = vrot.lane.b32.xlu0 %v9688_v29, %s11069_s11  ;;  %v1149_v41 = vsel %vm11382_vm10, %v1144_v9, %v1148_v14  ;;  %v1154_v42 = vrot.slane %v1153_v30, 4  ;;  %v1164_v45 = vshll.u32 %v1046_v27, 16  ;;  %v3199_v19 = vor.u32 %v3198_v35, %v3195_v32  ;;  %v1049_v14 = vld [vmem:[#allocation2 + $0x30] sm:$0xf]  ;;  %v1051_v6 = vld [vmem:[#allocation2 + $0x38] sm:$0x1] }
  0x66   : > { %v3208_v49 = vrot.slane %v3206_v36, 4  ;;  %v3214_v46 = vrot.slane %v3212_v39, 5  ;;  %v1170_v47 = vshll.u32 %v1047_v33, 16  ;;  %v1163_v52 = vrot.slane %v1161_v44, 4 }
  0x67   : > { %v1159_v48 = vsel %vm11382_vm10, %v1154_v42, %v1158_v24  ;;  %v1166_v53 = vrot.slane %v1164_v45, 5  ;;  %v1174_v25 = vshrl.u32 %v1047_v33, 16  ;;  %v3200_v56 = vrot.slane %v3199_v19, 4 }
  0x68   : > { %v9561_v55 = vcombine.low %v1149_v41, %v1159_v48  ;;  %v3209_v28 = vor.u32 %v3208_v49, %v3204_v10  ;;  %v1172_v58 = vrot.slane %v1170_v47, 5  ;;  %v1180_v61 = vshll.u32 %v1048_v43, 16  ;;  %v1597_v49 = vld [vmem:[#allocation2 + $0x30] sm:$0xe]  ;;  %v1599_v47 = vld [vmem:[#allocation2 + $0x38] sm:$0x1] }
  0x69   : > { %v1167_v31 = vor.u32 %v1166_v53, %v1163_v52  ;;  %v1176_v60 = vrot.slane %v1174_v25, 4  ;;  %v3217_v62 = vshrl.u32 %v3105_v20, 16  ;;  %v3205_v34 = vsel %vm11382_vm10, %v3200_v56, %v3204_v10  ;;  %v1052_v25 = vld [vmem:[#allocation2 + $0x3c] sm:$0xf] }
  0x6a   : > { %1524 = vrot.lane.b32.xlu1 %v9561_v55, %s11070_s12  ;;  %v3210_v7 = vrot.slane %v3209_v28, 4  ;;  %v3220_v8 = vshll.u32 %v3105_v20, 16  ;;  %v3226_v11 = vshll.u32 %v3106_v54, 16  ;;  %v1182_v1 = vrot.slane %v1180_v61, 5 }
  0x6b   : > { %v1168_v12 = vrot.slane %v1167_v31, 4  ;;  %v1177_v38 = vor.u32 %v1176_v60, %v1172_v58  ;;  %v3219_v13 = vrot.slane %v3217_v62, 4  ;;  %v3230_v18 = vshrl.u32 %v3106_v54, 16 }
  0x6c   : > { %v3215_v2 = vsel %vm11382_vm10, %v3210_v7, %v3214_v46  ;;  %v3222_v40 = vrot.slane %v3220_v8, 5  ;;  %v3228_v16 = vrot.slane %v3226_v11, 5  ;;  %v3236_v26 = vshll.u32 %v3107_v59, 16  ;;  %v1598_v46 = vld [vmem:[#allocation2 + $0x34] sm:$0xf] }
  0x6d   : > { %v9689_v22 = vcombine.low %v3205_v34, %v3215_v2  ;;  %v1173_v23 = vsel %vm11382_vm10, %v1168_v12, %v1172_v58  ;;  %v1178_v24 = vrot.slane %v1177_v38, 4  ;;  %v3232_v29 = vrot.slane %v3230_v18, 4  ;;  %v10587_v34 = vld [vmem:[%s14633_s1 + $0x40] sm:$0xff]  }
  0x6e   : > { %v3223_v27 = vor.u32 %v3222_v40, %v3219_v13  ;;  %v9643_v9 = vrot.slane %v2611_v63, 9  ;;  %v2725_v30 = vrot.slane %v2612_v3, 5  ;;  %v3238_v33 = vrot.slane %v3236_v26, 5  ;;  %v1053_v3 = vld [vmem:[#allocation2 + $0x40] sm:$0xf]  ;;  %10185 = vmatprep.subr.bf16.mxu0 %v10587_v34  ;;  %v11451_v40 = vld [vmem:[%s11158_s9 + $0xa8] sm:$0xff] }
  0x6f   : > { %3580 = vrot.lane.b32.xlu0 %v9689_v22, %s11069_s11  ;;  %v1183_v32 = vsel %vm11382_vm10, %v1178_v24, %v1182_v1  ;;  %v2728_v35 = vrot.slane %v2613_v37, 5  ;;  %v1185_v10 = vshrl.u32 %v1049_v14, 16  ;;  %v3233_v41 = vor.u32 %v3232_v29, %v3228_v16  ;;  %v1054_v37 = vld [vmem:[#allocation2 + $0x44] sm:$0x1]  ;;  %v11459_v22 = vld [vmem:[#allocation2 + $0x3c] sm:$0xe] }
  0x70   : > { %v9562_v36 = vcombine.low %v1173_v23, %v1183_v32  ;;  %v3224_v39 = vrot.slane %v3223_v27, 4  ;;  %v2726_v42 = vsel %vm11325_vm7, %v9643_v9, %v2725_v30  ;;  %v2727_v43 = vrot.slane %v2725_v30, 4  ;;  %v11461_v23 = vld [vmem:[#allocation2 + $0x40] sm:$0xf]  ;;  %v10590_v26 = vld [vmem:[%s14633_s1 + $0x48] sm:$0xff]  }
  0x71   : > { %v1187_v44 = vrot.slane %v1185_v10, 4  ;;  %v1188_v45 = vshll.u32 %v1049_v14, 16  ;;  %v1194_v19 = vshll.u32 %v1050_v5, 16  ;;  %v3234_v48 = vrot.slane %v3233_v41, 4  ;;  %v10589_v24 = vld [vmem:[%s14633_s1] sm:$0xff]  }
  0x72   : > { %1526 = vrot.lane.b32.xlu1 %v9562_v36, %s11070_s12  ;;  %v3229_v20 = vsel %vm11382_vm10, %v3224_v39, %v3228_v16  ;;  %v1198_v52 = vshrl.u32 %v1050_v5, 16  ;;  %v1204_v53 = vshll.u32 %v1051_v6, 16  ;;  %v2729_v54 = vsel %vm11325_vm7, %v2727_v43, %v2728_v35  ;;  %v11454_v16 = vld [vmem:[%s11158_s9 + $0xb0] sm:$0xff]  ;;  %v11474_v30 = vld [vmem:[%s11158_s9 + $0xb8] sm:$0x3]  ;;  %10186 = vmatpush3.bf16.msra.mxu0 %v10589_v24 }
  0x73   : > { %v1190_v55 = vrot.slane %v1188_v45, 5  ;;  %v1196_v56 = vrot.slane %v1194_v19, 5  ;;  %v422_v28 = vmul.f32 1.442695, %v350_v0  ;;  %v3239_v58 = vsel %vm11382_vm10, %v3234_v48, %v3238_v33  ;;  %v1602_v39 = vld [vmem:[#allocation2 + $0x44] sm:$0x1]  ;;  %10187 = vmatprep.subr.bf16.mxu0 %v10590_v26 }
  0x74   : > { %v9659_v59 = vcombine.low %v2726_v42, %v2729_v54  ;;  %v1200_v31 = vrot.slane %v1198_v52, 4  ;;  %v1206_v60 = vrot.slane %v1204_v53, 5  ;;  %v9690_v61 = vcombine.low %v3229_v20, %v3239_v58  ;;  %v11533_v26 = vld [vmem:[%s11158_s9 + $0xf8] sm:$0xff] }
  0x75   : > { %v1191_v62 = vor.u32 %v1190_v55, %v1187_v44  ;;  %10735 = vpow2.f32 %v422_v28  ;;  %v424_v63 = vmul.f32 1.442695, %v351_v50  ;;  %v9579_v0 = vrot.slane %v1597_v49, 9  ;;  %v11485_v55 = vld [vmem:[%s11158_s9 + $0xc0] sm:$0xff] }
  0x76   : > { %v1201_v7 = vor.u32 %v1200_v31, %v1196_v56  ;;  %v1714_v8 = vrot.slane %v1598_v46, 5  ;;  %v1717_v11 = vrot.slane %v1599_v47, 5  ;;  %3582 = vrot.lane.b32.xlu0 %v9690_v61, %s11069_s11  ;;  %vm296_vm11 = vcmp.gt.f32.partialorder %v11294_v51, 0.0  ;;  %v10576_v28 = vld [vmem:[#allocation2 + $0x3c] sm:$0xff]  }
  0x77   : > { %v1192_v12 = vrot.slane %v1191_v62, 4  ;;  %10737 = vpow2.f32 %v424_v63  ;;  %v426_v50 = vmul.f32 1.442695, %v352_v4  ;;  %v1209_v38 = vshrl.u32 %v1052_v25, 16 }
  0x78   : > { %v1202_v1 = vrot.slane %v1201_v7, 4  ;;  %v1715_v13 = vsel %vm11325_vm7, %v9579_v0, %v1714_v8  ;;  %v1716_v14 = vrot.slane %v1714_v8, 4  ;;  %v1212_v2 = vshll.u32 %v1052_v25, 16 }
  0x79   : > { %v1197_v18 = vsel %vm11382_vm10, %v1192_v12, %v1196_v56  ;;  %vm297_vm13 = vcmp.gt.f32.partialorder %v11333_v21, 0.0  ;;  %10739 = vpow2.f32 %v426_v50  ;;  %v1211_v4 = vrot.slane %v1209_v38, 4  ;;  %v11512_v38 = vld [vmem:[%s11158_s9 + $0xe0] sm:$0xff] }
  0x7a   : > { %v1218_v5 = vshll.u32 %v1053_v3, 16  ;;  %v1207_v6 = vsel %vm11382_vm10, %v1202_v1, %v1206_v60  ;;  %v1718_v27 = vsel %vm11325_vm7, %v1716_v14, %v1717_v11  ;;  %v1214_v29 = vrot.slane %v1212_v2, 5  ;;  %2863 = vrot.lane.b32.xlu0 %v9659_v59, %s11070_s12  ;;  %v11491_v60 = vld [vmem:[%s11158_s9 + $0xd0] sm:$0x3]  ;;  %v11505_v11 = vld [vmem:[%s11158_s9 + $0xd8] sm:$0xff] }
  0x7b   : > { %v1222_v9 = vshrl.u32 %v1053_v3, 16  ;;  %v9563_v32 = vcombine.low %v1197_v18, %v1207_v6  ;;  %v1228_v35 = vshll.u32 %v1054_v37, 16  ;;  %vm298_vm14 = vcmp.gt.f32.partialorder %v11342_v17, 0.0  ;;  %v11499_v3 = vld [vmem:[%s11158_s9 + $0xc8] sm:$0xff] }
  0x7c   : > { %v1220_v33 = vrot.slane %v1218_v5, 5  ;;  %v1215_v10 = vor.u32 %v1214_v29, %v1211_v4  ;;  %v9595_v41 = vcombine.low %v1715_v13, %v1718_v27  ;;  %v353_v43 = vmin.f32 %v11451_v40, 0.0  ;;  %v11515_v1 = vld [vmem:[%s11158_s9 + $0xe8] sm:$0x3] }
  0x7d   : > { %v1224_v36 = vrot.slane %v1222_v9, 4  ;;  %1528 = vrot.lane.b32.xlu1 %v9563_v32, %s11070_s12  ;;  %v1230_v42 = vrot.slane %v1228_v35, 5  ;;  %v354_v44 = vmin.f32 %v11454_v16, 0.0  ;;  %v9580_v49 = vrot.slane %v11459_v22, 9 }
  0x7e   : > { %v1216_v45 = vrot.slane %v1215_v10, 4  ;;  %v1721_v46 = vrot.slane %v11461_v23, 5  ;;  %v428_v20 = vmul.f32 1.442695, %v353_v43  ;;  %v1724_v52 = vrot.slane %v1602_v39, 5 }
  0x7f   : > { %v1225_v19 = vor.u32 %v1224_v36, %v1220_v33  ;;  %v10736_v47 = vpop.eup %10735  ;;  %v430_v48 = vmul.f32 1.442695, %v354_v44  ;;  %v355_v53 = vmin.f32 %v11474_v30, 0.0  ;;  %v356_v12 = vmin.f32 %v11485_v55, 0.0 }
  0x80   : > { %v9453_v25 = vadd.f32 -1.0, %v10736_v47  ;;  %v1221_v58 = vsel %vm11382_vm10, %v1216_v45, %v1220_v33  ;;  %10741 = vpow2.f32 %v428_v20  ;;  %v1723_v59 = vrot.slane %v1721_v46, 4 }
  0x81   : > { %v1226_v54 = vrot.slane %v1225_v19, 4  ;;  %v10738_v56 = vpop.eup %10737  ;;  %1852 = vrot.lane.b32.xlu1 %v9595_v41, %s11068_s10  ;;  %v432_v31 = vmul.f32 1.442695, %v355_v53  ;;  %10743 = vpow2.f32 %v430_v48  ;;  %v357_v50 = vmin.f32 %v11499_v3, 0.0 }
  0x82   : > { %v9454_v61 = vadd.f32 -1.0, %v10738_v56  ;;  %v566_v62 = vsel %vm296_vm11, %v11294_v51, %v9453_v25  ;;  %v1722_v13 = vsel %vm11325_vm7, %v9580_v49, %v1721_v46  ;;  %v1725_v14 = vsel %vm11325_vm7, %v1723_v59, %v1724_v52  ;;  %v11550_v49 = vld [vmem:[%s11158_s9 + $0x100] sm:$0x3] }
  0x83   : > { %v1231_v63 = vsel %vm11382_vm10, %v1226_v54, %v1230_v42  ;;  %v10740_v34 = vpop.eup %10739  ;;  %v10116_v7 = vpack.c.bf16 %v566_v62, %v566_v62  ;;  %10745 = vpow2.f32 %v432_v31  ;;  %v358_v2 = vmin.f32 %v11491_v60, 0.0 }
  0x84   : > { %v567_v0 = vsel %vm297_vm13, %v11333_v21, %v9454_v61  ;;  %v9455_v8 = vadd.f32 -1.0, %v10740_v34  ;;  %v9564_v51 = vcombine.low %v1221_v58, %v1231_v63  ;;  %v434_v4 = vmul.f32 1.442695, %v356_v12 }
  0x85   : > { %v10117_v37 = vpack.c.bf16 %v567_v0, %v567_v0  ;;  %856 = vst.msk [vmem:[#allocation2 + $0x48] sm:$0xf] %vm836_vm3, %v10116_v7  ;;  %2030 = vrot.lane.b32.xlu1 %v10576_v28, %s11069_s11  ;;  %v436_v5 = vmul.f32 1.442695, %v357_v50  ;;  %v359_v22 = vmin.f32 %v11505_v11, 0.0  ;;  %v360_v23 = vmin.f32 %v11512_v38, 0.0 }
  0x86   : > { %v568_v21 = vsel %vm298_vm14, %v11342_v17, %v9455_v8  ;;  %v361_v24 = vmin.f32 %v11515_v1, 0.0  ;;  %v11530_v17 = vld [vmem:[%s11158_s9 + $0xf0] sm:$0xff]  ;;  %vm299_vm15 = vcmp.gt.f32.partialorder %v11451_v40, 0.0  ;;  %vm300_vm0 = vcmp.gt.f32.partialorder %v11454_v16, 0.0 }
  0x87   : > { %857 = vst.msk [vmem:[#allocation2 + $0x4c] sm:$0xf] %vm836_vm3, %v10117_v37  ;;  %v10118_v18 = vpack.c.bf16 %v568_v21, %v568_v21  ;;  %v9596_v6 = vcombine.low %v1722_v13, %v1725_v14  ;;  %10747 = vpow2.f32 %v434_v4  ;;  %vm301_vm1 = vcmp.gt.f32.partialorder %v11474_v30, 0.0 }
  0x88   : > { %10749 = vpow2.f32 %v436_v5  ;;  %v438_v27 = vmul.f32 1.442695, %v358_v2  ;;  %v11540_v29 = vmul.f32 1.442695, %v359_v22  ;;  %v11542_v32 = vmul.f32 1.442695, %v360_v23 }
  0x89   : > { %858 = vst.msk [vmem:[#allocation2 + $0x50] sm:$0x1] %vm839_vm12, %v10118_v18  ;;  %1530 = vrot.lane.b32.xlu1 %v9564_v51, %s11070_s12  ;;  %v11544_v33 = vmul.f32 1.442695, %v361_v24  ;;  %v362_v35 = vmin.f32 %v11530_v17, 0.0  ;;  %v363_v10 = vmin.f32 %v11533_v26, 0.0 }
  0x8a   : > { %v10742_v9 = vpop.eup %10741  ;;  %vm302_vm2 = vcmp.gt.f32.partialorder %v11485_v55, 0.0  ;;  %vm303_vm4 = vcmp.gt.f32.partialorder %v11499_v3, 0.0  ;;  %10751 = vpow2.f32 %v438_v27  ;;  %v364_v50 = vmin.f32 %v11550_v49, 0.0 }
  0x8b   : > { %v10744_v36 = vpop.eup %10743  ;;  %v9456_v19 = vadd.f32 -1.0, %v10742_v9  ;;  %vm304_vm5 = vcmp.gt.f32.partialorder %v11491_v60, 0.0  ;;  %10753 = vpow2.f32 %v11540_v29  ;;  %vm305_vm6 = vcmp.gt.f32.partialorder %v11505_v11, 0.0 }
  0x8c   : > { %v3108_v39 = vld [vmem:[#allocation2 + $0x48] sm:$0xf]  ;;  %v9457_v20 = vadd.f32 -1.0, %v10744_v36  ;;  %10755 = vpow2.f32 %v11542_v32  ;;  %vm306_vm8 = vcmp.gt.f32.partialorder %v11512_v38, 0.0  ;;  %vm307_vm9 = vcmp.gt.f32.partialorder %v11515_v1, 0.0 }
  0x8d   : > { %v2614_v41 = vld [vmem:[#allocation2 + $0x48] sm:$0xe]  ;;  %v10746_v42 = vpop.eup %10745  ;;  %v3241_v43 = vshrl.u32 %v3108_v39, 16  ;;  %v3244_v44 = vshll.u32 %v3108_v39, 16  ;;  %1854 = vrot.lane.b32.xlu1 %v9596_v6, %s11068_s10  ;;  %v569_v59 = vsel %vm299_vm15, %v11451_v40, %v9456_v19  ;;  %10757 = vpow2.f32 %v11544_v33 }
  0x8e   : > { %v9644_v45 = vrot.slane %v2614_v41, 9  ;;  %v10575_v46 = vld [vmem:[#allocation2 + $0x48] sm:$0xff]   ;;  %v570_v31 = vsel %vm300_vm0, %v11454_v16, %v9457_v20  ;;  %v9458_v61 = vadd.f32 -1.0, %v10746_v42  ;;  %v10119_v51 = vpack.c.bf16 %v569_v59, %v569_v59 }
  0x8f   : > { %v3109_v47 = vld [vmem:[#allocation2 + $0x4c] sm:$0xf]  ;;  %v3243_v48 = vrot.slane %v3241_v43, 4  ;;  %v3246_v52 = vrot.slane %v3244_v44, 5  ;;  %3040 = vrot.lane.b32.xlu0 %v10575_v46, %s11068_s10  ;;  %v1055_v12 = vld [vmem:[#allocation2 + $0x48] sm:$0xf]  ;;  %v10120_v2 = vpack.c.bf16 %v570_v31, %v570_v31 }
  0x90   : > { %v3250_v53 = vshll.u32 %v3109_v47, 16  ;;  %v3254_v25 = vshrl.u32 %v3109_v47, 16  ;;  %v2615_v54 = vld [vmem:[#allocation2 + $0x4c] sm:$0xf]  ;;  %v3110_v56 = vld [vmem:[#allocation2 + $0x50] sm:$0x1]  ;;  %v571_v5 = vsel %vm301_vm1, %v11474_v30, %v9458_v61 }
  0x91   : > { %v2616_v28 = vld [vmem:[#allocation2 + $0x50] sm:$0x1]  ;;  %v2732_v58 = vrot.slane %v2615_v54, 5  ;;  %v3247_v62 = vor.u32 %v3246_v52, %v3243_v48  ;;  %v3260_v7 = vshll.u32 %v3110_v56, 16  ;;  %v10578_v0 = vld [vmem:[#allocation2 + $0x48] sm:$0xff]   ;;  %v10748_v21 = vpop.eup %10747  ;;  %v1233_v23 = vshrl.u32 %v1055_v12, 16 }
  0x92   : > { %v3252_v63 = vrot.slane %v3250_v53, 5  ;;  %v3256_v34 = vrot.slane %v3254_v25, 4  ;;  %v2735_v37 = vrot.slane %v2616_v28, 5  ;;  %2032 = vrot.lane.b32.xlu1 %v10578_v0, %s11069_s11  ;;  %v1056_v16 = vld [vmem:[#allocation2 + $0x4c] sm:$0xf]  ;;  %v10750_v18 = vpop.eup %10749  ;;  %v1236_v24 = vshll.u32 %v1055_v12, 16 }
  0x93   : > { %v2734_v8 = vrot.slane %v2732_v58, 4  ;;  %v3248_v13 = vrot.slane %v3247_v62, 4  ;;  %v3262_v40 = vrot.slane %v3260_v7, 5  ;;  %v2733_v4 = vsel %vm11325_vm7, %v9644_v45, %v2732_v58  ;;  %859 = vst.msk [vmem:[#allocation2 + $0x54] sm:$0xf] %vm836_vm3, %v10119_v51  ;;  %v10591_v39 = vld [vmem:[%s14633_s1 + $0x8] sm:$0xff]  }
  0x94   : > { %v3257_v14 = vor.u32 %v3256_v34, %v3252_v63  ;;  %v1057_v22 = vld [vmem:[#allocation2 + $0x50] sm:$0x1]  ;;  %860 = vst.msk [vmem:[#allocation2 + $0x58] sm:$0xf] %vm836_vm3, %v10120_v2  ;;  %v10121_v36 = vpack.c.bf16 %v571_v5, %v571_v5  ;;  %v1235_v41 = vrot.slane %v1233_v23, 4  ;;  %v1238_v42 = vrot.slane %v1236_v24, 5  ;;  %10188 = vmatpush3.bf16.msra.mxu0 %v10591_v39  ;;  %v10752_v52 = vpop.eup %10751 }
  0x95   : > { %v3253_v6 = vsel %vm11382_vm10, %v3248_v13, %v3252_v63  ;;  %v2736_v9 = vsel %vm11325_vm7, %v2734_v8, %v2735_v37  ;;  %v10593_v30 = vld [vmem:[%s14633_s1 + $0x50] sm:$0xff]   ;;  %v1242_v43 = vshll.u32 %v1056_v16, 16  ;;  %v1246_v44 = vshrl.u32 %v1056_v16, 16  ;;  %v11583_v20 = vld [vmem:[#allocation2 + $0x48] sm:$0xe]  ;;  %v10595_v28 = vld [vmem:[%s14633_s1 + $0x58] sm:$0xff]  }
  0x96   : > { %v3258_v27 = vrot.slane %v3257_v14, 4  ;;  %861 = vst.msk [vmem:[#allocation2 + $0x5c] sm:$0x1] %vm839_vm12, %v10121_v36  ;;  %v1252_v19 = vshll.u32 %v1057_v22, 16  ;;  %v9459_v46 = vadd.f32 -1.0, %v10748_v21  ;;  %v9460_v47 = vadd.f32 -1.0, %v10750_v18  ;;  %10189 = vmatprep.subr.bf16.mxu0 %v10593_v30 }
  0x97   : > { %v10594_v48 = vld [vmem:[%s14633_s1 + $0x10] sm:$0xff]   ;;  %v1239_v25 = vor.u32 %v1238_v42, %v1235_v41  ;;  %v1244_v54 = vrot.slane %v1242_v43, 5  ;;  %v1248_v56 = vrot.slane %v1246_v44, 4  ;;  %v9660_v58 = vcombine.low %v2733_v4, %v2736_v9 }
  0x98   : > { %v3263_v45 = vsel %vm11382_vm10, %v3258_v27, %v3262_v40  ;;  %v1254_v59 = vrot.slane %v1252_v19, 5  ;;  %v572_v31 = vsel %vm302_vm2, %v11485_v55, %v9459_v46  ;;  %v573_v61 = vsel %vm303_vm4, %v11499_v3, %v9460_v47  ;;  %10190 = vmatpush3.bf16.msra.mxu0 %v10594_v48  ;;  %v1604_v3 = vld [vmem:[#allocation2 + $0x4c] sm:$0xf]  ;;  %v1605_v16 = vld [vmem:[#allocation2 + $0x50] sm:$0x1] }
  0x99   : > { %v9691_v53 = vcombine.low %v3253_v6, %v3263_v45  ;;  %v1240_v62 = vrot.slane %v1239_v25, 4  ;;  %v10122_v63 = vpack.c.bf16 %v572_v31, %v572_v31  ;;  %v10123_v34 = vpack.c.bf16 %v573_v61, %v573_v61  ;;  %10191 = vmatprep.subr.bf16.mxu0 %v10595_v28 }
  0x9a   : > { %v9581_v7 = vrot.slane %v11583_v20, 9  ;;  %v3111_v0 = vld [vmem:[#allocation2 + $0x54] sm:$0xf]  ;;  %v1249_v55 = vor.u32 %v1248_v56, %v1244_v54  ;;  %v1728_v44 = vrot.slane %v1604_v3, 5  ;;  %v1731_v19 = vrot.slane %v1605_v16, 5 }
  0x9b   : > { %3584 = vrot.lane.b32.xlu0 %v9691_v53, %s11069_s11  ;;  %v2617_v8 = vld [vmem:[#allocation2 + $0x54] sm:$0xe]  ;;  %v3112_v51 = vld [vmem:[#allocation2 + $0x58] sm:$0xf]  ;;  %v3265_v12 = vshrl.u32 %v3111_v0, 16  ;;  %v3268_v21 = vshll.u32 %v3111_v0, 16  ;;  %v1245_v23 = vsel %vm11382_vm10, %v1240_v62, %v1244_v54 }
  0x9c   : > { %v10577_v37 = vld [vmem:[#allocation2 + $0x54] sm:$0xff]   ;;  %862 = vst.msk [vmem:[#allocation2 + $0x60] sm:$0xf] %vm836_vm3, %v10122_v63  ;;  %863 = vst.msk [vmem:[#allocation2 + $0x64] sm:$0xf] %vm836_vm3, %v10123_v34  ;;  %v3274_v13 = vshll.u32 %v3112_v51, 16  ;;  %v1729_v54 = vsel %vm11325_vm7, %v9581_v7, %v1728_v44  ;;  %v10754_v34 = vpop.eup %10753 }
  0x9d   : > { %v3278_v14 = vshrl.u32 %v3112_v51, 16  ;;  %v2618_v40 = vld [vmem:[#allocation2 + $0x58] sm:$0xf]  ;;  %v9645_v2 = vrot.slane %v2617_v8, 9  ;;  %v3113_v18 = vld [vmem:[#allocation2 + $0x5c] sm:$0x1] }
  0x9e   : > { %v3267_v4 = vrot.slane %v3265_v12, 4  ;;  %v2619_v5 = vld [vmem:[#allocation2 + $0x5c] sm:$0x1]  ;;  %v2739_v22 = vrot.slane %v2618_v40, 5  ;;  %v3270_v24 = vrot.slane %v3268_v21, 5  ;;  %v3276_v29 = vrot.slane %v3274_v13, 5 }
  0x9f   : > { %2865 = vrot.lane.b32.xlu0 %v9660_v58, %s11070_s12  ;;  %v3280_v6 = vrot.slane %v3278_v14, 4  ;;  %v3284_v27 = vshll.u32 %v3113_v18, 16  ;;  %v2742_v39 = vrot.slane %v2619_v5, 5  ;;  %v1250_v30 = vrot.slane %v1249_v55, 4  ;;  %v1058_v53 = vld [vmem:[#allocation2 + $0x54] sm:$0xf]  ;;  %v10756_v14 = vpop.eup %10755 }
  0xa0   : > { %v11609_v9 = vsel %vm11325_vm7, %v9645_v2, %v2739_v22  ;;  %v2741_v36 = vrot.slane %v2739_v22, 4  ;;  %v3271_v41 = vor.u32 %v3270_v24, %v3267_v4  ;;  %v9461_v46 = vadd.f32 -1.0, %v10752_v52  ;;  %v10580_v3 = vld [vmem:[#allocation2 + $0x54] sm:$0xff]   ;;  %v1060_v5 = vld [vmem:[#allocation2 + $0x5c] sm:$0x1] }
  0xa1   : > { %v3281_v42 = vor.u32 %v3280_v6, %v3276_v29  ;;  %v3286_v43 = vrot.slane %v3284_v27, 5  ;;  %v1255_v45 = vsel %vm11382_vm10, %v1250_v30, %v1254_v59  ;;  %v1730_v56 = vrot.slane %v1728_v44, 4  ;;  %v10597_v13 = vld [vmem:[%s14633_s1 + $0x18] sm:$0xff]   ;;  %v10598_v44 = vld [vmem:[%s14633_s1 + $0x60] sm:$0xff]  }
  0xa2   : > { %v2743_v32 = vsel %vm11325_vm7, %v2741_v36, %v2742_v39  ;;  %v3272_v47 = vrot.slane %v3271_v41, 4  ;;  %v9565_v48 = vcombine.low %v1245_v23, %v1255_v45  ;;  %v574_v52 = vsel %vm304_vm5, %v11491_v60, %v9461_v46  ;;  %10192 = vmatpush3.bf16.msra.mxu0 %v10597_v13  ;;  %v1606_v36 = vld [vmem:[#allocation2 + $0x54] sm:$0xe] }
  0xa3   : > { %3042 = vrot.lane.b32.xlu0 %v10577_v37, %s11068_s10  ;;  %v3282_v20 = vrot.slane %v3281_v42, 4  ;;  %v9661_v25 = vcombine.low %v11609_v9, %v2743_v32  ;;  %v3114_v28 = vld [vmem:[#allocation2 + $0x60] sm:$0xf]  ;;  %v3115_v58 = vld [vmem:[#allocation2 + $0x64] sm:$0xf]  ;;  %v10124_v33 = vpack.c.bf16 %v574_v52, %v574_v52  ;;  %v1732_v0 = vsel %vm11325_vm7, %v1730_v56, %v1731_v19  ;;  %10193 = vmatprep.subr.bf16.mxu0 %v10598_v44 }
  0xa4   : > { %v3277_v59 = vsel %vm11382_vm10, %v3272_v47, %v3276_v29  ;;  %1532 = vrot.lane.b32.xlu1 %v9565_v48, %s11070_s12  ;;  %v3289_v61 = vshrl.u32 %v3114_v28, 16  ;;  %v2620_v62 = vld [vmem:[#allocation2 + $0x60] sm:$0xe]  ;;  %v2621_v63 = vld [vmem:[#allocation2 + $0x64] sm:$0xf]  ;;  %v3292_v60 = vshll.u32 %v3114_v28, 16  ;;  %v9597_v51 = vcombine.low %v1729_v54, %v1732_v0 }
  0xa5   : > { %v3287_v31 = vsel %vm11382_vm10, %v3282_v20, %v3286_v43  ;;  %v3298_v8 = vshll.u32 %v3115_v58, 16  ;;  %v1059_v37 = vld [vmem:[#allocation2 + $0x58] sm:$0xf]  ;;  %864 = vst.msk [vmem:[#allocation2 + $0x68] sm:$0x1] %vm839_vm12, %v10124_v33  ;;  %v3302_v55 = vshrl.u32 %v3115_v58, 16  ;;  %v10758_v20 = vpop.eup %10757 }
  0xa6   : > { %v9692_v7 = vcombine.low %v3277_v59, %v3287_v31  ;;  %v3291_v12 = vrot.slane %v3289_v61, 4  ;;  %v9646_v21 = vrot.slane %v2620_v62, 9  ;;  %v3294_v40 = vrot.slane %v3292_v60, 5  ;;  %v10579_v32 = vld [vmem:[#allocation2 + $0x60] sm:$0xff]   ;;  %v1607_v56 = vld [vmem:[#allocation2 + $0x58] sm:$0xf] }
  0xa7   : > { %v11637_v2 = vrot.slane %v3298_v8, 5  ;;  %v2746_v16 = vrot.slane %v2621_v63, 5  ;;  %v1257_v18 = vshrl.u32 %v1058_v53, 16  ;;  %v3304_v4 = vrot.slane %v3302_v55, 4  ;;  %v1608_v52 = vld [vmem:[#allocation2 + $0x5c] sm:$0x1] }
  0xa8   : > { %3586 = vrot.lane.b32.xlu0 %v9692_v7, %s11069_s11  ;;  %1856 = vrot.lane.b32.xlu1 %v9597_v51, %s11068_s10  ;;  %v1260_v22 = vshll.u32 %v1058_v53, 16  ;;  %v1266_v23 = vshll.u32 %v1059_v37, 16  ;;  %v1270_v24 = vshrl.u32 %v1059_v37, 16  ;;  %v3295_v29 = vor.u32 %v3294_v40, %v3291_v12  ;;  %v10599_v63 = vld [vmem:[%s14633_s1 + $0x20] sm:$0xff]  }
  0xa9   : > { %v11642_v6 = vsel %vm11325_vm7, %v9646_v21, %v2746_v16  ;;  %v2748_v27 = vrot.slane %v2746_v16, 4  ;;  %v1259_v9 = vrot.slane %v1257_v18, 4  ;;  %v3305_v39 = vor.u32 %v3304_v4, %v11637_v2  ;;  %v1061_v55 = vld [vmem:[#allocation2 + $0x60] sm:$0xf]  ;;  %10194 = vmatpush3.bf16.msra.mxu0 %v10599_v63  ;;  %v1062_v40 = vld [vmem:[#allocation2 + $0x64] sm:$0xf] }
  0xaa   : > { %v1262_v30 = vrot.slane %v1260_v22, 5  ;;  %v1268_v41 = vrot.slane %v1266_v23, 5  ;;  %v1272_v42 = vrot.slane %v1270_v24, 4  ;;  %v11646_v43 = vpop.permute.xlu0 %3034  ;;  %v3296_v45 = vrot.slane %v3295_v29, 4  ;;  %v10603_v16 = vld [vmem:[%s14633_s1 + $0x28] sm:$0xff]   ;;  %v10604_v18 = vld [vmem:[%s14633_s1 + $0x70] sm:$0xff]  }
  0xab   : > { %v1276_v19 = vshll.u32 %v1060_v5, 16  ;;  %v9462_v46 = vadd.f32 -1.0, %v10754_v34  ;;  %v9463_v47 = vadd.f32 -1.0, %v10756_v14  ;;  %v3306_v48 = vrot.slane %v3305_v39, 4  ;;  %v11695_v24 = vld [vmem:[#allocation2 + $0x60] sm:$0xe] }
  0xac   : > { %2867 = vrot.lane.b32.xlu0 %v9661_v25, %s11070_s12  ;;  %2034 = vrot.lane.b32.xlu1 %v10580_v3, %s11069_s11  ;;  %v1263_v53 = vor.u32 %v1262_v30, %v1259_v9  ;;  %v1273_v54 = vor.u32 %v1272_v42, %v1268_v41  ;;  %v9582_v28 = vrot.slane %v1606_v36, 9  ;;  %v11653_v58 = vpop.permute.xlu1 %3032  ;;  %v3116_v59 = vld [vmem:[#allocation2 + $0x68] sm:$0x1]  ;;  %v3301_v25 = vsel %vm11382_vm10, %v3296_v45, %v11637_v2  ;;  %v10607_v30 = vld [vmem:[%s14633_s1 + $0x80] sm:$0xff]  }
  0xad   : > { %v2622_v31 = vld [vmem:[#allocation2 + $0x68] sm:$0x1]  ;;  %v1278_v33 = vrot.slane %v1276_v19, 5  ;;  %v575_v61 = vsel %vm305_vm6, %v11505_v11, %v9462_v46  ;;  %v576_v62 = vsel %vm306_vm8, %v11512_v38, %v9463_v47  ;;  %v3308_v34 = vshll.u32 %v3116_v59, 16  ;;  %v11707_v45 = vld [vmem:[#allocation2 + $0x64] sm:$0xf]  ;;  %10445 = vmatprep.subr.bf16.mxu1 %v10607_v30 }
  0xae   : > { %v2749_v7 = vrot.slane %v2622_v31, 5  ;;  %v1264_v0 = vrot.slane %v1263_v53, 4  ;;  %v1274_v60 = vrot.slane %v1273_v54, 4  ;;  %v11667_v8 = vpop.permute.xlu0 %3036  ;;  %v10125_v37 = vpack.c.bf16 %v575_v61, %v575_v61  ;;  %v10602_v38 = vld [vmem:[%s14633_s1 + $0x68] sm:$0xff]   ;;  %v10606_v19 = vld [vmem:[%s14633_s1 + $0x30] sm:$0xff]   ;;  %10446 = vmatpush3.bf16.msra.mxu1 %v10607_v30 }
  0xaf   : > { %v10126_v51 = vpack.c.bf16 %v576_v62, %v576_v62  ;;  %v1735_v12 = vrot.slane %v1607_v56, 5  ;;  %v1738_v11 = vrot.slane %v1608_v52, 5  ;;  %v3310_v3 = vrot.slane %v3308_v34, 5  ;;  %10195 = vmatprep.subr.bf16.mxu0 %v10602_v38  ;;  %v1063_v9 = vld [vmem:[#allocation2 + $0x68] sm:$0x1]  ;;  %v10609_v56 = vld [vmem:[%s14633_s1 + $0x78] sm:$0xff]  }
  0xb0   : > { %3044 = vrot.lane.b32.xlu0 %v10579_v32, %s11068_s10  ;;  %v11675_v21 = vsel %vm11325_vm7, %v2748_v27, %v2749_v7  ;;  %v1269_v13 = vsel %vm11382_vm10, %v1264_v0, %v1268_v41  ;;  %v1279_v14 = vsel %vm11382_vm10, %v1274_v60, %v1278_v33  ;;  %v11681_v2 = vpop.permute.xlu1 %2022  ;;  %865 = vst.msk [vmem:[#allocation2 + $0x6c] sm:$0xf] %vm836_vm3, %v10125_v37  ;;  %v9464_v27 = vadd.f32 -1.0, %v10758_v20  ;;  %v11715_v53 = vld [vmem:[#allocation2 + $0x68] sm:$0x1]  ;;  %v10582_v62 = vld [vmem:[#allocation2 + $0x60] sm:$0xff]  }
  0xb1   : > { %v9662_v4 = vcombine.low %v11642_v6, %v11675_v21  ;;  %v9566_v5 = vcombine.low %v1269_v13, %v1279_v14  ;;  %866 = vst.msk [vmem:[#allocation2 + $0x70] sm:$0xf] %vm836_vm3, %v10126_v51  ;;  %v1736_v22 = vsel %vm11325_vm7, %v9582_v28, %v1735_v12  ;;  %v1737_v23 = vrot.slane %v1735_v12, 4  ;;  %10196 = vmatpush3.bf16.msra.mxu0 %v10603_v16 }
  0xb2   : > { %v3311_v29 = vsel %vm11382_vm10, %v3306_v48, %v3310_v3  ;;  %v1281_v36 = vshrl.u32 %v1061_v55, 16  ;;  %v1284_v39 = vshll.u32 %v1061_v55, 16  ;;  %v11699_v6 = vpop.permute.xlu0 %3038  ;;  %v1290_v44 = vshll.u32 %v1062_v40, 16  ;;  %10197 = vmatprep.subr.bf16.mxu0 %v10604_v18 }
  0xb3   : > { %v9693_v41 = vcombine.low %v3301_v25, %v3311_v29  ;;  %1534 = vrot.lane.b32.xlu1 %v9566_v5, %s11070_s12  ;;  %v1739_v42 = vsel %vm11325_vm7, %v1737_v23, %v1738_v11  ;;  %v1294_v32 = vshrl.u32 %v1062_v40, 16  ;;  %v577_v47 = vsel %vm307_vm9, %v11515_v1, %v9464_v27 }
  0xb4   : > { %v9598_v46 = vcombine.low %v1736_v22, %v1739_v42  ;;  %v1283_v20 = vrot.slane %v1281_v36, 4  ;;  %v1286_v48 = vrot.slane %v1284_v39, 5  ;;  %v11717_v54 = vpop.permute.xlu1 %2024  ;;  %v10127_v52 = vpack.c.bf16 %v577_v47, %v577_v47 }
  0xb5   : > { %3588 = vrot.lane.b32.xlu0 %v9693_v41, %s11069_s11  ;;  %v1292_v28 = vrot.slane %v1290_v44, 5  ;;  %v1296_v59 = vrot.slane %v1294_v32, 4  ;;  %v1300_v25 = vshll.u32 %v1063_v9, 16  ;;  %v446_v31 = vmul.f32 1.442695, %v362_v35  ;;  %10198 = vmatpush3.bf16.msra.mxu0 %v10606_v19 }
  0xb6   : > { %v1287_v1 = vor.u32 %v1286_v48, %v1283_v20  ;;  %v448_v33 = vmul.f32 1.442695, %v363_v10  ;;  %v9583_v61 = vrot.slane %v11695_v24, 9  ;;  %867 = vst.msk [vmem:[#allocation2 + $0x74] sm:$0x1] %vm839_vm12, %v10127_v52  ;;  %v1742_v7 = vrot.slane %v11707_v45, 5  ;;  %10199 = vmatprep.subr.bf16.mxu0 %v10609_v56 }
  0xb7   : > { %1858 = vrot.lane.b32.xlu1 %v9598_v46, %s11068_s10  ;;  %v1297_v63 = vor.u32 %v1296_v59, %v1292_v28  ;;  %v1302_v34 = vrot.slane %v1300_v25, 5  ;;  %v1745_v0 = vrot.slane %v11715_v53, 5  ;;  %10759 = vpow2.f32 %v446_v31  ;;  %v3117_v51 = vld [vmem:[#allocation2 + $0x6c] sm:$0xf]  ;;  %v10610_v56 = vld [vmem:[%s14633_s1 + $0x38] sm:$0xff]  }
  0xb8   : > { %v11732_v60 = vpop.permute.xlu0 %2855  ;;  %v10581_v35 = vld [vmem:[#allocation2 + $0x6c] sm:$0xff]   ;;  %v1288_v37 = vrot.slane %v1287_v1, 4  ;;  %v11734_v10 = vpop.permute.xlu1 %2026  ;;  %10761 = vpow2.f32 %v448_v33  ;;  %v3313_v55 = vshrl.u32 %v3117_v51, 16  ;;  %v3316_v38 = vshll.u32 %v3117_v51, 16 }
  0xb9   : > { %2869 = vrot.lane.b32.xlu0 %v9662_v4, %s11070_s12  ;;  %v3118_v12 = vld [vmem:[#allocation2 + $0x70] sm:$0xf]  ;;  %v2623_v11 = vld [vmem:[#allocation2 + $0x6c] sm:$0xe]  ;;  %vm308_vm11 = vcmp.gt.f32.partialorder %v11530_v17, 0.0  ;;  %v1298_v16 = vrot.slane %v1297_v63, 4  ;;  %v1743_v18 = vsel %vm11325_vm7, %v9583_v61, %v1742_v7  ;;  %10200 = vmatpush3.bf16.msra.mxu0 %v10610_v56 }
  0xba   : > { %v3322_v3 = vshll.u32 %v3118_v12, 16  ;;  %v3326_v21 = vshrl.u32 %v3118_v12, 16  ;;  %v2624_v13 = vld [vmem:[#allocation2 + $0x70] sm:$0xf]  ;;  %v1293_v40 = vsel %vm11382_vm10, %v1288_v37, %v1292_v28  ;;  %vm309_vm13 = vcmp.gt.f32.partialorder %v11533_v26, 0.0  ;;  %v10611_v63 = vld [vmem:[%s14633_s1 + $0x88] sm:$0xff]  }
  0xbb   : > { %2036 = vrot.lane.b32.xlu1 %v10582_v62, %s11069_s11  ;;  %v2753_v14 = vrot.slane %v2624_v13, 5  ;;  %v3315_v5 = vrot.slane %v3313_v55, 4  ;;  %v3318_v22 = vrot.slane %v3316_v38, 5  ;;  %v9647_v27 = vrot.slane %v2623_v11, 9  ;;  %v1064_v30 = vld [vmem:[#allocation2 + $0x6c] sm:$0xf]  ;;  %10447 = vmatprep.subr.bf16.mxu1 %v10611_v63 }
  0xbc   : > { %v11744_v4 = vpop.permute.xlu0 %2857  ;;  %v3324_v23 = vrot.slane %v3322_v3, 5  ;;  %v3328_v24 = vrot.slane %v3326_v21, 4  ;;  %v11746_v29 = vpop.permute.xlu1 %2028  ;;  %v1303_v36 = vsel %vm11382_vm10, %v1298_v16, %v1302_v34  ;;  %v1744_v39 = vrot.slane %v1742_v7, 4  ;;  %v1065_v48 = vld [vmem:[#allocation2 + $0x70] sm:$0xf]  ;;  %v11774_v51 = vld [vmem:[%s11158_s9 + $0x108] sm:$0xff]  ;;  %10448 = vmatpush3.bf16.msra.mxu1 %v10611_v63 }
  0xbd   : > { %3046 = vrot.lane.b32.xlu0 %v10581_v35, %s11068_s10  ;;  %v2755_v9 = vrot.slane %v2753_v14, 4  ;;  %v3119_v41 = vld [vmem:[#allocation2 + $0x74] sm:$0x1]  ;;  %v3319_v42 = vor.u32 %v3318_v22, %v3315_v5  ;;  %v9567_v45 = vcombine.low %v1293_v40, %v1303_v36  ;;  %v450_v19 = vmul.f32 1.442695, %v364_v50 }
  0xbe   : > { %v3329_v44 = vor.u32 %v3328_v24, %v3324_v23  ;;  %v2625_v32 = vld [vmem:[#allocation2 + $0x74] sm:$0x1]  ;;  %v3332_v46 = vshll.u32 %v3119_v41, 16  ;;  %v1746_v20 = vsel %vm11325_vm7, %v1744_v39, %v1745_v0  ;;  %v1305_v53 = vshrl.u32 %v1064_v30, 16  ;;  %v1612_v13 = vld [vmem:[#allocation2 + $0x6c] sm:$0xe] }
  0xbf   : > { %v2756_v47 = vrot.slane %v2625_v32, 5  ;;  %v3320_v52 = vrot.slane %v3319_v42, 4  ;;  %1536 = vrot.lane.b32.xlu1 %v9567_v45, %s11070_s12  ;;  %v9599_v59 = vcombine.low %v1743_v18, %v1746_v20  ;;  %10763 = vpow2.f32 %v450_v19  ;;  %v1066_v25 = vld [vmem:[#allocation2 + $0x74] sm:$0x1]  ;;  %v10584_v18 = vld [vmem:[#allocation2 + $0x6c] sm:$0xff]  }
  0xc0   : > { %v3330_v28 = vrot.slane %v3329_v44, 4  ;;  %v11759_v50 = vpop.permute.xlu1 %1844  ;;  %v3334_v1 = vrot.slane %v3332_v46, 5  ;;  %v2754_v31 = vsel %vm11325_vm7, %v9647_v27, %v2753_v14  ;;  %v1307_v33 = vrot.slane %v1305_v53, 4  ;;  %v11763_v62 = vpop.permute.xlu0 %2859  ;;  %v11779_v21 = vld [vmem:[%s11158_s9 + $0x110] sm:$0xff]  ;;  %v11794_v46 = vld [vmem:[%s11158_s9 + $0x118] sm:$0x3] }
  0xc1   : > { %v1308_v61 = vshll.u32 %v1064_v30, 16  ;;  %v10760_v34 = vpop.eup %10759  ;;  %v3325_v7 = vsel %vm11382_vm10, %v3320_v52, %v3324_v23  ;;  %v2757_v0 = vsel %vm11325_vm7, %v2755_v9, %v2756_v47  ;;  %vm310_vm14 = vcmp.gt.f32.partialorder %v11550_v49, 0.0  ;;  %v1613_v14 = vld [vmem:[#allocation2 + $0x70] sm:$0xf]  ;;  %v1614_v36 = vld [vmem:[#allocation2 + $0x74] sm:$0x1] }
  0xc2   : > { %v1314_v35 = vshll.u32 %v1065_v48, 16  ;;  %v1318_v37 = vshrl.u32 %v1065_v48, 16  ;;  %v10762_v12 = vpop.eup %10761  ;;  %v3335_v11 = vsel %vm11382_vm10, %v3330_v28, %v3334_v1  ;;  %v9465_v55 = vadd.f32 -1.0, %v10760_v34  ;;  %v11801_v53 = vld [vmem:[%s11158_s9 + $0x120] sm:$0xff]  ;;  %v10608_v1 = vld [vmem:[#allocation2 + $0xc] sm:$0xff]  }
  0xc3   : > { %v1310_v38 = vrot.slane %v1308_v61, 5  ;;  %v1324_v3 = vshll.u32 %v1066_v25, 16  ;;  %v9694_v40 = vcombine.low %v3325_v7, %v3335_v11  ;;  %v9466_v16 = vadd.f32 -1.0, %v10762_v12  ;;  %1860 = vrot.lane.b32.xlu1 %v9599_v59, %s11068_s10  ;;  %v10601_v25 = vld [vmem:[#allocation2] sm:$0xff]   ;;  %v10613_v7 = vld [vmem:[#allocation2 + $0x18] sm:$0xff]   ;;  %v10616_v12 = vld [vmem:[#allocation2 + $0x30] sm:$0xff]  }
  0xc4   : > { %v1316_v5 = vrot.slane %v1314_v35, 5  ;;  %v1320_v22 = vrot.slane %v1318_v37, 4  ;;  %v11782_v23 = vpop.permute.xlu1 %1846  ;;  %v9663_v24 = vcombine.low %v2754_v31, %v2757_v0  ;;  %v578_v27 = vsel %vm308_vm11, %v11530_v17, %v9465_v55  ;;  %v11796_v17 = vpop.permute.xlu0 %2861  ;;  %v10614_v0 = vld [vmem:[#allocation2 + $0x24] sm:$0xff]  }
  0xc5   : > { %v1311_v9 = vor.u32 %v1310_v38, %v1307_v33  ;;  %3590 = vrot.lane.b32.xlu0 %v9694_v40, %s11069_s11  ;;  %v579_v39 = vsel %vm309_vm13, %v11533_v26, %v9466_v16  ;;  %v10128_v30 = vpack.c.bf16 %v578_v27, %v578_v27  ;;  %v1326_v42 = vrot.slane %v1324_v3, 5 }
  0xc6   : > { %v1321_v41 = vor.u32 %v1320_v22, %v1316_v5  ;;  %v10129_v44 = vpack.c.bf16 %v579_v39, %v579_v39  ;;  %v365_v45 = vmin.f32 %v11774_v51, 0.0  ;;  %v366_v19 = vmin.f32 %v11779_v21, 0.0  ;;  %v11826_v22 = vld [vmem:[%s11158_s9 + $0x128] sm:$0xff] }
  0xc7   : > { %v1312_v32 = vrot.slane %v1311_v9, 4  ;;  %868 = vst.msk [vmem:[#allocation2 + $0x78] sm:$0xf] %vm836_vm3, %v10128_v30  ;;  %2038 = vrot.lane.b32.xlu1 %v10584_v18, %s11069_s11  ;;  %v9584_v26 = vrot.slane %v1612_v13, 9  ;;  %v1749_v20 = vrot.slane %v1613_v14, 5  ;;  %v1752_v48 = vrot.slane %v1614_v36, 5 }
  0xc8   : > { %v1322_v47 = vrot.slane %v1321_v41, 4  ;;  %v11803_v56 = vpop.permute.xlu1 %1848  ;;  %869 = vst.msk [vmem:[#allocation2 + $0x7c] sm:$0xf] %vm836_vm3, %v10129_v44  ;;  %v452_v28 = vmul.f32 1.442695, %v365_v45  ;;  %v367_v34 = vmin.f32 %v11794_v46, 0.0 }
  0xc9   : > { %v1317_v52 = vsel %vm11382_vm10, %v1312_v32, %v1316_v5  ;;  %v454_v59 = vmul.f32 1.442695, %v366_v19  ;;  %v10764_v31 = vpop.eup %10763  ;;  %2871 = vrot.lane.b32.xlu0 %v9663_v24, %s11070_s12  ;;  %v1750_v61 = vsel %vm11325_vm7, %v9584_v26, %v1749_v20  ;;  %v1751_v63 = vrot.slane %v1749_v20, 4  ;;  %v1521_v14 = vpop.permute.xlu0 %1520 }
  0xca   : > { %v1327_v33 = vsel %vm11382_vm10, %v1322_v47, %v1326_v42  ;;  %v9467_v35 = vadd.f32 -1.0, %v10764_v31  ;;  %10765 = vpow2.f32 %v452_v28  ;;  %v456_v55 = vmul.f32 1.442695, %v367_v34 }
  0xcb   : > { %v9568_v37 = vcombine.low %v1317_v52, %v1327_v33  ;;  %10767 = vpow2.f32 %v454_v59  ;;  %v1753_v11 = vsel %vm11325_vm7, %v1751_v63, %v1752_v48  ;;  %vm311_vm15 = vcmp.gt.f32.partialorder %v11774_v51, 0.0 }
  0xcc   : > { %v580_v38 = vsel %vm310_vm14, %v11550_v49, %v9467_v35  ;;  %v9600_v3 = vcombine.low %v1750_v61, %v1753_v11  ;;  %v368_v13 = vmin.f32 %v11801_v53, 0.0  ;;  %v11822_v40 = vpop.permute.xlu1 %1850  ;;  %10769 = vpow2.f32 %v456_v55 }
  0xcd   : > { %1538 = vrot.lane.b32.xlu1 %v9568_v37, %s11070_s12  ;;  %v10130_v16 = vpack.c.bf16 %v580_v38, %v580_v38  ;;  %vm1020_vm0 = vcmask 261120   ;;  %vm1568_vm1 = vcmask 523520   ;;  %vm312_vm2 = vcmp.gt.f32.partialorder %v11779_v21, 0.0 }
  0xce   : > { %v3120_v18 = vld [vmem:[#allocation2 + $0x78] sm:$0xf]  ;;  %1021 = vst.msk [vmem:[#allocation3] sm:$0xff] %vm1020_vm0, %v10601_v25  ;;  %1022 = vst.msk [vmem:[#allocation3 + $0x18] sm:$0xff] %vm1020_vm0, %v10608_v1  ;;  %vm313_vm4 = vcmp.gt.f32.partialorder %v11794_v46, 0.0  ;;  %v369_v25 = vmin.f32 %v11826_v22, 0.0 }
  0xcf   : > { %v2626_v5 = vld [vmem:[#allocation2 + $0x78] sm:$0xe]  ;;  %1023 = vst.msk [vmem:[#allocation3 + $0x30] sm:$0xff] %vm1020_vm0, %v10613_v7  ;;  %1024 = vst.msk [vmem:[#allocation3 + $0x48] sm:$0xff] %vm1020_vm0, %v10614_v0  ;;  %v3121_v24 = vld [vmem:[#allocation2 + $0x7c] sm:$0xf] }
  0xd0   : > { %1025 = vst.msk [vmem:[#allocation3 + $0x60] sm:$0xff] %vm1020_vm0, %v10616_v12  ;;  %v10583_v49 = vld [vmem:[#allocation2 + $0x78] sm:$0xff]   ;;  %v3337_v27 = vshrl.u32 %v3120_v18, 16  ;;  %v3340_v9 = vshll.u32 %v3120_v18, 16  ;;  %v3346_v36 = vshll.u32 %v3121_v24, 16  ;;  %v3350_v39 = vshrl.u32 %v3121_v24, 16 }
  0xd1   : > { %870 = vst.msk [vmem:[#allocation2 + $0x80] sm:$0x1] %vm839_vm12, %v10130_v16  ;;  %v2627_v30 = vld [vmem:[#allocation2 + $0x7c] sm:$0xf]  ;;  %v9648_v41 = vrot.slane %v2626_v5, 9  ;;  %1862 = vrot.lane.b32.xlu1 %v9600_v3, %s11068_s10  ;;  %3048 = vrot.lane.b32.xlu0 %v10583_v49, %s11068_s10  ;;  %vm314_vm5 = vcmp.gt.f32.partialorder %v11801_v53, 0.0 }
  0xd2   : > { %1569 = vst.msk [vmem:[#allocation3] sm:$0xff] %vm1568_vm1, %v1521_v14  ;;  %v3339_v42 = vrot.slane %v3337_v27, 4  ;;  %v2760_v44 = vrot.slane %v2627_v30, 5  ;;  %v3342_v32 = vrot.slane %v3340_v9, 5  ;;  %v3348_v45 = vrot.slane %v3346_v36, 5  ;;  %v10586_v47 = vld [vmem:[#allocation2 + $0x78] sm:$0xff]  }
  0xd3   : > { %v3352_v19 = vrot.slane %v3350_v39, 4  ;;  %v1067_v26 = vld [vmem:[#allocation2 + $0x78] sm:$0xf]  ;;  %v1523_v20 = vpop.permute.xlu1 %1522  ;;  %v1068_v52 = vld [vmem:[#allocation2 + $0x7c] sm:$0xf]  ;;  %vm315_vm6 = vcmp.gt.f32.partialorder %v11826_v22, 0.0 }
  0xd4   : > { %v2762_v48 = vrot.slane %v2760_v44, 4  ;;  %v1329_v28 = vshrl.u32 %v1067_v26, 16  ;;  %v1332_v59 = vshll.u32 %v1067_v26, 16  ;;  %1570 = vst.msk [vmem:[#allocation3 + $0x18] sm:$0xff] %vm1568_vm1, %v1523_v20  ;;  %v10766_v1 = vpop.eup %10765  ;;  %v3343_v31 = vor.u32 %v3342_v32, %v3339_v42 }
  0xd5   : > { %v3353_v33 = vor.u32 %v3352_v19, %v3348_v45  ;;  %2040 = vrot.lane.b32.xlu1 %v10586_v47, %s11069_s11  ;;  %v1338_v61 = vshll.u32 %v1068_v52, 16  ;;  %v1342_v63 = vshrl.u32 %v1068_v52, 16  ;;  %v10768_v34 = vpop.eup %10767  ;;  %v9468_v7 = vadd.f32 -1.0, %v10766_v1  ;;  %v1615_v19 = vld [vmem:[#allocation2 + $0x78] sm:$0xe] }
  0xd6   : > { %v1331_v0 = vrot.slane %v1329_v28, 4  ;;  %v1334_v35 = vrot.slane %v1332_v59, 5  ;;  %v458_v37 = vmul.f32 1.442695, %v368_v13  ;;  %v3344_v11 = vrot.slane %v3343_v31, 4  ;;  %v10770_v14 = vpop.eup %10769 }
  0xd7   : > { %v3354_v55 = vrot.slane %v3353_v33, 4  ;;  %v2761_v3 = vsel %vm11325_vm7, %v9648_v41, %v2760_v44  ;;  %v9469_v5 = vadd.f32 -1.0, %v10768_v34  ;;  %v581_v49 = vsel %vm311_vm15, %v11774_v51, %v9468_v7  ;;  %v2088_v44 = vld [vmem:[#allocation2 + $0x10] sm:$0xf]  ;;  %v1616_v47 = vld [vmem:[#allocation2 + $0x7c] sm:$0xf] }
  0xd8   : > { %v3122_v12 = vld [vmem:[#allocation2 + $0x80] sm:$0x1]  ;;  %v3349_v24 = vsel %vm11382_vm10, %v3344_v11, %v3348_v45  ;;  %v10131_v27 = vpack.c.bf16 %v581_v49, %v581_v49  ;;  %v9470_v13 = vadd.f32 -1.0, %v10770_v14  ;;  %v1335_v36 = vor.u32 %v1334_v35, %v1331_v0  ;;  %v2089_v59 = vld [vmem:[#allocation2 + $0x14] sm:$0x1] }
  0xd9   : > { %v2628_v38 = vld [vmem:[#allocation2 + $0x80] sm:$0x1]  ;;  %v3356_v16 = vshll.u32 %v3122_v12, 16  ;;  %v582_v41 = vsel %vm312_vm2, %v11779_v21, %v9469_v5  ;;  %v1340_v42 = vrot.slane %v1338_v61, 5  ;;  %v1344_v52 = vrot.slane %v1342_v63, 4 }
  0xda   : > { %v2763_v18 = vrot.slane %v2628_v38, 5  ;;  %v1069_v9 = vld [vmem:[#allocation2 + $0x80] sm:$0x1]  ;;  %v10132_v32 = vpack.c.bf16 %v582_v41, %v582_v41  ;;  %871 = vst.msk [vmem:[#allocation2 + $0x84] sm:$0xf] %vm836_vm3, %v10131_v27  ;;  %v583_v51 = vsel %vm313_vm4, %v11794_v46, %v9470_v13  ;;  %v1336_v45 = vrot.slane %v1335_v36, 4 }
  0xdb   : > { %v3358_v39 = vrot.slane %v3356_v16, 5  ;;  %v1348_v28 = vshll.u32 %v1069_v9, 16  ;;  %v1617_v21 = vld [vmem:[#allocation2 + $0x80] sm:$0x1]  ;;  %v11859_v1 = vld [vmem:[#allocation2 + $0xc] sm:$0xf]  ;;  %10771 = vpow2.f32 %v458_v37  ;;  %v1345_v61 = vor.u32 %v1344_v52, %v1340_v42 }
  0xdc   : > { %v2764_v30 = vsel %vm11325_vm7, %v2762_v48, %v2763_v18  ;;  %v1525_v26 = vpop.permute.xlu1 %1524  ;;  %v10133_v48 = vpack.c.bf16 %v583_v51, %v583_v51  ;;  %872 = vst.msk [vmem:[#allocation2 + $0x88] sm:$0xf] %vm836_vm3, %v10132_v32  ;;  %v460_v46 = vmul.f32 1.442695, %v369_v25  ;;  %v9585_v7 = vrot.slane %v1615_v19, 9 }
  0xdd   : > { %v3359_v20 = vsel %vm11382_vm10, %v3354_v55, %v3358_v39  ;;  %1571 = vst.msk [vmem:[#allocation3 + $0x30] sm:$0xff] %vm1568_vm1, %v1525_v26  ;;  %v9664_v33 = vcombine.low %v2761_v3, %v2764_v30  ;;  %v1350_v34 = vrot.slane %v1348_v28, 5  ;;  %v1756_v0 = vrot.slane %v1616_v47, 5  ;;  %v10619_v30 = vld [vmem:[#allocation2 + $0x3c] sm:$0xff]  }
  0xde   : > { %v9695_v31 = vcombine.low %v3349_v24, %v3359_v20  ;;  %873 = vst.msk [vmem:[#allocation2 + $0x8c] sm:$0x1] %vm839_vm12, %v10133_v48  ;;  %10773 = vpow2.f32 %v460_v46  ;;  %v1759_v63 = vrot.slane %v1617_v21, 5  ;;  %v2145_v35 = vshll.u32 %v2088_v44, 16 }
  0xdf   : > { %v2149_v12 = vshrl.u32 %v2088_v44, 16  ;;  %v1341_v11 = vsel %vm11382_vm10, %v1336_v45, %v1340_v42  ;;  %v1346_v55 = vrot.slane %v1345_v61, 4  ;;  %v1757_v25 = vsel %vm11325_vm7, %v9585_v7, %v1756_v0  ;;  %1026 = vst.msk [vmem:[#allocation3 + $0x78] sm:$0xff] %vm1020_vm0, %v10619_v30 }
  0xe0   : > { %3592 = vrot.lane.b32.xlu0 %v9695_v31, %s11069_s11  ;;  %v1758_v37 = vrot.slane %v1756_v0, 4  ;;  %v11871_v38 = vrot.slane %v2145_v35, 5  ;;  %v2155_v14 = vshll.u32 %v2089_v59, 16  ;;  %v2136_v16 = vshrl.u32 %v11859_v1, 16 }
  0xe1   : > { %v2151_v3 = vrot.slane %v2149_v12, 4  ;;  %v3123_v18 = vld [vmem:[#allocation2 + $0x84] sm:$0xf]  ;;  %v1351_v49 = vsel %vm11382_vm10, %v1346_v55, %v1350_v34  ;;  %v2139_v36 = vshll.u32 %v11859_v1, 16  ;;  %vm1892_vm9 = vcmask 785920  }
  0xe2   : > { %v2629_v5 = vld [vmem:[#allocation2 + $0x84] sm:$0xe]  ;;  %v1760_v24 = vsel %vm11325_vm7, %v1758_v37, %v1759_v63  ;;  %v3361_v27 = vshrl.u32 %v3123_v18, 16  ;;  %v3364_v13 = vshll.u32 %v3123_v18, 16  ;;  %v9569_v9 = vcombine.low %v1341_v11, %v1351_v49  ;;  %v2090_v49 = vld [vmem:[#allocation2 + $0x18] sm:$0xf] }
  0xe3   : > { %v10585_v41 = vld [vmem:[#allocation2 + $0x84] sm:$0xff]   ;;  %v9649_v44 = vrot.slane %v2629_v5, 9  ;;  %v9601_v32 = vcombine.low %v1757_v25, %v1760_v24  ;;  %v2152_v51 = vor.u32 %v2151_v3, %v11871_v38  ;;  %v2157_v21 = vrot.slane %v2155_v14, 5  ;;  %v11889_v25 = vld [vmem:[%s11158_s9 + $0x130] sm:$0x3]  ;;  %1893 = vst.msk [vmem:[#allocation3] sm:$0xff] %vm1892_vm9, %v11759_v50 }
  0xe4   : > { %2873 = vrot.lane.b32.xlu0 %v9664_v33, %s11070_s12  ;;  %v1527_v39 = vpop.permute.xlu1 %1526  ;;  %v3124_v42 = vld [vmem:[#allocation2 + $0x88] sm:$0xf]  ;;  %v3363_v19 = vrot.slane %v3361_v27, 4  ;;  %v3366_v47 = vrot.slane %v3364_v13, 5  ;;  %1540 = vrot.lane.b32.xlu1 %v9569_v9, %s11070_s12  ;;  %v2138_v18 = vrot.slane %v2136_v16, 4  ;;  %v2141_v5 = vrot.slane %v2139_v36, 5 }
  0xe5   : > { %1572 = vst.msk [vmem:[#allocation3 + $0x48] sm:$0xff] %vm1568_vm1, %v1527_v39  ;;  %v3125_v45 = vld [vmem:[#allocation2 + $0x8c] sm:$0x1]  ;;  %v3370_v26 = vshll.u32 %v3124_v42, 16  ;;  %v3374_v20 = vshrl.u32 %v3124_v42, 16  ;;  %v10772_v59 = vpop.eup %10771  ;;  %v2153_v0 = vrot.slane %v2152_v51, 4 }
  0xe6   : > { %v3380_v48 = vshll.u32 %v3125_v45, 16  ;;  %v2630_v52 = vld [vmem:[#allocation2 + $0x88] sm:$0xf]  ;;  %v2631_v28 = vld [vmem:[#allocation2 + $0x8c] sm:$0x1]  ;;  %v3367_v1 = vor.u32 %v3366_v47, %v3363_v19  ;;  %v9471_v7 = vadd.f32 -1.0, %v10772_v59  ;;  %v2142_v16 = vor.u32 %v2141_v5, %v2138_v18 }
  0xe7   : > { %v3372_v31 = vrot.slane %v3370_v26, 5  ;;  %v3376_v33 = vrot.slane %v3374_v20, 4  ;;  %v2767_v46 = vrot.slane %v2630_v52, 5  ;;  %v2770_v34 = vrot.slane %v2631_v28, 5  ;;  %v10592_v37 = vld [vmem:[#allocation2 + $0x84] sm:$0xff]   ;;  %1894 = vst.msk [vmem:[#allocation3 + $0x18] sm:$0xff] %vm1892_vm9, %v11782_v23 }
  0xe8   : > { %3050 = vrot.lane.b32.xlu0 %v10585_v41, %s11068_s10  ;;  %v3382_v61 = vrot.slane %v3380_v48, 5  ;;  %v10774_v63 = vpop.eup %10773  ;;  %v3368_v35 = vrot.slane %v3367_v1, 4  ;;  %1864 = vrot.lane.b32.xlu1 %v9601_v32, %s11068_s10  ;;  %v584_v14 = vsel %vm314_vm5, %v11801_v53, %v9471_v7  ;;  %v2091_v39 = vld [vmem:[#allocation2 + $0x1c] sm:$0xf]  ;;  %v2158_v53 = vsel %vm11382_vm10, %v2153_v0, %v2157_v21  ;;  %v2092_v36 = vld [vmem:[#allocation2 + $0x20] sm:$0x1] }
  0xe9   : > { %v3377_v12 = vor.u32 %v3376_v33, %v3372_v31  ;;  %v2768_v11 = vsel %vm11325_vm7, %v9649_v44, %v2767_v46  ;;  %v2769_v55 = vrot.slane %v2767_v46, 4  ;;  %v9472_v3 = vadd.f32 -1.0, %v10774_v63  ;;  %v1070_v45 = vld [vmem:[#allocation2 + $0x84] sm:$0xf]  ;;  %v1071_v19 = vld [vmem:[#allocation2 + $0x88] sm:$0xf] }
  0xea   : > { %v3373_v24 = vsel %vm11382_vm10, %v3368_v35, %v3372_v31  ;;  %v10134_v9 = vpack.c.bf16 %v584_v14, %v584_v14  ;;  %v370_v32 = vmin.f32 %v11889_v25, 0.0  ;;  %v2160_v51 = vshrl.u32 %v2090_v49, 16  ;;  %v11908_v48 = vld [vmem:[#allocation2 + $0x8c] sm:$0x1]  ;;  %1895 = vst.msk [vmem:[#allocation3 + $0x30] sm:$0xff] %vm1892_vm9, %v11803_v56  ;;  %1896 = vst.msk [vmem:[#allocation3 + $0x48] sm:$0xff] %vm1892_vm9, %v11822_v40 }
  0xeb   : > { %v3378_v27 = vrot.slane %v3377_v12, 4  ;;  %v2771_v13 = vsel %vm11325_vm7, %v2769_v55, %v2770_v34  ;;  %v585_v41 = vsel %vm315_vm6, %v11826_v22, %v9472_v3  ;;  %v2143_v22 = vrot.slane %v2142_v16, 4  ;;  %v11916_v34 = vld [vmem:[#allocation2 + $0x24] sm:$0xf]  ;;  %v10624_v56 = vld [vmem:[#allocation2 + $0x54] sm:$0xff]  }
  0xec   : > { %v9665_v30 = vcombine.low %v2768_v11, %v2771_v13  ;;  %v10135_v44 = vpack.c.bf16 %v585_v41, %v585_v41  ;;  %874 = vst.msk [vmem:[#allocation2 + $0x90] sm:$0xf] %vm836_vm3, %v10134_v9  ;;  %2042 = vrot.lane.b32.xlu1 %v10592_v37, %s11069_s11  ;;  %v2163_v26 = vshll.u32 %v2090_v49, 16  ;;  %v2169_v20 = vshll.u32 %v2091_v39, 16 }
  0xed   : > { %v3383_v42 = vsel %vm11382_vm10, %v3378_v27, %v3382_v61  ;;  %v462_v28 = vmul.f32 1.442695, %v370_v32  ;;  %v2162_v21 = vrot.slane %v2160_v51, 4  ;;  %v2173_v59 = vshrl.u32 %v2091_v39, 16  ;;  %1028 = vst.msk [vmem:[#allocation3 + $0xa8] sm:$0xff] %vm1020_vm0, %v10624_v56 }
  0xee   : > { %v9696_v47 = vcombine.low %v3373_v24, %v3383_v42  ;;  %875 = vst.msk [vmem:[#allocation2 + $0x94] sm:$0xf] %vm836_vm3, %v10135_v44  ;;  %v2179_v1 = vshll.u32 %v2092_v36, 16  ;;  %v2148_v31 = vsel %vm11382_vm10, %v2143_v22, %v11871_v38  ;;  %v2165_v33 = vrot.slane %v2163_v26, 5 }
  0xef   : > { %v1529_v52 = vpop.permute.xlu1 %1528  ;;  %v2171_v46 = vrot.slane %v2169_v20, 5  ;;  %v1353_v61 = vshrl.u32 %v1070_v45, 16  ;;  %v9623_v7 = vcombine.low %v2148_v31, %v2158_v53  ;;  %10775 = vpow2.f32 %v462_v28  ;;  %v11936_v31 = vpop.permute.xlu0 %3576 }
  0xf0   : > { %1573 = vst.msk [vmem:[#allocation3 + $0x60] sm:$0xff] %vm1568_vm1, %v1529_v52  ;;  %3594 = vrot.lane.b32.xlu0 %v9696_v47, %s11069_s11  ;;  %v2175_v0 = vrot.slane %v2173_v59, 4  ;;  %v2166_v63 = vor.u32 %v2165_v33, %v2162_v21  ;;  %v1356_v12 = vshll.u32 %v1070_v45, 16  ;;  %v1362_v11 = vshll.u32 %v1071_v19, 16  ;;  %v2094_v52 = vld [vmem:[#allocation2 + $0x28] sm:$0xf] }
  0xf1   : > { %v1355_v35 = vrot.slane %v1353_v61, 4  ;;  %2583 = vst.msk [vmem:[#allocation3 + $0x8] sm:$0xff] %vm1020_vm0, %v9623_v7  ;;  %v2181_v3 = vrot.slane %v2179_v1, 5  ;;  %v1366_v14 = vshrl.u32 %v1071_v19, 16  ;;  %v1372_v38 = vshll.u32 %v11908_v48, 16 }
  0xf2   : > { %v2176_v37 = vor.u32 %v2175_v0, %v2171_v46  ;;  %2903 = vst.msk [vmem:[#allocation3 + $0x8] sm:$0xff] %vm1568_vm1, %v11732_v60  ;;  %v2167_v5 = vrot.slane %v2166_v63, 4  ;;  %v1358_v49 = vrot.slane %v1356_v12, 5  ;;  %v2184_v39 = vshrl.u32 %v11916_v34, 16  ;;  %v2095_v1 = vld [vmem:[#allocation2 + $0x2c] sm:$0x1] }
  0xf3   : > { %v11918_v55 = vpop.permute.xlu1 %1852  ;;  %v3126_v18 = vld [vmem:[#allocation2 + $0x90] sm:$0xf]  ;;  %v1364_v42 = vrot.slane %v1362_v11, 5  ;;  %v1368_v22 = vrot.slane %v1366_v14, 4  ;;  %vm316_vm8 = vcmp.gt.f32.partialorder %v11889_v25, 0.0  ;;  %v1374_v0 = vrot.slane %v1372_v38, 5 }
  0xf4   : > { %2875 = vrot.lane.b32.xlu0 %v9665_v30, %s11070_s12  ;;  %v3385_v24 = vshrl.u32 %v3126_v18, 16  ;;  %v3388_v27 = vshll.u32 %v3126_v18, 16  ;;  %v2177_v13 = vrot.slane %v2176_v37, 4  ;;  %v2632_v9 = vld [vmem:[#allocation2 + $0x90] sm:$0xe]  ;;  %v2172_v16 = vsel %vm11382_vm10, %v2167_v5, %v2171_v46  ;;  %v11954_v38 = vld [vmem:[%s11158_s9 + $0x138] sm:$0xff] }
  0xf5   : > { %v10588_v41 = vld [vmem:[#allocation2 + $0x90] sm:$0xff]   ;;  %v1359_v36 = vor.u32 %v1358_v49, %v1355_v35  ;;  %v9650_v20 = vrot.slane %v2632_v9, 9  ;;  %v1369_v59 = vor.u32 %v1368_v22, %v1364_v42  ;;  %v2186_v63 = vrot.slane %v2184_v39, 4  ;;  %v11957_v49 = vld [vmem:[%s11158_s9 + $0x140] sm:$0xff]  ;;  %v1619_v39 = vld [vmem:[#allocation2 + $0x88] sm:$0xf] }
  0xf6   : > { %v3127_v53 = vld [vmem:[#allocation2 + $0x94] sm:$0xf]  ;;  %v3387_v44 = vrot.slane %v3385_v24, 4  ;;  %v3390_v60 = vrot.slane %v3388_v27, 5  ;;  %v2182_v19 = vsel %vm11382_vm10, %v2177_v13, %v2181_v3  ;;  %v2187_v11 = vshll.u32 %v11916_v34, 16  ;;  %v10622_v24 = vld [vmem:[#allocation2 + $0x48] sm:$0xff]  }
  0xf7   : > { %v11928_v30 = vpop.permute.xlu1 %2030  ;;  %v3394_v32 = vshll.u32 %v3127_v53, 16  ;;  %v3398_v51 = vshrl.u32 %v3127_v53, 16  ;;  %v2633_v45 = vld [vmem:[#allocation2 + $0x94] sm:$0xf]  ;;  %v1360_v47 = vrot.slane %v1359_v36, 4  ;;  %v9624_v26 = vcombine.low %v2172_v16, %v2182_v19  ;;  %1027 = vst.msk [vmem:[#allocation3 + $0x90] sm:$0xff] %vm1020_vm0, %v10622_v24 }
  0xf8   : > { %3052 = vrot.lane.b32.xlu0 %v10588_v41, %s11068_s10  ;;  %v2774_v48 = vrot.slane %v2633_v45, 5  ;;  %v3391_v28 = vor.u32 %v3390_v60, %v3387_v44  ;;  %v1370_v12 = vrot.slane %v1369_v59, 4  ;;  %v2193_v37 = vshll.u32 %v2094_v52, 16  ;;  %v1618_v9 = vld [vmem:[#allocation2 + $0x84] sm:$0xe]  ;;  %v11970_v45 = vpop.permute.xlu0 %3578  ;;  %3080 = vst.msk [vmem:[#allocation3 + $0x8] sm:$0xff] %vm1892_vm9, %v11653_v58 }
  0xf9   : > { %v11934_v21 = vrot.slane %v3394_v32, 5  ;;  %v10776_v46 = vpop.eup %10775  ;;  %v11938_v61 = vrot.slane %v3398_v51, 4  ;;  %2584 = vst.msk [vmem:[#allocation3 + $0x20] sm:$0xff] %vm1020_vm0, %v9624_v26  ;;  %v1365_v7 = vsel %vm11382_vm10, %v1360_v47, %v1364_v42  ;;  %v2197_v18 = vshrl.u32 %v2094_v52, 16  ;;  %v1620_v42 = vld [vmem:[#allocation2 + $0x8c] sm:$0x1] }
  0xfa   : > { %v9473_v35 = vadd.f32 -1.0, %v10776_v46  ;;  %2904 = vst.msk [vmem:[#allocation3 + $0x20] sm:$0xff] %vm1568_vm1, %v11744_v4  ;;  %v11949_v3 = vsel %vm11325_vm7, %v9650_v20, %v2774_v48  ;;  %v11951_v14 = vrot.slane %v2774_v48, 4  ;;  %v2203_v5 = vshll.u32 %v2095_v1, 16  ;;  %v2096_v44 = vld [vmem:[#allocation2 + $0x30] sm:$0xf] }
  0xfb   : > { %v1531_v33 = vpop.permute.xlu1 %1530  ;;  %v1375_v34 = vsel %vm11382_vm10, %v1370_v12, %v1374_v0  ;;  %v2189_v27 = vrot.slane %v2187_v11, 5  ;;  %v2195_v13 = vrot.slane %v2193_v37, 5  ;;  %v11964_v53 = vrot.slane %v3391_v28, 4  ;;  %v2097_v20 = vld [vmem:[#allocation2 + $0x34] sm:$0xf]  ;;  %3081 = vst.msk [vmem:[#allocation3 + $0x20] sm:$0xff] %vm1892_vm9, %v11646_v43 }
  0xfc   : > { %1574 = vst.msk [vmem:[#allocation3 + $0x78] sm:$0xff] %vm1568_vm1, %v1531_v33  ;;  %v586_v4 = vsel %vm316_vm8, %v11889_v25, %v9473_v35  ;;  %v9570_v16 = vcombine.low %v1365_v7, %v1375_v34  ;;  %v2199_v36 = vrot.slane %v2197_v18, 4  ;;  %v3401_v60 = vor.u32 %v11938_v61, %v11934_v21  ;;  %v11978_v7 = vld [vmem:[%s11158_s9 + $0x148] sm:$0x3]  ;;  %v11986_v24 = vld [vmem:[#allocation2 + $0x90] sm:$0xf] }
  0xfd   : > { %v10136_v41 = vpack.c.bf16 %v586_v4, %v586_v4  ;;  %v2190_v25 = vor.u32 %v2189_v27, %v2186_v63  ;;  %v2205_v32 = vrot.slane %v2203_v5, 5  ;;  %v371_v51 = vmin.f32 %v11954_v38, 0.0  ;;  %v2098_v63 = vld [vmem:[#allocation2 + $0x38] sm:$0x1]  ;;  %1897 = vst.msk [vmem:[#allocation3 + $0x60] sm:$0xff] %vm1892_vm9, %v11918_v55 }
  0xfe   : > { %1542 = vrot.lane.b32.xlu1 %v9570_v16, %s11070_s12  ;;  %v2200_v19 = vor.u32 %v2199_v36, %v2195_v13  ;;  %v372_v47 = vmin.f32 %v11957_v49, 0.0  ;;  %v9586_v22 = vrot.slane %v1618_v9, 9  ;;  %v1763_v26 = vrot.slane %v1619_v39, 5  ;;  %v3581_v39 = vpop.permute.xlu0 %3580  ;;  %v1074_v43 = vld [vmem:[#allocation2 + $0x94] sm:$0xf] }
  0xff   : > { %876 = vst.msk [vmem:[#allocation2 + $0x98] sm:$0x1] %vm839_vm12, %v10136_v41  ;;  %v2191_v48 = vrot.slane %v2190_v25, 4  ;;  %v464_v52 = vmul.f32 1.442695, %v371_v51  ;;  %v1766_v28 = vrot.slane %v1620_v42, 5  ;;  %v1855_v11 = vpop.permute.xlu1 %1854  ;;  %v3397_v25 = vsel %vm11382_vm10, %v11964_v53, %v11934_v21 }
 0x100   : > { %v2208_v59 = vshrl.u32 %v2096_v44, 16  ;;  %v2201_v1 = vrot.slane %v2200_v19, 4  ;;  %v466_v33 = vmul.f32 1.442695, %v372_v47  ;;  %v1764_v46 = vsel %vm11325_vm7, %v9586_v22, %v1763_v26  ;;  %1898 = vst.msk [vmem:[#allocation3 + $0x78] sm:$0xff] %vm1892_vm9, %v1855_v11 }
 0x101   : > { %v1765_v61 = vrot.slane %v1763_v26, 4  ;;  %v2196_v0 = vsel %vm11382_vm10, %v2191_v48, %v2195_v13  ;;  %10777 = vpow2.f32 %v464_v52  ;;  %v2211_v12 = vshll.u32 %v2096_v44, 16  ;;  %v10600_v13 = vld [vmem:[#allocation2 + $0x90] sm:$0xff]  }
 0x102   : > { %v2210_v35 = vrot.slane %v2208_v59, 4  ;;  %v2206_v37 = vsel %vm11382_vm10, %v2201_v1, %v2205_v32  ;;  %10779 = vpow2.f32 %v466_v33  ;;  %v2217_v5 = vshll.u32 %v2097_v20, 16  ;;  %v12050_v59 = vld [vmem:[%s11158_s9 + $0x150] sm:$0xff]  ;;  %v12053_v1 = vld [vmem:[%s11158_s9 + $0x158] sm:$0xff] }
 0x103   : > { %v1767_v18 = vsel %vm11325_vm7, %v1765_v61, %v1766_v28  ;;  %v9625_v4 = vcombine.low %v2196_v0, %v2206_v37  ;;  %v2213_v27 = vrot.slane %v2211_v12, 5  ;;  %v2221_v9 = vshrl.u32 %v2097_v20, 16 }
 0x104   : > { %v9602_v34 = vcombine.low %v1764_v46, %v1767_v18  ;;  %v3402_v41 = vrot.slane %v3401_v60, 4  ;;  %v11988_v16 = vrot.slane %v2217_v5, 5  ;;  %v2227_v36 = vshll.u32 %v2098_v63, 16  ;;  %v2033_v23 = vpop.permute.xlu1 %2032  ;;  %v1622_v18 = vld [vmem:[#allocation2 + $0x94] sm:$0xf] }
 0x105   : > { %v373_v42 = vmin.f32 %v11978_v7, 0.0  ;;  %2585 = vst.msk [vmem:[#allocation3 + $0x38] sm:$0xff] %vm1020_vm0, %v9625_v4  ;;  %v2214_v51 = vor.u32 %v2213_v27, %v2210_v35  ;;  %v2223_v19 = vrot.slane %v2221_v9, 4  ;;  %vm2070_vm11 = vcmask 1048320   ;;  %v1621_v35 = vld [vmem:[#allocation2 + $0x90] sm:$0xe] }
 0x106   : > { %v3128_v44 = vld [vmem:[#allocation2 + $0x98] sm:$0x1]  ;;  %1866 = vrot.lane.b32.xlu1 %v9602_v34, %s11068_s10  ;;  %2905 = vst.msk [vmem:[#allocation3 + $0x38] sm:$0xff] %vm1568_vm1, %v11763_v62  ;;  %v2229_v22 = vrot.slane %v2227_v36, 5  ;;  %v1377_v62 = vshrl.u32 %v11986_v24, 16  ;;  %vm317_vm13 = vcmp.gt.f32.partialorder %v11954_v38, 0.0 }
 0x107   : > { %v2634_v32 = vld [vmem:[#allocation2 + $0x98] sm:$0x1]  ;;  %v3404_v60 = vshll.u32 %v3128_v44, 16  ;;  %v468_v26 = vmul.f32 1.442695, %v373_v42  ;;  %v2215_v50 = vrot.slane %v2214_v51, 4  ;;  %v2224_v58 = vor.u32 %v2223_v19, %v11988_v16 }
 0x108   : > { %v2777_v47 = vrot.slane %v2634_v32, 5  ;;  %3082 = vst.msk [vmem:[#allocation3 + $0x38] sm:$0xff] %vm1892_vm9, %v11667_v8  ;;  %v1075_v40 = vld [vmem:[#allocation2 + $0x98] sm:$0x1]  ;;  %v1380_v55 = vshll.u32 %v11986_v24, 16  ;;  %v1386_v53 = vshll.u32 %v1074_v43, 16 }
 0x109   : > { %v3406_v21 = vrot.slane %v3404_v60, 5  ;;  %10781 = vpow2.f32 %v468_v26  ;;  %2071 = vst.msk [vmem:[#allocation3] sm:$0xff] %vm2070_vm11, %v11681_v2  ;;  %3624 = vst.msk [vmem:[#allocation3 + $0x8] sm:$0xff] %vm2070_vm11, %v11936_v31  ;;  %v2220_v2 = vsel %vm11382_vm10, %v2215_v50, %v11988_v16  ;;  %vm318_vm14 = vcmp.gt.f32.partialorder %v11957_v49, 0.0  ;;  %v12060_v5 = vld [vmem:[%s11158_s9 + $0x160] sm:$0x3] }
 0x10a   : > { %2072 = vst.msk [vmem:[#allocation3 + $0x18] sm:$0xff] %vm2070_vm11, %v11717_v54  ;;  %3625 = vst.msk [vmem:[#allocation3 + $0x20] sm:$0xff] %vm2070_vm11, %v11970_v45  ;;  %v2778_v8 = vsel %vm11325_vm7, %v11951_v14, %v2777_v47  ;;  %v2225_v54 = vrot.slane %v2224_v58, 4  ;;  %2044 = vrot.lane.b32.xlu1 %v10600_v13, %s11069_s11  ;;  %v1382_v31 = vrot.slane %v1380_v55, 5  ;;  %v1390_v45 = vshrl.u32 %v1074_v43, 16  ;;  %v10625_v14 = vld [vmem:[#allocation2 + $0x60] sm:$0xff]  }
 0x10b   : > { %2073 = vst.msk [vmem:[#allocation3 + $0x30] sm:$0xff] %vm2070_vm11, %v11734_v10  ;;  %3626 = vst.msk [vmem:[#allocation3 + $0x38] sm:$0xff] %vm2070_vm11, %v3581_v39  ;;  %v1379_v10 = vrot.slane %v1377_v62, 4  ;;  %v10778_v20 = vpop.eup %10777  ;;  %v1396_v28 = vshll.u32 %v1075_v40, 16  ;;  %v1388_v63 = vrot.slane %v1386_v53, 5  ;;  %v9666_v12 = vcombine.low %v11949_v3, %v2778_v8  ;;  %v10626_v13 = vld [vmem:[#allocation2 + $0x6c] sm:$0xff]  }
 0x10c   : > { %2074 = vst.msk [vmem:[#allocation3 + $0x48] sm:$0xff] %vm2070_vm11, %v11746_v29  ;;  %2075 = vst.msk [vmem:[#allocation3 + $0x60] sm:$0xff] %vm2070_vm11, %v11928_v30  ;;  %v3583_v29 = vpop.permute.xlu0 %3582  ;;  %v3407_v30 = vsel %vm11382_vm10, %v3402_v41, %v3406_v21  ;;  %v2230_v52 = vsel %vm11382_vm10, %v2225_v54, %v2229_v22  ;;  %v10780_v33 = vpop.eup %10779  ;;  %v9474_v46 = vadd.f32 -1.0, %v10778_v20  ;;  %vm319_vm15 = vcmp.gt.f32.partialorder %v11978_v7, 0.0  ;;  %v3640_v24 = vld [vmem:[#allocation2 + $0x18] sm:$0xe] }
 0x10d   : > { %2076 = vst.msk [vmem:[#allocation3 + $0x78] sm:$0xff] %vm2070_vm11, %v2033_v23  ;;  %v9697_v48 = vcombine.low %v3397_v25, %v3407_v30  ;;  %v9626_v61 = vcombine.low %v2220_v2, %v2230_v52  ;;  %v1383_v0 = vor.u32 %v1382_v31, %v1379_v10  ;;  %v9475_v11 = vadd.f32 -1.0, %v10780_v33  ;;  %v1623_v3 = vld [vmem:[#allocation2 + $0x98] sm:$0x1]  ;;  %v3641_v42 = vld [vmem:[#allocation2 + $0x1c] sm:$0xf] }
 0x10e   : > { %1029 = vst.msk [vmem:[#allocation3 + $0xc0] sm:$0xff] %vm1020_vm0, %v10625_v14  ;;  %v1392_v37 = vrot.slane %v1390_v45, 4  ;;  %v587_v4 = vsel %vm317_vm13, %v11954_v38, %v9474_v46  ;;  %v374_v27 = vmin.f32 %v12050_v59, 0.0  ;;  %v375_v9 = vmin.f32 %v12053_v1, 0.0  ;;  %1030 = vst.msk [vmem:[#allocation3 + $0xd8] sm:$0xff] %vm1020_vm0, %v10626_v13  ;;  %v10627_v55 = vld [vmem:[#allocation2 + $0x78] sm:$0xff]  }
 0x10f   : > { %3596 = vrot.lane.b32.xlu0 %v9697_v48, %s11069_s11  ;;  %2586 = vst.msk [vmem:[#allocation3 + $0x50] sm:$0xff] %vm1020_vm0, %v9626_v61  ;;  %v1384_v34 = vrot.slane %v1383_v0, 4  ;;  %v588_v39 = vsel %vm318_vm14, %v11957_v49, %v9475_v11  ;;  %v10137_v41 = vpack.c.bf16 %v587_v4, %v587_v4  ;;  %v1398_v36 = vrot.slane %v1396_v28, 5  ;;  %v3642_v58 = vld [vmem:[#allocation2 + $0x20] sm:$0x1]  ;;  %1031 = vst.msk [vmem:[#allocation3 + $0xf0] sm:$0xff] %vm1020_vm0, %v10627_v55 }
 0x110   : > { %2906 = vst.msk [vmem:[#allocation3 + $0x50] sm:$0xff] %vm1568_vm1, %v11796_v17  ;;  %v1393_v16 = vor.u32 %v1392_v37, %v1388_v63  ;;  %v3929_v38 = vld [vmem:[#allocation3 + $0x8] sm:$0xff]  ;;  %v12073_v44 = vpop.permute.xlu0 %2863  ;;  %v10138_v32 = vpack.c.bf16 %v588_v39, %v588_v39  ;;  %v470_v51 = vmul.f32 1.442695, %v374_v27  ;;  %v472_v19 = vmul.f32 1.442695, %v375_v9 }
 0x111   : > { %v3932_v25 = vld [vmem:[#allocation3 + $0x20] sm:$0xff]  ;;  %3083 = vst.msk [vmem:[#allocation3 + $0x50] sm:$0xff] %vm1892_vm9, %v11699_v6  ;;  %v9587_v60 = vrot.slane %v1621_v35, 9  ;;  %4207 = vmatprep.mubr.bf16.mxu0 %v3929_v38  ;;  %v1389_v17 = vsel %vm11382_vm10, %v1384_v34, %v1388_v63  ;;  %v1770_v22 = vrot.slane %v1622_v18, 5  ;;  %v1773_v26 = vrot.slane %v1623_v3, 5  ;;  %v3931_v61 = vld [vmem:[#allocation3 + $0x18] sm:$0xff] }
 0x112   : > { %v3928_v49 = vld [vmem:[#allocation3] sm:$0xff]  ;;  %877 = vst.msk [vmem:[#allocation2 + $0x9c] sm:$0xf] %vm836_vm3, %v10137_v41  ;;  %v1394_v47 = vrot.slane %v1393_v16, 4  ;;  %878 = vst.msk [vmem:[#allocation2 + $0xa0] sm:$0xf] %vm836_vm3, %v10138_v32  ;;  %10783 = vpow2.f32 %v470_v51 }
 0x113   : > { %2877 = vrot.lane.b32.xlu0 %v9666_v12, %s11070_s12  ;;  %4208 = vmatmul.mubr.bf16.vlgmr.msra.gmra.mrb[0].mxu0 %v3928_v49  ;;  %3627 = vst.msk [vmem:[#allocation3 + $0x50] sm:$0xff] %vm2070_vm11, %v3583_v29  ;;  %v10782_v6 = vpop.eup %10781  ;;  %v376_v50 = vmin.f32 %v12060_v5, 0.0  ;;  %v9703_v43 = vrot.slane %v3640_v24, 9  ;;  %v3738_v62 = vrot.slane %v3641_v42, 5  ;;  %10785 = vpow2.f32 %v472_v19  ;;  %v3643_v21 = vld [vmem:[#allocation2 + $0x24] sm:$0xe] }
 0x114   : > { %4215 = vmatprep.mubr.bf16.mxu0 %v3932_v25  ;;  %v9476_v23 = vadd.f32 -1.0, %v10782_v6  ;;  %v1399_v56 = vsel %vm11382_vm10, %v1394_v47, %v1398_v36  ;;  %v1771_v2 = vsel %vm11325_vm7, %v9587_v60, %v1770_v22  ;;  %v1772_v54 = vrot.slane %v1770_v22, 4  ;;  %v3644_v29 = vld [vmem:[#allocation2 + $0x28] sm:$0xf]  ;;  %v12095_v14 = vpop.permute.xlu0 %3040  ;;  %v3645_v28 = vld [vmem:[#allocation2 + $0x2c] sm:$0x1] }
 0x115   : > { %v9571_v8 = vcombine.low %v1389_v17, %v1399_v56  ;;  %v474_v10 = vmul.f32 1.442695, %v376_v50  ;;  %v3739_v31 = vsel %vm11325_vm7, %v9703_v43, %v3738_v62  ;;  %v3740_v53 = vrot.slane %v3738_v62, 4  ;;  %v3935_v0 = vld [vmem:[#allocation3 + $0x38] sm:$0xff] }
 0x116   : > { %v1533_v40 = vpop.permute.xlu1 %1532  ;;  %v589_v30 = vsel %vm319_vm15, %v11978_v7, %v9476_v23  ;;  %v3741_v45 = vrot.slane %v3642_v58, 5  ;;  %vm320_vm2 = vcmp.gt.f32.partialorder %v12050_v59, 0.0  ;;  %v1774_v48 = vsel %vm11325_vm7, %v1772_v54, %v1773_v26  ;;  %v10628_v58 = vld [vmem:[#allocation2 + $0x84] sm:$0xff]  }
 0x117   : > { %1575 = vst.msk [vmem:[#allocation3 + $0x90] sm:$0xff] %vm1568_vm1, %v1533_v40  ;;  %v10139_v20 = vpack.c.bf16 %v589_v30, %v589_v30  ;;  %1544 = vrot.lane.b32.xlu1 %v9571_v8, %s11070_s12  ;;  %10787 = vpow2.f32 %v474_v10  ;;  %v9603_v52 = vcombine.low %v1771_v2, %v1774_v48  ;;  %v9704_v33 = vrot.slane %v3643_v21, 9 }
 0x118   : > { %v3742_v7 = vsel %vm11325_vm7, %v3740_v53, %v3741_v45  ;;  %v3745_v46 = vrot.slane %v3644_v29, 5  ;;  %v3748_v3 = vrot.slane %v3645_v28, 5  ;;  %v12113_v16 = vpop.permute.xlu0 %3584  ;;  %vm321_vm4 = vcmp.gt.f32.partialorder %v12053_v1, 0.0  ;;  %v3934_v29 = vld [vmem:[#allocation3 + $0x30] sm:$0xff]  ;;  %1032 = vst.msk [vmem:[#allocation3 + $0x108] sm:$0xff] %vm1020_vm0, %v10628_v58 }
 0x119   : > { %879 = vst.msk [vmem:[#allocation2 + $0xa4] sm:$0x1] %vm839_vm12, %v10139_v20  ;;  %v3129_v35 = vld [vmem:[#allocation2 + $0x9c] sm:$0xf]  ;;  %v9719_v11 = vcombine.low %v3739_v31, %v3742_v7  ;;  %v3130_v18 = vld [vmem:[#allocation2 + $0xa0] sm:$0xf] }
 0x11a   : > { %v1857_v63 = vpop.permute.xlu1 %1856  ;;  %v12105_v12 = vld [vmem:[#allocation2 + $0x9c] sm:$0xe]  ;;  %v3409_v24 = vshrl.u32 %v3129_v35, 16  ;;  %v3412_v4 = vshll.u32 %v3129_v35, 16  ;;  %v3418_v34 = vshll.u32 %v3130_v18, 16  ;;  %v3422_v27 = vshrl.u32 %v3130_v18, 16 }
 0x11b   : > { %1899 = vst.msk [vmem:[#allocation3 + $0x90] sm:$0xff] %vm1892_vm9, %v1857_v63  ;;  %v10596_v37 = vld [vmem:[#allocation2 + $0x9c] sm:$0xff]   ;;  %4216 = vmatmul.mubr.bf16.gmra.mrb[4].mxu0 %v3931_v61  ;;  %1868 = vrot.lane.b32.xlu1 %v9603_v52, %s11068_s10  ;;  %v3746_v41 = vsel %vm11325_vm7, %v9704_v33, %v3745_v46  ;;  %v3747_v19 = vrot.slane %v3745_v46, 4  ;;  %v9651_v49 = vrot.slane %v12105_v12, 9  ;;  %vm322_vm5 = vcmp.gt.f32.partialorder %v12060_v5, 0.0  ;;  %v3938_v40 = vld [vmem:[#allocation3 + $0x50] sm:$0xff] }
 0x11c   : > { %v2636_v9 = vld [vmem:[#allocation2 + $0xa0] sm:$0xf]  ;;  %3912 = vst.msk [vmem:[#allocation3 + $0x10] sm:$0xff] %vm1020_vm0, %v9719_v11  ;;  %4223 = vmatprep.mubr.bf16.mxu0 %v3935_v0  ;;  %3054 = vrot.lane.b32.xlu0 %v10596_v37, %s11068_s10  ;;  %v3411_v13 = vrot.slane %v3409_v24, 4  ;;  %v10784_v38 = vpop.eup %10783  ;;  %v3414_v42 = vrot.slane %v3412_v4, 5  ;;  %v12115_v25 = vrot.slane %v3418_v34, 5  ;;  %v12133_v48 = vpop.permute.xlu0 %2865 }
 0x11d   : > { %v2781_v39 = vrot.slane %v2636_v9, 5  ;;  %v3424_v32 = vrot.slane %v3422_v27, 4  ;;  %v10612_v51 = vld [vmem:[#allocation2 + $0x9c] sm:$0xff]   ;;  %v10786_v60 = vpop.eup %10785  ;;  %v9477_v17 = vadd.f32 -1.0, %v10784_v38  ;;  %v3749_v6 = vsel %vm11325_vm7, %v3747_v19, %v3748_v3  ;;  %v10629_v52 = vld [vmem:[#allocation2 + $0x90] sm:$0xff]   ;;  %v12148_v11 = vld [vmem:[%s11158_s9 + $0x168] sm:$0xff] }
 0x11e   : > { %v2035_v36 = vpop.permute.xlu1 %2034  ;;  %v3415_v47 = vor.u32 %v3414_v42, %v3411_v13  ;;  %v9478_v26 = vadd.f32 -1.0, %v10786_v60  ;;  %v1076_v50 = vld [vmem:[#allocation2 + $0x9c] sm:$0xf]  ;;  %v9720_v21 = vcombine.low %v3746_v41, %v3749_v6  ;;  %v12151_v37 = vld [vmem:[%s11158_s9 + $0x170] sm:$0xff]  ;;  %1033 = vst.msk [vmem:[#allocation3 + $0x120] sm:$0xff] %vm1020_vm0, %v10629_v52  ;;  %v377_v38 = vmin.f32 %v12148_v11, 0.0 }
 0x11f   : > { %2077 = vst.msk [vmem:[#allocation3 + $0x90] sm:$0xff] %vm2070_vm11, %v2035_v36  ;;  %v3425_v22 = vor.u32 %v3424_v32, %v12115_v25  ;;  %2046 = vrot.lane.b32.xlu1 %v10612_v51, %s11069_s11  ;;  %v2783_v23 = vrot.slane %v2781_v39, 4  ;;  %v590_v56 = vsel %vm320_vm2, %v12050_v59, %v9477_v17  ;;  %v1077_v59 = vld [vmem:[#allocation2 + $0xa0] sm:$0xf]  ;;  %v1401_v20 = vshrl.u32 %v1076_v50, 16 }
 0x120   : > { %v3131_v43 = vld [vmem:[#allocation2 + $0xa4] sm:$0x1]  ;;  %v3416_v8 = vrot.slane %v3415_v47, 4  ;;  %v591_v30 = vsel %vm321_vm4, %v12053_v1, %v9478_v26  ;;  %v10140_v31 = vpack.c.bf16 %v590_v56, %v590_v56  ;;  %3913 = vst.msk [vmem:[#allocation3 + $0x28] sm:$0xff] %vm1020_vm0, %v9720_v21  ;;  %v2782_v1 = vsel %vm11325_vm7, %v9651_v49, %v2781_v39  ;;  %v1624_v27 = vld [vmem:[#allocation2 + $0x9c] sm:$0xe]  ;;  %v12166_v17 = vpop.permute.xlu0 %3042 }
 0x121   : > { %v2637_v62 = vld [vmem:[#allocation2 + $0xa4] sm:$0x1]  ;;  %v10788_v55 = vpop.eup %10787  ;;  %v3426_v2 = vrot.slane %v3425_v22, 4  ;;  %v3428_v54 = vshll.u32 %v3131_v43, 16  ;;  %v10141_v33 = vpack.c.bf16 %v591_v30, %v591_v30  ;;  %v1403_v35 = vrot.slane %v1401_v20, 4 }
 0x122   : > { %v2784_v10 = vrot.slane %v2637_v62, 5  ;;  %v9479_v53 = vadd.f32 -1.0, %v10788_v55  ;;  %v3421_v7 = vsel %vm11382_vm10, %v3416_v8, %v12115_v25  ;;  %v1078_v46 = vld [vmem:[#allocation2 + $0xa4] sm:$0x1]  ;;  %880 = vst.msk [vmem:[#allocation2 + $0xa8] sm:$0xf] %vm836_vm3, %v10140_v31 }
 0x123   : > { %v3930_v45 = vld [vmem:[#allocation3 + $0x10] sm:$0xff]  ;;  %4224 = vmatmul.mubr.bf16.gmra.mrb[8].mxu0 %v3934_v29  ;;  %v3430_v28 = vrot.slane %v3428_v54, 5  ;;  %v1404_v12 = vshll.u32 %v1076_v50, 16  ;;  %881 = vst.msk [vmem:[#allocation2 + $0xac] sm:$0xf] %vm836_vm3, %v10141_v33  ;;  %v1410_v4 = vshll.u32 %v1077_v59, 16 }
 0x124   : > { %10449 = vmatprep.mubr.msk.bf16.mxu1 %vm1020_vm0, %v3930_v45  ;;  %4231 = vmatprep.mubr.bf16.mxu0 %v3938_v40  ;;  %v2785_v0 = vsel %vm11325_vm7, %v2783_v23, %v2784_v10  ;;  %v592_v63 = vsel %vm322_vm5, %v12060_v5, %v9479_v53  ;;  %v1414_v34 = vshrl.u32 %v1077_v59, 16  ;;  %v1625_v5 = vld [vmem:[#allocation2 + $0xa0] sm:$0xf]  ;;  %v1420_v13 = vshll.u32 %v1078_v46, 16  ;;  %v12158_v39 = vld [vmem:[#allocation2 + $0x3c] sm:$0xf]  ;;  %v12185_v46 = vpop.permute.xlu0 %3586 }
 0x125   : > { %v1535_v61 = vpop.permute.xlu1 %1534  ;;  %v3431_v18 = vsel %vm11382_vm10, %v3426_v2, %v3430_v28  ;;  %v10142_v24 = vpack.c.bf16 %v592_v63, %v592_v63  ;;  %v1406_v3 = vrot.slane %v1404_v12, 5  ;;  %v9667_v41 = vcombine.low %v2782_v1, %v2785_v0  ;;  %v1626_v25 = vld [vmem:[#allocation2 + $0xa4] sm:$0x1]  ;;  %v2100_v59 = vld [vmem:[#allocation2 + $0x40] sm:$0xf] }
 0x126   : > { %1576 = vst.msk [vmem:[#allocation3 + $0xa8] sm:$0xff] %vm1568_vm1, %v1535_v61  ;;  %v9698_v9 = vcombine.low %v3421_v7, %v3431_v18  ;;  %v12161_v36 = vrot.slane %v1410_v4, 5  ;;  %v378_v42 = vmin.f32 %v12151_v37, 0.0  ;;  %v1416_v19 = vrot.slane %v1414_v34, 4  ;;  %v3937_v47 = vld [vmem:[#allocation3 + $0x48] sm:$0xff] }
 0x127   : > { %882 = vst.msk [vmem:[#allocation2 + $0xb0] sm:$0x1] %vm839_vm12, %v10142_v24  ;;  %v1407_v51 = vor.u32 %v1406_v3, %v1403_v35  ;;  %v9588_v60 = vrot.slane %v1624_v27, 9  ;;  %v1777_v49 = vrot.slane %v1625_v5, 5  ;;  %v3933_v22 = vld [vmem:[#allocation3 + $0x28] sm:$0xff]  ;;  %v1422_v26 = vrot.slane %v1420_v13, 5 }
 0x128   : > { %3598 = vrot.lane.b32.xlu0 %v9698_v9, %s11069_s11  ;;  %v476_v6 = vmul.f32 1.442695, %v377_v38  ;;  %v478_v50 = vmul.f32 1.442695, %v378_v42  ;;  %10450 = vmatmul.mubr.msk.bf16.vlgmr.msra.gmra.mrb[0].mxu1 %vm1020_vm0, %v3933_v22  ;;  %v1780_v62 = vrot.slane %v1626_v25, 5  ;;  %v2232_v23 = vshrl.u32 %v12158_v39, 16 }
 0x129   : > { %v1859_v32 = vpop.permute.xlu1 %1858  ;;  %v1408_v58 = vrot.slane %v1407_v51, 4  ;;  %v1779_v43 = vrot.slane %v1777_v49, 4  ;;  %v3132_v56 = vld [vmem:[#allocation2 + $0xa8] sm:$0xf]  ;;  %v1417_v54 = vor.u32 %v1416_v19, %v12161_v36  ;;  %v12175_v10 = vsel %vm11325_vm7, %v9588_v60, %v1777_v49  ;;  %v2101_v3 = vld [vmem:[#allocation2 + $0x44] sm:$0x1] }
 0x12a   : > { %1900 = vst.msk [vmem:[#allocation3 + $0xa8] sm:$0xff] %vm1892_vm9, %v1859_v32  ;;  %v2638_v21 = vld [vmem:[#allocation2 + $0xa8] sm:$0xe]  ;;  %10789 = vpow2.f32 %v476_v6  ;;  %v3133_v8 = vld [vmem:[#allocation2 + $0xac] sm:$0xf]  ;;  %v3433_v2 = vshrl.u32 %v3132_v56, 16 }
 0x12b   : > { %4232 = vmatmul.mubr.bf16.gmra.mrb[12].mxu0 %v3937_v47  ;;  %v10605_v55 = vld [vmem:[#allocation2 + $0xa8] sm:$0xff]   ;;  %10791 = vpow2.f32 %v478_v50  ;;  %v3436_v29 = vshll.u32 %v3132_v56, 16  ;;  %v3442_v30 = vshll.u32 %v3133_v8, 16  ;;  %v3446_v31 = vshrl.u32 %v3133_v8, 16  ;;  %v12201_v25 = vld [vmem:[%s11158_s9 + $0x178] sm:$0x3] }
 0x12c   : > { %2879 = vrot.lane.b32.xlu0 %v9667_v41, %s11070_s12  ;;  %v2639_v53 = vld [vmem:[#allocation2 + $0xac] sm:$0xf]  ;;  %v9652_v45 = vrot.slane %v2638_v21, 9  ;;  %vm323_vm6 = vcmp.gt.f32.partialorder %v12148_v11, 0.0  ;;  %v3435_v52 = vrot.slane %v3433_v2, 4  ;;  %v1413_v1 = vsel %vm11382_vm10, %v1408_v58, %v12161_v36  ;;  %v12204_v58 = vpop.permute.xlu0 %2867 }
 0x12d   : > { %v2037_v40 = vpop.permute.xlu1 %2036  ;;  %v2788_v28 = vrot.slane %v2639_v53, 5  ;;  %vm324_vm8 = vcmp.gt.f32.partialorder %v12151_v37, 0.0  ;;  %v1781_v33 = vsel %vm11325_vm7, %v1779_v43, %v1780_v62  ;;  %v3438_v61 = vrot.slane %v3436_v29, 5  ;;  %v1079_v49 = vld [vmem:[#allocation2 + $0xa8] sm:$0xf]  ;;  %v10630_v62 = vld [vmem:[#allocation2 + $0x9c] sm:$0xff]  }
 0x12e   : > { %2078 = vst.msk [vmem:[#allocation3 + $0xa8] sm:$0xff] %vm2070_vm11, %v2037_v40  ;;  %v3134_v20 = vld [vmem:[#allocation2 + $0xb0] sm:$0x1]  ;;  %v3444_v0 = vrot.slane %v3442_v30, 5  ;;  %v3448_v63 = vrot.slane %v3446_v31, 4  ;;  %v1418_v4 = vrot.slane %v1417_v54, 4  ;;  %v9604_v60 = vcombine.low %v12175_v10, %v1781_v33 }
 0x12f   : > { %v2640_v7 = vld [vmem:[#allocation2 + $0xb0] sm:$0x1]  ;;  %v3452_v35 = vshll.u32 %v3134_v20, 16  ;;  %v12190_v12 = vsel %vm11325_vm7, %v9652_v45, %v2788_v28  ;;  %v2790_v18 = vrot.slane %v2788_v28, 4  ;;  %v3439_v27 = vor.u32 %v3438_v61, %v3435_v52  ;;  %1034 = vst.msk [vmem:[#allocation3 + $0x138] sm:$0xff] %vm1020_vm0, %v10630_v62  ;;  %v10617_v61 = vld [vmem:[#allocation2 + $0xa8] sm:$0xff]  }
 0x130   : > { %3056 = vrot.lane.b32.xlu0 %v10605_v55, %s11068_s10  ;;  %v2791_v24 = vrot.slane %v2640_v7, 5  ;;  %v3449_v5 = vor.u32 %v3448_v63, %v3444_v0  ;;  %v2234_v13 = vrot.slane %v2232_v23, 4  ;;  %v1423_v36 = vsel %vm11382_vm10, %v1418_v4, %v1422_v26  ;;  %v1080_v20 = vld [vmem:[#allocation2 + $0xac] sm:$0xf]  ;;  %v1081_v52 = vld [vmem:[#allocation2 + $0xb0] sm:$0x1] }
 0x131   : > { %v1537_v34 = vpop.permute.xlu1 %1536  ;;  %v3454_v9 = vrot.slane %v3452_v35, 5  ;;  %v2235_v38 = vshll.u32 %v12158_v39, 16  ;;  %v2241_v42 = vshll.u32 %v2100_v59, 16  ;;  %v3440_v32 = vrot.slane %v3439_v27, 4  ;;  %v12225_v63 = vld [vmem:[%s11158_s9 + $0x180] sm:$0xff] }
 0x132   : > { %1577 = vst.msk [vmem:[#allocation3 + $0xc0] sm:$0xff] %vm1568_vm1, %v1537_v34  ;;  %v12195_v41 = vsel %vm11325_vm7, %v2790_v18, %v2791_v24  ;;  %v3450_v51 = vrot.slane %v3449_v5, 4  ;;  %v9572_v19 = vcombine.low %v1413_v1, %v1423_v36  ;;  %v2245_v6 = vshrl.u32 %v2100_v59, 16  ;;  %v3646_v24 = vld [vmem:[#allocation2 + $0x30] sm:$0xe] }
 0x133   : > { %v2237_v47 = vrot.slane %v2235_v38, 5  ;;  %v2243_v22 = vrot.slane %v2241_v42, 5  ;;  %v2251_v50 = vshll.u32 %v2101_v3, 16  ;;  %v3445_v39 = vsel %vm11382_vm10, %v3440_v32, %v3444_v0  ;;  %v3647_v4 = vld [vmem:[#allocation2 + $0x34] sm:$0xf] }
 0x134   : > { %v10790_v26 = vpop.eup %10789  ;;  %v3455_v23 = vsel %vm11382_vm10, %v3450_v51, %v3454_v9  ;;  %v9668_v56 = vcombine.low %v12190_v12, %v12195_v41  ;;  %1546 = vrot.lane.b32.xlu1 %v9572_v19, %s11070_s12  ;;  %v379_v21 = vmin.f32 %v12201_v25, 0.0  ;;  %v2247_v54 = vrot.slane %v2245_v6, 4  ;;  %v12234_v9 = vld [vmem:[%s11158_s9 + $0x188] sm:$0xff]  ;;  %v3648_v3 = vld [vmem:[#allocation2 + $0x38] sm:$0x1] }
 0x135   : > { %v1861_v43 = vpop.permute.xlu1 %1860  ;;  %v10792_v40 = vpop.eup %10791  ;;  %v9699_v55 = vcombine.low %v3445_v39, %v3455_v23  ;;  %v9480_v8 = vadd.f32 -1.0, %v10790_v26  ;;  %v2238_v2 = vor.u32 %v2237_v47, %v2234_v13  ;;  %v2253_v29 = vrot.slane %v2251_v50, 5  ;;  %v12241_v38 = vld [vmem:[#allocation2 + $0xa8] sm:$0xe]  ;;  %v12244_v19 = vld [vmem:[#allocation2 + $0xac] sm:$0xf] }
 0x136   : > { %1901 = vst.msk [vmem:[#allocation3 + $0xc0] sm:$0xff] %vm1892_vm9, %v1861_v43  ;;  %v9481_v10 = vadd.f32 -1.0, %v10792_v40  ;;  %v480_v30 = vmul.f32 1.442695, %v379_v21  ;;  %v1425_v31 = vshrl.u32 %v1079_v49, 16  ;;  %v2248_v59 = vor.u32 %v2247_v54, %v2243_v22 }
 0x137   : > { %3600 = vrot.lane.b32.xlu0 %v9699_v55, %s11069_s11  ;;  %v593_v53 = vsel %vm323_vm6, %v12148_v11, %v9480_v8  ;;  %v2239_v45 = vrot.slane %v2238_v2, 4  ;;  %v1428_v7 = vshll.u32 %v1079_v49, 16  ;;  %v1434_v34 = vshll.u32 %v1080_v20, 16 }
 0x138   : > { %v594_v1 = vsel %vm324_vm8, %v12151_v37, %v9481_v10  ;;  %v10143_v33 = vpack.c.bf16 %v593_v53, %v593_v53  ;;  %1870 = vrot.lane.b32.xlu1 %v9604_v60, %s11068_s10  ;;  %10793 = vpow2.f32 %v480_v30  ;;  %v1427_v0 = vrot.slane %v1425_v31, 4  ;;  %v12230_v37 = vpop.permute.xlu0 %3044  ;;  %v12246_v60 = vld [vmem:[#allocation2 + $0xb0] sm:$0x1] }
 0x139   : > { %v2039_v28 = vpop.permute.xlu1 %2038  ;;  %v10144_v11 = vpack.c.bf16 %v594_v1, %v594_v1  ;;  %v2244_v35 = vsel %vm11382_vm10, %v2239_v45, %v2243_v22  ;;  %v2249_v12 = vrot.slane %v2248_v59, 4  ;;  %v1430_v18 = vrot.slane %v1428_v7, 5  ;;  %v3649_v59 = vld [vmem:[#allocation2 + $0x3c] sm:$0xe] }
 0x13a   : > { %2079 = vst.msk [vmem:[#allocation3 + $0xc0] sm:$0xff] %vm2070_vm11, %v2039_v28  ;;  %v1438_v27 = vshrl.u32 %v1080_v20, 16  ;;  %v1444_v5 = vshll.u32 %v1081_v52, 16  ;;  %v380_v36 = vmin.f32 %v12225_v63, 0.0  ;;  %v1436_v32 = vrot.slane %v1434_v34, 5 }
 0x13b   : > { %883 = vst.msk [vmem:[#allocation2 + $0xb4] sm:$0xf] %vm836_vm3, %v10143_v33  ;;  %2881 = vrot.lane.b32.xlu0 %v9668_v56, %s11070_s12  ;;  %884 = vst.msk [vmem:[#allocation2 + $0xb8] sm:$0xf] %vm836_vm3, %v10144_v11  ;;  %v2254_v13 = vsel %vm11382_vm10, %v2249_v12, %v2253_v29  ;;  %v1431_v41 = vor.u32 %v1430_v18, %v1427_v0  ;;  %v381_v6 = vmin.f32 %v12234_v9, 0.0  ;;  %v9705_v62 = vrot.slane %v3646_v24, 9 }
 0x13c   : > { %v9627_v42 = vcombine.low %v2244_v35, %v2254_v13  ;;  %2048 = vrot.lane.b32.xlu1 %v10617_v61, %s11069_s11  ;;  %v1440_v51 = vrot.slane %v1438_v27, 4  ;;  %v1446_v22 = vrot.slane %v1444_v5, 5  ;;  %v482_v50 = vmul.f32 1.442695, %v380_v36  ;;  %v12253_v56 = vpop.permute.xlu0 %3588  ;;  %v3650_v33 = vld [vmem:[#allocation2 + $0x40] sm:$0xf] }
 0x13d   : > { %v1432_v47 = vrot.slane %v1431_v41, 4  ;;  %v3752_v26 = vrot.slane %v3647_v4, 5  ;;  %v3755_v39 = vrot.slane %v3648_v3, 5  ;;  %v484_v23 = vmul.f32 1.442695, %v381_v6 }
 0x13e   : > { %2587 = vst.msk [vmem:[#allocation3 + $0x68] sm:$0xff] %vm1020_vm0, %v9627_v42  ;;  %v1441_v43 = vor.u32 %v1440_v51, %v1436_v32  ;;  %10795 = vpow2.f32 %v482_v50  ;;  %vm325_vm13 = vcmp.gt.f32.partialorder %v12201_v25, 0.0  ;;  %v9589_v55 = vrot.slane %v12241_v38, 9  ;;  %v3651_v61 = vld [vmem:[#allocation2 + $0x44] sm:$0x1] }
 0x13f   : > { %v1539_v49 = vpop.permute.xlu1 %1538  ;;  %2907 = vst.msk [vmem:[#allocation3 + $0x68] sm:$0xff] %vm1568_vm1, %v12073_v44  ;;  %v3754_v40 = vrot.slane %v3752_v26, 4  ;;  %v1437_v54 = vsel %vm11382_vm10, %v1432_v47, %v1436_v32  ;;  %vm326_vm14 = vcmp.gt.f32.partialorder %v12225_v63, 0.0  ;;  %10797 = vpow2.f32 %v484_v23  ;;  %v2102_v0 = vld [vmem:[#allocation2 + $0x48] sm:$0xf] }
 0x140   : > { %1578 = vst.msk [vmem:[#allocation3 + $0xd8] sm:$0xff] %vm1568_vm1, %v1539_v49  ;;  %v1442_v21 = vrot.slane %v1441_v43, 4  ;;  %v1784_v44 = vrot.slane %v12244_v19, 5  ;;  %v1787_v10 = vrot.slane %v12246_v60, 5  ;;  %v3753_v45 = vsel %vm11325_vm7, %v9705_v62, %v3752_v26  ;;  %v12284_v3 = vpop.permute.xlu0 %2869  ;;  %v2103_v38 = vld [vmem:[#allocation2 + $0x4c] sm:$0xf] }
 0x141   : > { %3084 = vst.msk [vmem:[#allocation3 + $0x68] sm:$0xff] %vm1892_vm9, %v12095_v14  ;;  %vm327_vm15 = vcmp.gt.f32.partialorder %v12234_v9, 0.0  ;;  %v9706_v51 = vrot.slane %v3649_v59, 9  ;;  %v3940_v19 = vld [vmem:[#allocation3 + $0x60] sm:$0xff]  ;;  %v3759_v60 = vrot.slane %v3650_v33, 5  ;;  %v3762_v49 = vrot.slane %v3651_v61, 5 }
 0x142   : > { %v3135_v2 = vld [vmem:[#allocation2 + $0xb4] sm:$0xf]  ;;  %3628 = vst.msk [vmem:[#allocation3 + $0x68] sm:$0xff] %vm2070_vm11, %v12113_v16  ;;  %v10794_v14 = vpop.eup %10793  ;;  %v3136_v30 = vld [vmem:[#allocation2 + $0xb8] sm:$0xf]  ;;  %v1447_v53 = vsel %vm11382_vm10, %v1442_v21, %v1446_v22  ;;  %v3756_v16 = vsel %vm11325_vm7, %v3754_v40, %v3755_v39  ;;  %v1785_v36 = vsel %vm11325_vm7, %v9589_v55, %v1784_v44  ;;  %v1786_v32 = vrot.slane %v1784_v44, 4 }
 0x143   : > { %v1863_v8 = vpop.permute.xlu1 %1862  ;;  %v10615_v29 = vld [vmem:[#allocation2 + $0xb4] sm:$0xff]   ;;  %v3457_v31 = vshrl.u32 %v3135_v2, 16  ;;  %v9482_v20 = vadd.f32 -1.0, %v10794_v14  ;;  %v3460_v52 = vshll.u32 %v3135_v2, 16  ;;  %v3466_v7 = vshll.u32 %v3136_v30, 16 }
 0x144   : > { %1902 = vst.msk [vmem:[#allocation3 + $0xd8] sm:$0xff] %vm1892_vm9, %v1863_v8  ;;  %v3470_v28 = vshrl.u32 %v3136_v30, 16  ;;  %v12273_v1 = vld [vmem:[#allocation2 + $0xb8] sm:$0xf]  ;;  %3058 = vrot.lane.b32.xlu0 %v10615_v29, %s11068_s10  ;;  %v12276_v35 = vld [vmem:[#allocation2 + $0xb4] sm:$0xe]  ;;  %v9573_v18 = vcombine.low %v1437_v54, %v1447_v53  ;;  %v9721_v41 = vcombine.low %v3753_v45, %v3756_v16  ;;  %v1788_v26 = vsel %vm11325_vm7, %v1786_v32, %v1787_v10 }
 0x145   : > { %v3459_v11 = vrot.slane %v3457_v31, 4  ;;  %v2795_v12 = vrot.slane %v12273_v1, 5  ;;  %v595_v4 = vsel %vm325_vm13, %v12201_v25, %v9482_v20  ;;  %v3462_v34 = vrot.slane %v3460_v52, 5  ;;  %v2104_v8 = vld [vmem:[#allocation2 + $0x50] sm:$0x1]  ;;  %v12304_v31 = vpop.permute.xlu0 %3046  ;;  %v10620_v59 = vld [vmem:[#allocation2 + $0xb4] sm:$0xff]  }
 0x146   : > { %v12282_v27 = vrot.slane %v3466_v7, 5  ;;  %v3472_v5 = vrot.slane %v3470_v28, 4  ;;  %v10145_v13 = vpack.c.bf16 %v595_v4, %v595_v4  ;;  %1548 = vrot.lane.b32.xlu1 %v9573_v18, %s11070_s12  ;;  %v9653_v25 = vrot.slane %v12276_v35, 9  ;;  %3914 = vst.msk [vmem:[#allocation3 + $0x40] sm:$0xff] %vm1020_vm0, %v9721_v41  ;;  %v12302_v30 = vld [vmem:[%s11158_s9 + $0x190] sm:$0x3] }
 0x147   : > { %v2041_v24 = vpop.permute.xlu1 %2040  ;;  %v3463_v42 = vor.u32 %v3462_v34, %v3459_v11  ;;  %v2256_v47 = vshrl.u32 %v2102_v0, 16  ;;  %v2259_v22 = vshll.u32 %v2102_v0, 16  ;;  %v2797_v62 = vrot.slane %v2795_v12, 4  ;;  %v1082_v33 = vld [vmem:[#allocation2 + $0xb4] sm:$0xf]  ;;  %v10631_v18 = vld [vmem:[#allocation2 + $0xa8] sm:$0xff]  }
 0x148   : > { %2080 = vst.msk [vmem:[#allocation3 + $0xd8] sm:$0xff] %vm2070_vm11, %v2041_v24  ;;  %v10796_v50 = vpop.eup %10795  ;;  %v3473_v43 = vor.u32 %v3472_v5, %v12282_v27  ;;  %v2265_v39 = vshll.u32 %v2103_v38, 16  ;;  %v9605_v21 = vcombine.low %v1785_v36, %v1788_v26  ;;  %v3760_v40 = vsel %vm11325_vm7, %v9706_v51, %v3759_v60  ;;  %v1083_v35 = vld [vmem:[#allocation2 + $0xb8] sm:$0xf] }
 0x149   : > { %885 = vst.msk [vmem:[#allocation2 + $0xbc] sm:$0x1] %vm839_vm12, %v10145_v13  ;;  %v3941_v6 = vld [vmem:[#allocation3 + $0x68] sm:$0xff]  ;;  %v9483_v23 = vadd.f32 -1.0, %v10796_v50  ;;  %v3761_v55 = vrot.slane %v3759_v60, 4  ;;  %v10798_v2 = vpop.eup %10797  ;;  %v3464_v54 = vrot.slane %v3463_v42, 4  ;;  %v12320_v34 = vsel %vm11325_vm7, %v9653_v25, %v2795_v12  ;;  %v12331_v51 = vpop.permute.xlu0 %3590 }
 0x14a   : > { %4239 = vmatprep.mubr.bf16.mxu0 %v3941_v6  ;;  %v2258_v44 = vrot.slane %v2256_v47, 4  ;;  %v2261_v14 = vrot.slane %v2259_v22, 5  ;;  %v2267_v29 = vrot.slane %v2265_v39, 5  ;;  %v9484_v10 = vadd.f32 -1.0, %v10798_v2  ;;  %1872 = vrot.lane.b32.xlu1 %v9605_v21, %s11068_s10  ;;  %1035 = vst.msk [vmem:[#allocation3 + $0x150] sm:$0xff] %vm1020_vm0, %v10631_v18 }
 0x14b   : > { %4240 = vmatmul.mubr.bf16.gmra.mrb[16].mxu0 %v3940_v19  ;;  %v596_v53 = vsel %vm326_vm14, %v12225_v63, %v9483_v23  ;;  %v3763_v45 = vsel %vm11325_vm7, %v3761_v55, %v3762_v49  ;;  %v2269_v16 = vshrl.u32 %v2103_v38, 16  ;;  %v2275_v28 = vshll.u32 %v2104_v8, 16 }
 0x14c   : > { %v10146_v20 = vpack.c.bf16 %v596_v53, %v596_v53  ;;  %v9722_v52 = vcombine.low %v3760_v40, %v3763_v45  ;;  %v2262_v7 = vor.u32 %v2261_v14, %v2258_v44  ;;  %v3474_v61 = vrot.slane %v3473_v43, 4 }
 0x14d   : > { %v597_v0 = vsel %vm327_vm15, %v12234_v9, %v9484_v10  ;;  %v2271_v11 = vrot.slane %v2269_v16, 4  ;;  %v382_v63 = vmin.f32 %v12302_v30, 0.0  ;;  %v3936_v13 = vld [vmem:[#allocation3 + $0x40] sm:$0xff]  ;;  %v2277_v42 = vrot.slane %v2275_v28, 5 }
 0x14e   : > { %v10147_v5 = vpack.c.bf16 %v597_v0, %v597_v0  ;;  %886 = vst.msk [vmem:[#allocation2 + $0xc0] sm:$0xf] %vm836_vm3, %v10146_v20  ;;  %v2263_v9 = vrot.slane %v2262_v7, 4  ;;  %10453 = vmatprep.mubr.msk.bf16.mxu1 %vm1020_vm0, %v3936_v13  ;;  %2050 = vrot.lane.b32.xlu1 %v10620_v59, %s11069_s11  ;;  %v3469_v1 = vsel %vm11382_vm10, %v3464_v54, %v12282_v27  ;;  %v1449_v25 = vshrl.u32 %v1082_v33, 16  ;;  %v12347_v16 = vld [vmem:[%s11158_s9 + $0x198] sm:$0xff]  ;;  %v12349_v59 = vpop.permute.xlu0 %2871 }
 0x14f   : > { %3915 = vst.msk [vmem:[#allocation3 + $0x58] sm:$0xff] %vm1020_vm0, %v9722_v52  ;;  %v2272_v38 = vor.u32 %v2271_v11, %v2267_v29  ;;  %v486_v12 = vmul.f32 1.442695, %v382_v63  ;;  %v1452_v32 = vshll.u32 %v1082_v33, 16  ;;  %v1458_v22 = vshll.u32 %v1083_v35, 16  ;;  %v12354_v33 = vld [vmem:[%s11158_s9 + $0x1a0] sm:$0xff] }
 0x150   : > { %v3137_v24 = vld [vmem:[#allocation2 + $0xbc] sm:$0x1]  ;;  %887 = vst.msk [vmem:[#allocation2 + $0xc4] sm:$0xf] %vm836_vm3, %v10147_v5  ;;  %v2268_v60 = vsel %vm11382_vm10, %v2263_v9, %v2267_v29  ;;  %v1451_v50 = vrot.slane %v1449_v25, 4  ;;  %v1462_v23 = vshrl.u32 %v1083_v35, 16 }
 0x151   : > { %v2643_v4 = vld [vmem:[#allocation2 + $0xbc] sm:$0x1]  ;;  %v3476_v41 = vshll.u32 %v3137_v24, 16  ;;  %v2273_v49 = vrot.slane %v2272_v38, 4  ;;  %10799 = vpow2.f32 %v486_v12  ;;  %v1454_v27 = vrot.slane %v1452_v32, 5 }
 0x152   : > { %v2798_v36 = vrot.slane %v2643_v4, 5  ;;  %v1084_v47 = vld [vmem:[#allocation2 + $0xbc] sm:$0x1]  ;;  %v1460_v39 = vrot.slane %v1458_v22, 5  ;;  %v1464_v44 = vrot.slane %v1462_v23, 4  ;;  %vm328_vm2 = vcmp.gt.f32.partialorder %v12302_v30, 0.0  ;;  %v12379_v22 = vpop.permute.xlu0 %3048 }
 0x153   : > { %v3478_v19 = vrot.slane %v3476_v41, 5  ;;  %v2278_v26 = vsel %vm11382_vm10, %v2273_v49, %v2277_v42  ;;  %v1455_v8 = vor.u32 %v1454_v27, %v1451_v50  ;;  %v1468_v2 = vshll.u32 %v1084_v47, 16  ;;  %v1630_v24 = vld [vmem:[#allocation2 + $0xb4] sm:$0xe]  ;;  %v1631_v5 = vld [vmem:[#allocation2 + $0xb8] sm:$0xf] }
 0x154   : > { %v2799_v6 = vsel %vm11325_vm7, %v2797_v62, %v2798_v36  ;;  %v9628_v55 = vcombine.low %v2268_v60, %v2278_v26  ;;  %v1465_v7 = vor.u32 %v1464_v44, %v1460_v39  ;;  %v383_v42 = vmin.f32 %v12347_v16, 0.0  ;;  %v2106_v47 = vld [vmem:[#allocation2 + $0x58] sm:$0xf]  ;;  %v3653_v44 = vld [vmem:[#allocation2 + $0x4c] sm:$0xf] }
 0x155   : > { %v3479_v43 = vsel %vm11382_vm10, %v3474_v61, %v3478_v19  ;;  %v3138_v54 = vld [vmem:[#allocation2 + $0xc0] sm:$0xf]  ;;  %v9669_v14 = vcombine.low %v12320_v34, %v2799_v6  ;;  %v1456_v45 = vrot.slane %v1455_v8, 4  ;;  %v1470_v28 = vrot.slane %v1468_v2, 5 }
 0x156   : > { %v1541_v21 = vpop.permute.xlu1 %1540  ;;  %v9700_v40 = vcombine.low %v3469_v1, %v3479_v43  ;;  %v3939_v62 = vld [vmem:[#allocation3 + $0x58] sm:$0xff]  ;;  %2588 = vst.msk [vmem:[#allocation3 + $0x80] sm:$0xff] %vm1020_vm0, %v9628_v55  ;;  %v3481_v29 = vshrl.u32 %v3138_v54, 16  ;;  %v3484_v10 = vshll.u32 %v3138_v54, 16  ;;  %v2644_v53 = vld [vmem:[#allocation2 + $0xc0] sm:$0xe] }
 0x157   : > { %1579 = vst.msk [vmem:[#allocation3 + $0xf0] sm:$0xff] %vm1568_vm1, %v1541_v21  ;;  %10454 = vmatmul.mubr.msk.bf16.gmra.mrb[4].mxu1 %vm1020_vm0, %v3939_v62  ;;  %2908 = vst.msk [vmem:[#allocation3 + $0x80] sm:$0xff] %vm1568_vm1, %v12133_v48  ;;  %v3139_v20 = vld [vmem:[#allocation2 + $0xc4] sm:$0xf]  ;;  %v9654_v52 = vrot.slane %v2644_v53, 9  ;;  %v1461_v48 = vsel %vm11382_vm10, %v1456_v45, %v1460_v39  ;;  %v1466_v34 = vrot.slane %v1465_v7, 4 }
 0x158   : > { %3602 = vrot.lane.b32.xlu0 %v9700_v40, %s11069_s11  ;;  %v3483_v0 = vrot.slane %v3481_v29, 4  ;;  %v3486_v11 = vrot.slane %v3484_v10, 5  ;;  %v3490_v63 = vshll.u32 %v3139_v20, 16  ;;  %v3494_v35 = vshrl.u32 %v3139_v20, 16  ;;  %3085 = vst.msk [vmem:[#allocation3 + $0x80] sm:$0xff] %vm1892_vm9, %v12166_v17  ;;  %v10618_v13 = vld [vmem:[#allocation2 + $0xc0] sm:$0xff]  }
 0x159   : > { %v2645_v18 = vld [vmem:[#allocation2 + $0xc4] sm:$0xf]  ;;  %3629 = vst.msk [vmem:[#allocation3 + $0x80] sm:$0xff] %vm2070_vm11, %v12185_v46  ;;  %v1471_v38 = vsel %vm11382_vm10, %v1466_v34, %v1470_v28  ;;  %v1632_v46 = vld [vmem:[#allocation2 + $0xbc] sm:$0x1]  ;;  %v384_v49 = vmin.f32 %v12354_v33, 0.0 }
 0x15a   : > { %v1865_v61 = vpop.permute.xlu1 %1864  ;;  %v2802_v4 = vrot.slane %v2645_v18, 5  ;;  %v3487_v9 = vor.u32 %v3486_v11, %v3483_v0  ;;  %v12364_v41 = vrot.slane %v3490_v63, 5  ;;  %v3496_v17 = vrot.slane %v3494_v35, 4  ;;  %v2105_v1 = vld [vmem:[#allocation2 + $0x54] sm:$0xf] }
 0x15b   : > { %1903 = vst.msk [vmem:[#allocation3 + $0xf0] sm:$0xff] %vm1892_vm9, %v1865_v61  ;;  %v10800_v25 = vpop.eup %10799  ;;  %v9574_v60 = vcombine.low %v1461_v48, %v1471_v38  ;;  %v488_v50 = vmul.f32 1.442695, %v383_v42  ;;  %v9590_v27 = vrot.slane %v1630_v24, 9  ;;  %v1791_v43 = vrot.slane %v1631_v5, 5  ;;  %v12404_v24 = vpop.permute.xlu0 %3592 }
 0x15c   : > { %2883 = vrot.lane.b32.xlu0 %v9669_v14, %s11070_s12  ;;  %v12369_v36 = vsel %vm11325_vm7, %v9654_v52, %v2802_v4  ;;  %v12374_v32 = vrot.slane %v3487_v9, 4  ;;  %v12376_v19 = vrot.slane %v2802_v4, 4  ;;  %v9485_v6 = vadd.f32 -1.0, %v10800_v25  ;;  %v2107_v40 = vld [vmem:[#allocation2 + $0x5c] sm:$0x1]  ;;  %v3943_v14 = vld [vmem:[#allocation3 + $0x78] sm:$0xff] }
 0x15d   : > { %v3497_v39 = vor.u32 %v3496_v17, %v12364_v41  ;;  %1550 = vrot.lane.b32.xlu1 %v9574_v60, %s11070_s12  ;;  %v490_v23 = vmul.f32 1.442695, %v384_v49  ;;  %v1794_v21 = vrot.slane %v1632_v46, 5  ;;  %v12390_v55 = vld [vmem:[%s11158_s9 + $0x1a8] sm:$0x3]  ;;  %10801 = vpow2.f32 %v488_v50  ;;  %v10623_v17 = vld [vmem:[#allocation2 + $0xc0] sm:$0xff]  }
 0x15e   : > { %v2043_v12 = vpop.permute.xlu1 %2042  ;;  %v3493_v26 = vsel %vm11382_vm10, %v12374_v32, %v12364_v41  ;;  %v598_v8 = vsel %vm328_vm2, %v12302_v30, %v9485_v6  ;;  %v1792_v2 = vsel %vm11325_vm7, %v9590_v27, %v1791_v43  ;;  %v1793_v62 = vrot.slane %v1791_v43, 4  ;;  %v3652_v54 = vld [vmem:[#allocation2 + $0x48] sm:$0xe]  ;;  %v3654_v45 = vld [vmem:[#allocation2 + $0x50] sm:$0x1] }
 0x15f   : > { %2081 = vst.msk [vmem:[#allocation3 + $0xf0] sm:$0xff] %vm2070_vm11, %v2043_v12  ;;  %v10148_v29 = vpack.c.bf16 %v598_v8, %v598_v8  ;;  %10803 = vpow2.f32 %v490_v23  ;;  %v2280_v10 = vshrl.u32 %v2105_v1, 16  ;;  %v2283_v53 = vshll.u32 %v2105_v1, 16  ;;  %v3655_v61 = vld [vmem:[#allocation2 + $0x54] sm:$0xe] }
 0x160   : > { %3060 = vrot.lane.b32.xlu0 %v10618_v13, %s11068_s10  ;;  %v3944_v20 = vld [vmem:[#allocation3 + $0x80] sm:$0xff]  ;;  %vm329_vm4 = vcmp.gt.f32.partialorder %v12347_v16, 0.0  ;;  %v1795_v52 = vsel %vm11325_vm7, %v1793_v62, %v1794_v21  ;;  %v2289_v30 = vshll.u32 %v2106_v47, 16  ;;  %v2293_v7 = vshrl.u32 %v2106_v47, 16  ;;  %v2108_v49 = vld [vmem:[#allocation2 + $0x60] sm:$0xf] }
 0x161   : > { %v2299_v28 = vshll.u32 %v2107_v40, 16  ;;  %4247 = vmatprep.mubr.bf16.mxu0 %v3944_v20  ;;  %888 = vst.msk [vmem:[#allocation2 + $0xc8] sm:$0x1] %vm839_vm12, %v10148_v29  ;;  %v12401_v0 = vrot.slane %v3497_v39, 4  ;;  %vm330_vm5 = vcmp.gt.f32.partialorder %v12354_v33, 0.0  ;;  %v9606_v11 = vcombine.low %v1792_v2, %v1795_v52 }
 0x162   : > { %v2282_v63 = vrot.slane %v2280_v10, 4  ;;  %v2285_v35 = vrot.slane %v2283_v53, 5  ;;  %v3656_v18 = vld [vmem:[#allocation2 + $0x58] sm:$0xf]  ;;  %4248 = vmatmul.mubr.bf16.gmra.mrb[20].mxu0 %v3943_v14  ;;  %v2291_v4 = vrot.slane %v2289_v30, 5  ;;  %v2295_v48 = vrot.slane %v2293_v7, 4 }
 0x163   : > { %v2301_v34 = vrot.slane %v2299_v28, 5  ;;  %v385_v5 = vmin.f32 %v12390_v55, 0.0  ;;  %v3657_v13 = vld [vmem:[#allocation2 + $0x5c] sm:$0x1]  ;;  %1874 = vrot.lane.b32.xlu1 %v9606_v11, %s11068_s10  ;;  %v9707_v38 = vrot.slane %v3652_v54, 9  ;;  %v3766_v42 = vrot.slane %v3653_v44, 5  ;;  %v12419_v54 = vpop.permute.xlu0 %2873 }
 0x164   : > { %v2286_v9 = vor.u32 %v2285_v35, %v2282_v63  ;;  %v3769_v46 = vrot.slane %v3654_v45, 5  ;;  %v2296_v1 = vor.u32 %v2295_v48, %v2291_v4  ;;  %v9708_v25 = vrot.slane %v3655_v61, 9  ;;  %v12410_v43 = vld [vmem:[#allocation2 + $0x64] sm:$0xf]  ;;  %v10632_v44 = vld [vmem:[#allocation2 + $0xb4] sm:$0xff]  }
 0x165   : > { %v492_v12 = vmul.f32 1.442695, %v385_v5  ;;  %v3773_v60 = vrot.slane %v3656_v18, 5  ;;  %v3767_v6 = vsel %vm11325_vm7, %v9707_v38, %v3766_v42  ;;  %v3768_v50 = vrot.slane %v3766_v42, 4  ;;  %1036 = vst.msk [vmem:[#allocation3 + $0x168] sm:$0xff] %vm1020_vm0, %v10632_v44 }
 0x166   : > { %v2287_v47 = vrot.slane %v2286_v9, 4  ;;  %v3776_v27 = vrot.slane %v3657_v13, 5  ;;  %v2297_v39 = vrot.slane %v2296_v1, 4  ;;  %v2304_v2 = vshrl.u32 %v2108_v49, 16  ;;  %v2110_v18 = vld [vmem:[#allocation2 + $0x68] sm:$0x1] }
 0x167   : > { %10805 = vpow2.f32 %v492_v12  ;;  %v3774_v23 = vsel %vm11325_vm7, %v9708_v25, %v3773_v60  ;;  %v3775_v21 = vrot.slane %v3773_v60, 4  ;;  %2052 = vrot.lane.b32.xlu1 %v10623_v17, %s11069_s11  ;;  %v3770_v8 = vsel %vm11325_vm7, %v3768_v50, %v3769_v46  ;;  %v10802_v14 = vpop.eup %10801  ;;  %v3658_v17 = vld [vmem:[#allocation2 + $0x60] sm:$0xe]  ;;  %v3659_v38 = vld [vmem:[#allocation2 + $0x64] sm:$0xf] }
 0x168   : > { %v2292_v40 = vsel %vm11382_vm10, %v2287_v47, %v2291_v4  ;;  %v2307_v62 = vshll.u32 %v2108_v49, 16  ;;  %v3140_v29 = vld [vmem:[#allocation2 + $0xc8] sm:$0x1]  ;;  %v2302_v53 = vsel %vm11382_vm10, %v2297_v39, %v2301_v34  ;;  %vm331_vm6 = vcmp.gt.f32.partialorder %v12390_v55, 0.0  ;;  %v3661_v12 = vld [vmem:[#allocation2 + $0x6c] sm:$0xe] }
 0x169   : > { %v2646_v10 = vld [vmem:[#allocation2 + $0xc8] sm:$0x1]  ;;  %v9723_v45 = vcombine.low %v3767_v6, %v3770_v8  ;;  %v3777_v20 = vsel %vm11325_vm7, %v3775_v21, %v3776_v27  ;;  %v2313_v52 = vshll.u32 %v12410_v43, 16  ;;  %v10804_v30 = vpop.eup %10803  ;;  %v3500_v7 = vshll.u32 %v3140_v29, 16  ;;  %v3662_v49 = vld [vmem:[#allocation2 + $0x70] sm:$0xf]  ;;  %v12451_v6 = vpop.permute.xlu0 %3050 }
 0x16a   : > { %v2805_v28 = vrot.slane %v2646_v10, 5  ;;  %v9486_v61 = vadd.f32 -1.0, %v10802_v14  ;;  %v9629_v11 = vcombine.low %v2292_v40, %v2302_v53  ;;  %v9487_v63 = vadd.f32 -1.0, %v10804_v30  ;;  %v3663_v47 = vld [vmem:[#allocation2 + $0x74] sm:$0x1] }
 0x16b   : > { %3916 = vst.msk [vmem:[#allocation3 + $0x70] sm:$0xff] %vm1020_vm0, %v9723_v45  ;;  %v9724_v35 = vcombine.low %v3774_v23, %v3777_v20  ;;  %v2306_v4 = vrot.slane %v2304_v2, 4  ;;  %v2309_v48 = vrot.slane %v2307_v62, 5  ;;  %v3502_v34 = vrot.slane %v3500_v7, 5  ;;  %v2111_v27 = vld [vmem:[#allocation2 + $0x6c] sm:$0xf] }
 0x16c   : > { %v2806_v5 = vsel %vm11325_vm7, %v12376_v19, %v2805_v28  ;;  %v599_v13 = vsel %vm329_vm4, %v12347_v16, %v9486_v61  ;;  %2589 = vst.msk [vmem:[#allocation3 + $0x98] sm:$0xff] %vm1020_vm0, %v9629_v11  ;;  %v12436_v9 = vrot.slane %v2313_v52, 5  ;;  %v600_v46 = vsel %vm330_vm5, %v12354_v33, %v9487_v63  ;;  %v3660_v16 = vld [vmem:[#allocation2 + $0x68] sm:$0x1]  ;;  %v2112_v29 = vld [vmem:[#allocation2 + $0x70] sm:$0xf] }
 0x16d   : > { %v9670_v42 = vcombine.low %v12369_v36, %v2806_v5  ;;  %v10149_v1 = vpack.c.bf16 %v599_v13, %v599_v13  ;;  %2909 = vst.msk [vmem:[#allocation3 + $0x98] sm:$0xff] %vm1568_vm1, %v12204_v58  ;;  %v2310_v19 = vor.u32 %v2309_v48, %v2306_v4  ;;  %v3503_v25 = vsel %vm11382_vm10, %v12401_v0, %v3502_v34  ;;  %v2113_v11 = vld [vmem:[#allocation2 + $0x74] sm:$0x1]  ;;  %v3946_v4 = vld [vmem:[#allocation3 + $0x90] sm:$0xff]  ;;  %v2114_v13 = vld [vmem:[#allocation2 + $0x78] sm:$0xf] }
 0x16e   : > { %3917 = vst.msk [vmem:[#allocation3 + $0x88] sm:$0xff] %vm1020_vm0, %v9724_v35  ;;  %v10150_v60 = vpack.c.bf16 %v600_v46, %v600_v46  ;;  %v2317_v36 = vshrl.u32 %v12410_v43, 16  ;;  %v2323_v33 = vshll.u32 %v2110_v18, 16  ;;  %v9701_v58 = vcombine.low %v3493_v26, %v3503_v25  ;;  %v12478_v35 = vpop.permute.xlu0 %3594 }
 0x16f   : > { %3086 = vst.msk [vmem:[#allocation3 + $0x98] sm:$0xff] %vm1892_vm9, %v12230_v37  ;;  %v2311_v0 = vrot.slane %v2310_v19, 4  ;;  %v9709_v37 = vrot.slane %v3658_v17, 9  ;;  %v3780_v50 = vrot.slane %v3659_v38, 5  ;;  %v3783_v21 = vrot.slane %v3660_v16, 5 }
 0x170   : > { %889 = vst.msk [vmem:[#allocation2 + $0xcc] sm:$0xf] %vm836_vm3, %v10149_v1  ;;  %v1543_v43 = vpop.permute.xlu1 %1542  ;;  %890 = vst.msk [vmem:[#allocation2 + $0xd0] sm:$0xf] %vm836_vm3, %v10150_v60  ;;  %v2319_v39 = vrot.slane %v2317_v36, 4  ;;  %v2325_v23 = vrot.slane %v2323_v33, 5  ;;  %3604 = vrot.lane.b32.xlu0 %v9701_v58, %s11069_s11 }
 0x171   : > { %3630 = vst.msk [vmem:[#allocation3 + $0x98] sm:$0xff] %vm2070_vm11, %v12253_v56  ;;  %v9710_v40 = vrot.slane %v3661_v12, 9  ;;  %v10806_v41 = vpop.eup %10805  ;;  %v2316_v56 = vsel %vm11382_vm10, %v2311_v0, %v12436_v9  ;;  %v3781_v32 = vsel %vm11325_vm7, %v9709_v37, %v3780_v50  ;;  %v3782_v26 = vrot.slane %v3780_v50, 4  ;;  %v2115_v50 = vld [vmem:[#allocation2 + $0x7c] sm:$0xf] }
 0x172   : > { %1580 = vst.msk [vmem:[#allocation3 + $0x108] sm:$0xff] %vm1568_vm1, %v1543_v43  ;;  %v3787_v8 = vrot.slane %v3662_v49, 5  ;;  %v9488_v2 = vadd.f32 -1.0, %v10806_v41  ;;  %v3942_v62 = vld [vmem:[#allocation3 + $0x70] sm:$0xff]  ;;  %v2320_v44 = vor.u32 %v2319_v39, %v12436_v9  ;;  %v3790_v14 = vrot.slane %v3663_v47, 5 }
 0x173   : > { %v2328_v10 = vshrl.u32 %v2111_v27, 16  ;;  %10457 = vmatprep.mubr.msk.bf16.mxu1 %vm1020_vm0, %v3942_v62  ;;  %v3784_v53 = vsel %vm11325_vm7, %v3782_v26, %v3783_v21  ;;  %v2331_v52 = vshll.u32 %v2111_v27, 16  ;;  %v2337_v5 = vshll.u32 %v2112_v29, 16 }
 0x174   : > { %v3788_v45 = vsel %vm11325_vm7, %v9710_v40, %v3787_v8  ;;  %v3789_v20 = vrot.slane %v3787_v8, 4  ;;  %v601_v30 = vsel %vm331_vm6, %v12390_v55, %v9488_v2  ;;  %v2321_v28 = vrot.slane %v2320_v44, 4  ;;  %2885 = vrot.lane.b32.xlu0 %v9670_v42, %s11070_s12  ;;  %v12496_v40 = vpop.permute.xlu0 %2875  ;;  %v3664_v2 = vld [vmem:[#allocation2 + $0x78] sm:$0xe] }
 0x175   : > { %v3945_v7 = vld [vmem:[#allocation3 + $0x88] sm:$0xff]  ;;  %v9725_v61 = vcombine.low %v3781_v32, %v3784_v53  ;;  %v2330_v63 = vrot.slane %v2328_v10, 4  ;;  %v10151_v18 = vpack.c.bf16 %v601_v30, %v601_v30  ;;  %v2333_v34 = vrot.slane %v2331_v52, 5 }
 0x176   : > { %10458 = vmatmul.mubr.msk.bf16.gmra.mrb[8].mxu1 %vm1020_vm0, %v3945_v7  ;;  %v3791_v48 = vsel %vm11325_vm7, %v3789_v20, %v3790_v14  ;;  %v2326_v9 = vsel %vm11382_vm10, %v2321_v28, %v2325_v23  ;;  %v2341_v46 = vshrl.u32 %v2112_v29, 16  ;;  %v2339_v49 = vrot.slane %v2337_v5, 5  ;;  %v2116_v23 = vld [vmem:[#allocation2 + $0x80] sm:$0x1]  ;;  %v3665_v29 = vld [vmem:[#allocation2 + $0x7c] sm:$0xf] }
 0x177   : > { %v3141_v55 = vld [vmem:[#allocation2 + $0xcc] sm:$0xf]  ;;  %3918 = vst.msk [vmem:[#allocation3 + $0xa0] sm:$0xff] %vm1020_vm0, %v9725_v61  ;;  %v9726_v38 = vcombine.low %v3788_v45, %v3791_v48  ;;  %v3142_v19 = vld [vmem:[#allocation2 + $0xd0] sm:$0xf]  ;;  %v9630_v12 = vcombine.low %v2316_v56, %v2326_v9  ;;  %v2334_v25 = vor.u32 %v2333_v34, %v2330_v63  ;;  %v2347_v37 = vshll.u32 %v2113_v11, 16 }
 0x178   : > { %v3947_v17 = vld [vmem:[#allocation3 + $0x98] sm:$0xff]  ;;  %v1867_v42 = vpop.permute.xlu1 %1866  ;;  %891 = vst.msk [vmem:[#allocation2 + $0xd4] sm:$0x1] %vm839_vm12, %v10151_v18  ;;  %v3505_v16 = vshrl.u32 %v3141_v55, 16  ;;  %v3508_v60 = vshll.u32 %v3141_v55, 16  ;;  %v3514_v36 = vshll.u32 %v3142_v19, 16 }
 0x179   : > { %v10621_v1 = vld [vmem:[#allocation2 + $0xcc] sm:$0xff]   ;;  %4255 = vmatprep.mubr.bf16.mxu0 %v3947_v17  ;;  %1904 = vst.msk [vmem:[#allocation3 + $0x108] sm:$0xff] %vm1892_vm9, %v1867_v42  ;;  %v3518_v33 = vshrl.u32 %v3142_v19, 16  ;;  %v2335_v58 = vrot.slane %v2334_v25, 4  ;;  %v2343_v0 = vrot.slane %v2341_v46, 4  ;;  %v2352_v21 = vshrl.u32 %v2114_v13, 16  ;;  %v12513_v46 = vpop.permute.xlu0 %3052 }
 0x17a   : > { %4256 = vmatmul.mubr.bf16.gmra.mrb[24].mxu0 %v3946_v4  ;;  %3919 = vst.msk [vmem:[#allocation3 + $0xb8] sm:$0xff] %vm1020_vm0, %v9726_v38  ;;  %3062 = vrot.lane.b32.xlu0 %v10621_v1, %s11068_s10  ;;  %v3507_v47 = vrot.slane %v3505_v16, 4  ;;  %2590 = vst.msk [vmem:[#allocation3 + $0xb0] sm:$0xff] %vm1020_vm0, %v9630_v12  ;;  %v3510_v27 = vrot.slane %v3508_v60, 5  ;;  %v12492_v43 = vrot.slane %v3514_v36, 5  ;;  %v2349_v26 = vrot.slane %v2347_v37, 5 }
 0x17b   : > { %v3520_v39 = vrot.slane %v3518_v33, 4  ;;  %2910 = vst.msk [vmem:[#allocation3 + $0xb0] sm:$0xff] %vm1568_vm1, %v12284_v3  ;;  %v2340_v56 = vsel %vm11382_vm10, %v2335_v58, %v2339_v49  ;;  %v2344_v32 = vor.u32 %v2343_v0, %v2339_v49  ;;  %v2355_v8 = vshll.u32 %v2114_v13, 16  ;;  %v3666_v10 = vld [vmem:[#allocation2 + $0x80] sm:$0x1] }
 0x17c   : > { %v2045_v41 = vpop.permute.xlu1 %2044  ;;  %3087 = vst.msk [vmem:[#allocation3 + $0xb0] sm:$0xff] %vm1892_vm9, %v12304_v31  ;;  %v3511_v62 = vor.u32 %v3510_v27, %v3507_v47  ;;  %v2354_v44 = vrot.slane %v2352_v21, 4  ;;  %v2361_v14 = vshll.u32 %v2115_v50, 16  ;;  %v2365_v20 = vshrl.u32 %v2115_v50, 16  ;;  %v3667_v30 = vld [vmem:[#allocation2 + $0x84] sm:$0xe] }
 0x17d   : > { %2082 = vst.msk [vmem:[#allocation3 + $0x108] sm:$0xff] %vm2070_vm11, %v2045_v41  ;;  %v3521_v3 = vor.u32 %v3520_v39, %v12492_v43  ;;  %3631 = vst.msk [vmem:[#allocation3 + $0xb0] sm:$0xff] %vm2070_vm11, %v12331_v51  ;;  %v2345_v53 = vrot.slane %v2344_v32, 4  ;;  %v2357_v45 = vrot.slane %v2355_v8, 5  ;;  %v2371_v52 = vshll.u32 %v2116_v23, 16  ;;  %v3949_v12 = vld [vmem:[#allocation3 + $0xa8] sm:$0xff] }
 0x17e   : > { %v3948_v31 = vld [vmem:[#allocation3 + $0xa0] sm:$0xff]  ;;  %v3512_v28 = vrot.slane %v3511_v62, 4  ;;  %v2363_v11 = vrot.slane %v2361_v14, 5  ;;  %v9711_v63 = vrot.slane %v3664_v2, 9  ;;  %v2367_v34 = vrot.slane %v2365_v20, 4 }
 0x17f   : > { %v3143_v7 = vld [vmem:[#allocation2 + $0xd4] sm:$0x1]  ;;  %v3522_v61 = vrot.slane %v3521_v3, 4  ;;  %10461 = vmatprep.mubr.msk.bf16.mxu1 %vm1020_vm0, %v3948_v31  ;;  %v2350_v51 = vsel %vm11382_vm10, %v2345_v53, %v2349_v26  ;;  %v2358_v48 = vor.u32 %v2357_v45, %v2354_v44  ;;  %v3668_v5 = vld [vmem:[#allocation2 + $0x88] sm:$0xf]  ;;  %v2373_v9 = vrot.slane %v2371_v52, 5 }
 0x180   : > { %v3524_v18 = vshll.u32 %v3143_v7, 16  ;;  %v3517_v13 = vsel %vm11382_vm10, %v3512_v28, %v12492_v43  ;;  %v9631_v55 = vcombine.low %v2340_v56, %v2350_v51  ;;  %v3794_v17 = vrot.slane %v3665_v29, 5  ;;  %v3669_v38 = vld [vmem:[#allocation2 + $0x8c] sm:$0x1]  ;;  %v2117_v49 = vld [vmem:[#allocation2 + $0x84] sm:$0xf] }
 0x181   : > { %v3951_v4 = vld [vmem:[#allocation3 + $0xb8] sm:$0xff]  ;;  %v2359_v1 = vrot.slane %v2358_v48, 4  ;;  %v2368_v19 = vor.u32 %v2367_v34, %v2363_v11  ;;  %v3797_v16 = vrot.slane %v3666_v10, 5  ;;  %v9712_v36 = vrot.slane %v3667_v30, 9  ;;  %v2118_v27 = vld [vmem:[#allocation2 + $0x88] sm:$0xf]  ;;  %v12537_v14 = vpop.permute.xlu0 %3596 }
 0x182   : > { %10462 = vmatmul.mubr.msk.bf16.gmra.mrb[12].mxu1 %vm1020_vm0, %v3951_v4  ;;  %v3526_v42 = vrot.slane %v3524_v18, 5  ;;  %2591 = vst.msk [vmem:[#allocation3 + $0xc8] sm:$0xff] %vm1020_vm0, %v9631_v55  ;;  %v3795_v25 = vsel %vm11325_vm7, %v9711_v63, %v3794_v17  ;;  %v3796_v60 = vrot.slane %v3794_v17, 4  ;;  %v3801_v33 = vrot.slane %v3668_v5, 5  ;;  %v2121_v8 = vld [vmem:[#allocation2 + $0x94] sm:$0xf] }
 0x183   : > { %2911 = vst.msk [vmem:[#allocation3 + $0xc8] sm:$0xff] %vm1568_vm1, %v12349_v59  ;;  %v2364_v0 = vsel %vm11382_vm10, %v2359_v1, %v2363_v11  ;;  %v2369_v37 = vrot.slane %v2368_v19, 4  ;;  %v3804_v50 = vrot.slane %v3669_v38, 5  ;;  %v2119_v59 = vld [vmem:[#allocation2 + $0x8c] sm:$0x1]  ;;  %v2376_v32 = vshrl.u32 %v2117_v49, 16 }
 0x184   : > { %v3527_v47 = vsel %vm11382_vm10, %v3522_v61, %v3526_v42  ;;  %v3950_v58 = vld [vmem:[#allocation3 + $0xb0] sm:$0xff]  ;;  %3088 = vst.msk [vmem:[#allocation3 + $0xc8] sm:$0xff] %vm1892_vm9, %v12379_v22  ;;  %v3798_v39 = vsel %vm11325_vm7, %v3796_v60, %v3797_v16  ;;  %v3802_v23 = vsel %vm11325_vm7, %v9712_v36, %v3801_v33  ;;  %v3803_v21 = vrot.slane %v3801_v33, 4  ;;  %v2120_v22 = vld [vmem:[#allocation2 + $0x90] sm:$0xf]  ;;  %v3952_v17 = vld [vmem:[#allocation3 + $0xc0] sm:$0xff] }
 0x185   : > { %v9702_v43 = vcombine.low %v3517_v13, %v3527_v47  ;;  %4263 = vmatprep.mubr.bf16.mxu0 %v3950_v58  ;;  %3632 = vst.msk [vmem:[#allocation3 + $0xc8] sm:$0xff] %vm2070_vm11, %v12404_v24  ;;  %v2374_v41 = vsel %vm11382_vm10, %v2369_v37, %v2373_v9  ;;  %v9727_v56 = vcombine.low %v3795_v25, %v3798_v39  ;;  %v2379_v26 = vshll.u32 %v2117_v49, 16  ;;  %v2122_v29 = vld [vmem:[#allocation2 + $0x98] sm:$0x1]  ;;  %v3670_v24 = vld [vmem:[#allocation2 + $0x90] sm:$0xe]  ;;  %v2878_v36 = vpop.permute.xlu0 %2877 }
 0x186   : > { %4264 = vmatmul.mubr.bf16.gmra.mrb[28].mxu0 %v3949_v12  ;;  %v9632_v2 = vcombine.low %v2364_v0, %v2374_v41  ;;  %v3805_v62 = vsel %vm11325_vm7, %v3803_v21, %v3804_v50  ;;  %v2385_v3 = vshll.u32 %v2118_v27, 16  ;;  %v2389_v44 = vshrl.u32 %v2118_v27, 16  ;;  %v3671_v20 = vld [vmem:[#allocation2 + $0x94] sm:$0xf]  ;;  %v3672_v11 = vld [vmem:[#allocation2 + $0x98] sm:$0x1] }
 0x187   : > { %3606 = vrot.lane.b32.xlu0 %v9702_v43, %s11069_s11  ;;  %3920 = vst.msk [vmem:[#allocation3 + $0xd0] sm:$0xff] %vm1020_vm0, %v9727_v56  ;;  %v9728_v10 = vcombine.low %v3802_v23, %v3805_v62  ;;  %v2378_v31 = vrot.slane %v2376_v32, 4  ;;  %v2381_v53 = vrot.slane %v2379_v26, 5  ;;  %v2395_v45 = vshll.u32 %v2119_v59, 16  ;;  %v3673_v48 = vld [vmem:[#allocation2 + $0x9c] sm:$0xe] }
 0x188   : > { %2592 = vst.msk [vmem:[#allocation3 + $0xe0] sm:$0xff] %vm1020_vm0, %v9632_v2  ;;  %v2387_v30 = vrot.slane %v2385_v3, 5  ;;  %v2391_v7 = vrot.slane %v2389_v44, 4  ;;  %v2400_v28 = vshrl.u32 %v2120_v22, 16  ;;  %v2403_v61 = vshll.u32 %v2120_v22, 16 }
 0x189   : > { %v1545_v52 = vpop.permute.xlu1 %1544  ;;  %2912 = vst.msk [vmem:[#allocation3 + $0xe0] sm:$0xff] %vm1568_vm1, %v12419_v54  ;;  %v2382_v63 = vor.u32 %v2381_v53, %v2378_v31  ;;  %v2397_v18 = vrot.slane %v2395_v45, 5  ;;  %v2409_v4 = vshll.u32 %v2121_v8, 16  ;;  %v2413_v51 = vshrl.u32 %v2121_v8, 16  ;;  %v3674_v9 = vld [vmem:[#allocation2 + $0xa0] sm:$0xf] }
 0x18a   : > { %1581 = vst.msk [vmem:[#allocation3 + $0x120] sm:$0xff] %vm1568_vm1, %v1545_v52  ;;  %v2392_v34 = vor.u32 %v2391_v7, %v2387_v30  ;;  %v2402_v5 = vrot.slane %v2400_v28, 4  ;;  %v2405_v13 = vrot.slane %v2403_v61, 5  ;;  %v2419_v55 = vshll.u32 %v2122_v29, 16  ;;  %v3675_v33 = vld [vmem:[#allocation2 + $0xa4] sm:$0x1] }
 0x18b   : > { %3921 = vst.msk [vmem:[#allocation3 + $0xe8] sm:$0xff] %vm1020_vm0, %v9728_v10  ;;  %v2383_v54 = vrot.slane %v2382_v63, 4  ;;  %v2411_v38 = vrot.slane %v2409_v4, 5  ;;  %v2415_v42 = vrot.slane %v2413_v51, 4  ;;  %v9713_v1 = vrot.slane %v3670_v24, 9  ;;  %v3955_v61 = vld [vmem:[#allocation3 + $0xd8] sm:$0xff] }
 0x18c   : > { %3089 = vst.msk [vmem:[#allocation3 + $0xe0] sm:$0xff] %vm1892_vm9, %v12451_v6  ;;  %v3953_v16 = vld [vmem:[#allocation3 + $0xc8] sm:$0xff]  ;;  %v2393_v12 = vrot.slane %v2392_v34, 4  ;;  %v2406_v25 = vor.u32 %v2405_v13, %v2402_v5  ;;  %v2421_v60 = vrot.slane %v2419_v55, 5  ;;  %v3808_v6 = vrot.slane %v3671_v20, 5 }
 0x18d   : > { %3633 = vst.msk [vmem:[#allocation3 + $0xe0] sm:$0xff] %vm2070_vm11, %v12478_v35  ;;  %v1869_v19 = vpop.permute.xlu1 %1868  ;;  %4271 = vmatprep.mubr.bf16.mxu0 %v3953_v16  ;;  %v2388_v49 = vsel %vm11382_vm10, %v2383_v54, %v2387_v30  ;;  %v2416_v47 = vor.u32 %v2415_v42, %v2411_v38  ;;  %v3811_v35 = vrot.slane %v3672_v11, 5  ;;  %v9714_v58 = vrot.slane %v3673_v48, 9  ;;  %v2123_v0 = vld [vmem:[#allocation2 + $0x9c] sm:$0xf] }
 0x18e   : > { %1905 = vst.msk [vmem:[#allocation3 + $0x120] sm:$0xff] %vm1892_vm9, %v1869_v19  ;;  %4272 = vmatmul.mubr.bf16.gmra.mrb[32].mxu0 %v3952_v17  ;;  %v3954_v37 = vld [vmem:[#allocation3 + $0xd0] sm:$0xff]  ;;  %v2398_v50 = vsel %vm11382_vm10, %v2393_v12, %v2397_v18  ;;  %v2407_v27 = vrot.slane %v2406_v25, 4  ;;  %v3809_v43 = vsel %vm11325_vm7, %v9713_v1, %v3808_v6  ;;  %v3810_v39 = vrot.slane %v3808_v6, 4  ;;  %v2124_v23 = vld [vmem:[#allocation2 + $0xa0] sm:$0xf]  ;;  %v3055_v20 = vpop.permute.xlu0 %3054 }
 0x18f   : > { %10465 = vmatprep.mubr.msk.bf16.mxu1 %vm1020_vm0, %v3954_v37  ;;  %v9633_v21 = vcombine.low %v2388_v49, %v2398_v50  ;;  %v2417_v59 = vrot.slane %v2416_v47, 4  ;;  %v3815_v41 = vrot.slane %v3674_v9, 5  ;;  %v3818_v56 = vrot.slane %v3675_v33, 5  ;;  %v2125_v32 = vld [vmem:[#allocation2 + $0xa4] sm:$0x1] }
 0x190   : > { %v2412_v8 = vsel %vm11382_vm10, %v2407_v27, %v2411_v38  ;;  %v3812_v2 = vsel %vm11325_vm7, %v3810_v39, %v3811_v35  ;;  %v2424_v62 = vshrl.u32 %v2123_v0, 16  ;;  %v2427_v3 = vshll.u32 %v2123_v0, 16  ;;  %v2126_v44 = vld [vmem:[#allocation2 + $0xa8] sm:$0xf]  ;;  %v2127_v28 = vld [vmem:[#allocation2 + $0xac] sm:$0xf] }
 0x191   : > { %v2047_v26 = vpop.permute.xlu1 %2046  ;;  %2593 = vst.msk [vmem:[#allocation3 + $0xf8] sm:$0xff] %vm1020_vm0, %v9633_v21  ;;  %v2422_v29 = vsel %vm11382_vm10, %v2417_v59, %v2421_v60  ;;  %v9729_v24 = vcombine.low %v3809_v43, %v3812_v2  ;;  %v3816_v10 = vsel %vm11325_vm7, %v9714_v58, %v3815_v41  ;;  %v3817_v31 = vrot.slane %v3815_v41, 4  ;;  %v3676_v5 = vld [vmem:[#allocation2 + $0xa8] sm:$0xe]  ;;  %v3677_v13 = vld [vmem:[#allocation2 + $0xac] sm:$0xf] }
 0x192   : > { %v3957_v22 = vld [vmem:[#allocation3 + $0xe8] sm:$0xff]  ;;  %2083 = vst.msk [vmem:[#allocation3 + $0x120] sm:$0xff] %vm2070_vm11, %v2047_v26  ;;  %v9634_v45 = vcombine.low %v2412_v8, %v2422_v29  ;;  %v2426_v52 = vrot.slane %v2424_v62, 4  ;;  %v2429_v30 = vrot.slane %v2427_v3, 5  ;;  %v2433_v7 = vshll.u32 %v2124_v23, 16 }
 0x193   : > { %10466 = vmatmul.mubr.msk.bf16.gmra.mrb[16].mxu1 %vm1020_vm0, %v3957_v22  ;;  %2913 = vst.msk [vmem:[#allocation3 + $0xf8] sm:$0xff] %vm1568_vm1, %v12496_v40  ;;  %v3819_v11 = vsel %vm11325_vm7, %v3817_v31, %v3818_v56  ;;  %v2437_v63 = vshrl.u32 %v2124_v23, 16  ;;  %v2443_v18 = vshll.u32 %v2125_v32, 16  ;;  %v2128_v40 = vld [vmem:[#allocation2 + $0xb0] sm:$0x1]  ;;  %v2448_v4 = vshrl.u32 %v2126_v44, 16 }
 0x194   : > { %v3956_v53 = vld [vmem:[#allocation3 + $0xe0] sm:$0xff]  ;;  %3090 = vst.msk [vmem:[#allocation3 + $0xf8] sm:$0xff] %vm1892_vm9, %v12513_v46  ;;  %v9730_v51 = vcombine.low %v3816_v10, %v3819_v11  ;;  %v2430_v48 = vor.u32 %v2429_v30, %v2426_v52  ;;  %v2435_v34 = vrot.slane %v2433_v7, 5  ;;  %v2451_v46 = vshll.u32 %v2126_v44, 16  ;;  %v3678_v38 = vld [vmem:[#allocation2 + $0xb0] sm:$0x1] }
 0x195   : > { %4279 = vmatprep.mubr.bf16.mxu0 %v3956_v53  ;;  %3922 = vst.msk [vmem:[#allocation3 + $0x100] sm:$0xff] %vm1020_vm0, %v9729_v24  ;;  %2594 = vst.msk [vmem:[#allocation3 + $0x110] sm:$0xff] %vm1020_vm0, %v9634_v45  ;;  %v2439_v55 = vrot.slane %v2437_v63, 4  ;;  %v2445_v9 = vrot.slane %v2443_v18, 5  ;;  %v2450_v17 = vrot.slane %v2448_v4, 4  ;;  %v2457_v54 = vshll.u32 %v2127_v28, 16 }
 0x196   : > { %3634 = vst.msk [vmem:[#allocation3 + $0xf8] sm:$0xff] %vm2070_vm11, %v12537_v14  ;;  %4280 = vmatmul.mubr.bf16.gmra.mrb[36].mxu0 %v3955_v61  ;;  %v2431_v14 = vrot.slane %v2430_v48, 4  ;;  %v2453_v42 = vrot.slane %v2451_v46, 5  ;;  %v2461_v1 = vshrl.u32 %v2127_v28, 16  ;;  %v2467_v19 = vshll.u32 %v2128_v40, 16  ;;  %v3958_v22 = vld [vmem:[#allocation3 + $0xf0] sm:$0xff] }
 0x197   : > { %2914 = vst.msk [vmem:[#allocation3 + $0x110] sm:$0xff] %vm1568_vm1, %v2878_v36  ;;  %v3679_v16 = vld [vmem:[#allocation2 + $0xb4] sm:$0xe]  ;;  %v2440_v12 = vor.u32 %v2439_v55, %v2435_v34  ;;  %v2459_v25 = vrot.slane %v2457_v54, 5  ;;  %v9715_v60 = vrot.slane %v3676_v5, 9  ;;  %v3822_v6 = vrot.slane %v3677_v13, 5 }
 0x198   : > { %3091 = vst.msk [vmem:[#allocation3 + $0x110] sm:$0xff] %vm1892_vm9, %v3055_v20  ;;  %v3680_v36 = vld [vmem:[#allocation2 + $0xb8] sm:$0xf]  ;;  %v2436_v49 = vsel %vm11382_vm10, %v2431_v14, %v2435_v34  ;;  %v2454_v47 = vor.u32 %v2453_v42, %v2450_v17  ;;  %v2463_v35 = vrot.slane %v2461_v1, 4  ;;  %v2469_v58 = vrot.slane %v2467_v19, 5 }
 0x199   : > { %3923 = vst.msk [vmem:[#allocation3 + $0x118] sm:$0xff] %vm1020_vm0, %v9730_v51  ;;  %v3681_v0 = vld [vmem:[#allocation2 + $0xbc] sm:$0x1]  ;;  %v2129_v37 = vld [vmem:[#allocation2 + $0xb4] sm:$0xf]  ;;  %v2441_v50 = vrot.slane %v2440_v12, 4  ;;  %v3823_v27 = vsel %vm11325_vm7, %v9715_v60, %v3822_v6 }
 0x19a   : > { %v3599_v33 = vpop.permute.xlu0 %3598  ;;  %v3824_v43 = vrot.slane %v3822_v6, 4  ;;  %v3825_v39 = vrot.slane %v3678_v38, 5  ;;  %v2455_v21 = vrot.slane %v2454_v47, 4  ;;  %v2464_v59 = vor.u32 %v2463_v35, %v2459_v25  ;;  %v2130_v32 = vld [vmem:[#allocation2 + $0xb8] sm:$0xf]  ;;  %v3961_v47 = vld [vmem:[#allocation3 + $0x108] sm:$0xff] }
 0x19b   : > { %3635 = vst.msk [vmem:[#allocation3 + $0x110] sm:$0xff] %vm2070_vm11, %v3599_v33  ;;  %v9716_v41 = vrot.slane %v3679_v16, 9  ;;  %v3829_v56 = vrot.slane %v3680_v36, 5  ;;  %v2446_v8 = vsel %vm11382_vm10, %v2441_v50, %v2445_v9  ;;  %v3832_v62 = vrot.slane %v3681_v0, 5  ;;  %v2131_v3 = vld [vmem:[#allocation2 + $0xbc] sm:$0x1] }
 0x19c   : > { %v3960_v23 = vld [vmem:[#allocation3 + $0x100] sm:$0xff]  ;;  %v3826_v2 = vsel %vm11325_vm7, %v3824_v43, %v3825_v39  ;;  %v2472_v44 = vshrl.u32 %v2129_v37, 16  ;;  %v9635_v29 = vcombine.low %v2436_v49, %v2446_v8  ;;  %v2460_v10 = vsel %vm11382_vm10, %v2455_v21, %v2459_v25  ;;  %v2132_v45 = vld [vmem:[#allocation2 + $0xc0] sm:$0xf]  ;;  %v2133_v61 = vld [vmem:[#allocation2 + $0xc4] sm:$0xf] }
 0x19d   : > { %v3959_v26 = vld [vmem:[#allocation3 + $0xf8] sm:$0xff]  ;;  %10469 = vmatprep.mubr.msk.bf16.mxu1 %vm1020_vm0, %v3960_v23  ;;  %v2465_v31 = vrot.slane %v2464_v59, 4  ;;  %v9731_v53 = vcombine.low %v3823_v27, %v3826_v2  ;;  %v3830_v52 = vsel %vm11325_vm7, %v9716_v41, %v3829_v56  ;;  %v3831_v30 = vrot.slane %v3829_v56, 4  ;;  %v2134_v4 = vld [vmem:[#allocation2 + $0xc8] sm:$0x1] }
 0x19e   : > { %4287 = vmatprep.mubr.bf16.mxu0 %v3959_v26  ;;  %v2880_v24 = vpop.permute.xlu0 %2879  ;;  %v2474_v7 = vrot.slane %v2472_v44, 4  ;;  %v2475_v28 = vshll.u32 %v2129_v37, 16  ;;  %2595 = vst.msk [vmem:[#allocation3 + $0x128] sm:$0xff] %vm1020_vm0, %v9635_v29  ;;  %v2481_v63 = vshll.u32 %v2130_v32, 16  ;;  %v2485_v18 = vshrl.u32 %v2130_v32, 16 }
 0x19f   : > { %4288 = vmatmul.mubr.bf16.gmra.mrb[40].mxu0 %v3958_v22  ;;  %v2470_v11 = vsel %vm11382_vm10, %v2465_v31, %v2469_v58  ;;  %3924 = vst.msk [vmem:[#allocation3 + $0x130] sm:$0xff] %vm1020_vm0, %v9731_v53  ;;  %v2491_v40 = vshll.u32 %v2131_v3, 16  ;;  %v3833_v48 = vsel %vm11325_vm7, %v3831_v30, %v3832_v62  ;;  %v2496_v46 = vshrl.u32 %v2132_v45, 16  ;;  %v3682_v5 = vld [vmem:[#allocation2 + $0xc0] sm:$0xe] }
 0x1a0   : > { %v3963_v20 = vld [vmem:[#allocation3 + $0x118] sm:$0xff]  ;;  %2915 = vst.msk [vmem:[#allocation3 + $0x128] sm:$0xff] %vm1568_vm1, %v2880_v24  ;;  %v9636_v51 = vcombine.low %v2460_v10, %v2470_v11  ;;  %v2477_v34 = vrot.slane %v2475_v28, 5  ;;  %v3683_v13 = vld [vmem:[#allocation2 + $0xc4] sm:$0xf]  ;;  %v9732_v17 = vcombine.low %v3830_v52, %v3833_v48  ;;  %v2483_v54 = vrot.slane %v2481_v63, 5 }
 0x1a1   : > { %10470 = vmatmul.mubr.msk.bf16.gmra.mrb[20].mxu1 %vm1020_vm0, %v3963_v20  ;;  %v2487_v38 = vrot.slane %v2485_v18, 4  ;;  %v2493_v14 = vrot.slane %v2491_v40, 5  ;;  %v3684_v42 = vld [vmem:[#allocation2 + $0xc8] sm:$0x1]  ;;  %v2498_v19 = vrot.slane %v2496_v46, 4  ;;  %v2499_v16 = vshll.u32 %v2132_v45, 16 }
 0x1a2   : > { %v3057_v55 = vpop.permute.xlu0 %3056  ;;  %v3962_v9 = vld [vmem:[#allocation3 + $0x110] sm:$0xff]  ;;  %2596 = vst.msk [vmem:[#allocation3 + $0x140] sm:$0xff] %vm1020_vm0, %v9636_v51  ;;  %v2478_v1 = vor.u32 %v2477_v34, %v2474_v7  ;;  %v2505_v12 = vshll.u32 %v2133_v61, 16  ;;  %3925 = vst.msk [vmem:[#allocation3 + $0x148] sm:$0xff] %vm1020_vm0, %v9732_v17  ;;  %v2509_v6 = vshrl.u32 %v2133_v61, 16  ;;  %v2515_v36 = vshll.u32 %v2134_v4, 16 }
 0x1a3   : > { %3092 = vst.msk [vmem:[#allocation3 + $0x128] sm:$0xff] %vm1892_vm9, %v3057_v55  ;;  %4295 = vmatprep.mubr.bf16.mxu0 %v3962_v9  ;;  %v3685_v25 = vld [vmem:[#allocation2 + $0xcc] sm:$0xe]  ;;  %v2488_v60 = vor.u32 %v2487_v38, %v2483_v54  ;;  %v9717_v33 = vrot.slane %v3682_v5, 9  ;;  %v3686_v49 = vld [vmem:[#allocation2 + $0xd0] sm:$0xf] }
 0x1a4   : > { %v2479_v35 = vrot.slane %v2478_v1, 4  ;;  %v2501_v58 = vrot.slane %v2499_v16, 5  ;;  %v2507_v0 = vrot.slane %v2505_v12, 5  ;;  %v3836_v37 = vrot.slane %v3683_v13, 5  ;;  %v3687_v23 = vld [vmem:[#allocation2 + $0xd4] sm:$0x1] }
 0x1a5   : > { %v2489_v50 = vrot.slane %v2488_v60, 4  ;;  %v2511_v27 = vrot.slane %v2509_v6, 4  ;;  %v2517_v43 = vrot.slane %v2515_v36, 5  ;;  %v3839_v39 = vrot.slane %v3684_v42, 5  ;;  %v4510_v10 = vld [vmem:[#allocation4 + $0xc] sm:$0x1] }
 0x1a6   : > { %v1547_v21 = vpop.permute.xlu1 %1546  ;;  %v3966_v59 = vld [vmem:[#allocation3 + $0x130] sm:$0xff]  ;;  %v2484_v41 = vsel %vm11382_vm10, %v2479_v35, %v2483_v54  ;;  %v2502_v56 = vor.u32 %v2501_v58, %v2498_v19  ;;  %v3837_v32 = vsel %vm11325_vm7, %v9717_v33, %v3836_v37  ;;  %v3838_v26 = vrot.slane %v3836_v37, 4  ;;  %v4513_v7 = vld [vmem:[#allocation4 + $0x18] sm:$0x1]  ;;  %v4569_v28 = vld [vmem:[#allocation4 + $0x20] sm:$0x1] }
 0x1a7   : > { %4296 = vmatmul.mubr.bf16.gmra.mrb[44].mxu0 %v3961_v47  ;;  %1582 = vst.msk [vmem:[#allocation3 + $0x138] sm:$0xff] %vm1568_vm1, %v1547_v21  ;;  %10473 = vmatprep.mubr.msk.bf16.mxu1 %vm1020_vm0, %v3966_v59  ;;  %v2494_v22 = vsel %vm11382_vm10, %v2489_v50, %v2493_v14  ;;  %v2512_v8 = vor.u32 %v2511_v27, %v2507_v0  ;;  %v9718_v2 = vrot.slane %v3685_v25, 9  ;;  %v3843_v62 = vrot.slane %v3686_v49, 5  ;;  %v4566_v31 = vld [vmem:[#allocation4 + $0x14] sm:$0x1]  ;;  %v3964_v14 = vld [vmem:[#allocation3 + $0x120] sm:$0xff] }
 0x1a8   : > { %v9637_v3 = vcombine.low %v2484_v41, %v2494_v22  ;;  %v2503_v44 = vrot.slane %v2502_v56, 4  ;;  %v3840_v29 = vsel %vm11325_vm7, %v3838_v26, %v3839_v39  ;;  %v3846_v24 = vrot.slane %v3687_v23, 5  ;;  %v4516_v13 = vld [vmem:[#allocation4 + $0x24] sm:$0x1]  ;;  %v4572_v33 = vld [vmem:[#allocation4 + $0x2c] sm:$0x1] }
 0x1a9   : > { %v3601_v53 = vpop.permute.xlu0 %3600  ;;  %v2513_v45 = vrot.slane %v2512_v8, 4  ;;  %v9733_v20 = vcombine.low %v3837_v32, %v3840_v29  ;;  %v3844_v52 = vsel %vm11325_vm7, %v9718_v2, %v3843_v62  ;;  %v3845_v30 = vrot.slane %v3843_v62, 4  ;;  %v3969_v11 = vld [vmem:[#allocation3 + $0x148] sm:$0xff]  ;;  %v4519_v23 = vld [vmem:[#allocation4 + $0x30] sm:$0x1] }
 0x1aa   : > { %3636 = vst.msk [vmem:[#allocation3 + $0x128] sm:$0xff] %vm2070_vm11, %v3601_v53  ;;  %v1871_v61 = vpop.permute.xlu1 %1870  ;;  %v2508_v63 = vsel %vm11382_vm10, %v2503_v44, %v2507_v0  ;;  %vm4505_vm8 = vsmask.f32 256  ;;  %vm4561_vm13 = vsmask.f32 7938  ;;  %10474 = vmatmul.mubr.msk.bf16.gmra.mrb[24].mxu1 %vm1020_vm0, %v3969_v11  ;;  %v11071_v6 = vmov 0  }
 0x1ab   : > { %2597 = vst.msk [vmem:[#allocation3 + $0x158] sm:$0xff] %vm1020_vm0, %v9637_v3  ;;  %v2518_v18 = vsel %vm11382_vm10, %v2513_v45, %v2517_v43  ;;  %3926 = vst.msk [vmem:[#allocation3 + $0x160] sm:$0xff] %vm1020_vm0, %v9733_v20  ;;  %v3847_v40 = vsel %vm11325_vm7, %v3845_v30, %v3846_v24  ;;  %v4575_v21 = vld [vmem:[#allocation4 + $0x38] sm:$0x1]  ;;  %v4522_v59 = vld [vmem:[#allocation4 + $0x3c] sm:$0x1] }
 0x1ac   : > { %1906 = vst.msk [vmem:[#allocation3 + $0x138] sm:$0xff] %vm1892_vm9, %v1871_v61  ;;  %vm12631_vm14 = vmand %vm839_vm12, %vm4505_vm8  ;;  %v9638_v51 = vcombine.low %v2508_v63, %v2518_v18  ;;  %v9734_v48 = vcombine.low %v3844_v52, %v3847_v40  ;;  %vm4905_vm6 = vsmask.f32 4368 }
 0x1ad   : > { %v4511_v34 = vsel %vm12631_vm14, 0, %v4510_v10  ;;  %vm12639_vm15 = vmand %vm839_vm12, %vm4561_vm13  ;;  %v4514_v5 = vsel %vm12631_vm14, 0, %v4513_v7  ;;  %v2882_v55 = vpop.permute.xlu0 %2881  ;;  %v4517_v54 = vsel %vm12631_vm14, 0, %v4516_v13  ;;  %4497 = vst.msk [vmem:[#allocation4] sm:$0xf] %vm836_vm3, %v11071_v6  ;;  %v4520_v41 = vsel %vm12631_vm14, 0, %v4519_v23 }
 0x1ae   : > { %4512 = vst [vmem:[#allocation4 + $0xc] sm:$0x1] %v4511_v34  ;;  %v4567_v9 = vsel %vm12639_vm15, 0, %v4566_v31  ;;  %4515 = vst [vmem:[#allocation4 + $0x18] sm:$0x1] %v4514_v5  ;;  %v4570_v17 = vsel %vm12639_vm15, 0, %v4569_v28  ;;  %v2049_v38 = vpop.permute.xlu1 %2048 }
 0x1af   : > { %2916 = vst.msk [vmem:[#allocation3 + $0x140] sm:$0xff] %vm1568_vm1, %v2882_v55  ;;  %4568 = vst [vmem:[#allocation4 + $0x14] sm:$0x1] %v4567_v9  ;;  %v4573_v49 = vsel %vm12639_vm15, 0, %v4572_v33  ;;  %v4576_v56 = vsel %vm12639_vm15, 0, %v4575_v21  ;;  %v4523_v32 = vsel %vm12631_vm14, 0, %v4522_v59 }
 0x1b0   : > { %2598 = vst.msk [vmem:[#allocation3 + $0x170] sm:$0xff] %vm1020_vm0, %v9638_v51  ;;  %3927 = vst.msk [vmem:[#allocation3 + $0x178] sm:$0xff] %vm1020_vm0, %v9734_v48  ;;  %v4581_v33 = vld [vmem:[#allocation4 + $0x50] sm:$0x1] }
 0x1b1   : > { %4571 = vst [vmem:[#allocation4 + $0x20] sm:$0x1] %v4570_v17  ;;  %4518 = vst [vmem:[#allocation4 + $0x24] sm:$0x1] %v4517_v54  ;;  %v3965_v42 = vld [vmem:[#allocation3 + $0x128] sm:$0xff] }
 0x1b2   : > { %2084 = vst.msk [vmem:[#allocation3 + $0x138] sm:$0xff] %vm2070_vm11, %v2049_v38  ;;  %4303 = vmatprep.mubr.bf16.mxu0 %v3965_v42  ;;  %v3972_v1 = vld [vmem:[#allocation3 + $0x160] sm:$0xff]  ;;  %4574 = vst [vmem:[#allocation4 + $0x2c] sm:$0x1] %v4573_v49  ;;  %v4528_v49 = vld [vmem:[#allocation4 + $0x54] sm:$0x1] }
 0x1b3   : > { %4304 = vmatmul.mubr.bf16.gmra.mrb[48].mxu0 %v3964_v14  ;;  %10477 = vmatprep.mubr.msk.bf16.mxu1 %vm1020_vm0, %v3972_v1  ;;  %4498 = vst.msk [vmem:[#allocation4 + $0x4] sm:$0xf] %vm836_vm3, %v11071_v6  ;;  %4501 = vst.msk [vmem:[#allocation4 + $0xcc] sm:$0xf] %vm836_vm3, %v11071_v6 }
 0x1b4   : > { %4499 = vst.msk [vmem:[#allocation4 + $0x8] sm:$0x1] %vm839_vm12, %v11071_v6  ;;  %4503 = vst.msk [vmem:[#allocation4 + $0xd4] sm:$0x1] %vm839_vm12, %v11071_v6  ;;  %v4507_v47 = vld [vmem:[#allocation4] sm:$0x1] }
 0x1b5   : > { %4502 = vst.msk [vmem:[#allocation4 + $0xd0] sm:$0xf] %vm836_vm3, %v11071_v6  ;;  %v4508_v35 = vsel %vm12631_vm14, 0, %v4507_v47  ;;  %4521 = vst [vmem:[#allocation4 + $0x30] sm:$0x1] %v4520_v41 }
 0x1b6   : > { %v3059_v16 = vpop.permute.xlu0 %3058  ;;  %4509 = vst [vmem:[#allocation4] sm:$0x1] %v4508_v35  ;;  %4577 = vst [vmem:[#allocation4 + $0x38] sm:$0x1] %v4576_v56  ;;  %v6030_v40 = vld [vmem:[#allocation4] sm:$0xe] }
 0x1b7   : > { %v3975_v19 = vld [vmem:[#allocation3 + $0x178] sm:$0xff]  ;;  %3093 = vst.msk [vmem:[#allocation3 + $0x140] sm:$0xff] %vm1892_vm9, %v3059_v16  ;;  %4524 = vst [vmem:[#allocation4 + $0x3c] sm:$0x1] %v4523_v32  ;;  %v9866_v5 = vrot.slane %v6030_v40, 9 }
 0x1b8   : > { %10478 = vmatmul.mubr.msk.bf16.gmra.mrb[28].mxu1 %vm1020_vm0, %v3975_v19  ;;  %v1549_v12 = vpop.permute.xlu1 %1548  ;;  %v4584_v56 = vld [vmem:[#allocation4 + $0x5c] sm:$0x1] }
 0x1b9   : > { %1583 = vst.msk [vmem:[#allocation3 + $0x150] sm:$0xff] %vm1568_vm1, %v1549_v12  ;;  %v3967_v37 = vld [vmem:[#allocation3 + $0x138] sm:$0xff] }
 0x1ba   : > { %v5487_v22 = vld [vmem:[#allocation4 + $0x4] sm:$0xf] }
 0x1bb   : > { %v4563_v0 = vld [vmem:[#allocation4 + $0x8] sm:$0x1]  ;;  %v5544_v62 = vshll.u32 %v5487_v22, 16  ;;  %v5548_v3 = vshrl.u32 %v5487_v22, 16  ;;  %v6031_v63 = vld [vmem:[#allocation4 + $0x4] sm:$0xf] }
 0x1bc   : > { %v1873_v25 = vpop.permute.xlu1 %1872  ;;  %v4564_v50 = vsel %vm12639_vm15, 0, %v4563_v0  ;;  %v6128_v48 = vrot.slane %v6031_v63, 5  ;;  %v4529_v0 = vsel %vm12631_vm14, 0, %v4528_v49  ;;  %v4531_v22 = vld [vmem:[#allocation4 + $0x60] sm:$0x1] }
 0x1bd   : > { %1907 = vst.msk [vmem:[#allocation3 + $0x150] sm:$0xff] %vm1892_vm9, %v1873_v25  ;;  %4565 = vst [vmem:[#allocation4 + $0x8] sm:$0x1] %v4564_v50  ;;  %v5486_v26 = vld [vmem:[#allocation4] sm:$0xf]  ;;  %v5546_v31 = vrot.slane %v5544_v62, 5 }
 0x1be   : > { %v5535_v8 = vshrl.u32 %v5486_v26, 16  ;;  %v5538_v2 = vshll.u32 %v5486_v26, 16  ;;  %v5550_v53 = vrot.slane %v5548_v3, 4  ;;  %v6130_v55 = vrot.slane %v6128_v48, 4  ;;  %4530 = vst [vmem:[#allocation4 + $0x54] sm:$0x1] %v4529_v0 }
 0x1bf   : > { %v6129_v9 = vsel %vm11325_vm7, %v9866_v5, %v6128_v48  ;;  %v4585_v26 = vsel %vm12639_vm15, 0, %v4584_v56  ;;  %v4532_v62 = vsel %vm12631_vm14, 0, %v4531_v22  ;;  %v12715_v3 = vld [vmem:[%s14634_s2] ss:$0 sm:$0xff] }
 0x1c0   : > { %v2051_v60 = vpop.permute.xlu1 %2050  ;;  %v5537_v29 = vrot.slane %v5535_v8, 4  ;;  %v5540_v24 = vrot.slane %v5538_v2, 5  ;;  %v5551_v52 = vor.u32 %v5550_v53, %v5546_v31  ;;  %4586 = vst [vmem:[#allocation4 + $0x5c] sm:$0x1] %v4585_v26  ;;  %4533 = vst [vmem:[#allocation4 + $0x60] sm:$0x1] %v4532_v62 }
 0x1c1   : > { %2085 = vst.msk [vmem:[#allocation3 + $0x150] sm:$0xff] %vm2070_vm11, %v2051_v60  ;;  %v4578_v60 = vld [vmem:[#allocation4 + $0x44] sm:$0x1] }
 0x1c2   : > { %v5541_v45 = vor.u32 %v5540_v24, %v5537_v29  ;;  %v5552_v61 = vrot.slane %v5551_v52, 4  ;;  %v4579_v6 = vsel %vm12639_vm15, 0, %v4578_v60  ;;  %v4534_v60 = vld [vmem:[#allocation4 + $0x6c] sm:$0x1] }
 0x1c3   : > { %4580 = vst [vmem:[#allocation4 + $0x44] sm:$0x1] %v4579_v6 }
 0x1c4   : > { %v5488_v10 = vld [vmem:[#allocation4 + $0x8] sm:$0x1]  ;;  %v5542_v7 = vrot.slane %v5541_v45, 4 }
 0x1c5   : > { %v5554_v20 = vshll.u32 %v5488_v10, 16  ;;  %v6032_v51 = vld [vmem:[#allocation4 + $0x8] sm:$0x1] }
 0x1c6   : > { %v5547_v11 = vsel %vm11382_vm10, %v5542_v7, %v5546_v31  ;;  %v6131_v13 = vrot.slane %v6032_v51, 5 }
 0x1c7   : > { %v5556_v28 = vrot.slane %v5554_v20, 5 }
 0x1c8   : > { %v6132_v17 = vsel %vm11325_vm7, %v6130_v55, %v6131_v13  ;;  %v3970_v47 = vld [vmem:[#allocation3 + $0x150] sm:$0xff] }
 0x1c9   : > { %v5557_v18 = vsel %vm11382_vm10, %v5552_v61, %v5556_v28  ;;  %v9882_v54 = vcombine.low %v6129_v9, %v6132_v17 }
 0x1ca   : > { %v3603_v36 = vpop.permute.xlu0 %3602  ;;  %v9850_v34 = vcombine.low %v5547_v11, %v5557_v18  ;;  %v4587_v11 = vld [vmem:[#allocation4 + $0x68] sm:$0x1] }
 0x1cb   : > { %3637 = vst.msk [vmem:[#allocation3 + $0x140] sm:$0xff] %vm2070_vm11, %v3603_v36  ;;  %v4525_v36 = vld [vmem:[#allocation4 + $0x48] sm:$0x1]  ;;  %v4588_v48 = vsel %vm12639_vm15, 0, %v4587_v11 }
 0x1cc   : > { %5966 = vrot.lane.b32.xlu1 %v9850_v34, %s11070_s12  ;;  %v4526_v35 = vsel %vm12631_vm14, 0, %v4525_v36  ;;  %4589 = vst [vmem:[#allocation4 + $0x68] sm:$0x1] %v4588_v48  ;;  %v4535_v36 = vsel %vm12631_vm14, 0, %v4534_v60  ;;  %v5241_v48 = vld [vmem:[#allocation4 + $0x20] sm:$0x1] }
 0x1cd   : > { %4527 = vst [vmem:[#allocation4 + $0x48] sm:$0x1] %v4526_v35  ;;  %4536 = vst [vmem:[#allocation4 + $0x6c] sm:$0x1] %v4535_v36 }
 0x1ce   : > { %v2884_v58 = vpop.permute.xlu0 %2883 }
 0x1cf   : > { %2917 = vst.msk [vmem:[#allocation3 + $0x158] sm:$0xff] %vm1568_vm1, %v2884_v58  ;;  %v1551_v39 = vpop.permute.xlu1 %1550  ;;  %v4582_v58 = vsel %vm12639_vm15, 0, %v4581_v33  ;;  %v4590_v33 = vld [vmem:[#allocation4 + $0x74] sm:$0x1] }
 0x1d0   : > { %1584 = vst.msk [vmem:[#allocation3 + $0x168] sm:$0xff] %vm1568_vm1, %v1551_v39  ;;  %6286 = vrot.lane.b32.xlu1 %v9882_v54, %s11068_s10  ;;  %4583 = vst [vmem:[#allocation4 + $0x50] sm:$0x1] %v4582_v58  ;;  %v4591_v49 = vsel %vm12639_vm15, 0, %v4590_v33 }
 0x1d1   : > { %4592 = vst [vmem:[#allocation4 + $0x74] sm:$0x1] %v4591_v49 }
 0x1d2   : > { %v3061_v27 = vpop.permute.xlu0 %3060  ;;  %v3968_v43 = vld [vmem:[#allocation3 + $0x140] sm:$0xff] }
 0x1d3   : > { %3094 = vst.msk [vmem:[#allocation3 + $0x158] sm:$0xff] %vm1892_vm9, %v3061_v27  ;;  %4311 = vmatprep.mubr.bf16.mxu0 %v3968_v43 }
 0x1d4   : > { %4312 = vmatmul.mubr.bf16.gmra.mrb[52].mxu0 %v3967_v37 }
 0x1d5   : > { %v1875_v44 = vpop.permute.xlu1 %1874 }
 0x1d6   : > { %1908 = vst.msk [vmem:[#allocation3 + $0x168] sm:$0xff] %vm1892_vm9, %v1875_v44 }
 0x1d9   : > { %v2053_v30 = vpop.permute.xlu1 %2052 }
 0x1da   : > { %2086 = vst.msk [vmem:[#allocation3 + $0x168] sm:$0xff] %vm2070_vm11, %v2053_v30  ;;  %v10637_v30 = vld [vmem:[%s14635_s3 + $0x80] sm:$0xff]  }
 0x1db   : > { %10481 = vmatprep.subr.bf16.mxu0 %v10637_v30 }
 0x1dc   : > { %10482 = vmatpush3.bf16.msra.mxu0 %v10637_v30 }
 0x1e1   : > { %v3973_v9 = vld [vmem:[#allocation3 + $0x168] sm:$0xff] }
 0x1e2   : > { %v3605_v38 = vpop.permute.xlu0 %3604 }
 0x1e3   : > { %3638 = vst.msk [vmem:[#allocation3 + $0x158] sm:$0xff] %vm2070_vm11, %v3605_v38  ;;  %v10639_v38 = vld [vmem:[%s14635_s3 + $0x88] sm:$0xff]  }
 0x1e4   : > { %10483 = vmatprep.subr.bf16.mxu0 %v10639_v38 }
 0x1e5   : > { %10484 = vmatpush3.bf16.msra.mxu0 %v10639_v38 }
 0x1e6   : > { %v10201_v14 = vpop.f32.mrb[0].mxu0  ;;  %v2886_v12 = vpop.permute.xlu0 %2885 }
 0x1e7   : > { %v10202_v42 = vpop.f32.mrb[1].mxu0  ;;  %2918 = vst.msk [vmem:[#allocation3 + $0x170] sm:$0xff] %vm1568_vm1, %v2886_v12 }
 0x1e8   : > { %v10203_v1 = vadd.f32 %v10202_v42, %v10201_v14  ;;  %v10204_v19 = vpop.f32.mrb[2].mxu0 }
 0x1e9   : > { %v10205_v16 = vpop.f32.mrb[3].mxu0 }
 0x1ea   : > { %v10206_v25 = vadd.f32 %v10205_v16, %v10204_v19  ;;  %v3971_v50 = vld [vmem:[#allocation3 + $0x158] sm:$0xff]  ;;  %v4210_v31 = vadd.f32 %v10203_v1, %v12715_v3 }
 0x1eb   : > { %4319 = vmatprep.mubr.bf16.mxu0 %v3971_v50 }
 0x1ec   : > { %v3063_v37 = vpop.permute.xlu0 %3062  ;;  %4320 = vmatmul.mubr.bf16.gmra.mrb[56].mxu0 %v3970_v47  ;;  %v4213_v20 = vadd.f32 %v10206_v25, %v12715_v3  ;;  %v4537_v47 = vld [vmem:[#allocation4 + $0x78] sm:$0x1] }
 0x1ed   : > { %3095 = vst.msk [vmem:[#allocation3 + $0x170] sm:$0xff] %vm1892_vm9, %v3063_v37  ;;  %v4538_v58 = vsel %vm12631_vm14, 0, %v4537_v47 }
 0x1ee   : > { %v10207_v27 = vpop.f32.mrb[4].mxu0  ;;  %4539 = vst [vmem:[#allocation4 + $0x78] sm:$0x1] %v4538_v58 }
 0x1ef   : > { %v10208_v43 = vpop.f32.mrb[5].mxu0 }
 0x1f0   : > { %v10209_v39 = vadd.f32 %v10208_v43, %v10207_v27  ;;  %v10210_v23 = vpop.f32.mrb[6].mxu0 }
 0x1f1   : > { %v10211_v21 = vpop.f32.mrb[7].mxu0 }
 0x1f2   : > { %v10212_v59 = vadd.f32 %v10211_v21, %v10210_v23  ;;  %v4218_v10 = vadd.f32 %v10209_v39, %v12715_v3 }
 0x1f4   : > { %v4221_v53 = vadd.f32 %v10212_v59, %v12715_v3 }
 0x1f6   : > { %v10213_v41 = vpop.f32.mrb[8].mxu0 }
 0x1f7   : > { %v10214_v32 = vpop.f32.mrb[9].mxu0 }
 0x1f8   : > { %v12708_v8 = vadd.f32 %v10214_v32, %v10213_v41  ;;  %v10216_v2 = vpop.f32.mrb[10].mxu0 }
 0x1f9   : > { %v10217_v44 = vpop.f32.mrb[11].mxu0  ;;  %v3607_v24 = vpop.permute.xlu0 %3606 }
 0x1fa   : > { %v12717_v29 = vadd.f32 %v10217_v44, %v10216_v2  ;;  %3639 = vst.msk [vmem:[#allocation3 + $0x170] sm:$0xff] %vm2070_vm11, %v3607_v24 }
 0x1fb   : > { %v10451_v45 = vpop.f32.mrb[0].mxu1 }
 0x1fc   : > { %v4370_v7 = vpop.f32.mrb[1].mxu1  ;;  %v4379_v28 = vadd.f32 %v10451_v45, %v4218_v10 }
 0x1fd   : > { %v4371_v63 = vadd.f32 %v4370_v7, %v4210_v31  ;;  %v10452_v18 = vpop.f32.mrb[2].mxu1  ;;  %v5230_v7 = vld [vmem:[#allocation4 + $0xc] sm:$0xf] }
 0x1fe   : > { %v10219_v52 = vpop.f32.mrb[12].mxu0  ;;  %v4373_v34 = vpop.f32.mrb[3].mxu1  ;;  %v4651_v5 = vmin.f32 %v4379_v28, 0.0  ;;  %v4382_v13 = vadd.f32 %v10452_v18, %v4221_v53  ;;  %vm4619_vm12 = vcmp.gt.f32.partialorder %v4379_v28, 0.0 }
 0x1ff   : > { %v10220_v61 = vpop.f32.mrb[13].mxu0  ;;  %v4649_v17 = vmin.f32 %v4371_v63, 0.0  ;;  %v4374_v54 = vadd.f32 %v4373_v34, %v4213_v20  ;;  %vm4617_vm2 = vcmp.gt.f32.partialorder %v4371_v63, 0.0 }
 0x200   : > { %v12727_v40 = vadd.f32 %v10220_v61, %v10219_v52  ;;  %v10222_v51 = vpop.f32.mrb[14].mxu0  ;;  %v4685_v42 = vmul.f32 1.442695, %v4651_v5  ;;  %v4652_v1 = vmin.f32 %v4382_v13, 0.0  ;;  %vm4620_vm4 = vcmp.gt.f32.partialorder %v4382_v13, 0.0 }
 0x201   : > { %v10223_v55 = vpop.f32.mrb[15].mxu0  ;;  %v3974_v14 = vld [vmem:[#allocation3 + $0x170] sm:$0xff]  ;;  %v4681_v16 = vmul.f32 1.442695, %v4649_v17  ;;  %v4650_v12 = vmin.f32 %v4374_v54, 0.0  ;;  %vm4618_vm5 = vcmp.gt.f32.partialorder %v4374_v54, 0.0 }
 0x202   : > { %v12734_v19 = vadd.f32 %v10223_v55, %v10222_v51  ;;  %4327 = vmatprep.mubr.bf16.mxu0 %v3974_v14  ;;  %10807 = vpow2.f32 %v4685_v42  ;;  %v4687_v25 = vmul.f32 1.442695, %v4652_v1  ;;  %v5237_v52 = vld [vmem:[#allocation4 + $0x18] sm:$0xf]  ;;  %v5234_v5 = vld [vmem:[#allocation4 + $0x14] sm:$0x1] }
 0x203   : > { %4328 = vmatmul.mubr.bf16.gmra.mrb[60].mxu0 %v3973_v9  ;;  %10809 = vpow2.f32 %v4681_v16  ;;  %v4683_v6 = vmul.f32 1.442695, %v4650_v12 }
 0x204   : > { %10811 = vpow2.f32 %v4687_v25 }
 0x205   : > { %10813 = vpow2.f32 %v4683_v6 }
 0x20c   : > { %v10808_v35 = vpop.eup %10807 }
 0x20d   : > { %v10810_v0 = vpop.eup %10809  ;;  %v9772_v37 = vadd.f32 -1.0, %v10808_v35 }
 0x20e   : > { %v10812_v50 = vpop.eup %10811  ;;  %v9770_v27 = vadd.f32 -1.0, %v10810_v0 }
 0x20f   : > { %v10814_v43 = vpop.eup %10813  ;;  %v4779_v39 = vsel %vm4619_vm12, %v4379_v28, %v9772_v37  ;;  %v9773_v23 = vadd.f32 -1.0, %v10812_v50  ;;  %vm12744_vm12 = vmand %vm836_vm3, %vm4561_vm13 }
 0x210   : > { %v4777_v21 = vsel %vm4617_vm2, %v4371_v63, %v9770_v27  ;;  %v9771_v59 = vadd.f32 -1.0, %v10814_v43  ;;  %v10154_v41 = vpack.c.bf16 %v4779_v39, %v4779_v39  ;;  %vm12750_vm2 = vmor %vm4505_vm8, %vm4905_vm6 }
 0x211   : > { %v10152_v56 = vpack.c.bf16 %v4777_v21, %v4777_v21  ;;  %v4780_v32 = vsel %vm4620_vm4, %v4382_v13, %v9773_v23  ;;  %v4226_v23 = vadd.f32 %v12708_v8, %v12715_v3  ;;  %v4229_v21 = vadd.f32 %v12717_v29, %v12715_v3 }
 0x212   : > { %v4778_v26 = vsel %vm4618_vm5, %v4374_v54, %v9771_v59  ;;  %v4925_v22 = vshrl.u32 %v10154_v41, 16  ;;  %v10155_v2 = vpack.c.bf16 %v4780_v32, %v4780_v32  ;;  %v4928_v10 = vshll.u32 %v10154_v41, 16 }
 0x213   : > { %v4908_v62 = vshrl.u32 %v10152_v56, 16  ;;  %v10153_v44 = vpack.c.bf16 %v4778_v26, %v4778_v26  ;;  %v4911_v45 = vshll.u32 %v10152_v56, 16  ;;  %v4234_v32 = vadd.f32 %v12727_v40, %v12715_v3 }
 0x214   : > { %v4927_v24 = vrot.slane %v4925_v22, 7  ;;  %v4933_v31 = vshrl.u32 %v10155_v2, 16  ;;  %v4936_v11 = vshll.u32 %v10155_v2, 16  ;;  %v4237_v26 = vadd.f32 %v12734_v19, %v12715_v3 }
 0x215   : > { %v4910_v53 = vrot.slane %v4908_v62, 7  ;;  %v4916_v20 = vshrl.u32 %v10153_v44, 16  ;;  %v4919_v51 = vshll.u32 %v10153_v44, 16 }
 0x216   : > { %v4930_v28 = vor.u32 %v4928_v10, %v4927_v24  ;;  %v4935_v61 = vrot.slane %v4933_v31, 7  ;;  %v4931_v13 = vrot.slane %v4927_v24, 4 }
 0x217   : > { %v4913_v63 = vor.u32 %v4911_v45, %v4910_v53  ;;  %v4918_v18 = vrot.slane %v4916_v20, 7  ;;  %v4914_v54 = vrot.slane %v4910_v53, 4 }
 0x218   : > { %v5238_v55 = vsel %vm12744_vm12, %v4930_v28, %v5237_v52  ;;  %v4938_v9 = vor.u32 %v4936_v11, %v4935_v61  ;;  %v4940_v17 = vrot.slane %v4935_v61, 4 }
 0x219   : > { %v5231_v38 = vsel %vm12744_vm12, %v4913_v63, %v5230_v7  ;;  %v4921_v14 = vor.u32 %v4919_v51, %v4918_v18  ;;  %v4923_v42 = vrot.slane %v4918_v18, 4  ;;  %5239 = vst [vmem:[#allocation4 + $0x18] sm:$0xf] %v5238_v55 }
 0x21a   : > { %5232 = vst [vmem:[#allocation4 + $0xc] sm:$0xf] %v5231_v38  ;;  %v4939_v1 = vsel %vm12750_vm2, %v4931_v13, %v4938_v9  ;;  %v5242_v16 = vsel %vm12631_vm14, %v4940_v17, %v5241_v48 }
 0x21b   : > { %v4922_v12 = vsel %vm12750_vm2, %v4914_v54, %v4921_v14  ;;  %v5235_v25 = vsel %vm12631_vm14, %v4923_v42, %v5234_v5  ;;  %5240 = vst.msk [vmem:[#allocation4 + $0x1c] sm:$0xf] %vm836_vm3, %v4939_v1  ;;  %5243 = vst [vmem:[#allocation4 + $0x20] sm:$0x1] %v5242_v16 }
 0x21c   : > { %5233 = vst.msk [vmem:[#allocation4 + $0x10] sm:$0xf] %vm836_vm3, %v4922_v12  ;;  %5236 = vst [vmem:[#allocation4 + $0x14] sm:$0x1] %v5235_v25 }
 0x21e   : > { %v10225_v60 = vpop.f32.mrb[16].mxu0 }
 0x21f   : > { %v10226_v6 = vpop.f32.mrb[17].mxu0 }
 0x220   : > { %v12768_v36 = vadd.f32 %v10226_v6, %v10225_v60  ;;  %v10228_v33 = vpop.f32.mrb[18].mxu0  ;;  %v7041_v45 = vld [vmem:[#allocation4 + $0x18] sm:$0xe] }
 0x221   : > { %v10229_v49 = vpop.f32.mrb[19].mxu0  ;;  %v7038_v35 = vld [vmem:[#allocation4 + $0xc] sm:$0xe]  ;;  %v9931_v17 = vrot.slane %v7041_v45, 9 }
 0x222   : > { %v12770_v47 = vadd.f32 %v10229_v49, %v10228_v33  ;;  %v6033_v58 = vld [vmem:[#allocation4 + $0xc] sm:$0xe]  ;;  %v9930_v27 = vrot.slane %v7038_v35, 9  ;;  %v7042_v62 = vld [vmem:[#allocation4 + $0x1c] sm:$0xf] }
 0x223   : > { %v10633_v0 = vld [vmem:[#allocation4 + $0xc] sm:$0xff]   ;;  %v7040_v50 = vld [vmem:[#allocation4 + $0x14] sm:$0x1]  ;;  %v9867_v41 = vrot.slane %v6033_v58, 9  ;;  %v7043_v44 = vld [vmem:[#allocation4 + $0x20] sm:$0x1] }
 0x224   : > { %v7039_v37 = vld [vmem:[#allocation4 + $0x10] sm:$0xf]  ;;  %6462 = vrot.lane.b32.xlu1 %v10633_v0, %s11069_s11  ;;  %v6035_v59 = vld [vmem:[#allocation4 + $0x14] sm:$0x1]  ;;  %v7139_v2 = vrot.slane %v7040_v50, 5  ;;  %v7143_v10 = vrot.slane %v7042_v62, 5 }
 0x225   : > { %v7136_v43 = vrot.slane %v7039_v37, 5  ;;  %v6034_v39 = vld [vmem:[#allocation4 + $0x10] sm:$0xf]  ;;  %v6138_v29 = vrot.slane %v6035_v59, 5  ;;  %v5489_v31 = vld [vmem:[#allocation4 + $0xc] sm:$0xf] }
 0x226   : > { %v6135_v56 = vrot.slane %v6034_v39, 5  ;;  %v5490_v20 = vld [vmem:[#allocation4 + $0x10] sm:$0xf]  ;;  %v5559_v19 = vshrl.u32 %v5489_v31, 16  ;;  %v5562_v52 = vshll.u32 %v5489_v31, 16  ;;  %v7145_v11 = vrot.slane %v7143_v10, 4 }
 0x227   : > { %v7138_v22 = vrot.slane %v7136_v43, 4  ;;  %v7137_v8 = vsel %vm11325_vm7, %v9930_v27, %v7136_v43  ;;  %v7146_v63 = vrot.slane %v7043_v44, 5  ;;  %v5568_v54 = vshll.u32 %v5490_v20, 16  ;;  %v10634_v60 = vld [vmem:[#allocation4 + $0x18] sm:$0xff]   ;;  %v5491_v6 = vld [vmem:[#allocation4 + $0x14] sm:$0x1] }
 0x228   : > { %v6137_v24 = vrot.slane %v6135_v56, 4  ;;  %v6136_v40 = vsel %vm11325_vm7, %v9867_v41, %v6135_v56  ;;  %v5561_v5 = vrot.slane %v5559_v19, 4  ;;  %v5564_v13 = vrot.slane %v5562_v52, 5  ;;  %v10635_v58 = vld [vmem:[#allocation4 + $0x18] sm:$0xff]   ;;  %v8081_v62 = vld [vmem:[#allocation4 + $0x20] sm:$0x1] }
 0x229   : > { %v7140_v53 = vsel %vm11325_vm7, %v7138_v22, %v7139_v2  ;;  %v7147_v1 = vsel %vm11325_vm7, %v7145_v11, %v7146_v63  ;;  %v5572_v16 = vshrl.u32 %v5490_v20, 16  ;;  %v7144_v0 = vsel %vm11325_vm7, %v9931_v17, %v7143_v10  ;;  %v6037_v39 = vld [vmem:[#allocation4 + $0x1c] sm:$0xf]  ;;  %v6038_v44 = vld [vmem:[#allocation4 + $0x20] sm:$0x1] }
 0x22a   : > { %v10455_v7 = vpop.f32.mrb[4].mxu1  ;;  %v9946_v28 = vcombine.low %v7137_v8, %v7140_v53  ;;  %v6139_v61 = vsel %vm11325_vm7, %v6137_v24, %v6138_v29  ;;  %v5565_v33 = vor.u32 %v5564_v13, %v5561_v5  ;;  %v5570_v37 = vrot.slane %v5568_v54, 5  ;;  %v8080_v41 = vld [vmem:[#allocation4 + $0x1c] sm:$0xf]  ;;  %v7535_v24 = vld [vmem:[#allocation4 + $0x18] sm:$0xf] }
 0x22b   : > { %v4386_v18 = vpop.f32.mrb[5].mxu1  ;;  %v12789_v51 = vadd.f32 %v10455_v7, %v4234_v32  ;;  %v9883_v48 = vcombine.low %v6136_v40, %v6139_v61  ;;  %v9947_v43 = vcombine.low %v7144_v0, %v7147_v1  ;;  %v5578_v59 = vshll.u32 %v5491_v6, 16  ;;  %v6036_v31 = vld [vmem:[#allocation4 + $0x18] sm:$0xe]  ;;  %v7536_v7 = vld [vmem:[#allocation4 + $0x1c] sm:$0xf] }
 0x22c   : > { %v12791_v55 = vadd.f32 %v4386_v18, %v4226_v23  ;;  %v10456_v9 = vpop.f32.mrb[6].mxu1  ;;  %7294 = vrot.lane.b32.xlu0 %v9946_v28, %s11070_s12  ;;  %v5566_v32 = vrot.slane %v5565_v33, 4  ;;  %v6142_v2 = vrot.slane %v6037_v39, 5  ;;  %v8177_v8 = vrot.slane %v8080_v41, 5 }
 0x22d   : > { %v4389_v38 = vpop.f32.mrb[7].mxu1  ;;  %v4655_v14 = vmin.f32 %v12789_v51, 0.0  ;;  %v12795_v42 = vadd.f32 %v10456_v9, %v4237_v26  ;;  %6288 = vrot.lane.b32.xlu1 %v9883_v48, %s11068_s10  ;;  %v8079_v26 = vld [vmem:[#allocation4 + $0x18] sm:$0xe]  ;;  %v5580_v10 = vrot.slane %v5578_v59, 5  ;;  %v8180_v52 = vrot.slane %v8081_v62, 5 }
 0x22e   : > { %v4653_v12 = vmin.f32 %v12791_v55, 0.0  ;;  %v12801_v25 = vadd.f32 %v4389_v38, %v4229_v21  ;;  %v5574_v21 = vrot.slane %v5572_v16, 4  ;;  %v6144_v53 = vrot.slane %v6142_v2, 4 }
 0x22f   : > { %v4693_v49 = vmul.f32 1.442695, %v4655_v14  ;;  %v4656_v35 = vmin.f32 %v12795_v42, 0.0  ;;  %v9994_v40 = vrot.slane %v8079_v26, 9  ;;  %v5571_v20 = vsel %vm11382_vm10, %v5566_v32, %v5570_v37  ;;  %v5493_v32 = vld [vmem:[#allocation4 + $0x1c] sm:$0xf] }
 0x230   : > { %v4689_v50 = vmul.f32 1.442695, %v4653_v12  ;;  %v4654_v27 = vmin.f32 %v12801_v25, 0.0  ;;  %7471 = vrot.lane.b32.xlu0 %v10634_v60, %s11068_s10  ;;  %v5575_v22 = vor.u32 %v5574_v21, %v5570_v37  ;;  %v8179_v19 = vrot.slane %v8177_v8, 4 }
 0x231   : > { %10815 = vpow2.f32 %v4693_v49  ;;  %v4695_v23 = vmul.f32 1.442695, %v4656_v35  ;;  %6464 = vrot.lane.b32.xlu1 %v10635_v58, %s11069_s11  ;;  %v6145_v11 = vrot.slane %v6038_v44, 5  ;;  %v8178_v63 = vsel %vm11325_vm7, %v9994_v40, %v8177_v8 }
 0x232   : > { %10817 = vpow2.f32 %v4689_v50  ;;  %v4691_v56 = vmul.f32 1.442695, %v4654_v27  ;;  %v5576_v29 = vrot.slane %v5575_v22, 4  ;;  %v7584_v18 = vshrl.u32 %v7535_v24, 16  ;;  %v12838_v27 = vld [vmem:[#allocation4 + $0x18] sm:$0xf] }
 0x233   : > { %10819 = vpow2.f32 %v4695_v23  ;;  %v8181_v9 = vsel %vm11325_vm7, %v8179_v19, %v8180_v52  ;;  %v7587_v17 = vshll.u32 %v7535_v24, 16  ;;  %v9868_v38 = vrot.slane %v6036_v31, 9  ;;  %v5244_v19 = vld [vmem:[#allocation4 + $0x24] sm:$0xf] }
 0x234   : > { %10821 = vpow2.f32 %v4691_v56  ;;  %7296 = vrot.lane.b32.xlu0 %v9947_v43, %s11070_s12  ;;  %v5581_v61 = vsel %vm11382_vm10, %v5576_v29, %v5580_v10  ;;  %v6146_v14 = vsel %vm11325_vm7, %v6144_v53, %v6145_v11  ;;  %v10010_v1 = vcombine.low %v8178_v63, %v8181_v9 }
 0x235   : > { %v10231_v45 = vpop.f32.mrb[20].mxu0  ;;  %v9851_v13 = vcombine.low %v5571_v20, %v5581_v61  ;;  %v7593_v16 = vshll.u32 %v7536_v7, 16  ;;  %v12822_v12 = vadd.f32 %v12768_v36, %v12715_v3  ;;  %v7597_v6 = vshrl.u32 %v7536_v7, 16 }
 0x236   : > { %v10232_v28 = vpop.f32.mrb[21].mxu0  ;;  %vm4621_vm8 = vcmp.gt.f32.partialorder %v12791_v55, 0.0  ;;  %vm4623_vm13 = vcmp.gt.f32.partialorder %v12789_v51, 0.0  ;;  %v12829_v49 = vadd.f32 %v12770_v47, %v12715_v3  ;;  %v6143_v35 = vsel %vm11325_vm7, %v9868_v38, %v6142_v2  ;;  %8351 = vst.msk [vmem:[#allocation5 + $0x10] sm:$0xff] %vm1020_vm0, %v10010_v1 }
 0x237   : > { %v10233_v48 = vadd.f32 %v10232_v28, %v10231_v45  ;;  %v10234_v5 = vpop.f32.mrb[22].mxu0  ;;  %5968 = vrot.lane.b32.xlu1 %v9851_v13, %s11070_s12  ;;  %v9884_v0 = vcombine.low %v6143_v35, %v6146_v14  ;;  %v12834_v37 = vrot.slane %v7584_v18, 4  ;;  %v12836_v50 = vrot.slane %v7587_v17, 5  ;;  %v5251_v18 = vld [vmem:[#allocation4 + $0x30] sm:$0xf] }
 0x238   : > { %v10235_v54 = vpop.f32.mrb[23].mxu0  ;;  %vm4622_vm4 = vcmp.gt.f32.partialorder %v12801_v25, 0.0  ;;  %vm4624_vm5 = vcmp.gt.f32.partialorder %v12795_v42, 0.0  ;;  %v12842_v47 = vrot.slane %v7593_v16, 5  ;;  %v12851_v56 = vrot.slane %v7597_v6, 4 }
 0x239   : > { %v10236_v60 = vadd.f32 %v10235_v54, %v10234_v5  ;;  %v12848_v41 = vadd.f32 %v10233_v48, %v12715_v3  ;;  %v5583_v62 = vshrl.u32 %v12838_v27, 16  ;;  %v7590_v8 = vor.u32 %v12836_v50, %v12834_v37  ;;  %v5255_v17 = vld [vmem:[#allocation4 + $0x38] sm:$0x1]  ;;  %v5248_v6 = vld [vmem:[#allocation4 + $0x2c] sm:$0x1] }
 0x23a   : > { %v5586_v24 = vshll.u32 %v12838_v27, 16  ;;  %v5592_v53 = vshll.u32 %v5493_v32, 16  ;;  %v5596_v48 = vshrl.u32 %v5493_v32, 16 }
 0x23b   : > { %v10816_v33 = vpop.eup %10815  ;;  %6290 = vrot.lane.b32.xlu1 %v9884_v0, %s11068_s10  ;;  %v4253_v45 = vadd.f32 %v10236_v60, %v12715_v3  ;;  %v12868_v61 = vrot.slane %v5583_v62, 4  ;;  %v4593_v60 = vld [vmem:[#allocation4 + $0x80] sm:$0x1]  ;;  %v4540_v0 = vld [vmem:[#allocation4 + $0x84] sm:$0x1] }
 0x23c   : > { %v10818_v36 = vpop.eup %10817  ;;  %v9776_v58 = vadd.f32 -1.0, %v10816_v33  ;;  %v12870_v54 = vrot.slane %v5592_v53, 5  ;;  %v5598_v16 = vrot.slane %v5596_v48, 4  ;;  %v5588_v62 = vrot.slane %v5586_v24, 5 }
 0x23d   : > { %v10820_v43 = vpop.eup %10819  ;;  %v9774_v39 = vadd.f32 -1.0, %v10818_v36  ;;  %v8369_v20 = vld [vmem:[#allocation5 + $0x10] sm:$0xff]  ;;  %v7591_v48 = vrot.slane %v7590_v8, 4 }
 0x23e   : > { %v10822_v23 = vpop.eup %10821  ;;  %v4783_v21 = vsel %vm4623_vm13, %v12789_v51, %v9776_v58  ;;  %v9777_v59 = vadd.f32 -1.0, %v10820_v43  ;;  %10485 = vmatprep.mubr.msk.bf16.mxu0 %vm1020_vm0, %v8369_v20  ;;  %v5599_v53 = vor.u32 %v5598_v16, %v12870_v54  ;;  %v4541_v20 = vsel %vm12631_vm14, 0, %v4540_v0 }
 0x23f   : > { %v4781_v26 = vsel %vm4621_vm8, %v12791_v55, %v9774_v39  ;;  %v9775_v22 = vadd.f32 -1.0, %v10822_v23  ;;  %v10158_v2 = vpack.c.bf16 %v4783_v21, %v4783_v21  ;;  %v4596_v21 = vld [vmem:[#allocation4 + $0x8c] sm:$0x1]  ;;  %4542 = vst [vmem:[#allocation4 + $0x84] sm:$0x1] %v4541_v20 }
 0x240   : > { %v10156_v44 = vpack.c.bf16 %v4781_v26, %v4781_v26  ;;  %v4784_v51 = vsel %vm4624_vm5, %v12795_v42, %v9777_v59  ;;  %v7600_v42 = vor.u32 %v12851_v56, %v12842_v47  ;;  %v4543_v59 = vld [vmem:[#allocation4 + $0x90] sm:$0x1] }
 0x241   : > { %v4782_v29 = vsel %vm4622_vm4, %v12801_v25, %v9775_v22  ;;  %v4959_v10 = vshrl.u32 %v10158_v2, 16  ;;  %v10159_v31 = vpack.c.bf16 %v4784_v51, %v4784_v51  ;;  %v4962_v7 = vshll.u32 %v10158_v2, 16  ;;  %v7537_v2 = vld [vmem:[#allocation4 + $0x20] sm:$0x1] }
 0x242   : > { %v4942_v55 = vshrl.u32 %v10156_v44, 16  ;;  %v10157_v40 = vpack.c.bf16 %v4782_v29, %v4782_v29  ;;  %v4945_v11 = vshll.u32 %v10156_v44, 16  ;;  %v4594_v44 = vsel %vm12639_vm15, 0, %v4593_v60 }
 0x243   : > { %v4961_v52 = vrot.slane %v4959_v10, 7  ;;  %v4967_v28 = vshrl.u32 %v10159_v31, 16  ;;  %v4970_v9 = vshll.u32 %v10159_v31, 16  ;;  %4595 = vst [vmem:[#allocation4 + $0x80] sm:$0x1] %v4594_v44  ;;  %v5600_v60 = vrot.slane %v5599_v53, 4 }
 0x244   : > { %v4944_v25 = vrot.slane %v4942_v55, 7  ;;  %v4950_v63 = vshrl.u32 %v10157_v40, 16  ;;  %v4953_v1 = vshll.u32 %v10157_v40, 16  ;;  %v5494_v40 = vld [vmem:[#allocation4 + $0x20] sm:$0x1] }
 0x245   : > { %v4964_v5 = vor.u32 %v4962_v7, %v4961_v52  ;;  %v4969_v13 = vrot.slane %v4967_v28, 7  ;;  %v4965_v33 = vrot.slane %v4961_v52, 4 }
 0x246   : > { %v4947_v38 = vor.u32 %v4945_v11, %v4944_v25  ;;  %v4952_v14 = vrot.slane %v4950_v63, 7  ;;  %v4948_v27 = vrot.slane %v4944_v25, 4  ;;  %v7603_v11 = vshll.u32 %v7537_v2, 16 }
 0x247   : > { %v5252_v35 = vsel %vm12744_vm12, %v4964_v5, %v5251_v18  ;;  %v4972_v36 = vor.u32 %v4970_v9, %v4969_v13  ;;  %v4974_v58 = vrot.slane %v4969_v13, 4  ;;  %v5589_v5 = vor.u32 %v5588_v62, %v12868_v61 }
 0x248   : > { %v5245_v43 = vsel %vm12744_vm12, %v4947_v38, %v5244_v19  ;;  %v4955_v39 = vor.u32 %v4953_v1, %v4952_v14  ;;  %v4957_v23 = vrot.slane %v4952_v14, 4  ;;  %5253 = vst [vmem:[#allocation4 + $0x30] sm:$0xf] %v5252_v35  ;;  %v4597_v19 = vsel %vm12639_vm15, 0, %v4596_v21 }
 0x249   : > { %5246 = vst [vmem:[#allocation4 + $0x24] sm:$0xf] %v5245_v43  ;;  %v4973_v32 = vsel %vm12750_vm2, %v4965_v33, %v4972_v36  ;;  %v5256_v26 = vsel %vm12631_vm14, %v4974_v58, %v5255_v17  ;;  %v10459_v22 = vpop.f32.mrb[8].mxu1  ;;  %4598 = vst [vmem:[#allocation4 + $0x8c] sm:$0x1] %v4597_v19  ;;  %v5602_v38 = vshll.u32 %v5494_v40, 16 }
 0x24a   : > { %v4956_v51 = vsel %vm12750_vm2, %v4948_v27, %v4955_v39  ;;  %v5249_v29 = vsel %vm12631_vm14, %v4957_v23, %v5248_v6  ;;  %5254 = vst.msk [vmem:[#allocation4 + $0x34] sm:$0xf] %vm836_vm3, %v4973_v32  ;;  %5257 = vst [vmem:[#allocation4 + $0x38] sm:$0x1] %v5256_v26  ;;  %v4402_v10 = vpop.f32.mrb[9].mxu1  ;;  %v12888_v31 = vadd.f32 %v10459_v22, %v12848_v41  ;;  %v4544_v41 = vsel %vm12631_vm14, 0, %v4543_v59 }
 0x24b   : > { %5247 = vst.msk [vmem:[#allocation4 + $0x28] sm:$0xf] %vm836_vm3, %v4956_v51  ;;  %5250 = vst [vmem:[#allocation4 + $0x2c] sm:$0x1] %v5249_v29  ;;  %v12893_v24 = vadd.f32 %v4402_v10, %v12822_v12  ;;  %v10460_v55 = vpop.f32.mrb[10].mxu1  ;;  %v7605_v61 = vrot.slane %v7603_v11, 5  ;;  %v7596_v59 = vsel %vm11382_vm10, %v7591_v48, %v12842_v47 }
 0x24c   : > { %v4405_v52 = vpop.f32.mrb[11].mxu1  ;;  %v4659_v7 = vmin.f32 %v12888_v31, 0.0  ;;  %v12902_v28 = vadd.f32 %v10460_v55, %v4253_v45  ;;  %4545 = vst [vmem:[#allocation4 + $0x90] sm:$0x1] %v4544_v41  ;;  %v5590_v6 = vrot.slane %v5589_v5, 4  ;;  %v5604_v27 = vrot.slane %v5602_v38, 5 }
 0x24d   : > { %v10237_v25 = vpop.f32.mrb[24].mxu0  ;;  %v4657_v12 = vmin.f32 %v12893_v24, 0.0  ;;  %v12906_v63 = vadd.f32 %v4405_v52, %v12829_v49  ;;  %v7601_v49 = vrot.slane %v7600_v42, 4  ;;  %vm4627_vm6 = vcmp.gt.f32.partialorder %v12888_v31, 0.0 }
 0x24e   : > { %v10238_v18 = vpop.f32.mrb[25].mxu0  ;;  %v4701_v13 = vmul.f32 1.442695, %v4659_v7  ;;  %v4660_v45 = vmin.f32 %v12902_v28, 0.0  ;;  %v5605_v22 = vsel %vm11382_vm10, %v5600_v60, %v5604_v27  ;;  %vm4625_vm8 = vcmp.gt.f32.partialorder %v12893_v24, 0.0 }
 0x24f   : > { %v10239_v9 = vadd.f32 %v10238_v18, %v10237_v25  ;;  %v10240_v17 = vpop.f32.mrb[26].mxu0  ;;  %v4697_v14 = vmul.f32 1.442695, %v4657_v12  ;;  %v4658_v1 = vmin.f32 %v12906_v63, 0.0  ;;  %v7606_v56 = vsel %vm11382_vm10, %v7601_v49, %v7605_v61 }
 0x250   : > { %v10241_v16 = vpop.f32.mrb[27].mxu0  ;;  %10823 = vpow2.f32 %v4701_v13  ;;  %v4703_v37 = vmul.f32 1.442695, %v4660_v45  ;;  %v8082_v33 = vld [vmem:[#allocation4 + $0x24] sm:$0xe]  ;;  %v9978_v47 = vcombine.low %v7596_v59, %v7606_v56  ;;  %v5595_v20 = vsel %vm11382_vm10, %v5590_v6, %v12870_v54 }
 0x251   : > { %v10242_v50 = vadd.f32 %v10241_v16, %v10240_v17  ;;  %10825 = vpow2.f32 %v4697_v14  ;;  %v4699_v8 = vmul.f32 1.442695, %v4658_v1  ;;  %v4258_v36 = vadd.f32 %v10239_v9, %v12715_v3  ;;  %v7044_v0 = vld [vmem:[#allocation4 + $0x24] sm:$0xe] }
 0x252   : > { %v8083_v35 = vld [vmem:[#allocation4 + $0x28] sm:$0xf]  ;;  %10827 = vpow2.f32 %v4703_v37  ;;  %v7046_v32 = vld [vmem:[#allocation4 + $0x2c] sm:$0x1]  ;;  %v9995_v51 = vrot.slane %v8082_v33, 9  ;;  %v9932_v41 = vrot.slane %v7044_v0, 9  ;;  %v9852_v52 = vcombine.low %v5595_v20, %v5605_v22 }
 0x253   : > { %v10636_v58 = vld [vmem:[#allocation4 + $0x24] sm:$0xff]   ;;  %v8184_v43 = vrot.slane %v8083_v35, 5  ;;  %10829 = vpow2.f32 %v4699_v8  ;;  %v4261_v21 = vadd.f32 %v10242_v50, %v12715_v3  ;;  %v8084_v2 = vld [vmem:[#allocation4 + $0x2c] sm:$0x1]  ;;  %v7153_v44 = vrot.slane %v7046_v32, 5 }
 0x254   : > { %v10638_v42 = vld [vmem:[#allocation4 + $0x24] sm:$0xff]   ;;  %7473 = vrot.lane.b32.xlu0 %v10636_v58, %s11068_s10  ;;  %v8187_v10 = vrot.slane %v8084_v2, 5  ;;  %v12949_v5 = vld [vmem:[#allocation4 + $0x2c] sm:$0x1]  ;;  %vm4628_vm13 = vcmp.gt.f32.partialorder %v12902_v28, 0.0  ;;  %vm4626_vm4 = vcmp.gt.f32.partialorder %v12906_v63, 0.0 }
 0x255   : > { %v7045_v39 = vld [vmem:[#allocation4 + $0x28] sm:$0xf]  ;;  %v12921_v23 = vpop.f32.mrb[12].mxu1  ;;  %6466 = vrot.lane.b32.xlu1 %v10638_v42, %s11069_s11  ;;  %v8186_v29 = vrot.slane %v8184_v43, 4  ;;  %v6039_v25 = vld [vmem:[#allocation4 + $0x24] sm:$0xe]  ;;  %v8185_v54 = vsel %vm11325_vm7, %v9995_v51, %v8184_v43 }
 0x256   : > { %v7150_v26 = vrot.slane %v7045_v39, 5  ;;  %v4418_v62 = vpop.f32.mrb[13].mxu1  ;;  %v6040_v11 = vld [vmem:[#allocation4 + $0x28] sm:$0xf]  ;;  %v9869_v60 = vrot.slane %v6039_v25, 9  ;;  %v6152_v6 = vrot.slane %v12949_v5, 5 }
 0x257   : > { %v12932_v53 = vadd.f32 %v4418_v62, %v4258_v36  ;;  %v12934_v55 = vpop.f32.mrb[14].mxu1  ;;  %v8188_v7 = vsel %vm11325_vm7, %v8186_v29, %v8187_v10  ;;  %v6149_v17 = vrot.slane %v6040_v11, 5  ;;  %v12972_v22 = vld [vmem:[#allocation4 + $0x24] sm:$0xf]  ;;  %v5265_v20 = vld [vmem:[#allocation4 + $0x48] sm:$0xf] }
 0x258   : > { %v7152_v40 = vrot.slane %v7150_v26, 4  ;;  %v4421_v19 = vpop.f32.mrb[15].mxu1  ;;  %8015 = vrot.lane.b32.xlu0 %v9978_v47, %s11069_s11  ;;  %v7151_v45 = vsel %vm11325_vm7, %v9932_v41, %v7150_v26  ;;  %v10011_v9 = vcombine.low %v8185_v54, %v8188_v7  ;;  %v10640_v26 = vld [vmem:[#allocation4 + $0x30] sm:$0xff]  }
 0x259   : > { %v4661_v12 = vmin.f32 %v12932_v53, 0.0  ;;  %v12942_v18 = vadd.f32 %v4421_v19, %v4261_v21  ;;  %v10243_v13 = vpop.f32.mrb[28].mxu0  ;;  %5970 = vrot.lane.b32.xlu1 %v9852_v52, %s11070_s12  ;;  %v12962_v0 = vsel %vm11325_vm7, %v9869_v60, %v6149_v17  ;;  %vm4629_vm5 = vcmp.gt.f32.partialorder %v12932_v53, 0.0  ;;  %v5269_v54 = vld [vmem:[#allocation4 + $0x50] sm:$0x1] }
 0x25a   : > { %v7154_v48 = vsel %vm11325_vm7, %v7152_v40, %v7153_v44  ;;  %v10824_v38 = vpop.eup %10823  ;;  %v10244_v16 = vpop.f32.mrb[29].mxu0  ;;  %8352 = vst.msk [vmem:[#allocation5 + $0x28] sm:$0xff] %vm1020_vm0, %v10011_v9  ;;  %v12986_v10 = vrot.slane %v6149_v17, 4 }
 0x25b   : > { %v4705_v14 = vmul.f32 1.442695, %v4661_v12  ;;  %v4662_v1 = vmin.f32 %v12942_v18, 0.0  ;;  %v9948_v49 = vcombine.low %v7151_v45, %v7154_v48  ;;  %v10826_v37 = vpop.eup %10825  ;;  %v9780_v50 = vadd.f32 -1.0, %v10824_v38  ;;  %v10246_v61 = vpop.f32.mrb[30].mxu0 }
 0x25c   : > { %v10245_v8 = vadd.f32 %v10244_v16, %v10243_v13  ;;  %v10828_v33 = vpop.eup %10827  ;;  %v9778_v35 = vadd.f32 -1.0, %v10826_v37  ;;  %v10247_v58 = vpop.f32.mrb[31].mxu0 }
 0x25d   : > { %10831 = vpow2.f32 %v4705_v14  ;;  %v4707_v36 = vmul.f32 1.442695, %v4662_v1  ;;  %7298 = vrot.lane.b32.xlu0 %v9948_v49, %s11070_s12  ;;  %v10830_v27 = vpop.eup %10829  ;;  %v4787_v43 = vsel %vm4627_vm6, %v12888_v31, %v9780_v50  ;;  %v9781_v56 = vadd.f32 -1.0, %v10828_v33  ;;  %v5262_v33 = vld [vmem:[#allocation4 + $0x44] sm:$0x1] }
 0x25e   : > { %v4266_v42 = vadd.f32 %v10245_v8, %v12715_v3  ;;  %v10248_v39 = vadd.f32 %v10247_v58, %v10246_v61  ;;  %v4785_v21 = vsel %vm4625_vm8, %v12893_v24, %v9778_v35  ;;  %v9779_v59 = vadd.f32 -1.0, %v10830_v27 }
 0x25f   : > { %v10162_v32 = vpack.c.bf16 %v4787_v43, %v4787_v43  ;;  %10833 = vpow2.f32 %v4707_v36  ;;  %v10160_v2 = vpack.c.bf16 %v4785_v21, %v4785_v21  ;;  %v4788_v31 = vsel %vm4628_vm13, %v12902_v28, %v9781_v56 }
 0x260   : > { %v12978_v62 = vadd.f32 %v12921_v23, %v4266_v42  ;;  %v4269_v44 = vadd.f32 %v10248_v39, %v12715_v3  ;;  %v4786_v24 = vsel %vm4626_vm4, %v12906_v63, %v9779_v59  ;;  %v10163_v29 = vpack.c.bf16 %v4788_v31, %v4788_v31  ;;  %v5258_v3 = vld [vmem:[#allocation4 + $0x3c] sm:$0xf] }
 0x261   : > { %v4993_v51 = vshrl.u32 %v10162_v32, 16  ;;  %vm4630_vm6 = vcmp.gt.f32.partialorder %v12942_v18, 0.0  ;;  %7475 = vrot.lane.b32.xlu0 %v10640_v26, %s11068_s10  ;;  %v4976_v47 = vshrl.u32 %v10160_v2, 16  ;;  %v10161_v40 = vpack.c.bf16 %v4786_v24, %v4786_v24  ;;  %v10249_v7 = vpop.f32.mrb[32].mxu0  ;;  %v8372_v25 = vld [vmem:[#allocation5 + $0x28] sm:$0xff] }
 0x262   : > { %v4996_v28 = vshll.u32 %v10162_v32, 16  ;;  %v7608_v23 = vshrl.u32 %v12972_v22, 16  ;;  %v4979_v19 = vshll.u32 %v10160_v2, 16  ;;  %v5001_v52 = vshrl.u32 %v10163_v29, 16  ;;  %v10250_v45 = vpop.f32.mrb[33].mxu0  ;;  %10486 = vmatmul.mubr.msk.bf16.vlgmr.msra.gmra.mrb[64].mxu0 %vm1020_vm0, %v8372_v25 }
 0x263   : > { %v4995_v41 = vrot.slane %v4993_v51, 7  ;;  %v4663_v63 = vmin.f32 %v12978_v62, 0.0  ;;  %v4978_v11 = vrot.slane %v4976_v47, 7  ;;  %v4984_v12 = vshrl.u32 %v10161_v40, 16  ;;  %v10252_v1 = vpop.f32.mrb[34].mxu0 }
 0x264   : > { %v5004_v48 = vshll.u32 %v10163_v29, 16  ;;  %v12991_v13 = vadd.f32 %v12934_v55, %v4269_v44  ;;  %v4987_v9 = vshll.u32 %v10161_v40, 16  ;;  %v5003_v38 = vrot.slane %v5001_v52, 7  ;;  %v10253_v50 = vpop.f32.mrb[35].mxu0  ;;  %v13030_v52 = vld [vmem:[%s14634_s2] ss:$0 sm:$0xff] }
 0x265   : > { %v4998_v17 = vor.u32 %v4996_v28, %v4995_v41  ;;  %v4709_v14 = vmul.f32 1.442695, %v4663_v63  ;;  %v4981_v16 = vor.u32 %v4979_v19, %v4978_v11  ;;  %v4982_v49 = vrot.slane %v4978_v11, 4  ;;  %v7539_v19 = vld [vmem:[#allocation4 + $0x28] sm:$0xf] }
 0x266   : > { %v4986_v60 = vrot.slane %v4984_v12, 7  ;;  %v4999_v37 = vrot.slane %v4995_v41, 4  ;;  %v12994_v8 = vpop.f32.mrb[16].mxu1  ;;  %v5006_v35 = vor.u32 %v5004_v48, %v5003_v38  ;;  %v5008_v36 = vrot.slane %v5003_v38, 4  ;;  %v5276_v38 = vld [vmem:[#allocation4 + $0x5c] sm:$0x1] }
 0x267   : > { %v10832_v61 = vpop.eup %10831  ;;  %v5266_v55 = vsel %vm12744_vm12, %v4998_v17, %v5265_v20  ;;  %10835 = vpow2.f32 %v4709_v14  ;;  %v4434_v58 = vpop.f32.mrb[17].mxu1  ;;  %v5259_v27 = vsel %vm12744_vm12, %v4981_v16, %v5258_v3  ;;  %v4664_v26 = vmin.f32 %v12991_v13, 0.0 }
 0x268   : > { %v4989_v43 = vor.u32 %v4987_v9, %v4986_v60  ;;  %v4991_v56 = vrot.slane %v4986_v60, 4  ;;  %5267 = vst [vmem:[#allocation4 + $0x48] sm:$0xf] %v5266_v55  ;;  %v9782_v42 = vadd.f32 -1.0, %v10832_v61  ;;  %v13000_v39 = vpop.f32.mrb[18].mxu1  ;;  %v5007_v59 = vsel %vm12750_vm2, %v4999_v37, %v5006_v35  ;;  %v10641_v60 = vld [vmem:[#allocation4 + $0x30] sm:$0xff]  }
 0x269   : > { %v10834_v21 = vpop.eup %10833  ;;  %5260 = vst [vmem:[#allocation4 + $0x3c] sm:$0xf] %v5259_v27  ;;  %v5270_v32 = vsel %vm12631_vm14, %v5008_v36, %v5269_v54  ;;  %v10251_v2 = vadd.f32 %v10250_v45, %v10249_v7  ;;  %v4437_v31 = vpop.f32.mrb[19].mxu1  ;;  %5268 = vst.msk [vmem:[#allocation4 + $0x4c] sm:$0xf] %vm836_vm3, %v5007_v59  ;;  %v10254_v28 = vadd.f32 %v10253_v50, %v10252_v1  ;;  %vm4631_vm8 = vcmp.gt.f32.partialorder %v12978_v62, 0.0 }
 0x26a   : > { %v4990_v44 = vsel %vm12750_vm2, %v4982_v49, %v4989_v43  ;;  %v5263_v24 = vsel %vm12631_vm14, %v4991_v56, %v5262_v33  ;;  %5271 = vst [vmem:[#allocation4 + $0x50] sm:$0x1] %v5270_v32  ;;  %v4789_v51 = vsel %vm4629_vm5, %v12932_v53, %v9782_v42  ;;  %v9783_v29 = vadd.f32 -1.0, %v10834_v21  ;;  %v13021_v3 = vpop.f32.mrb[36].mxu0  ;;  %v5272_v45 = vld [vmem:[#allocation4 + $0x54] sm:$0xf] }
 0x26b   : > { %5261 = vst.msk [vmem:[#allocation4 + $0x40] sm:$0xf] %vm836_vm3, %v4990_v44  ;;  %5264 = vst [vmem:[#allocation4 + $0x44] sm:$0x1] %v5263_v24  ;;  %v10164_v47 = vpack.c.bf16 %v4789_v51, %v4789_v51  ;;  %v4711_v40 = vmul.f32 1.442695, %v4664_v26  ;;  %v6153_v20 = vsel %vm11325_vm7, %v12986_v10, %v6152_v6  ;;  %v4274_v5 = vadd.f32 %v13030_v52, %v10251_v2 }
 0x26c   : > { %v4790_v53 = vsel %vm4630_vm6, %v12942_v18, %v9783_v29  ;;  %v9885_v41 = vcombine.low %v12962_v0, %v6153_v20  ;;  %v13033_v63 = vpop.f32.mrb[37].mxu0  ;;  %v4277_v0 = vadd.f32 %v13030_v52, %v10254_v28  ;;  %v7611_v25 = vshll.u32 %v12972_v22, 16  ;;  %v7540_v35 = vld [vmem:[#allocation4 + $0x2c] sm:$0x1]  ;;  %v8085_v36 = vld [vmem:[#allocation4 + $0x30] sm:$0xe] }
 0x26d   : > { %v5010_v7 = vshrl.u32 %v10164_v47, 16  ;;  %v10165_v6 = vpack.c.bf16 %v4790_v53, %v4790_v53  ;;  %10837 = vpow2.f32 %v4711_v40  ;;  %v13036_v10 = vpop.f32.mrb[38].mxu0  ;;  %v13039_v18 = vadd.f32 %v4434_v58, %v4274_v5  ;;  %v8086_v59 = vld [vmem:[#allocation4 + $0x34] sm:$0xf] }
 0x26e   : > { %6292 = vrot.lane.b32.xlu1 %v9885_v41, %s11068_s10  ;;  %v7617_v11 = vshll.u32 %v7539_v19, 16  ;;  %v13043_v12 = vpop.f32.mrb[39].mxu0  ;;  %v5013_v54 = vshll.u32 %v10164_v47, 16  ;;  %v7610_v17 = vrot.slane %v7608_v23, 4  ;;  %v13048_v1 = vadd.f32 %v4437_v31, %v4277_v0  ;;  %v8087_v31 = vld [vmem:[#allocation4 + $0x38] sm:$0x1] }
 0x26f   : > { %v5012_v48 = vrot.slane %v5010_v7, 7  ;;  %v5018_v9 = vshrl.u32 %v10165_v6, 16  ;;  %v4665_v14 = vmin.f32 %v13039_v18, 0.0  ;;  %v7613_v16 = vrot.slane %v7611_v25, 5  ;;  %v7048_v53 = vld [vmem:[#allocation4 + $0x34] sm:$0xf] }
 0x270   : > { %v7621_v49 = vshrl.u32 %v7539_v19, 16  ;;  %v5021_v55 = vshll.u32 %v10165_v6, 16  ;;  %vm4632_vm13 = vcmp.gt.f32.partialorder %v12991_v13, 0.0  ;;  %v4666_v23 = vmin.f32 %v13048_v1, 0.0  ;;  %v7047_v19 = vld [vmem:[#allocation4 + $0x30] sm:$0xe] }
 0x271   : > { %v10836_v37 = vpop.eup %10835  ;;  %v5015_v50 = vor.u32 %v5013_v54, %v5012_v48  ;;  %v5016_v61 = vrot.slane %v5012_v48, 4  ;;  %v5020_v33 = vrot.slane %v5018_v9, 7  ;;  %v4713_v22 = vmul.f32 1.442695, %v4665_v14  ;;  %v7049_v25 = vld [vmem:[#allocation4 + $0x38] sm:$0x1] }
 0x272   : > { %v9784_v58 = vadd.f32 -1.0, %v10836_v37  ;;  %v7619_v27 = vrot.slane %v7617_v11, 5  ;;  %6468 = vrot.lane.b32.xlu1 %v10641_v60, %s11069_s11  ;;  %v7614_v21 = vor.u32 %v7613_v16, %v7610_v17  ;;  %v4715_v26 = vmul.f32 1.442695, %v4666_v23  ;;  %v13058_v44 = vpop.f32.mrb[40].mxu0 }
 0x273   : > { %v5273_v43 = vsel %vm12744_vm12, %v5015_v50, %v5272_v45  ;;  %v5023_v56 = vor.u32 %v5021_v55, %v5020_v33  ;;  %v5025_v42 = vrot.slane %v5020_v33, 4  ;;  %10839 = vpow2.f32 %v4713_v22  ;;  %v13064_v40 = vpop.f32.mrb[41].mxu0  ;;  %v5495_v37 = vld [vmem:[#allocation4 + $0x24] sm:$0xf] }
 0x274   : > { %5274 = vst [vmem:[#allocation4 + $0x54] sm:$0xf] %v5273_v43  ;;  %v4791_v32 = vsel %vm4631_vm8, %v12978_v62, %v9784_v58  ;;  %v7623_v2 = vrot.slane %v7621_v49, 4  ;;  %v7615_v47 = vrot.slane %v7614_v21, 4  ;;  %vm4633_vm4 = vcmp.gt.f32.partialorder %v13039_v18, 0.0  ;;  %v13070_v11 = vpop.f32.mrb[42].mxu0 }
 0x275   : > { %v5024_v24 = vsel %vm12750_vm2, %v5016_v61, %v5023_v56  ;;  %v5277_v51 = vsel %vm12631_vm14, %v5025_v42, %v5276_v38  ;;  %v10166_v29 = vpack.c.bf16 %v4791_v32, %v4791_v32  ;;  %10841 = vpow2.f32 %v4715_v26  ;;  %v13073_v17 = vpop.f32.mrb[43].mxu0  ;;  %v13075_v38 = vpop.f32.mrb[20].mxu1  ;;  %v5279_v61 = vld [vmem:[#allocation4 + $0x60] sm:$0xf]  ;;  %v5496_v43 = vld [vmem:[#allocation4 + $0x28] sm:$0xf] }
 0x276   : > { %5275 = vst.msk [vmem:[#allocation4 + $0x58] sm:$0xf] %vm836_vm3, %v5024_v24  ;;  %5278 = vst [vmem:[#allocation4 + $0x5c] sm:$0x1] %v5277_v51  ;;  %v7624_v62 = vor.u32 %v7623_v2, %v7619_v27  ;;  %v7627_v28 = vshll.u32 %v7540_v35, 16  ;;  %v9996_v20 = vrot.slane %v8085_v36, 9  ;;  %v7620_v6 = vsel %vm11382_vm10, %v7615_v47, %v7619_v27 }
 0x277   : > { %v10838_v41 = vpop.eup %10837  ;;  %v5027_v5 = vshrl.u32 %v10166_v29, 16  ;;  %v5030_v7 = vshll.u32 %v10166_v29, 16  ;;  %v8191_v0 = vrot.slane %v8086_v59, 5  ;;  %vm4634_vm5 = vcmp.gt.f32.partialorder %v13048_v1, 0.0  ;;  %v13079_v50 = vpop.f32.mrb[21].mxu1 }
 0x278   : > { %v9785_v48 = vadd.f32 -1.0, %v10838_v41  ;;  %v7625_v54 = vrot.slane %v7624_v62, 4  ;;  %v7629_v45 = vrot.slane %v7627_v28, 5  ;;  %v8194_v9 = vrot.slane %v8087_v31, 5  ;;  %v13086_v56 = vpop.f32.mrb[22].mxu1 }
 0x279   : > { %v5029_v14 = vrot.slane %v5027_v5, 7  ;;  %v8192_v16 = vsel %vm11325_vm7, %v9996_v20, %v8191_v0  ;;  %v8193_v49 = vrot.slane %v8191_v0, 4  ;;  %v9933_v60 = vrot.slane %v7047_v19, 9  ;;  %v5497_v24 = vld [vmem:[#allocation4 + $0x2c] sm:$0x1]  ;;  %v13095_v51 = vpop.f32.mrb[23].mxu1 }
 0x27a   : > { %v4792_v33 = vsel %vm4632_vm13, %v12991_v13, %v9785_v48  ;;  %v7630_v55 = vsel %vm11382_vm10, %v7625_v54, %v7629_v45  ;;  %v7157_v35 = vrot.slane %v7048_v53, 5  ;;  %v7160_v36 = vrot.slane %v7049_v25, 5  ;;  %v13099_v19 = vpop.f32.mrb[44].mxu0  ;;  %v5283_v41 = vld [vmem:[#allocation4 + $0x68] sm:$0x1] }
 0x27b   : > { %v5032_v58 = vor.u32 %v5030_v7, %v5029_v14  ;;  %v5033_v22 = vrot.slane %v5029_v14, 4  ;;  %v10167_v23 = vpack.c.bf16 %v4792_v33, %v4792_v33  ;;  %v9979_v27 = vcombine.low %v7620_v6, %v7630_v55  ;;  %v13102_v0 = vpop.f32.mrb[45].mxu0 }
 0x27c   : > { %v8195_v42 = vsel %vm11325_vm7, %v8193_v49, %v8194_v9  ;;  %v7158_v21 = vsel %vm11325_vm7, %v9933_v60, %v7157_v35  ;;  %v7159_v59 = vrot.slane %v7157_v35, 4  ;;  %v5607_v13 = vshrl.u32 %v5495_v37, 16  ;;  %v13106_v14 = vpop.f32.mrb[46].mxu0 }
 0x27d   : > { %v5280_v32 = vsel %vm12744_vm12, %v5032_v58, %v5279_v61  ;;  %v5035_v26 = vshrl.u32 %v10167_v23, 16  ;;  %v5038_v2 = vshll.u32 %v10167_v23, 16  ;;  %8017 = vrot.lane.b32.xlu0 %v9979_v27, %s11069_s11  ;;  %v10012_v31 = vcombine.low %v8192_v16, %v8195_v42  ;;  %v10840_v29 = vpop.eup %10839  ;;  %v10642_v58 = vld [vmem:[#allocation4 + $0x3c] sm:$0xff]   ;;  %v13121_v42 = vpop.f32.mrb[47].mxu0 }
 0x27e   : > { %5281 = vst [vmem:[#allocation4 + $0x60] sm:$0xf] %v5280_v32  ;;  %v7161_v47 = vsel %vm11325_vm7, %v7159_v59, %v7160_v36  ;;  %v5609_v62 = vrot.slane %v5607_v13, 4  ;;  %v5610_v28 = vshll.u32 %v5495_v37, 16  ;;  %v5616_v20 = vshll.u32 %v5496_v43, 16 }
 0x27f   : > { %v5037_v53 = vrot.slane %v5035_v26, 7  ;;  %v9786_v5 = vadd.f32 -1.0, %v10840_v29  ;;  %8353 = vst.msk [vmem:[#allocation5 + $0x40] sm:$0xff] %vm1020_vm0, %v10012_v31  ;;  %v9949_v7 = vcombine.low %v7158_v21, %v7161_v47  ;;  %v5620_v6 = vshrl.u32 %v5496_v43, 16  ;;  %v10842_v25 = vpop.eup %10841  ;;  %v6043_v32 = vld [vmem:[#allocation4 + $0x34] sm:$0xf] }
 0x280   : > { %v5612_v48 = vrot.slane %v5610_v28, 5  ;;  %v5618_v54 = vrot.slane %v5616_v20, 5  ;;  %v5626_v45 = vshll.u32 %v5497_v24, 16  ;;  %v10257_v9 = vadd.f32 %v13033_v63, %v13021_v3  ;;  %v6044_v29 = vld [vmem:[#allocation4 + $0x38] sm:$0x1] }
 0x281   : > { %v5040_v16 = vor.u32 %v5038_v2, %v5037_v53  ;;  %v5042_v49 = vrot.slane %v5037_v53, 4  ;;  %v4793_v60 = vsel %vm4633_vm4, %v13039_v18, %v9786_v5  ;;  %v9787_v37 = vadd.f32 -1.0, %v10842_v25  ;;  %7300 = vrot.lane.b32.xlu0 %v9949_v7, %s11070_s12  ;;  %v6042_v18 = vld [vmem:[#allocation4 + $0x30] sm:$0xe]  ;;  %v5290_v28 = vld [vmem:[#allocation4 + $0x74] sm:$0x1] }
 0x282   : > { %v10168_v61 = vpack.c.bf16 %v4793_v60, %v4793_v60  ;;  %v5613_v33 = vor.u32 %v5612_v48, %v5609_v62  ;;  %v5622_v55 = vrot.slane %v5620_v6, 4  ;;  %v4282_v36 = vadd.f32 %v13030_v52, %v10257_v9  ;;  %v7541_v6 = vld [vmem:[#allocation4 + $0x30] sm:$0xf] }
 0x283   : > { %v5041_v35 = vsel %vm12750_vm2, %v5033_v22, %v5040_v16  ;;  %v5284_v3 = vsel %vm12631_vm14, %v5042_v49, %v5283_v41  ;;  %v4794_v63 = vsel %vm4634_vm5, %v13048_v1, %v9787_v37  ;;  %v5286_v22 = vld [vmem:[#allocation4 + $0x6c] sm:$0xf]  ;;  %v5628_v59 = vrot.slane %v5626_v45, 5  ;;  %v8088_v41 = vld [vmem:[#allocation4 + $0x3c] sm:$0xe] }
 0x284   : > { %5282 = vst.msk [vmem:[#allocation4 + $0x64] sm:$0xf] %vm836_vm3, %v5041_v35  ;;  %5285 = vst [vmem:[#allocation4 + $0x68] sm:$0x1] %v5284_v3  ;;  %v5044_v23 = vshrl.u32 %v10168_v61, 16  ;;  %v10169_v27 = vpack.c.bf16 %v4794_v63, %v4794_v63  ;;  %v5614_v43 = vrot.slane %v5613_v33, 4  ;;  %v5623_v21 = vor.u32 %v5622_v55, %v5618_v54 }
 0x285   : > { %v13124_v13 = vadd.f32 %v12994_v8, %v4282_v36  ;;  %v10260_v1 = vadd.f32 %v13043_v12, %v13036_v10  ;;  %7477 = vrot.lane.b32.xlu0 %v10642_v58, %s11068_s10  ;;  %v5047_v2 = vshll.u32 %v10168_v61, 16  ;;  %v9870_v47 = vrot.slane %v6042_v18, 9  ;;  %v8089_v33 = vld [vmem:[#allocation4 + $0x40] sm:$0xf]  ;;  %v8090_v55 = vld [vmem:[#allocation4 + $0x44] sm:$0x1] }
 0x286   : > { %v5046_v26 = vrot.slane %v5044_v23, 7  ;;  %v5052_v31 = vshrl.u32 %v10169_v27, 16  ;;  %v8375_v24 = vld [vmem:[#allocation5 + $0x40] sm:$0xff]  ;;  %v5055_v62 = vshll.u32 %v10169_v27, 16  ;;  %v5624_v20 = vrot.slane %v5623_v21, 4  ;;  %v13134_v25 = vpop.f32.mrb[48].mxu0 }
 0x287   : > { %10489 = vmatprep.mubr.msk.bf16.mxu0 %vm1020_vm0, %v8375_v24  ;;  %v4667_v8 = vmin.f32 %v13124_v13, 0.0  ;;  %v4285_v53 = vadd.f32 %v13030_v52, %v10260_v1  ;;  %v5619_v5 = vsel %vm11382_vm10, %v5614_v43, %v5618_v54  ;;  %v6156_v7 = vrot.slane %v6043_v32, 5  ;;  %v13141_v49 = vpop.f32.mrb[49].mxu0  ;;  %v7542_v36 = vld [vmem:[#allocation4 + $0x34] sm:$0xf] }
 0x288   : > { %v5049_v10 = vor.u32 %v5047_v2, %v5046_v26  ;;  %v5054_v12 = vrot.slane %v5052_v31, 7  ;;  %v5050_v48 = vrot.slane %v5046_v26, 4  ;;  %v5629_v45 = vsel %vm11382_vm10, %v5624_v20, %v5628_v59  ;;  %v13145_v35 = vpop.f32.mrb[50].mxu0  ;;  %v7543_v43 = vld [vmem:[#allocation4 + $0x38] sm:$0x1] }
 0x289   : > { %v4717_v9 = vmul.f32 1.442695, %v4667_v8  ;;  %v13139_v16 = vadd.f32 %v13000_v39, %v4285_v53  ;;  %v9853_v54 = vcombine.low %v5619_v5, %v5629_v45  ;;  %v6157_v39 = vsel %vm11325_vm7, %v9870_v47, %v6156_v7  ;;  %v7051_v21 = vld [vmem:[#allocation4 + $0x40] sm:$0xf]  ;;  %v13156_v2 = vpop.f32.mrb[51].mxu0 }
 0x28a   : > { %v5287_v60 = vsel %vm12744_vm12, %v5049_v10, %v5286_v22  ;;  %v5057_v37 = vor.u32 %v5055_v62, %v5054_v12  ;;  %v5059_v61 = vrot.slane %v5054_v12, 4  ;;  %v6159_v63 = vrot.slane %v6044_v29, 5  ;;  %v7050_v22 = vld [vmem:[#allocation4 + $0x3c] sm:$0xe]  ;;  %v13160_v62 = vpop.f32.mrb[24].mxu1 }
 0x28b   : > { %5288 = vst [vmem:[#allocation4 + $0x6c] sm:$0xf] %v5287_v60  ;;  %10843 = vpow2.f32 %v4717_v9  ;;  %v4668_v3 = vmin.f32 %v13139_v16, 0.0  ;;  %5972 = vrot.lane.b32.xlu1 %v9853_v54, %s11070_s12  ;;  %v6158_v23 = vrot.slane %v6156_v7, 4  ;;  %v9997_v27 = vrot.slane %v8088_v41, 9 }
 0x28c   : > { %v5058_v58 = vsel %vm12750_vm2, %v5050_v48, %v5057_v37  ;;  %v5291_v18 = vsel %vm12631_vm14, %v5059_v61, %v5290_v28  ;;  %v8198_v1 = vrot.slane %v8089_v33, 5  ;;  %v8201_v32 = vrot.slane %v8090_v55, 5  ;;  %v7052_v53 = vld [vmem:[#allocation4 + $0x44] sm:$0x1]  ;;  %v5498_v7 = vld [vmem:[#allocation4 + $0x30] sm:$0xf] }
 0x28d   : > { %5289 = vst.msk [vmem:[#allocation4 + $0x70] sm:$0xf] %vm836_vm3, %v5058_v58  ;;  %5292 = vst [vmem:[#allocation4 + $0x74] sm:$0x1] %v5291_v18  ;;  %v4719_v59 = vmul.f32 1.442695, %v4668_v3  ;;  %v6160_v31 = vsel %vm11325_vm7, %v6158_v23, %v6159_v63 }
 0x28e   : > { %v7632_v26 = vshrl.u32 %v7541_v6, 16  ;;  %v7635_v24 = vshll.u32 %v7541_v6, 16  ;;  %v7641_v29 = vshll.u32 %v7542_v36, 16  ;;  %v7645_v47 = vshrl.u32 %v7542_v36, 16  ;;  %v5499_v60 = vld [vmem:[#allocation4 + $0x34] sm:$0xf] }
 0x28f   : > { %vm4635_vm6 = vcmp.gt.f32.partialorder %v13124_v13, 0.0  ;;  %10845 = vpow2.f32 %v4719_v59  ;;  %v9886_v28 = vcombine.low %v6157_v39, %v6160_v31  ;;  %v8199_v20 = vsel %vm11325_vm7, %v9997_v27, %v8198_v1  ;;  %v13168_v37 = vpop.f32.mrb[25].mxu1  ;;  %v5500_v3 = vld [vmem:[#allocation4 + $0x38] sm:$0x1]  ;;  %v10643_v36 = vld [vmem:[#allocation4 + $0x3c] sm:$0xff]  }
 0x290   : > { %v8200_v8 = vrot.slane %v8198_v1, 4  ;;  %v7634_v41 = vrot.slane %v7632_v26, 4  ;;  %v7637_v10 = vrot.slane %v7635_v24, 5  ;;  %v7643_v12 = vrot.slane %v7641_v29, 5  ;;  %v13170_v39 = vpop.f32.mrb[26].mxu1 }
 0x291   : > { %v7647_v5 = vrot.slane %v7645_v47, 4  ;;  %6294 = vrot.lane.b32.xlu1 %v9886_v28, %s11068_s10  ;;  %v7651_v48 = vshll.u32 %v7543_v43, 16  ;;  %v9934_v45 = vrot.slane %v7050_v22, 9  ;;  %v7164_v9 = vrot.slane %v7051_v21, 5  ;;  %v13175_v27 = vpop.f32.mrb[27].mxu1 }
 0x292   : > { %v8202_v6 = vsel %vm11325_vm7, %v8200_v8, %v8201_v32  ;;  %v7638_v54 = vor.u32 %v7637_v10, %v7634_v41  ;;  %v7167_v55 = vrot.slane %v7052_v53, 5  ;;  %vm4636_vm8 = vcmp.gt.f32.partialorder %v13139_v16, 0.0  ;;  %v8091_v1 = vld [vmem:[#allocation4 + $0x48] sm:$0xe]  ;;  %v8092_v47 = vld [vmem:[#allocation4 + $0x4c] sm:$0xf] }
 0x293   : > { %v10013_v61 = vcombine.low %v8199_v20, %v8202_v6  ;;  %v7648_v33 = vor.u32 %v7647_v5, %v7643_v12  ;;  %v7653_v63 = vrot.slane %v7651_v48, 5  ;;  %v7165_v58 = vsel %vm11325_vm7, %v9934_v45, %v7164_v9  ;;  %v8093_v28 = vld [vmem:[#allocation4 + $0x50] sm:$0x1]  ;;  %v6045_v10 = vld [vmem:[#allocation4 + $0x3c] sm:$0xe] }
 0x294   : > { %v7166_v18 = vrot.slane %v7164_v9, 4  ;;  %v5631_v23 = vshrl.u32 %v5498_v7, 16  ;;  %v7639_v43 = vrot.slane %v7638_v54, 4  ;;  %v5634_v21 = vshll.u32 %v5498_v7, 16  ;;  %v6549_v4 = vld [vmem:[#allocation4 + $0x68] sm:$0x1] }
 0x295   : > { %8354 = vst.msk [vmem:[#allocation5 + $0x58] sm:$0xff] %vm1020_vm0, %v10013_v61  ;;  %v7649_v22 = vrot.slane %v7648_v33, 4  ;;  %v5640_v59 = vshll.u32 %v5499_v60, 16  ;;  %v10844_v32 = vpop.eup %10843  ;;  %6470 = vrot.lane.b32.xlu1 %v10643_v36, %s11069_s11  ;;  %v5644_v24 = vshrl.u32 %v5499_v60, 16  ;;  %v5650_v29 = vshll.u32 %v5500_v3, 16  ;;  %v13192_v61 = vpop.f32.mrb[28].mxu1 }
 0x296   : > { %v7168_v26 = vsel %vm11325_vm7, %v7166_v18, %v7167_v55  ;;  %v5633_v31 = vrot.slane %v5631_v23, 4  ;;  %v9788_v20 = vadd.f32 -1.0, %v10844_v32  ;;  %v7644_v8 = vsel %vm11382_vm10, %v7639_v43, %v7643_v12  ;;  %v6046_v36 = vld [vmem:[#allocation4 + $0x40] sm:$0xf]  ;;  %v5293_v32 = vld [vmem:[#allocation4 + $0x78] sm:$0xf] }
 0x297   : > { %v7654_v53 = vsel %vm11382_vm10, %v7649_v22, %v7653_v63  ;;  %v9950_v41 = vcombine.low %v7165_v58, %v7168_v26  ;;  %v5636_v7 = vrot.slane %v5634_v21, 5  ;;  %v5642_v6 = vrot.slane %v5640_v59, 5  ;;  %v13195_v58 = vpop.f32.mrb[29].mxu1  ;;  %v5967_v59 = vpop.permute.xlu1 %5966 }
 0x298   : > { %v9980_v5 = vcombine.low %v7644_v8, %v7654_v53  ;;  %v5646_v48 = vrot.slane %v5644_v24, 4  ;;  %v4795_v45 = vsel %vm4635_vm6, %v13124_v13, %v9788_v20  ;;  %v5652_v9 = vrot.slane %v5650_v29, 5  ;;  %v13197_v21 = vpop.f32.mrb[30].mxu1  ;;  %v6047_v8 = vld [vmem:[#allocation4 + $0x44] sm:$0x1] }
 0x299   : > { %v10263_v60 = vadd.f32 %v13064_v40, %v13058_v44  ;;  %v10266_v12 = vadd.f32 %v13073_v17, %v13070_v11  ;;  %v10846_v54 = vpop.eup %10845  ;;  %v10170_v33 = vpack.c.bf16 %v4795_v45, %v4795_v45  ;;  %v5637_v55 = vor.u32 %v5636_v7, %v5633_v31  ;;  %v13210_v53 = vpop.f32.mrb[31].mxu1  ;;  %v10654_v45 = vld [vmem:[#allocation4] sm:$0xff]  }
 0x29a   : > { %8019 = vrot.lane.b32.xlu0 %v9980_v5, %s11069_s11  ;;  %v5647_v3 = vor.u32 %v5646_v48, %v5642_v6  ;;  %v9998_v63 = vrot.slane %v8091_v1, 9  ;;  %v9789_v13 = vadd.f32 -1.0, %v10846_v54  ;;  %v8205_v18 = vrot.slane %v8092_v47, 5  ;;  %v7544_v48 = vld [vmem:[#allocation4 + $0x3c] sm:$0xf]  ;;  %5470 = vst.msk [vmem:[#allocation5] sm:$0xff] %vm1020_vm0, %v10654_v45 }
 0x29b   : > { %v8208_v23 = vrot.slane %v8093_v28, 5  ;;  %v9871_v43 = vrot.slane %v6045_v10, 9  ;;  %v5061_v44 = vshrl.u32 %v10170_v33, 16  ;;  %v5064_v40 = vshll.u32 %v10170_v33, 16  ;;  %6014 = vst.msk [vmem:[#allocation5] sm:$0xff] %vm1568_vm1, %v5967_v59 }
 0x29c   : > { %v8378_v22 = vld [vmem:[#allocation5 + $0x58] sm:$0xff]  ;;  %v5638_v11 = vrot.slane %v5637_v55, 4  ;;  %v5648_v17 = vrot.slane %v5647_v3, 4  ;;  %v4796_v1 = vsel %vm4636_vm8, %v13139_v16, %v9789_v13  ;;  %v8206_v26 = vsel %vm11325_vm7, %v9998_v63, %v8205_v18  ;;  %v10644_v55 = vld [vmem:[#allocation4 + $0x48] sm:$0xff]   ;;  %v7545_v3 = vld [vmem:[#allocation4 + $0x40] sm:$0xf] }
 0x29d   : > { %10490 = vmatmul.mubr.msk.bf16.gmra.mrb[68].mxu0 %vm1020_vm0, %v8378_v22  ;;  %v8207_v31 = vrot.slane %v8205_v18, 4  ;;  %v6163_v24 = vrot.slane %v6046_v36, 5  ;;  %v5063_v29 = vrot.slane %v5061_v44, 7  ;;  %v10171_v47 = vpack.c.bf16 %v4796_v1, %v4796_v1  ;;  %v5297_v22 = vld [vmem:[#allocation4 + $0x80] sm:$0x1] }
 0x29e   : > { %7302 = vrot.lane.b32.xlu0 %v9950_v41, %s11070_s12  ;;  %v5643_v28 = vsel %vm11382_vm10, %v5638_v11, %v5642_v6  ;;  %v5653_v20 = vsel %vm11382_vm10, %v5648_v17, %v5652_v9  ;;  %v6166_v63 = vrot.slane %v6047_v8, 5  ;;  %v4290_v36 = vadd.f32 %v13030_v52, %v10263_v60  ;;  %v7546_v17 = vld [vmem:[#allocation4 + $0x44] sm:$0x1] }
 0x29f   : > { %v9854_v16 = vcombine.low %v5643_v28, %v5653_v20  ;;  %v8209_v10 = vsel %vm11325_vm7, %v8207_v31, %v8208_v23  ;;  %v6164_v5 = vsel %vm11325_vm7, %v9871_v43, %v6163_v24  ;;  %v6165_v7 = vrot.slane %v6163_v24, 4  ;;  %v8094_v24 = vld [vmem:[#allocation4 + $0x54] sm:$0xe]  ;;  %v8096_v20 = vld [vmem:[#allocation4 + $0x5c] sm:$0x1] }
 0x2a0   : > { %v5066_v41 = vor.u32 %v5064_v40, %v5063_v29  ;;  %v5067_v54 = vrot.slane %v5063_v29, 4  ;;  %v5069_v33 = vshrl.u32 %v10171_v47, 16  ;;  %v5072_v6 = vshll.u32 %v10171_v47, 16  ;;  %v6287_v40 = vpop.permute.xlu1 %6286  ;;  %v8095_v29 = vld [vmem:[#allocation4 + $0x58] sm:$0xf] }
 0x2a1   : > { %5974 = vrot.lane.b32.xlu1 %v9854_v16, %s11070_s12  ;;  %v10014_v9 = vcombine.low %v8206_v26, %v8209_v10  ;;  %v4293_v13 = vadd.f32 %v13030_v52, %v10266_v12  ;;  %v7656_v43 = vshrl.u32 %v7544_v48, 16  ;;  %v7659_v44 = vshll.u32 %v7544_v48, 16  ;;  %6334 = vst.msk [vmem:[#allocation5] sm:$0xff] %vm1892_vm9, %v6287_v40 }
 0x2a2   : > { %v5294_v18 = vsel %vm12744_vm12, %v5066_v41, %v5293_v32  ;;  %v5071_v23 = vrot.slane %v5069_v33, 7  ;;  %7479 = vrot.lane.b32.xlu0 %v10644_v55, %s11068_s10  ;;  %v6167_v60 = vsel %vm11325_vm7, %v6165_v7, %v6166_v63  ;;  %v13228_v12 = vadd.f32 %v13079_v50, %v4290_v36  ;;  %v13236_v50 = vld [vmem:[#allocation4 + $0x48] sm:$0xe]  ;;  %v7054_v7 = vld [vmem:[#allocation4 + $0x4c] sm:$0xf] }
 0x2a3   : > { %5295 = vst [vmem:[#allocation4 + $0x78] sm:$0xf] %v5294_v18  ;;  %8355 = vst.msk [vmem:[#allocation5 + $0x70] sm:$0xff] %vm1020_vm0, %v10014_v9  ;;  %v13231_v11 = vadd.f32 %v13095_v51, %v4293_v13  ;;  %v7665_v32 = vshll.u32 %v7545_v3, 16  ;;  %v9887_v26 = vcombine.low %v6164_v5, %v6167_v60  ;;  %v7658_v31 = vrot.slane %v7656_v43, 4  ;;  %v10645_v5 = vld [vmem:[#allocation4 + $0x48] sm:$0xff]  }
 0x2a4   : > { %v5074_v1 = vor.u32 %v5072_v6, %v5071_v23  ;;  %v5076_v59 = vrot.slane %v5071_v23, 4  ;;  %v4669_v47 = vmin.f32 %v13228_v12, 0.0  ;;  %v7661_v16 = vrot.slane %v7659_v44, 5  ;;  %v7055_v9 = vld [vmem:[#allocation4 + $0x50] sm:$0x1] }
 0x2a5   : > { %v4670_v28 = vmin.f32 %v13231_v11, 0.0  ;;  %6296 = vrot.lane.b32.xlu1 %v9887_v26, %s11068_s10  ;;  %v7667_v10 = vrot.slane %v7665_v32, 5  ;;  %v7669_v41 = vshrl.u32 %v7545_v3, 16  ;;  %v7675_v33 = vshll.u32 %v7546_v17, 16  ;;  %v5502_v23 = vld [vmem:[#allocation4 + $0x40] sm:$0xf] }
 0x2a6   : > { %v5075_v51 = vsel %vm12750_vm2, %v5067_v54, %v5074_v1  ;;  %v5298_v8 = vsel %vm12631_vm14, %v5076_v59, %v5297_v22  ;;  %v4721_v48 = vmul.f32 1.442695, %v4669_v47  ;;  %v7662_v6 = vor.u32 %v7661_v16, %v7658_v31  ;;  %v5501_v54 = vld [vmem:[#allocation4 + $0x3c] sm:$0xf] }
 0x2a7   : > { %5296 = vst.msk [vmem:[#allocation4 + $0x7c] sm:$0xf] %vm836_vm3, %v5075_v51  ;;  %5299 = vst [vmem:[#allocation4 + $0x80] sm:$0x1] %v5298_v8  ;;  %v4723_v45 = vmul.f32 1.442695, %v4670_v28 }
 0x2a8   : > { %v8212_v55 = vrot.slane %v8095_v29, 5  ;;  %v13244_v63 = vpop.f32.mrb[52].mxu0  ;;  %10847 = vpow2.f32 %v4721_v48  ;;  %v7671_v36 = vrot.slane %v7669_v41, 4  ;;  %v9999_v13 = vrot.slane %v8094_v24, 9  ;;  %v5503_v29 = vld [vmem:[#allocation4 + $0x44] sm:$0x1] }
 0x2a9   : > { %v8215_v18 = vrot.slane %v8096_v20, 5  ;;  %v13246_v43 = vpop.f32.mrb[53].mxu0  ;;  %10849 = vpow2.f32 %v4723_v45  ;;  %v7677_v40 = vrot.slane %v7675_v33, 5  ;;  %6472 = vrot.lane.b32.xlu1 %v10645_v5, %s11069_s11  ;;  %v9935_v22 = vrot.slane %v13236_v50, 9  ;;  %v4599_v20 = vld [vmem:[#allocation4 + $0x98] sm:$0x1]  ;;  %v6463_v5 = vpop.permute.xlu1 %6462 }
 0x2aa   : > { %v8381_v44 = vld [vmem:[#allocation5 + $0x70] sm:$0xff]  ;;  %v8214_v3 = vrot.slane %v8212_v55, 4  ;;  %v13250_v60 = vpop.f32.mrb[54].mxu0  ;;  %vm4637_vm13 = vcmp.gt.f32.partialorder %v13228_v12, 0.0  ;;  %v7663_v17 = vrot.slane %v7662_v6, 4  ;;  %v7672_v32 = vor.u32 %v7671_v36, %v7667_v10  ;;  %6510 = vst.msk [vmem:[#allocation5] sm:$0xff] %vm2070_vm11, %v6463_v5 }
 0x2ab   : > { %10493 = vmatprep.mubr.msk.bf16.mxu0 %vm1020_vm0, %v8381_v44  ;;  %v7171_v1 = vrot.slane %v7054_v7, 5  ;;  %v5655_v59 = vshrl.u32 %v5501_v54, 16  ;;  %v13254_v26 = vpop.f32.mrb[55].mxu0  ;;  %vm4638_vm4 = vcmp.gt.f32.partialorder %v13231_v11, 0.0  ;;  %v8213_v31 = vsel %vm11325_vm7, %v9999_v13, %v8212_v55  ;;  %v6048_v44 = vld [vmem:[#allocation4 + $0x48] sm:$0xe] }
 0x2ac   : > { %v8216_v24 = vsel %vm11325_vm7, %v8214_v3, %v8215_v18  ;;  %v5658_v47 = vshll.u32 %v5501_v54, 16  ;;  %v5664_v28 = vshll.u32 %v5502_v23, 16  ;;  %v7673_v50 = vrot.slane %v7672_v32, 4  ;;  %v6050_v3 = vld [vmem:[#allocation4 + $0x50] sm:$0x1] }
 0x2ad   : > { %v10015_v51 = vcombine.low %v8213_v31, %v8216_v24  ;;  %v7173_v8 = vrot.slane %v7171_v1, 4  ;;  %v7174_v16 = vrot.slane %v7055_v9, 5  ;;  %v5657_v7 = vrot.slane %v5655_v59, 4  ;;  %v6049_v9 = vld [vmem:[#allocation4 + $0x4c] sm:$0xf] }
 0x2ae   : > { %v5660_v48 = vrot.slane %v5658_v47, 5  ;;  %v5666_v45 = vrot.slane %v5664_v28, 5  ;;  %v5668_v41 = vshrl.u32 %v5502_v23, 16  ;;  %v7668_v33 = vsel %vm11382_vm10, %v7663_v17, %v7667_v10  ;;  %v7547_v59 = vld [vmem:[#allocation4 + $0x48] sm:$0xf] }
 0x2af   : > { %v7678_v6 = vsel %vm11382_vm10, %v7673_v50, %v7677_v40  ;;  %8356 = vst.msk [vmem:[#allocation5 + $0x88] sm:$0xff] %vm1020_vm0, %v10015_v51  ;;  %v5674_v55 = vshll.u32 %v5503_v29, 16  ;;  %v10269_v54 = vadd.f32 %v13102_v0, %v13099_v19  ;;  %v7172_v13 = vsel %vm11325_vm7, %v9935_v22, %v7171_v1  ;;  %v10655_v31 = vld [vmem:[%s14635_s3 + $0x40] sm:$0xff]  }
 0x2b0   : > { %v9981_v36 = vcombine.low %v7668_v33, %v7678_v6  ;;  %v5661_v18 = vor.u32 %v5660_v48, %v5657_v7  ;;  %v5670_v23 = vrot.slane %v5668_v41, 4  ;;  %v7175_v10 = vsel %vm11325_vm7, %v7173_v8, %v7174_v16  ;;  %10315 = vmatprep.subr.bf16.mxu1 %v10655_v31  ;;  %v10658_v6 = vld [vmem:[%s14635_s3 + $0x48] sm:$0xff]  }
 0x2b1   : > { %v4298_v40 = vadd.f32 %v13030_v52, %v10269_v54  ;;  %v10272_v17 = vadd.f32 %v13121_v42, %v13106_v14  ;;  %v4600_v19 = vsel %vm12639_vm15, 0, %v4599_v20  ;;  %v5676_v22 = vrot.slane %v5674_v55, 5 }
 0x2b2   : > { %8021 = vrot.lane.b32.xlu0 %v9981_v36, %s11069_s11  ;;  %v5662_v0 = vrot.slane %v5661_v18, 4  ;;  %v5671_v32 = vor.u32 %v5670_v23, %v5666_v45  ;;  %4601 = vst [vmem:[#allocation4 + $0x98] sm:$0x1] %v4600_v19  ;;  %v6170_v1 = vrot.slane %v6049_v9, 5  ;;  %v10848_v24 = vpop.eup %10847  ;;  %v9872_v42 = vrot.slane %v6048_v44, 9 }
 0x2b3   : > { %v13283_v29 = vadd.f32 %v13075_v38, %v4298_v40  ;;  %v4301_v14 = vadd.f32 %v13030_v52, %v10272_v17  ;;  %v6173_v47 = vrot.slane %v6050_v3, 5  ;;  %v10850_v28 = vpop.eup %10849  ;;  %v9790_v20 = vadd.f32 -1.0, %v10848_v24  ;;  %v10657_v38 = vld [vmem:[%s14635_s3] sm:$0xff]   ;;  %v7549_v3 = vld [vmem:[#allocation4 + $0x50] sm:$0x1] }
 0x2b4   : > { %v9951_v50 = vcombine.low %v7172_v13, %v7175_v10  ;;  %v5672_v51 = vrot.slane %v5671_v32, 4  ;;  %v9791_v8 = vadd.f32 -1.0, %v10850_v28  ;;  %v7680_v7 = vshrl.u32 %v7547_v59, 16  ;;  %10316 = vmatpush3.bf16.msra.mxu1 %v10657_v38  ;;  %v10646_v13 = vld [vmem:[#allocation4 + $0x54] sm:$0xff]   ;;  %v7548_v44 = vld [vmem:[#allocation4 + $0x4c] sm:$0xf]  ;;  %v13313_v10 = vpop.permute.xlu1 %6288 }
 0x2b5   : > { %v4671_v16 = vmin.f32 %v13283_v29, 0.0  ;;  %v13288_v5 = vadd.f32 %v13086_v56, %v4301_v14  ;;  %v4797_v52 = vsel %vm4637_vm13, %v13228_v12, %v9790_v20  ;;  %v5667_v41 = vsel %vm11382_vm10, %v5662_v0, %v5666_v45  ;;  %10317 = vmatprep.subr.bf16.mxu1 %v10658_v6  ;;  %v8097_v19 = vld [vmem:[#allocation4 + $0x60] sm:$0xe]  ;;  %v5300_v0 = vld [vmem:[#allocation4 + $0x84] sm:$0xf]  ;;  %v10660_v14 = vld [vmem:[%s14635_s3 + $0x8] sm:$0xff]  }
 0x2b6   : > { %v8384_v48 = vld [vmem:[#allocation5 + $0x88] sm:$0xff]  ;;  %7304 = vrot.lane.b32.xlu0 %v9951_v50, %s11070_s12  ;;  %v5677_v33 = vsel %vm11382_vm10, %v5672_v51, %v5676_v22  ;;  %v6172_v56 = vrot.slane %v6170_v1, 4  ;;  %v10172_v55 = vpack.c.bf16 %v4797_v52, %v4797_v52  ;;  %v4798_v54 = vsel %vm4638_vm4, %v13231_v11, %v9791_v8  ;;  %v8099_v51 = vld [vmem:[#allocation4 + $0x68] sm:$0x1] }
 0x2b7   : > { %10494 = vmatmul.mubr.msk.bf16.gmra.mrb[72].mxu0 %vm1020_vm0, %v8384_v48  ;;  %v9855_v12 = vcombine.low %v5667_v41, %v5677_v33  ;;  %v4725_v9 = vmul.f32 1.442695, %v4671_v16  ;;  %v10173_v36 = vpack.c.bf16 %v4798_v54, %v4798_v54  ;;  %v4672_v45 = vmin.f32 %v13288_v5, 0.0  ;;  %v8098_v24 = vld [vmem:[#allocation4 + $0x64] sm:$0xf]  ;;  %v10662_v33 = vld [vmem:[%s14635_s3 + $0x10] sm:$0xff]  }
 0x2b8   : > { %v6171_v18 = vsel %vm11325_vm7, %v9872_v42, %v6170_v1  ;;  %v6174_v23 = vsel %vm11325_vm7, %v6172_v56, %v6173_v47  ;;  %v5078_v11 = vshrl.u32 %v10172_v55, 16  ;;  %v5081_v40 = vshll.u32 %v10172_v55, 16  ;;  %v5304_v47 = vld [vmem:[#allocation4 + $0x8c] sm:$0x1]  ;;  %10318 = vmatpush3.bf16.msra.mxu1 %v10660_v14 }
 0x2b9   : > { %5976 = vrot.lane.b32.xlu1 %v9855_v12, %s11070_s12  ;;  %10851 = vpow2.f32 %v4725_v9  ;;  %v7682_v17 = vrot.slane %v7680_v7, 4  ;;  %v5086_v32 = vshrl.u32 %v10173_v36, 16  ;;  %v4727_v22 = vmul.f32 1.442695, %v4672_v45  ;;  %v7056_v12 = vld [vmem:[#allocation4 + $0x54] sm:$0xe] }
 0x2ba   : > { %7481 = vrot.lane.b32.xlu0 %v10646_v13, %s11068_s10  ;;  %v9888_v1 = vcombine.low %v6171_v18, %v6174_v23  ;;  %v7683_v31 = vshll.u32 %v7547_v59, 16  ;;  %v5080_v42 = vrot.slane %v5078_v11, 7  ;;  %v7689_v28 = vshll.u32 %v7548_v44, 16  ;;  %v10661_v59 = vld [vmem:[%s14635_s3 + $0x50] sm:$0xff]  }
 0x2bb   : > { %v7693_v20 = vshrl.u32 %v7548_v44, 16  ;;  %v7699_v50 = vshll.u32 %v7549_v3, 16  ;;  %v5088_v8 = vrot.slane %v5086_v32, 7  ;;  %v5089_v16 = vshll.u32 %v10173_v36, 16  ;;  %v7057_v9 = vld [vmem:[#allocation4 + $0x58] sm:$0xf]  ;;  %10319 = vmatprep.subr.bf16.mxu1 %v10661_v59  ;;  %v13328_v36 = vpop.permute.xlu1 %6464 }
 0x2bc   : > { %10853 = vpow2.f32 %v4727_v22  ;;  %v7685_v7 = vrot.slane %v7683_v31, 5  ;;  %v5083_v38 = vor.u32 %v5081_v40, %v5080_v42  ;;  %vm4639_vm5 = vcmp.gt.f32.partialorder %v13283_v29, 0.0  ;;  %v10647_v23 = vld [vmem:[#allocation4 + $0x54] sm:$0xff]   ;;  %v5504_v3 = vld [vmem:[#allocation4 + $0x48] sm:$0xf]  ;;  %10320 = vmatpush3.bf16.msra.mxu1 %v10662_v33 }
 0x2bd   : > { %6298 = vrot.lane.b32.xlu1 %v9888_v1, %s11068_s10  ;;  %v7691_v52 = vrot.slane %v7689_v28, 5  ;;  %v7695_v48 = vrot.slane %v7693_v20, 4  ;;  %v10000_v41 = vrot.slane %v8097_v19, 9  ;;  %v5084_v56 = vrot.slane %v5080_v42, 4  ;;  %v7058_v32 = vld [vmem:[#allocation4 + $0x5c] sm:$0x1] }
 0x2be   : > { %v5091_v6 = vor.u32 %v5089_v16, %v5088_v8  ;;  %v5093_v55 = vrot.slane %v5088_v8, 4  ;;  %v7686_v54 = vor.u32 %v7685_v7, %v7682_v17  ;;  %v5301_v45 = vsel %vm12744_vm12, %v5083_v38, %v5300_v0  ;;  %v5506_v38 = vld [vmem:[#allocation4 + $0x50] sm:$0x1] }
 0x2bf   : > { %v7696_v13 = vor.u32 %v7695_v48, %v7691_v52  ;;  %v7701_v18 = vrot.slane %v7699_v50, 5  ;;  %v8219_v44 = vrot.slane %v8098_v24, 5  ;;  %5302 = vst [vmem:[#allocation4 + $0x84] sm:$0xf] %v5301_v45  ;;  %v8222_v19 = vrot.slane %v8099_v51, 5  ;;  %v10663_v24 = vld [vmem:[%s14635_s3 + $0x58] sm:$0xff]  }
 0x2c0   : > { %v5092_v11 = vsel %vm12750_vm2, %v5084_v56, %v5091_v6  ;;  %v5305_v40 = vsel %vm12631_vm14, %v5093_v55, %v5304_v47  ;;  %v7687_v17 = vrot.slane %v7686_v54, 4  ;;  %v9936_v1 = vrot.slane %v7056_v12, 9  ;;  %v5505_v47 = vld [vmem:[#allocation4 + $0x4c] sm:$0xf]  ;;  %v10665_v50 = vld [vmem:[%s14635_s3 + $0x18] sm:$0xff]   ;;  %10321 = vmatprep.subr.bf16.mxu1 %v10663_v24  ;;  %v5969_v55 = vpop.permute.xlu1 %5968 }
 0x2c1   : > { %5303 = vst.msk [vmem:[#allocation4 + $0x88] sm:$0xf] %vm836_vm3, %v5092_v11  ;;  %5306 = vst [vmem:[#allocation4 + $0x8c] sm:$0x1] %v5305_v40  ;;  %v7697_v0 = vrot.slane %v7696_v13, 4  ;;  %6474 = vrot.lane.b32.xlu1 %v10647_v23, %s11069_s11  ;;  %v8221_v22 = vrot.slane %v8219_v44, 4  ;;  %v8220_v42 = vsel %vm11325_vm7, %v10000_v41, %v8219_v44  ;;  %10322 = vmatpush3.bf16.msra.mxu1 %v10665_v50 }
 0x2c2   : > { %v7178_v31 = vrot.slane %v7057_v9, 5  ;;  %v7692_v14 = vsel %vm11382_vm10, %v7687_v17, %v7691_v52  ;;  %v5679_v28 = vshrl.u32 %v5504_v3, 16  ;;  %v5682_v20 = vshll.u32 %v5504_v3, 16  ;;  %v13352_v52 = vpop.f32.mrb[56].mxu0  ;;  %v10666_v54 = vld [vmem:[#allocation4 + $0xc] sm:$0xff]  }
 0x2c3   : > { %v10852_v51 = vpop.eup %10851  ;;  %v7702_v8 = vsel %vm11382_vm10, %v7697_v0, %v7701_v18  ;;  %v8223_v16 = vsel %vm11325_vm7, %v8221_v22, %v8222_v19  ;;  %v7181_v59 = vrot.slane %v7058_v32, 5  ;;  %v13354_v6 = vpop.f32.mrb[57].mxu0  ;;  %v5688_v45 = vshll.u32 %v5505_v47, 16  ;;  %v6051_v17 = vld [vmem:[#allocation4 + $0x54] sm:$0xe]  ;;  %5471 = vst.msk [vmem:[#allocation5 + $0x18] sm:$0xff] %vm1020_vm0, %v10666_v54 }
 0x2c4   : > { %v7180_v7 = vrot.slane %v7178_v31, 4  ;;  %v9792_v48 = vadd.f32 -1.0, %v10852_v51  ;;  %v9982_v41 = vcombine.low %v7692_v14, %v7702_v8  ;;  %v10016_v33 = vcombine.low %v8220_v42, %v8223_v16  ;;  %v13358_v18 = vpop.f32.mrb[58].mxu0  ;;  %v6052_v24 = vld [vmem:[#allocation4 + $0x58] sm:$0xf]  ;;  %6015 = vst.msk [vmem:[#allocation5 + $0x18] sm:$0xff] %vm1568_vm1, %v5969_v55 }
 0x2c5   : > { %v5681_v56 = vrot.slane %v5679_v28, 4  ;;  %v5684_v9 = vrot.slane %v5682_v20, 5  ;;  %v5692_v13 = vshrl.u32 %v5505_v47, 16  ;;  %v7179_v3 = vsel %vm11325_vm7, %v9936_v1, %v7178_v31  ;;  %v13369_v19 = vpop.f32.mrb[59].mxu0  ;;  %6335 = vst.msk [vmem:[#allocation5 + $0x18] sm:$0xff] %vm1892_vm9, %v13313_v10  ;;  %v10667_v54 = vld [vmem:[%s14635_s3 + $0x60] sm:$0xff]  }
 0x2c6   : > { %v7182_v12 = vsel %vm11325_vm7, %v7180_v7, %v7181_v59  ;;  %v10854_v23 = vpop.eup %10853  ;;  %v4799_v44 = vsel %vm4639_vm5, %v13283_v29, %v9792_v48  ;;  %8023 = vrot.lane.b32.xlu0 %v9982_v41, %s11069_s11  ;;  %8357 = vst.msk [vmem:[#allocation5 + $0xa0] sm:$0xff] %vm1020_vm0, %v10016_v33  ;;  %v5698_v11 = vshll.u32 %v5506_v38, 16  ;;  %v10275_v40 = vadd.f32 %v13141_v49, %v13134_v25  ;;  %v6053_v25 = vld [vmem:[#allocation4 + $0x5c] sm:$0x1]  ;;  %v4602_v50 = vld [vmem:[#allocation4 + $0xa4] sm:$0x1]  ;;  %v13382_v7 = vpop.permute.xlu1 %6290 }
 0x2c7   : > { %v10174_v32 = vpack.c.bf16 %v4799_v44, %v4799_v44  ;;  %v9793_v0 = vadd.f32 -1.0, %v10854_v23  ;;  %v5685_v22 = vor.u32 %v5684_v9, %v5681_v56  ;;  %v5690_v29 = vrot.slane %v5688_v45, 5  ;;  %v4546_v49 = vld [vmem:[#allocation4 + $0x9c] sm:$0x1]  ;;  %6511 = vst.msk [vmem:[#allocation5 + $0x18] sm:$0xff] %vm2070_vm11, %v13328_v36  ;;  %v10648_v56 = vld [vmem:[#allocation4 + $0x60] sm:$0xff]   ;;  %10323 = vmatprep.subr.bf16.mxu1 %v10667_v54 }
 0x2c8   : > { %vm4640_vm6 = vcmp.gt.f32.partialorder %v13288_v5, 0.0  ;;  %v9952_v14 = vcombine.low %v7179_v3, %v7182_v12  ;;  %v5694_v1 = vrot.slane %v5692_v13, 4  ;;  %v10278_v31 = vadd.f32 %v13156_v2, %v13145_v35  ;;  %v5307_v51 = vld [vmem:[#allocation4 + $0x90] sm:$0xf]  ;;  %v10669_v44 = vld [vmem:[%s14635_s3 + $0x20] sm:$0xff]  }
 0x2c9   : > { %v5095_v42 = vshrl.u32 %v10174_v32, 16  ;;  %v4800_v47 = vsel %vm4640_vm6, %v13288_v5, %v9793_v0  ;;  %v5686_v28 = vrot.slane %v5685_v22, 4  ;;  %v5700_v20 = vrot.slane %v5698_v11, 5  ;;  %v13387_v5 = vld [vmem:[%s14634_s2] ss:$0 sm:$0xff]  ;;  %10324 = vmatpush3.bf16.msra.mxu1 %v10669_v44 }
 0x2ca   : > { %v10175_v8 = vpack.c.bf16 %v4800_v47, %v4800_v47  ;;  %7306 = vrot.lane.b32.xlu0 %v9952_v14, %s11070_s12  ;;  %v5695_v16 = vor.u32 %v5694_v1, %v5690_v29  ;;  %v9873_v35 = vrot.slane %v6051_v17, 9  ;;  %v6177_v2 = vrot.slane %v6052_v24, 5  ;;  %v10670_v1 = vld [vmem:[%s14635_s3 + $0x68] sm:$0xff]   ;;  %v7552_v47 = vld [vmem:[#allocation4 + $0x5c] sm:$0x1] }
 0x2cb   : > { %v5097_v59 = vrot.slane %v5095_v42, 7  ;;  %v5098_v10 = vshll.u32 %v10174_v32, 16  ;;  %v4306_v38 = vadd.f32 %v13387_v5, %v10275_v40  ;;  %v4547_v36 = vsel %vm12631_vm14, 0, %v4546_v49  ;;  %v7550_v32 = vld [vmem:[#allocation4 + $0x54] sm:$0xf]  ;;  %10325 = vmatprep.subr.bf16.mxu1 %v10670_v1  ;;  %v10675_v1 = vld [vmem:[#allocation4 + $0x18] sm:$0xff]  }
 0x2cc   : > { %v5103_v48 = vshrl.u32 %v10175_v8, 16  ;;  %v5691_v41 = vsel %vm11382_vm10, %v5686_v28, %v5690_v29  ;;  %v5696_v33 = vrot.slane %v5695_v16, 4  ;;  %v6180_v55 = vrot.slane %v6053_v25, 5  ;;  %4548 = vst [vmem:[#allocation4 + $0x9c] sm:$0x1] %v4547_v36  ;;  %5472 = vst.msk [vmem:[#allocation5 + $0x30] sm:$0xff] %vm1020_vm0, %v10675_v1 }
 0x2cd   : > { %v5100_v12 = vor.u32 %v5098_v10, %v5097_v59  ;;  %v5106_v9 = vshll.u32 %v10175_v8, 16  ;;  %v8387_v45 = vld [vmem:[#allocation5 + $0xa0] sm:$0xff]  ;;  %v6179_v13 = vrot.slane %v6177_v2, 4  ;;  %v13398_v23 = vadd.f32 %v13168_v37, %v4306_v38  ;;  %v13420_v28 = vld [vmem:[#allocation4 + $0x10] sm:$0xf] }
 0x2ce   : > { %v5105_v3 = vrot.slane %v5103_v48, 7  ;;  %10497 = vmatprep.mubr.msk.bf16.mxu0 %vm1020_vm0, %v8387_v45  ;;  %v5701_v11 = vsel %vm11382_vm10, %v5696_v33, %v5700_v20  ;;  %7483 = vrot.lane.b32.xlu0 %v10648_v56, %s11068_s10  ;;  %v4309_v40 = vadd.f32 %v13387_v5, %v10278_v31  ;;  %v4603_v17 = vsel %vm12639_vm15, 0, %v4602_v50  ;;  %v7551_v37 = vld [vmem:[#allocation4 + $0x58] sm:$0xf]  ;;  %v13422_v20 = vpop.permute.xlu1 %6466  ;;  %v7061_v44 = vld [vmem:[#allocation4 + $0x68] sm:$0x1] }
 0x2cf   : > { %v5101_v0 = vrot.slane %v5097_v59, 4  ;;  %v5308_v22 = vsel %vm12744_vm12, %v5100_v12, %v5307_v51  ;;  %v5311_v29 = vld [vmem:[#allocation4 + $0x98] sm:$0x1]  ;;  %v9856_v24 = vcombine.low %v5691_v41, %v5701_v11  ;;  %v6178_v14 = vsel %vm11325_vm7, %v9873_v35, %v6177_v2  ;;  %4604 = vst [vmem:[#allocation4 + $0xa4] sm:$0x1] %v4603_v17  ;;  %v10671_v59 = vld [vmem:[%s14635_s3 + $0x28] sm:$0xff]  }
 0x2d0   : > { %5309 = vst [vmem:[#allocation4 + $0x90] sm:$0xf] %v5308_v22  ;;  %v5108_v31 = vor.u32 %v5106_v9, %v5105_v3  ;;  %v5110_v25 = vrot.slane %v5105_v3, 4  ;;  %v6181_v49 = vsel %vm11325_vm7, %v6179_v13, %v6180_v55  ;;  %v4673_v42 = vmin.f32 %v13398_v23, 0.0  ;;  %v8100_v35 = vld [vmem:[#allocation4 + $0x6c] sm:$0xe]  ;;  %10326 = vmatpush3.bf16.msra.mxu1 %v10671_v59 }
 0x2d1   : > { %5978 = vrot.lane.b32.xlu1 %v9856_v24, %s11070_s12  ;;  %v13426_v50 = vadd.f32 %v13175_v27, %v4309_v40  ;;  %v7704_v51 = vshrl.u32 %v7550_v32, 16  ;;  %v7707_v8 = vshll.u32 %v7550_v32, 16  ;;  %v7713_v16 = vshll.u32 %v7551_v37, 16  ;;  %v8101_v2 = vld [vmem:[#allocation4 + $0x70] sm:$0xf]  ;;  %v10672_v41 = vld [vmem:[%s14635_s3 + $0x70] sm:$0xff]  }
 0x2d2   : > { %v5109_v10 = vsel %vm12750_vm2, %v5101_v0, %v5108_v31  ;;  %v5312_v38 = vsel %vm12631_vm14, %v5110_v25, %v5311_v29  ;;  %v4729_v36 = vmul.f32 1.442695, %v4673_v42  ;;  %v7717_v48 = vshrl.u32 %v7551_v37, 16  ;;  %v8102_v27 = vld [vmem:[#allocation4 + $0x74] sm:$0x1]  ;;  %v10674_v3 = vld [vmem:[%s14635_s3 + $0x30] sm:$0xff]   ;;  %10327 = vmatprep.subr.bf16.mxu1 %v10672_v41  ;;  %v5971_v31 = vpop.permute.xlu1 %5970 }
 0x2d3   : > { %5310 = vst.msk [vmem:[#allocation4 + $0x94] sm:$0xf] %vm836_vm3, %v5109_v10  ;;  %5313 = vst [vmem:[#allocation4 + $0x98] sm:$0x1] %v5312_v38  ;;  %v9889_v33 = vcombine.low %v6178_v14, %v6181_v49  ;;  %v4674_v56 = vmin.f32 %v13426_v50, 0.0  ;;  %v7706_v55 = vrot.slane %v7704_v51, 4 }
 0x2d4   : > { %v7709_v54 = vrot.slane %v7707_v8, 5  ;;  %v13440_v12 = vld [vmem:[#allocation4 + $0x64] sm:$0xf]  ;;  %10855 = vpow2.f32 %v4729_v36  ;;  %v7715_v9 = vrot.slane %v7713_v16, 5  ;;  %v7719_v45 = vrot.slane %v7717_v48, 4  ;;  %10328 = vmatpush3.bf16.msra.mxu1 %v10674_v3  ;;  %6016 = vst.msk [vmem:[#allocation5 + $0x30] sm:$0xff] %vm1568_vm1, %v5971_v31 }
 0x2d5   : > { %v7723_v13 = vshll.u32 %v7552_v47, 16  ;;  %6300 = vrot.lane.b32.xlu1 %v9889_v33, %s11068_s10  ;;  %v4731_v11 = vmul.f32 1.442695, %v4674_v56  ;;  %v8226_v17 = vrot.slane %v8101_v2, 5  ;;  %v5507_v32 = vld [vmem:[#allocation4 + $0x54] sm:$0xf]  ;;  %v10284_v31 = vadd.f32 %v13254_v26, %v13250_v60 }
 0x2d6   : > { %v7710_v40 = vor.u32 %v7709_v54, %v7706_v55  ;;  %v6584_v37 = vshll.u32 %v13420_v28, 16  ;;  %vm4641_vm8 = vcmp.gt.f32.partialorder %v13398_v23, 0.0  ;;  %v7720_v0 = vor.u32 %v7719_v45, %v7715_v9  ;;  %v7059_v24 = vld [vmem:[#allocation4 + $0x60] sm:$0xe]  ;;  %v5508_v14 = vld [vmem:[#allocation4 + $0x58] sm:$0xf] }
 0x2d7   : > { %v7725_v22 = vrot.slane %v7723_v13, 5  ;;  %v10001_v29 = vrot.slane %v8100_v35, 9  ;;  %10857 = vpow2.f32 %v4731_v11  ;;  %v10649_v49 = vld [vmem:[#allocation4 + $0x60] sm:$0xff]   ;;  %v8228_v42 = vrot.slane %v8226_v17, 4  ;;  %v13451_v2 = vld [vmem:[#allocation4 + $0x5c] sm:$0x1] }
 0x2d8   : > { %v7711_v25 = vrot.slane %v7710_v40, 4  ;;  %v8229_v47 = vrot.slane %v8102_v27, 5  ;;  %v7721_v51 = vrot.slane %v7720_v0, 4  ;;  %v7185_v16 = vrot.slane %v13440_v12, 5  ;;  %v13453_v10 = vpop.f32.mrb[60].mxu0  ;;  %v10676_v35 = vld [vmem:[%s14635_s3 + $0x78] sm:$0xff]  }
 0x2d9   : > { %v8227_v8 = vsel %vm11325_vm7, %v10001_v29, %v8226_v17  ;;  %v5703_v59 = vshrl.u32 %v5507_v32, 16  ;;  %6476 = vrot.lane.b32.xlu1 %v10649_v49, %s11069_s11  ;;  %v7188_v36 = vrot.slane %v7061_v44, 5  ;;  %v5706_v48 = vshll.u32 %v5507_v32, 16  ;;  %v13462_v41 = vpop.f32.mrb[61].mxu0  ;;  %v10678_v33 = vld [vmem:[%s14635_s3 + $0x38] sm:$0xff]   ;;  %6336 = vst.msk [vmem:[#allocation5 + $0x30] sm:$0xff] %vm1892_vm9, %v13382_v7  ;;  %10329 = vmatprep.subr.bf16.mxu1 %v10676_v35 }
 0x2da   : > { %v8230_v38 = vsel %vm11325_vm7, %v8228_v42, %v8229_v47  ;;  %v5712_v27 = vshll.u32 %v5508_v14, 16  ;;  %v7716_v56 = vsel %vm11382_vm10, %v7711_v25, %v7715_v9  ;;  %v7726_v55 = vsel %vm11382_vm10, %v7721_v51, %v7725_v22  ;;  %v4549_v45 = vld [vmem:[#allocation4 + $0xa8] sm:$0x1]  ;;  %v4605_v13 = vld [vmem:[#allocation4 + $0xb0] sm:$0x1]  ;;  %v13472_v44 = vpop.f32.mrb[62].mxu0  ;;  %10330 = vmatpush3.bf16.msra.mxu1 %v10678_v33 }
 0x2db   : > { %v10017_v54 = vcombine.low %v8227_v8, %v8230_v38  ;;  %v7187_v12 = vrot.slane %v7185_v16, 4  ;;  %v9983_v3 = vcombine.low %v7716_v56, %v7726_v55  ;;  %v9937_v11 = vrot.slane %v7059_v24, 9  ;;  %v13476_v32 = vpop.f32.mrb[63].mxu0  ;;  %6512 = vst.msk [vmem:[#allocation5 + $0x30] sm:$0xff] %vm2070_vm11, %v13422_v20  ;;  %v6054_v29 = vld [vmem:[#allocation4 + $0x60] sm:$0xe] }
 0x2dc   : > { %v5705_v40 = vrot.slane %v5703_v59, 4  ;;  %v5708_v17 = vrot.slane %v5706_v48, 5  ;;  %v5714_v0 = vrot.slane %v5712_v27, 5  ;;  %v5716_v22 = vshrl.u32 %v5508_v14, 16  ;;  %v6055_v25 = vld [vmem:[#allocation4 + $0x64] sm:$0xf] }
 0x2dd   : > { %8358 = vst.msk [vmem:[#allocation5 + $0xb8] sm:$0xff] %vm1020_vm0, %v10017_v54  ;;  %v7189_v9 = vsel %vm11325_vm7, %v7187_v12, %v7188_v36  ;;  %v10281_v7 = vadd.f32 %v13246_v43, %v13244_v63  ;;  %8025 = vrot.lane.b32.xlu0 %v9983_v3, %s11069_s11  ;;  %v5722_v1 = vshll.u32 %v13451_v2, 16  ;;  %v4550_v20 = vsel %vm12631_vm14, 0, %v4549_v45  ;;  %v11001_v14 = vld [vmem:[%s14635_s3 + $0x80] sm:$0xff]   ;;  %v10683_v35 = vld [vmem:[#allocation4 + $0x30] sm:$0xff]  }
 0x2de   : > { %v5709_v24 = vor.u32 %v5708_v17, %v5705_v40  ;;  %10517 = vmatprep.subr.bf16.mxu1 %v11001_v14  ;;  %v10856_v63 = vpop.eup %10855  ;;  %v7186_v43 = vsel %vm11325_vm7, %v9937_v11, %v7185_v16  ;;  %v5718_v49 = vrot.slane %v5716_v22, 4  ;;  %4551 = vst [vmem:[#allocation4 + $0xa8] sm:$0x1] %v4550_v20  ;;  %v4606_v47 = vsel %vm12639_vm15, 0, %v4605_v13  ;;  %v10680_v51 = vld [vmem:[#allocation4 + $0x24] sm:$0xff]   ;;  %5474 = vst.msk [vmem:[#allocation5 + $0x60] sm:$0xff] %vm1020_vm0, %v10683_v35 }
 0x2df   : > { %v4314_v42 = vadd.f32 %v13387_v5, %v10281_v7  ;;  %v9794_v8 = vadd.f32 -1.0, %v10856_v63  ;;  %v9953_v60 = vcombine.low %v7186_v43, %v7189_v9  ;;  %v4317_v2 = vadd.f32 %v13387_v5, %v10284_v31  ;;  %4607 = vst [vmem:[#allocation4 + $0xb0] sm:$0x1] %v4606_v47  ;;  %v6056_v59 = vld [vmem:[#allocation4 + $0x68] sm:$0x1]  ;;  %5473 = vst.msk [vmem:[#allocation5 + $0x48] sm:$0xff] %vm1020_vm0, %v10680_v51 }
 0x2e0   : > { %v5710_v26 = vrot.slane %v5709_v24, 4  ;;  %vm4642_vm13 = vcmp.gt.f32.partialorder %v13426_v50, 0.0  ;;  %v5719_v38 = vor.u32 %v5718_v49, %v5714_v0  ;;  %v6184_v36 = vrot.slane %v6055_v25, 5  ;;  %v7553_v48 = vld [vmem:[#allocation4 + $0x60] sm:$0xf]  ;;  %v10650_v17 = vld [vmem:[#allocation4 + $0x6c] sm:$0xff]  }
 0x2e1   : > { %v13502_v16 = vadd.f32 %v13160_v62, %v4314_v42  ;;  %v10858_v27 = vpop.eup %10857  ;;  %v4801_v33 = vsel %vm4641_vm8, %v13398_v23, %v9794_v8  ;;  %7308 = vrot.lane.b32.xlu0 %v9953_v60, %s11070_s12  ;;  %v5724_v56 = vrot.slane %v5722_v1, 5  ;;  %v13510_v55 = vadd.f32 %v13170_v39, %v4317_v2  ;;  %v7555_v25 = vld [vmem:[#allocation4 + $0x68] sm:$0x1]  ;;  %v8104_v49 = vld [vmem:[#allocation4 + $0x7c] sm:$0xf] }
 0x2e2   : > { %v9874_v54 = vrot.slane %v6054_v29, 9  ;;  %v10176_v62 = vpack.c.bf16 %v4801_v33, %v4801_v33  ;;  %v9795_v12 = vadd.f32 -1.0, %v10858_v27  ;;  %v5720_v45 = vrot.slane %v5719_v38, 4  ;;  %v5314_v42 = vld [vmem:[#allocation4 + $0x9c] sm:$0xf] }
 0x2e3   : > { %v6187_v13 = vrot.slane %v6056_v59, 5  ;;  %v5715_v11 = vsel %vm11382_vm10, %v5710_v26, %v5714_v0  ;;  %v4675_v40 = vmin.f32 %v13502_v16, 0.0  ;;  %v4676_v23 = vmin.f32 %v13510_v55, 0.0  ;;  %v7554_v0 = vld [vmem:[#allocation4 + $0x64] sm:$0xf] }
 0x2e4   : > { %v8390_v3 = vld [vmem:[#allocation5 + $0xb8] sm:$0xff]  ;;  %v7728_v9 = vshrl.u32 %v7553_v48, 16  ;;  %v5112_v22 = vshrl.u32 %v10176_v62, 16  ;;  %v4802_v39 = vsel %vm4642_vm13, %v13426_v50, %v9795_v12  ;;  %v5725_v7 = vsel %vm11382_vm10, %v5720_v45, %v5724_v56  ;;  %v8103_v60 = vld [vmem:[#allocation4 + $0x78] sm:$0xe] }
 0x2e5   : > { %10498 = vmatmul.mubr.msk.bf16.gmra.mrb[76].mxu0 %vm1020_vm0, %v8390_v3  ;;  %v6185_v29 = vsel %vm11325_vm7, %v9874_v54, %v6184_v36  ;;  %v10177_v24 = vpack.c.bf16 %v4802_v39, %v4802_v39  ;;  %v9857_v1 = vcombine.low %v5715_v11, %v5725_v7  ;;  %v4733_v20 = vmul.f32 1.442695, %v4675_v40  ;;  %7485 = vrot.lane.b32.xlu0 %v10650_v17, %s11068_s10  ;;  %v8105_v35 = vld [vmem:[#allocation4 + $0x80] sm:$0x1]  ;;  %v7062_v38 = vld [vmem:[#allocation4 + $0x6c] sm:$0xe] }
 0x2e6   : > { %v4735_v31 = vmul.f32 1.442695, %v4676_v23  ;;  %v5114_v14 = vrot.slane %v5112_v22, 7  ;;  %v5115_v63 = vshll.u32 %v10176_v62, 16  ;;  %v6186_v43 = vrot.slane %v6184_v36, 4 }
 0x2e7   : > { %v7731_v50 = vshll.u32 %v7553_v48, 16  ;;  %v5120_v47 = vshrl.u32 %v10177_v24, 16  ;;  %5980 = vrot.lane.b32.xlu1 %v9857_v1, %s11070_s12  ;;  %10859 = vpow2.f32 %v4733_v20  ;;  %v7730_v51 = vrot.slane %v7728_v9, 4  ;;  %v7063_v56 = vld [vmem:[#allocation4 + $0x70] sm:$0xf] }
 0x2e8   : > { %v7737_v8 = vshll.u32 %v7554_v0, 16  ;;  %v5117_v26 = vor.u32 %v5115_v63, %v5114_v14  ;;  %v5123_v2 = vshll.u32 %v10177_v24, 16  ;;  %10861 = vpow2.f32 %v4735_v31  ;;  %v5318_v62 = vld [vmem:[#allocation4 + $0xa4] sm:$0x1]  ;;  %v7064_v17 = vld [vmem:[#allocation4 + $0x74] sm:$0x1] }
 0x2e9   : > { %v6188_v59 = vsel %vm11325_vm7, %v6186_v43, %v6187_v13  ;;  %v5118_v27 = vrot.slane %v5114_v14, 4  ;;  %v5122_v36 = vrot.slane %v5120_v47, 7  ;;  %v7733_v33 = vrot.slane %v7731_v50, 5  ;;  %v5510_v9 = vld [vmem:[#allocation4 + $0x60] sm:$0xf]  ;;  %v10651_v31 = vld [vmem:[#allocation4 + $0x6c] sm:$0xff]  }
 0x2ea   : > { %v9890_v48 = vcombine.low %v6185_v29, %v6188_v59  ;;  %v5315_v54 = vsel %vm12744_vm12, %v5117_v26, %v5314_v42  ;;  %v7739_v12 = vrot.slane %v7737_v8, 5  ;;  %v7741_v45 = vshrl.u32 %v7554_v0, 16  ;;  %v5511_v24 = vld [vmem:[#allocation4 + $0x64] sm:$0xf]  ;;  %v10686_v14 = vld [vmem:[#allocation4 + $0x3c] sm:$0xff]  }
 0x2eb   : > { %v7747_v3 = vshll.u32 %v7555_v25, 16  ;;  %5316 = vst [vmem:[#allocation4 + $0x9c] sm:$0xf] %v5315_v54  ;;  %v5125_v11 = vor.u32 %v5123_v2, %v5122_v36  ;;  %v5127_v40 = vrot.slane %v5122_v36, 4  ;;  %vm4643_vm4 = vcmp.gt.f32.partialorder %v13502_v16, 0.0  ;;  %5475 = vst.msk [vmem:[#allocation5 + $0x78] sm:$0xff] %vm1020_vm0, %v10686_v14 }
 0x2ec   : > { %6302 = vrot.lane.b32.xlu1 %v9890_v48, %s11068_s10  ;;  %v7734_v13 = vor.u32 %v7733_v33, %v7730_v51  ;;  %v8233_v23 = vrot.slane %v8104_v49, 5  ;;  %vm4644_vm5 = vcmp.gt.f32.partialorder %v13510_v55, 0.0  ;;  %v7743_v22 = vrot.slane %v7741_v45, 4  ;;  %v5512_v36 = vld [vmem:[#allocation4 + $0x68] sm:$0x1] }
 0x2ed   : > { %v7749_v39 = vrot.slane %v7747_v3, 5  ;;  %v10002_v7 = vrot.slane %v8103_v60, 9  ;;  %v8236_v29 = vrot.slane %v8105_v35, 5  ;;  %v5126_v0 = vsel %vm12750_vm2, %v5118_v27, %v5125_v11  ;;  %v13551_v3 = vpop.permute.xlu0 %7294  ;;  %v6057_v14 = vld [vmem:[#allocation4 + $0x6c] sm:$0xe] }
 0x2ee   : > { %v5319_v1 = vsel %vm12631_vm14, %v5127_v40, %v5318_v62  ;;  %v7735_v20 = vrot.slane %v7734_v13, 4  ;;  %v9938_v25 = vrot.slane %v7062_v38, 9  ;;  %5317 = vst.msk [vmem:[#allocation4 + $0xa0] sm:$0xf] %vm836_vm3, %v5126_v0  ;;  %v7744_v63 = vor.u32 %v7743_v22, %v7739_v12 }
 0x2ef   : > { %5320 = vst [vmem:[#allocation4 + $0xa4] sm:$0x1] %v5319_v1  ;;  %v8234_v43 = vsel %vm11325_vm7, %v10002_v7, %v8233_v23  ;;  %v8235_v50 = vrot.slane %v8233_v23, 4  ;;  %v7192_v49 = vrot.slane %v7063_v56, 5  ;;  %v7195_v42 = vrot.slane %v7064_v17, 5  ;;  %v13556_v17 = vpop.permute.xlu1 %6292 }
 0x2f0   : > { %6478 = vrot.lane.b32.xlu1 %v10651_v31, %s11069_s11  ;;  %v5727_v47 = vshrl.u32 %v5510_v9, 16  ;;  %v5730_v51 = vshll.u32 %v5510_v9, 16  ;;  %v5736_v8 = vshll.u32 %v5511_v24, 16  ;;  %v7740_v60 = vsel %vm11382_vm10, %v7735_v20, %v7739_v12 }
 0x2f1   : > { %v7745_v26 = vrot.slane %v7744_v63, 4  ;;  %v8237_v2 = vsel %vm11325_vm7, %v8235_v50, %v8236_v29  ;;  %v7194_v59 = vrot.slane %v7192_v49, 4  ;;  %v10860_v35 = vpop.eup %10859  ;;  %v7193_v27 = vsel %vm11325_vm7, %v9938_v25, %v7192_v49  ;;  %v6058_v29 = vld [vmem:[#allocation4 + $0x70] sm:$0xf]  ;;  %v6059_v63 = vld [vmem:[#allocation4 + $0x74] sm:$0x1] }
 0x2f2   : > { %v10018_v38 = vcombine.low %v8234_v43, %v8237_v2  ;;  %v5729_v48 = vrot.slane %v5727_v47, 4  ;;  %v5732_v33 = vrot.slane %v5730_v51, 5  ;;  %v10862_v56 = vpop.eup %10861  ;;  %v9796_v54 = vadd.f32 -1.0, %v10860_v35  ;;  %v4552_v49 = vld [vmem:[#allocation4 + $0xb4] sm:$0x1] }
 0x2f3   : > { %v7750_v62 = vsel %vm11382_vm10, %v7745_v26, %v7749_v39  ;;  %v5738_v45 = vrot.slane %v5736_v8, 5  ;;  %v5740_v12 = vshrl.u32 %v5511_v24, 16  ;;  %v9797_v11 = vadd.f32 -1.0, %v10862_v56  ;;  %v4608_v8 = vld [vmem:[#allocation4 + $0xbc] sm:$0x1]  ;;  %v6469_v35 = vpop.permute.xlu1 %6468 }
 0x2f4   : > { %v9984_v40 = vcombine.low %v7740_v60, %v7750_v62  ;;  %8359 = vst.msk [vmem:[#allocation5 + $0xd0] sm:$0xff] %vm1020_vm0, %v10018_v38  ;;  %v7196_v13 = vsel %vm11325_vm7, %v7194_v59, %v7195_v42  ;;  %v5733_v23 = vor.u32 %v5732_v33, %v5729_v48  ;;  %v4803_v9 = vsel %vm4643_vm4, %v13502_v16, %v9796_v54  ;;  %v13571_v60 = vpop.permute.xlu0 %7471  ;;  %v7556_v59 = vld [vmem:[#allocation4 + $0x6c] sm:$0xf]  ;;  %v5321_v38 = vld [vmem:[#allocation4 + $0xa8] sm:$0xf] }
 0x2f5   : > { %v5742_v22 = vrot.slane %v5740_v12, 4  ;;  %v5746_v39 = vshll.u32 %v5512_v36, 16  ;;  %v10287_v7 = vadd.f32 %v13354_v6, %v13352_v52  ;;  %v10178_v24 = vpack.c.bf16 %v4803_v9, %v4803_v9 }
 0x2f6   : > { %v4804_v0 = vsel %vm4644_vm5, %v13510_v55, %v9797_v11  ;;  %8027 = vrot.lane.b32.xlu0 %v9984_v40, %s11069_s11  ;;  %v5734_v1 = vrot.slane %v5733_v23, 4  ;;  %v10290_v20 = vadd.f32 %v13369_v19, %v13358_v18  ;;  %v9954_v25 = vcombine.low %v7193_v27, %v7196_v13  ;;  %v10652_v11 = vld [vmem:[#allocation4 + $0x78] sm:$0xff]  }
 0x2f7   : > { %v10179_v31 = vpack.c.bf16 %v4804_v0, %v4804_v0  ;;  %v5743_v16 = vor.u32 %v5742_v22, %v5738_v45  ;;  %v5129_v43 = vshrl.u32 %v10178_v24, 16  ;;  %v5132_v50 = vshll.u32 %v10178_v24, 16  ;;  %v7558_v0 = vld [vmem:[#allocation4 + $0x74] sm:$0x1] }
 0x2f8   : > { %v5748_v52 = vrot.slane %v5746_v39, 5  ;;  %v6191_v6 = vrot.slane %v6058_v29, 5  ;;  %v5739_v55 = vsel %vm11382_vm10, %v5734_v1, %v5738_v45  ;;  %v6194_v26 = vrot.slane %v6059_v63, 5  ;;  %v5325_v45 = vld [vmem:[#allocation4 + $0xb0] sm:$0x1] }
 0x2f9   : > { %v5137_v42 = vshrl.u32 %v10179_v31, 16  ;;  %v5140_v47 = vshll.u32 %v10179_v31, 16  ;;  %v5744_v51 = vrot.slane %v5743_v16, 4  ;;  %v5131_v18 = vrot.slane %v5129_v43, 7  ;;  %v7557_v39 = vld [vmem:[#allocation4 + $0x70] sm:$0xf] }
 0x2fa   : > { %7310 = vrot.lane.b32.xlu0 %v9954_v25, %s11070_s12  ;;  %v6193_v19 = vrot.slane %v6191_v6, 4  ;;  %v4322_v2 = vadd.f32 %v13387_v5, %v10287_v7  ;;  %v4553_v33 = vsel %vm12631_vm14, 0, %v4552_v49  ;;  %v4325_v56 = vadd.f32 %v13387_v5, %v10290_v20  ;;  %v8107_v20 = vld [vmem:[#allocation4 + $0x88] sm:$0xf]  ;;  %v13606_v49 = vld [vmem:[#allocation4 + $0x7c] sm:$0xf] }
 0x2fb   : > { %v5139_v27 = vrot.slane %v5137_v42, 7  ;;  %v8393_v36 = vld [vmem:[#allocation5 + $0xd0] sm:$0xff]  ;;  %v5749_v48 = vsel %vm11382_vm10, %v5744_v51, %v5748_v52  ;;  %v5134_v54 = vor.u32 %v5132_v50, %v5131_v18  ;;  %v5135_v62 = vrot.slane %v5131_v18, 4  ;;  %4554 = vst [vmem:[#allocation4 + $0xb4] sm:$0x1] %v4553_v33 }
 0x2fc   : > { %10501 = vmatprep.mubr.msk.bf16.mxu0 %vm1020_vm0, %v8393_v36  ;;  %v9858_v12 = vcombine.low %v5739_v55, %v5749_v48  ;;  %v9875_v40 = vrot.slane %v6057_v14, 9  ;;  %v6195_v9 = vsel %vm11325_vm7, %v6193_v19, %v6194_v26  ;;  %v13584_v22 = vadd.f32 %v13195_v58, %v4322_v2  ;;  %v8106_v52 = vld [vmem:[#allocation4 + $0x84] sm:$0xe]  ;;  %v10653_v26 = vld [vmem:[#allocation4 + $0x78] sm:$0xff]   ;;  %v8108_v2 = vld [vmem:[#allocation4 + $0x8c] sm:$0x1] }
 0x2fd   : > { %v5142_v13 = vor.u32 %v5140_v47, %v5139_v27  ;;  %v5144_v23 = vrot.slane %v5139_v27, 4  ;;  %v5322_v7 = vsel %vm12744_vm12, %v5134_v54, %v5321_v38  ;;  %v13591_v29 = vadd.f32 %v13210_v53, %v4325_v56  ;;  %v13602_v53 = vpop.permute.xlu0 %7296  ;;  %v5973_v42 = vpop.permute.xlu1 %5972  ;;  %v7065_v36 = vld [vmem:[#allocation4 + $0x78] sm:$0xe]  ;;  %v5513_v48 = vld [vmem:[#allocation4 + $0x6c] sm:$0xf] }
 0x2fe   : > { %5982 = vrot.lane.b32.xlu1 %v9858_v12, %s11070_s12  ;;  %7487 = vrot.lane.b32.xlu0 %v10652_v11, %s11068_s10  ;;  %v4609_v24 = vsel %vm12639_vm15, 0, %v4608_v8  ;;  %v7752_v1 = vshrl.u32 %v7556_v59, 16  ;;  %5323 = vst [vmem:[#allocation4 + $0xa8] sm:$0xf] %v5322_v7  ;;  %v6192_v25 = vsel %vm11325_vm7, %v9875_v40, %v6191_v6  ;;  %v4677_v16 = vmin.f32 %v13584_v22, 0.0  ;;  %6017 = vst.msk [vmem:[#allocation5 + $0x48] sm:$0xff] %vm1568_vm1, %v5973_v42 }
 0x2ff   : > { %v5143_v58 = vsel %vm12750_vm2, %v5135_v62, %v5142_v13  ;;  %v5326_v31 = vsel %vm12631_vm14, %v5144_v23, %v5325_v45  ;;  %4610 = vst [vmem:[#allocation4 + $0xbc] sm:$0x1] %v4609_v24  ;;  %v9891_v14 = vcombine.low %v6192_v25, %v6195_v9  ;;  %v4678_v63 = vmin.f32 %v13591_v29, 0.0  ;;  %v10688_v8 = vld [vmem:[#allocation4 + $0x48] sm:$0xff]   ;;  %6337 = vst.msk [vmem:[#allocation5 + $0x48] sm:$0xff] %vm1892_vm9, %v13556_v17 }
 0x300   : > { %5324 = vst.msk [vmem:[#allocation4 + $0xac] sm:$0xf] %vm836_vm3, %v5143_v58  ;;  %5327 = vst [vmem:[#allocation4 + $0xb0] sm:$0x1] %v5326_v31  ;;  %v7754_v43 = vrot.slane %v7752_v1, 4  ;;  %v7755_v50 = vshll.u32 %v7556_v59, 16 }
 0x301   : > { %v4737_v47 = vmul.f32 1.442695, %v4677_v16  ;;  %v7761_v55 = vshll.u32 %v7557_v39, 16  ;;  %v7765_v6 = vshrl.u32 %v7557_v39, 16  ;;  %v7771_v51 = vshll.u32 %v7558_v0, 16  ;;  %6513 = vst.msk [vmem:[#allocation5 + $0x48] sm:$0xff] %vm2070_vm11, %v6469_v35  ;;  %v13616_v23 = vpop.permute.xlu0 %7473 }
 0x302   : > { %6304 = vrot.lane.b32.xlu1 %v9891_v14, %s11068_s10  ;;  %v4739_v18 = vmul.f32 1.442695, %v4678_v63  ;;  %v7757_v19 = vrot.slane %v7755_v50, 5  ;;  %v8240_v38 = vrot.slane %v8107_v20, 5  ;;  %5476 = vst.msk [vmem:[#allocation5 + $0x90] sm:$0xff] %vm1020_vm0, %v10688_v8  ;;  %v10003_v56 = vrot.slane %v8106_v52, 9 }
 0x303   : > { %10863 = vpow2.f32 %v4737_v47  ;;  %v7763_v59 = vrot.slane %v7761_v55, 5  ;;  %v7767_v27 = vrot.slane %v7765_v6, 4  ;;  %v7067_v62 = vld [vmem:[#allocation4 + $0x80] sm:$0x1]  ;;  %v5514_v45 = vld [vmem:[#allocation4 + $0x70] sm:$0xf] }
 0x304   : > { %10865 = vpow2.f32 %v4739_v18  ;;  %v7758_v33 = vor.u32 %v7757_v19, %v7754_v43  ;;  %v8242_v54 = vrot.slane %v8240_v38, 4  ;;  %vm4645_vm6 = vcmp.gt.f32.partialorder %v13584_v22, 0.0  ;;  %v5515_v13 = vld [vmem:[#allocation4 + $0x74] sm:$0x1]  ;;  %v4555_v24 = vld [vmem:[#allocation4 + $0xc0] sm:$0x1]  ;;  %v13624_v43 = vpop.permute.xlu1 %6294 }
 0x305   : > { %v7768_v12 = vor.u32 %v7767_v27, %v7763_v59  ;;  %v7773_v11 = vrot.slane %v7771_v51, 5  ;;  %v8243_v17 = vrot.slane %v8108_v2, 5  ;;  %v7199_v40 = vrot.slane %v13606_v49, 5  ;;  %v4611_v31 = vld [vmem:[#allocation4 + $0xc8] sm:$0x1]  ;;  %v10690_v27 = vld [vmem:[#allocation4 + $0x54] sm:$0xff]  }
 0x306   : > { %vm4646_vm8 = vcmp.gt.f32.partialorder %v13591_v29, 0.0  ;;  %v7759_v35 = vrot.slane %v7758_v33, 4  ;;  %6480 = vrot.lane.b32.xlu1 %v10653_v26, %s11069_s11  ;;  %v8241_v9 = vsel %vm11325_vm7, %v10003_v56, %v8240_v38  ;;  %v5751_v39 = vshrl.u32 %v5513_v48, 16  ;;  %v6061_v47 = vld [vmem:[#allocation4 + $0x7c] sm:$0xf]  ;;  %5477 = vst.msk [vmem:[#allocation5 + $0xa8] sm:$0xff] %vm1020_vm0, %v10690_v27 }
 0x307   : > { %v5754_v7 = vshll.u32 %v5513_v48, 16  ;;  %v7769_v0 = vrot.slane %v7768_v12, 4  ;;  %v8244_v1 = vsel %vm11325_vm7, %v8242_v54, %v8243_v17  ;;  %v9939_v20 = vrot.slane %v7065_v36, 9  ;;  %v6060_v38 = vld [vmem:[#allocation4 + $0x78] sm:$0xe] }
 0x308   : > { %v7201_v58 = vrot.slane %v7199_v40, 4  ;;  %v10019_v25 = vcombine.low %v8241_v9, %v8244_v1  ;;  %v7202_v16 = vrot.slane %v7067_v62, 5  ;;  %v5753_v14 = vrot.slane %v5751_v39, 4 }
 0x309   : > { %v5756_v63 = vrot.slane %v5754_v7, 5  ;;  %v7764_v50 = vsel %vm11382_vm10, %v7759_v35, %v7763_v59  ;;  %v7774_v52 = vsel %vm11382_vm10, %v7769_v0, %v7773_v11  ;;  %v5760_v49 = vshll.u32 %v5514_v45, 16  ;;  %v13637_v59 = vpop.permute.xlu0 %8015 }
 0x30a   : > { %v5764_v42 = vshrl.u32 %v5514_v45, 16  ;;  %v9985_v55 = vcombine.low %v7764_v50, %v7774_v52  ;;  %8360 = vst.msk [vmem:[#allocation5 + $0xe8] sm:$0xff] %vm1020_vm0, %v10019_v25  ;;  %v7203_v6 = vsel %vm11325_vm7, %v7201_v58, %v7202_v16  ;;  %v5770_v8 = vshll.u32 %v5515_v13, 16  ;;  %v6062_v45 = vld [vmem:[#allocation4 + $0x80] sm:$0x1]  ;;  %v10656_v50 = vld [vmem:[#allocation4 + $0x84] sm:$0xff]  }
 0x30b   : > { %v5757_v51 = vor.u32 %v5756_v63, %v5753_v14  ;;  %v5762_v18 = vrot.slane %v5760_v49, 5  ;;  %v10293_v26 = vadd.f32 %v13462_v41, %v13453_v10  ;;  %v4556_v2 = vsel %vm12631_vm14, 0, %v4555_v24 }
 0x30c   : > { %v5766_v19 = vrot.slane %v5764_v42, 4  ;;  %8029 = vrot.lane.b32.xlu0 %v9985_v55, %s11069_s11  ;;  %v7200_v36 = vsel %vm11325_vm7, %v9939_v20, %v7199_v40  ;;  %4557 = vst [vmem:[#allocation4 + $0xc0] sm:$0x1] %v4556_v2  ;;  %v10296_v33 = vadd.f32 %v13476_v32, %v13472_v44  ;;  %v4612_v10 = vsel %vm12639_vm15, 0, %v4611_v31  ;;  %v7559_v44 = vld [vmem:[#allocation4 + $0x78] sm:$0xf]  ;;  %v6471_v32 = vpop.permute.xlu1 %6470 }
 0x30d   : > { %v5758_v48 = vrot.slane %v5757_v51, 4  ;;  %v10864_v41 = vpop.eup %10863  ;;  %v9955_v56 = vcombine.low %v7200_v36, %v7203_v6  ;;  %v4330_v62 = vadd.f32 %v13387_v5, %v10293_v26  ;;  %4613 = vst [vmem:[#allocation4 + $0xc8] sm:$0x1] %v4612_v10  ;;  %v6198_v12 = vrot.slane %v6061_v47, 5  ;;  %v13666_v14 = vpop.permute.xlu0 %7298  ;;  %v7560_v55 = vld [vmem:[#allocation4 + $0x7c] sm:$0xf] }
 0x30e   : > { %v5767_v54 = vor.u32 %v5766_v19, %v5762_v18  ;;  %v10866_v11 = vpop.eup %10865  ;;  %v9798_v17 = vadd.f32 -1.0, %v10864_v41  ;;  %v5772_v40 = vrot.slane %v5770_v8, 5  ;;  %v4333_v13 = vadd.f32 %v13387_v5, %v10296_v33  ;;  %v10691_v6 = vld [vmem:[#allocation4 + $0x60] sm:$0xff]   ;;  %v5328_v33 = vld [vmem:[#allocation4 + $0xb4] sm:$0xf] }
 0x30f   : > { %v9876_v35 = vrot.slane %v6060_v38, 9  ;;  %v9799_v9 = vadd.f32 -1.0, %v10866_v11  ;;  %v5763_v39 = vsel %vm11382_vm10, %v5758_v48, %v5762_v18  ;;  %v13652_v24 = vadd.f32 %v13192_v61, %v4330_v62  ;;  %v7561_v26 = vld [vmem:[#allocation4 + $0x80] sm:$0x1]  ;;  %5478 = vst.msk [vmem:[#allocation5 + $0xc0] sm:$0xff] %vm1020_vm0, %v10691_v6 }
 0x310   : > { %v5768_v7 = vrot.slane %v5767_v54, 4  ;;  %v4805_v0 = vsel %vm4645_vm6, %v13584_v22, %v9798_v17  ;;  %7312 = vrot.lane.b32.xlu0 %v9955_v56, %s11070_s12  ;;  %v13659_v1 = vadd.f32 %v13197_v21, %v4333_v13  ;;  %v6200_v5 = vrot.slane %v6198_v12, 4  ;;  %v6528_v54 = vld [vmem:[#allocation4 + $0x14] sm:$0x1]  ;;  %v6526_v62 = vld [vmem:[#allocation4 + $0xc] sm:$0xf] }
 0x311   : > { %v6201_v20 = vrot.slane %v6062_v45, 5  ;;  %v10180_v58 = vpack.c.bf16 %v4805_v0, %v4805_v0  ;;  %v4806_v31 = vsel %vm4646_vm8, %v13591_v29, %v9799_v9  ;;  %v8396_v25 = vld [vmem:[#allocation5 + $0xe8] sm:$0xff]  ;;  %v7776_v16 = vshrl.u32 %v7559_v44, 16  ;;  %v5332_v11 = vld [vmem:[#allocation4 + $0xbc] sm:$0x1] }
 0x312   : > { %v5773_v61 = vsel %vm11382_vm10, %v5768_v7, %v5772_v40  ;;  %v10181_v22 = vpack.c.bf16 %v4806_v31, %v4806_v31  ;;  %10502 = vmatmul.mubr.msk.bf16.gmra.mrb[80].mxu0 %vm1020_vm0, %v8396_v25  ;;  %v4679_v21 = vmin.f32 %v13652_v24, 0.0  ;;  %v6199_v52 = vsel %vm11325_vm7, %v9876_v35, %v6198_v12  ;;  %v13681_v40 = vpop.permute.xlu0 %7475  ;;  %v10659_v31 = vld [vmem:[#allocation4 + $0x84] sm:$0xff]  }
 0x313   : > { %v9859_v63 = vcombine.low %v5763_v39, %v5773_v61  ;;  %v5146_v49 = vshrl.u32 %v10180_v58, 16  ;;  %v5149_v42 = vshll.u32 %v10180_v58, 16  ;;  %v4680_v29 = vmin.f32 %v13659_v1, 0.0  ;;  %v5975_v2 = vpop.permute.xlu1 %5974  ;;  %v8110_v61 = vld [vmem:[#allocation4 + $0x94] sm:$0xf] }
 0x314   : > { %v6202_v47 = vsel %vm11325_vm7, %v6200_v5, %v6201_v20  ;;  %v5154_v51 = vshrl.u32 %v10181_v22, 16  ;;  %v5157_v8 = vshll.u32 %v10181_v22, 16  ;;  %v4741_v18 = vmul.f32 1.442695, %v4679_v21  ;;  %7489 = vrot.lane.b32.xlu0 %v10656_v50, %s11068_s10  ;;  %6018 = vst.msk [vmem:[#allocation5 + $0x60] sm:$0xff] %vm1568_vm1, %v5975_v2 }
 0x315   : > { %5984 = vrot.lane.b32.xlu1 %v9859_v63, %s11070_s12  ;;  %v9892_v19 = vcombine.low %v6199_v52, %v6202_v47  ;;  %v5148_v38 = vrot.slane %v5146_v49, 7  ;;  %v4743_v27 = vmul.f32 1.442695, %v4680_v29  ;;  %v7778_v36 = vrot.slane %v7776_v16, 4  ;;  %6338 = vst.msk [vmem:[#allocation5 + $0x60] sm:$0xff] %vm1892_vm9, %v13624_v43 }
 0x316   : > { %v7779_v48 = vshll.u32 %v7559_v44, 16  ;;  %v5156_v10 = vrot.slane %v5154_v51, 7  ;;  %10867 = vpow2.f32 %v4741_v18  ;;  %v7785_v41 = vshll.u32 %v7560_v55, 16  ;;  %6514 = vst.msk [vmem:[#allocation5 + $0x60] sm:$0xff] %vm2070_vm11, %v6471_v32  ;;  %v8109_v5 = vld [vmem:[#allocation4 + $0x90] sm:$0xe] }
 0x317   : > { %v7789_v56 = vshrl.u32 %v7560_v55, 16  ;;  %v5151_v45 = vor.u32 %v5149_v42, %v5148_v38  ;;  %v5152_v12 = vrot.slane %v5148_v38, 4  ;;  %10869 = vpow2.f32 %v4743_v27  ;;  %v7068_v16 = vld [vmem:[#allocation4 + $0x84] sm:$0xe]  ;;  %v8111_v50 = vld [vmem:[#allocation4 + $0x98] sm:$0x1] }
 0x318   : > { %v7781_v17 = vrot.slane %v7779_v48, 5  ;;  %v5159_v13 = vor.u32 %v5157_v8, %v5156_v10  ;;  %v5161_v35 = vrot.slane %v5156_v10, 4  ;;  %v7787_v44 = vrot.slane %v7785_v41, 5  ;;  %v7069_v52 = vld [vmem:[#allocation4 + $0x88] sm:$0xf] }
 0x319   : > { %6306 = vrot.lane.b32.xlu1 %v9892_v19, %s11068_s10  ;;  %v7791_v9 = vrot.slane %v7789_v56, 4  ;;  %v5329_v39 = vsel %vm12744_vm12, %v5151_v45, %v5328_v33  ;;  %v7795_v43 = vshll.u32 %v7561_v26, 16  ;;  %v13689_v0 = vrot.slane %v6584_v37, 5  ;;  %v7070_v49 = vld [vmem:[#allocation4 + $0x8c] sm:$0x1]  ;;  %v13702_v19 = vpop.permute.xlu0 %8017 }
 0x31a   : > { %v7782_v7 = vor.u32 %v7781_v17, %v7778_v36  ;;  %5330 = vst [vmem:[#allocation4 + $0xb4] sm:$0xf] %v5329_v39  ;;  %v5160_v32 = vsel %vm12750_vm2, %v5152_v12, %v5159_v13  ;;  %v5333_v20 = vsel %vm12631_vm14, %v5161_v35, %v5332_v11  ;;  %vm4647_vm13 = vcmp.gt.f32.partialorder %v13652_v24, 0.0  ;;  %v5516_v55 = vld [vmem:[#allocation4 + $0x78] sm:$0xf]  ;;  %v10692_v36 = vld [vmem:[#allocation4 + $0x6c] sm:$0xff]   ;;  %v13709_v11 = vpop.permute.xlu1 %6296 }
 0x31b   : > { %v7792_v58 = vor.u32 %v7791_v9, %v7787_v44  ;;  %v6588_v25 = vshrl.u32 %v13420_v28, 16  ;;  %5331 = vst.msk [vmem:[#allocation4 + $0xb8] sm:$0xf] %vm836_vm3, %v5160_v32  ;;  %5334 = vst [vmem:[#allocation4 + $0xbc] sm:$0x1] %v5333_v20  ;;  %vm4648_vm4 = vcmp.gt.f32.partialorder %v13659_v1, 0.0 }
 0x31c   : > { %v7783_v37 = vrot.slane %v7782_v7, 4  ;;  %v7797_v22 = vrot.slane %v7795_v43, 5  ;;  %v6594_v63 = vshll.u32 %v6528_v54, 16  ;;  %v6575_v21 = vshrl.u32 %v6526_v62, 16  ;;  %5479 = vst.msk [vmem:[#allocation5 + $0xd8] sm:$0xff] %vm1020_vm0, %v10692_v36 }
 0x31d   : > { %v7793_v42 = vrot.slane %v7792_v58, 4  ;;  %6482 = vrot.lane.b32.xlu1 %v10659_v31, %s11069_s11  ;;  %v6590_v29 = vrot.slane %v6588_v25, 4  ;;  %v6578_v47 = vshll.u32 %v6526_v62, 16  ;;  %v10004_v28 = vrot.slane %v8109_v5, 9  ;;  %v5517_v32 = vld [vmem:[#allocation4 + $0x7c] sm:$0xf] }
 0x31e   : > { %v7788_v6 = vsel %vm11382_vm10, %v7783_v37, %v7787_v44  ;;  %v6596_v51 = vrot.slane %v6594_v63, 5  ;;  %v6577_v8 = vrot.slane %v6575_v21, 4  ;;  %v8247_v18 = vrot.slane %v8110_v61, 5  ;;  %v13722_v61 = vpop.permute.xlu0 %7300 }
 0x31f   : > { %v7798_v26 = vsel %vm11382_vm10, %v7793_v42, %v7797_v22  ;;  %v6591_v2 = vor.u32 %v6590_v29, %v13689_v0  ;;  %v6580_v38 = vrot.slane %v6578_v47, 5  ;;  %v8250_v27 = vrot.slane %v8111_v50, 5  ;;  %v6063_v42 = vld [vmem:[#allocation4 + $0x84] sm:$0xe] }
 0x320   : > { %v9986_v48 = vcombine.low %v7788_v6, %v7798_v26  ;;  %v8248_v33 = vsel %vm11325_vm7, %v10004_v28, %v8247_v18  ;;  %v8249_v10 = vrot.slane %v8247_v18, 4  ;;  %v9940_v41 = vrot.slane %v7068_v16, 9  ;;  %v10868_v56 = vpop.eup %10867  ;;  %v6065_v6 = vld [vmem:[#allocation4 + $0x8c] sm:$0x1] }
 0x321   : > { %v6592_v54 = vrot.slane %v6591_v2, 4  ;;  %v6581_v62 = vor.u32 %v6580_v38, %v6577_v8  ;;  %v7206_v45 = vrot.slane %v7069_v52, 5  ;;  %v7209_v12 = vrot.slane %v7070_v49, 5  ;;  %v10870_v17 = vpop.eup %10869  ;;  %v5518_v52 = vld [vmem:[#allocation4 + $0x80] sm:$0x1] }
 0x322   : > { %v9800_v13 = vadd.f32 -1.0, %v10868_v56  ;;  %8031 = vrot.lane.b32.xlu0 %v9986_v48, %s11069_s11  ;;  %v8251_v35 = vsel %vm11325_vm7, %v8249_v10, %v8250_v27  ;;  %v5775_v44 = vshrl.u32 %v5516_v55, 16  ;;  %v5778_v9 = vshll.u32 %v5516_v55, 16  ;;  %v6529_v2 = vld [vmem:[#allocation4 + $0x18] sm:$0xf] }
 0x323   : > { %v9801_v39 = vadd.f32 -1.0, %v10870_v17  ;;  %v6597_v7 = vsel %vm11382_vm10, %v6592_v54, %v6596_v51  ;;  %v6582_v43 = vrot.slane %v6581_v62, 4  ;;  %v10020_v5 = vcombine.low %v8248_v33, %v8251_v35  ;;  %v13733_v51 = vpop.permute.xlu1 %6472  ;;  %v6530_v33 = vld [vmem:[#allocation4 + $0x1c] sm:$0xf]  ;;  %v5335_v10 = vld [vmem:[#allocation4 + $0xc0] sm:$0xf] }
 0x324   : > { %v4807_v20 = vsel %vm4647_vm13, %v13652_v24, %v9800_v13  ;;  %v7207_v58 = vsel %vm11325_vm7, %v9940_v41, %v7206_v45  ;;  %v7208_v31 = vrot.slane %v7206_v45, 4  ;;  %v5777_v25 = vrot.slane %v5775_v44, 4  ;;  %v13743_v45 = vpop.permute.xlu0 %7477  ;;  %v5339_v13 = vld [vmem:[#allocation4 + $0xc8] sm:$0x1]  ;;  %v10664_v44 = vld [vmem:[#allocation4 + $0x90] sm:$0xff]  }
 0x325   : > { %v10182_v16 = vpack.c.bf16 %v4807_v20, %v4807_v20  ;;  %v4808_v37 = vsel %vm4648_vm4, %v13659_v1, %v9801_v39  ;;  %v6587_v22 = vsel %vm11382_vm10, %v6582_v43, %v13689_v0  ;;  %8361 = vst.msk [vmem:[#allocation5 + $0x100] sm:$0xff] %vm1020_vm0, %v10020_v5  ;;  %v5780_v63 = vrot.slane %v5778_v9, 5  ;;  %v6064_v1 = vld [vmem:[#allocation4 + $0x88] sm:$0xf]  ;;  %v6531_v5 = vld [vmem:[#allocation4 + $0x20] sm:$0x1] }
 0x326   : > { %v10183_v24 = vpack.c.bf16 %v4808_v37, %v4808_v37  ;;  %v9914_v21 = vcombine.low %v6587_v22, %v6597_v7  ;;  %v7210_v50 = vsel %vm11325_vm7, %v7208_v31, %v7209_v12  ;;  %v5784_v49 = vshll.u32 %v5517_v32, 16  ;;  %v10693_v37 = vld [vmem:[#allocation4 + $0x78] sm:$0xff]  }
 0x327   : > { %v5163_v29 = vshrl.u32 %v10182_v16, 16  ;;  %v5166_v47 = vshll.u32 %v10182_v16, 16  ;;  %v9956_v28 = vcombine.low %v7207_v58, %v7210_v50  ;;  %v5781_v55 = vor.u32 %v5780_v63, %v5777_v25  ;;  %v7563_v25 = vld [vmem:[#allocation4 + $0x88] sm:$0xf]  ;;  %5480 = vst.msk [vmem:[#allocation5 + $0xf0] sm:$0xff] %vm1020_vm0, %v10693_v37 }
 0x328   : > { %v5171_v0 = vshrl.u32 %v10183_v24, 16  ;;  %v5174_v8 = vshll.u32 %v10183_v24, 16  ;;  %7022 = vst.msk [vmem:[#allocation5 + $0x8] sm:$0xff] %vm1020_vm0, %v9914_v21  ;;  %v13736_v18 = vrot.slane %v5784_v49, 5  ;;  %v5788_v26 = vshrl.u32 %v5517_v32, 16 }
 0x329   : > { %v5165_v38 = vrot.slane %v5163_v29, 7  ;;  %7342 = vst.msk [vmem:[#allocation5 + $0x8] sm:$0xff] %vm1568_vm1, %v13551_v3  ;;  %7314 = vrot.lane.b32.xlu0 %v9956_v28, %s11070_s12  ;;  %v5782_v27 = vrot.slane %v5781_v55, 4  ;;  %v5794_v36 = vshll.u32 %v5518_v52, 16  ;;  %v9877_v48 = vrot.slane %v6063_v42, 9 }
 0x32a   : > { %v5173_v41 = vrot.slane %v5171_v0, 7  ;;  %v5790_v56 = vrot.slane %v5788_v26, 4  ;;  %7519 = vst.msk [vmem:[#allocation5 + $0x8] sm:$0xff] %vm1892_vm9, %v13571_v60  ;;  %v6205_v54 = vrot.slane %v6064_v1, 5  ;;  %v6208_v62 = vrot.slane %v6065_v6, 5  ;;  %v13773_v6 = vpop.permute.xlu0 %8019 }
 0x32b   : > { %v5168_v12 = vor.u32 %v5166_v47, %v5165_v38  ;;  %v5169_v17 = vrot.slane %v5165_v38, 4  ;;  %v5787_v3 = vsel %vm11382_vm10, %v5782_v27, %v13736_v18  ;;  %v5796_v35 = vrot.slane %v5794_v36, 5  ;;  %8063 = vst.msk [vmem:[#allocation5 + $0x8] sm:$0xff] %vm2070_vm11, %v13637_v59  ;;  %v7562_v32 = vld [vmem:[#allocation4 + $0x84] sm:$0xf]  ;;  %v5977_v16 = vpop.permute.xlu1 %5976 }
 0x32c   : > { %v5176_v9 = vor.u32 %v5174_v8, %v5173_v41  ;;  %v5178_v39 = vrot.slane %v5173_v41, 4  ;;  %v8399_v7 = vld [vmem:[#allocation5 + $0x100] sm:$0xff]  ;;  %v5791_v60 = vor.u32 %v5790_v56, %v13736_v18  ;;  %v13753_v43 = vsel %vm11325_vm7, %v9877_v48, %v6205_v54  ;;  %6019 = vst.msk [vmem:[#allocation5 + $0x78] sm:$0xff] %vm1568_vm1, %v5977_v16  ;;  %v7564_v42 = vld [vmem:[#allocation4 + $0x8c] sm:$0x1] }
 0x32d   : > { %v5336_v20 = vsel %vm12744_vm12, %v5168_v12, %v5335_v10  ;;  %10505 = vmatprep.mubr.msk.bf16.mxu0 %vm1020_vm0, %v8399_v7  ;;  %7491 = vrot.lane.b32.xlu0 %v10664_v44, %s11068_s10  ;;  %v6207_v58 = vrot.slane %v6205_v54, 4  ;;  %v6599_v59 = vshrl.u32 %v6529_v2, 16  ;;  %v6602_v31 = vshll.u32 %v6529_v2, 16  ;;  %6339 = vst.msk [vmem:[#allocation5 + $0x78] sm:$0xff] %vm1892_vm9, %v13709_v11  ;;  %v8112_v55 = vld [vmem:[#allocation4 + $0x9c] sm:$0xe] }
 0x32e   : > { %5337 = vst [vmem:[#allocation4 + $0xc0] sm:$0xf] %v5336_v20  ;;  %v5177_v22 = vsel %vm12750_vm2, %v5169_v17, %v5176_v9  ;;  %v5340_v63 = vsel %vm12631_vm14, %v5178_v39, %v5339_v13  ;;  %v5792_v24 = vrot.slane %v5791_v60, 4  ;;  %v6608_v30 = vshll.u32 %v6530_v33, 16  ;;  %v8113_v1 = vld [vmem:[#allocation4 + $0xa0] sm:$0xf] }
 0x32f   : > { %5338 = vst.msk [vmem:[#allocation4 + $0xc4] sm:$0xf] %vm836_vm3, %v5177_v22  ;;  %5341 = vst [vmem:[#allocation4 + $0xc8] sm:$0x1] %v5340_v63  ;;  %v6209_v21 = vsel %vm11325_vm7, %v6207_v58, %v6208_v62  ;;  %v6601_v50 = vrot.slane %v6599_v59, 4  ;;  %v6604_v52 = vrot.slane %v6602_v31, 5  ;;  %v13783_v31 = vpop.permute.xlu0 %7302 }
 0x330   : > { %v6612_v49 = vshrl.u32 %v6530_v33, 16  ;;  %v5797_v34 = vsel %vm11382_vm10, %v5792_v24, %v5796_v35  ;;  %v9893_v29 = vcombine.low %v13753_v43, %v6209_v21  ;;  %v6610_v47 = vrot.slane %v6608_v30, 5  ;;  %6515 = vst.msk [vmem:[#allocation5 + $0x78] sm:$0xff] %vm2070_vm11, %v13733_v51  ;;  %v7071_v26 = vld [vmem:[#allocation4 + $0x90] sm:$0xe]  ;;  %v8367_v51 = vld [vmem:[#allocation5] sm:$0xff] }
 0x331   : > { %v6618_v28 = vshll.u32 %v6531_v5, 16  ;;  %v9860_v0 = vcombine.low %v5787_v3, %v5797_v34  ;;  %v6605_v8 = vor.u32 %v6604_v52, %v6601_v50  ;;  %v7800_v11 = vshrl.u32 %v7562_v32, 16  ;;  %v7072_v48 = vld [vmem:[#allocation4 + $0x94] sm:$0xf]  ;;  %v8114_v62 = vld [vmem:[#allocation4 + $0xa4] sm:$0x1] }
 0x332   : > { %v6614_v18 = vrot.slane %v6612_v49, 4  ;;  %v7803_v38 = vshll.u32 %v7562_v32, 16  ;;  %v7809_v27 = vshll.u32 %v7563_v25, 16  ;;  %v7813_v36 = vshrl.u32 %v7563_v25, 16  ;;  %v8368_v33 = vld [vmem:[#allocation5 + $0x8] sm:$0xff]  ;;  %v11002_v60 = vld [vmem:[%s14635_s3 + $0x80] sm:$0xff]  }
 0x333   : > { %v6620_v2 = vrot.slane %v6618_v28, 5  ;;  %5986 = vrot.lane.b32.xlu1 %v9860_v0, %s11070_s12  ;;  %v6606_v10 = vrot.slane %v6605_v8, 4  ;;  %v7802_v56 = vrot.slane %v7800_v11, 4  ;;  %v7819_v54 = vshll.u32 %v7564_v42, 16  ;;  %8646 = vmatprep.mubr.bf16.mxu1 %v8368_v33  ;;  %v7073_v35 = vld [vmem:[#allocation4 + $0x98] sm:$0x1] }
 0x334   : > { %v6615_v41 = vor.u32 %v6614_v18, %v6610_v47  ;;  %v7805_v12 = vrot.slane %v7803_v38, 5  ;;  %v7811_v17 = vrot.slane %v7809_v27, 5  ;;  %v7815_v13 = vrot.slane %v7813_v36, 4  ;;  %8647 = vmatmul.mubr.bf16.vlgmr.msra.gmra.mrb[32].mxu1 %v8367_v51  ;;  %v10694_v43 = vld [vmem:[#allocation4 + $0x84] sm:$0xff]   ;;  %v11003_v25 = vld [vmem:[%s14635_s3 + $0x88] sm:$0xff]  }
 0x335   : > { %v10005_v3 = vrot.slane %v8112_v55, 9  ;;  %v6611_v44 = vsel %vm11382_vm10, %v6606_v10, %v6610_v47  ;;  %v7821_v39 = vrot.slane %v7819_v54, 5  ;;  %v8254_v7 = vrot.slane %v8113_v1, 5  ;;  %10519 = vmatpush3.bf16.msra.mxu1 %v11002_v60  ;;  %v5519_v59 = vld [vmem:[#allocation4 + $0x84] sm:$0xf]  ;;  %5481 = vst.msk [vmem:[#allocation5 + $0x108] sm:$0xff] %vm1020_vm0, %v10694_v43  ;;  %v13798_v1 = vpop.permute.xlu1 %6298 }
 0x336   : > { %v6616_v9 = vrot.slane %v6615_v41, 4  ;;  %v7806_v5 = vor.u32 %v7805_v12, %v7802_v56  ;;  %v7816_v32 = vor.u32 %v7815_v13, %v7811_v17  ;;  %v8257_v20 = vrot.slane %v8114_v62, 5  ;;  %10518 = vmatprep.subr.bf16.mxu1 %v11003_v25  ;;  %v5520_v24 = vld [vmem:[#allocation4 + $0x88] sm:$0xf]  ;;  %v5521_v30 = vld [vmem:[#allocation4 + $0x8c] sm:$0x1] }
 0x337   : > { %v9941_v58 = vrot.slane %v7071_v26, 9  ;;  %6308 = vrot.lane.b32.xlu1 %v9893_v29, %s11068_s10  ;;  %v8255_v37 = vsel %vm11325_vm7, %v10005_v3, %v8254_v7  ;;  %v8256_v22 = vrot.slane %v8254_v7, 4  ;;  %v7213_v63 = vrot.slane %v7072_v48, 5  ;;  %v10668_v49 = vld [vmem:[#allocation4 + $0x90] sm:$0xff]   ;;  %v13805_v38 = vpop.f32.mrb[64].mxu0 }
 0x338   : > { %v6621_v16 = vsel %vm11382_vm10, %v6616_v9, %v6620_v2  ;;  %v7807_v50 = vrot.slane %v7806_v5, 4  ;;  %v7817_v52 = vrot.slane %v7816_v32, 4  ;;  %v7216_v42 = vrot.slane %v7073_v35, 5  ;;  %v6066_v34 = vld [vmem:[#allocation4 + $0x90] sm:$0xe]  ;;  %v13817_v12 = vpop.f32.mrb[65].mxu0 }
 0x339   : > { %v9915_v21 = vcombine.low %v6611_v44, %v6621_v16  ;;  %v8258_v29 = vsel %vm11325_vm7, %v8256_v22, %v8257_v20  ;;  %v7214_v47 = vsel %vm11325_vm7, %v9941_v58, %v7213_v63  ;;  %v7215_v28 = vrot.slane %v7213_v63, 4  ;;  %10520 = vmatpush3.bf16.msra.mxu1 %v11003_v25  ;;  %v6067_v26 = vld [vmem:[#allocation4 + $0x94] sm:$0xf]  ;;  %v6068_v2 = vld [vmem:[#allocation4 + $0x98] sm:$0x1]  ;;  %v13822_v60 = vpop.f32.mrb[66].mxu0 }
 0x33a   : > { %v5799_v55 = vshrl.u32 %v5519_v59, 16  ;;  %v7812_v0 = vsel %vm11382_vm10, %v7807_v50, %v7811_v17  ;;  %v7822_v8 = vsel %vm11382_vm10, %v7817_v52, %v7821_v39  ;;  %v10021_v18 = vcombine.low %v8255_v37, %v8258_v29  ;;  %v6532_v10 = vld [vmem:[#allocation4 + $0x24] sm:$0xf]  ;;  %v6533_v41 = vld [vmem:[#allocation4 + $0x28] sm:$0xf]  ;;  %v13830_v25 = vpop.f32.mrb[67].mxu0 }
 0x33b   : > { %7023 = vst.msk [vmem:[#allocation5 + $0x20] sm:$0xff] %vm1020_vm0, %v9915_v21  ;;  %v5802_v11 = vshll.u32 %v5519_v59, 16  ;;  %v9987_v27 = vcombine.low %v7812_v0, %v7822_v8  ;;  %6484 = vrot.lane.b32.xlu1 %v10668_v49, %s11069_s11  ;;  %v7217_v36 = vsel %vm11325_vm7, %v7215_v28, %v7216_v42  ;;  %v5808_v33 = vshll.u32 %v5520_v24, 16  ;;  %v6534_v39 = vld [vmem:[#allocation4 + $0x2c] sm:$0x1]  ;;  %v13828_v59 = vpop.permute.xlu1 %6474 }
 0x33c   : > { %7343 = vst.msk [vmem:[#allocation5 + $0x20] sm:$0xff] %vm1568_vm1, %v13602_v53  ;;  %v5801_v48 = vrot.slane %v5799_v55, 4  ;;  %v9957_v56 = vcombine.low %v7214_v47, %v7217_v36  ;;  %v5812_v62 = vshrl.u32 %v5520_v24, 16  ;;  %v5818_v51 = vshll.u32 %v5521_v30, 16  ;;  %v13815_v53 = vpop.permute.xlu0 %7479  ;;  %v7565_v58 = vld [vmem:[#allocation4 + $0x90] sm:$0xf] }
 0x33d   : > { %7520 = vst.msk [vmem:[#allocation5 + $0x20] sm:$0xff] %vm1892_vm9, %v13616_v23  ;;  %v5804_v54 = vrot.slane %v5802_v11, 5  ;;  %8033 = vrot.lane.b32.xlu0 %v9987_v27, %s11069_s11  ;;  %v5810_v17 = vrot.slane %v5808_v33, 5  ;;  %v9878_v13 = vrot.slane %v6066_v34, 9  ;;  %v6212_v3 = vrot.slane %v6067_v26, 5  ;;  %v10673_v24 = vld [vmem:[#allocation4 + $0x9c] sm:$0xff]  }
 0x33e   : > { %8362 = vst.msk [vmem:[#allocation5 + $0x118] sm:$0xff] %vm1020_vm0, %v10021_v18  ;;  %v6215_v35 = vrot.slane %v6068_v2, 5  ;;  %v5814_v44 = vrot.slane %v5812_v62, 4  ;;  %v5820_v9 = vrot.slane %v5818_v51, 5  ;;  %v6623_v7 = vshrl.u32 %v6532_v10, 16 }
 0x33f   : > { %8064 = vst.msk [vmem:[#allocation5 + $0x20] sm:$0xff] %vm2070_vm11, %v13702_v19  ;;  %v5805_v23 = vor.u32 %v5804_v54, %v5801_v48  ;;  %v13826_v43 = vsel %vm11325_vm7, %v9878_v13, %v6212_v3  ;;  %v6214_v5 = vrot.slane %v6212_v3, 4  ;;  %v6626_v32 = vshll.u32 %v6532_v10, 16  ;;  %v7566_v63 = vld [vmem:[#allocation4 + $0x94] sm:$0xf] }
 0x340   : > { %v6632_v20 = vshll.u32 %v6533_v41, 16  ;;  %v5815_v16 = vor.u32 %v5814_v44, %v5810_v17  ;;  %v6625_v37 = vrot.slane %v6623_v7, 4  ;;  %v6636_v22 = vshrl.u32 %v6533_v41, 16  ;;  %v7567_v49 = vld [vmem:[#allocation4 + $0x98] sm:$0x1]  ;;  %v13841_v55 = vpop.permute.xlu0 %8021 }
 0x341   : > { %v5806_v19 = vrot.slane %v5805_v23, 4  ;;  %7316 = vrot.lane.b32.xlu0 %v9957_v56, %s11070_s12  ;;  %v13835_v30 = vsel %vm11325_vm7, %v6214_v5, %v6215_v35  ;;  %v6628_v21 = vrot.slane %v6626_v32, 5  ;;  %v6642_v52 = vshll.u32 %v6534_v39, 16  ;;  %v8115_v28 = vld [vmem:[#allocation4 + $0xa8] sm:$0xe]  ;;  %v10695_v56 = vld [vmem:[#allocation4 + $0x90] sm:$0xff]  }
 0x342   : > { %v6634_v50 = vrot.slane %v6632_v20, 5  ;;  %v5816_v34 = vrot.slane %v5815_v16, 4  ;;  %v9894_v29 = vcombine.low %v13826_v43, %v13835_v30  ;;  %v6638_v47 = vrot.slane %v6636_v22, 4  ;;  %v8116_v2 = vld [vmem:[#allocation4 + $0xac] sm:$0xf]  ;;  %v8370_v23 = vld [vmem:[#allocation5 + $0x18] sm:$0xff] }
 0x343   : > { %v5811_v42 = vsel %vm11382_vm10, %v5806_v19, %v5810_v17  ;;  %v6629_v8 = vor.u32 %v6628_v21, %v6625_v37  ;;  %v6644_v18 = vrot.slane %v6642_v52, 5  ;;  %v7824_v11 = vshrl.u32 %v7565_v58, 16  ;;  %v8117_v10 = vld [vmem:[#allocation4 + $0xb0] sm:$0x1]  ;;  %v7074_v13 = vld [vmem:[#allocation4 + $0x9c] sm:$0xe]  ;;  %v5979_v44 = vpop.permute.xlu1 %5978 }
 0x344   : > { %v7827_v26 = vshll.u32 %v7565_v58, 16  ;;  %v5821_v27 = vsel %vm11382_vm10, %v5816_v34, %v5820_v9  ;;  %v6639_v36 = vor.u32 %v6638_v47, %v6634_v50  ;;  %v7833_v48 = vshll.u32 %v7566_v63, 16  ;;  %v7075_v3 = vld [vmem:[#allocation4 + $0xa0] sm:$0xf]  ;;  %v7076_v35 = vld [vmem:[#allocation4 + $0xa4] sm:$0x1] }
 0x345   : > { %v8402_v0 = vld [vmem:[#allocation5 + $0x118] sm:$0xff]  ;;  %v7837_v33 = vshrl.u32 %v7566_v63, 16  ;;  %v9861_v54 = vcombine.low %v5811_v42, %v5821_v27  ;;  %7493 = vrot.lane.b32.xlu0 %v10673_v24, %s11068_s10  ;;  %v6630_v62 = vrot.slane %v6629_v8, 4  ;;  %v7826_v51 = vrot.slane %v7824_v11, 4  ;;  %6020 = vst.msk [vmem:[#allocation5 + $0x90] sm:$0xff] %vm1568_vm1, %v5979_v44  ;;  %v13856_v24 = vpop.permute.xlu0 %7304 }
 0x346   : > { %10506 = vmatmul.mubr.msk.bf16.gmra.mrb[84].mxu0 %vm1020_vm0, %v8402_v0  ;;  %v8371_v41 = vld [vmem:[#allocation5 + $0x20] sm:$0xff]  ;;  %v7829_v17 = vrot.slane %v7827_v26, 5  ;;  %v6640_v39 = vrot.slane %v6639_v36, 4  ;;  %v7835_v9 = vrot.slane %v7833_v48, 5  ;;  %v7843_v43 = vshll.u32 %v7567_v49, 16  ;;  %5482 = vst.msk [vmem:[#allocation5 + $0x120] sm:$0xff] %vm1020_vm0, %v10695_v56 }
 0x347   : > { %8654 = vmatprep.mubr.bf16.mxu1 %v8371_v41  ;;  %v7839_v7 = vrot.slane %v7837_v33, 4  ;;  %v5522_v5 = vld [vmem:[#allocation4 + $0x90] sm:$0xf]  ;;  %5988 = vrot.lane.b32.xlu1 %v9861_v54, %s11070_s12  ;;  %v6635_v32 = vsel %vm11382_vm10, %v6630_v62, %v6634_v50  ;;  %v10006_v58 = vrot.slane %v8115_v28, 9  ;;  %v8261_v19 = vrot.slane %v8116_v2, 5  ;;  %6340 = vst.msk [vmem:[#allocation5 + $0x90] sm:$0xff] %vm1892_vm9, %v13798_v1 }
 0x348   : > { %8655 = vmatmul.mubr.bf16.gmra.mrb[36].mxu1 %v8370_v23  ;;  %v7830_v20 = vor.u32 %v7829_v17, %v7826_v51  ;;  %v6645_v16 = vsel %vm11382_vm10, %v6640_v39, %v6644_v18  ;;  %v7845_v22 = vrot.slane %v7843_v43, 5  ;;  %v8264_v63 = vrot.slane %v8117_v10, 5  ;;  %6516 = vst.msk [vmem:[#allocation5 + $0x90] sm:$0xff] %vm2070_vm11, %v13828_v59  ;;  %v5523_v47 = vld [vmem:[#allocation4 + $0x94] sm:$0xf]  ;;  %v10677_v10 = vld [vmem:[#allocation4 + $0x9c] sm:$0xff]  }
 0x349   : > { %v7840_v37 = vor.u32 %v7839_v7, %v7835_v9  ;;  %v9916_v30 = vcombine.low %v6635_v32, %v6645_v16  ;;  %v8262_v50 = vsel %vm11325_vm7, %v10006_v58, %v8261_v19  ;;  %v8263_v52 = vrot.slane %v8261_v19, 4  ;;  %v5524_v0 = vld [vmem:[#allocation4 + $0x98] sm:$0x1]  ;;  %v6069_v11 = vld [vmem:[#allocation4 + $0x9c] sm:$0xe] }
 0x34a   : > { %v7831_v21 = vrot.slane %v7830_v20, 4  ;;  %v9942_v42 = vrot.slane %v7074_v13, 9  ;;  %v7220_v1 = vrot.slane %v7075_v3, 5  ;;  %v7223_v34 = vrot.slane %v7076_v35, 5  ;;  %v6070_v36 = vld [vmem:[#allocation4 + $0xa0] sm:$0xf]  ;;  %v13881_v3 = vpop.permute.xlu0 %7481 }
 0x34b   : > { %v7841_v49 = vrot.slane %v7840_v37, 4  ;;  %6310 = vrot.lane.b32.xlu1 %v9894_v29, %s11068_s10  ;;  %7024 = vst.msk [vmem:[#allocation5 + $0x38] sm:$0xff] %vm1020_vm0, %v9916_v30  ;;  %v8265_v59 = vsel %vm11325_vm7, %v8263_v52, %v8264_v63  ;;  %v5823_v8 = vshrl.u32 %v5522_v5, 16  ;;  %v5826_v18 = vshll.u32 %v5522_v5, 16  ;;  %v6535_v48 = vld [vmem:[#allocation4 + $0x30] sm:$0xf] }
 0x34c   : > { %v7836_v28 = vsel %vm11382_vm10, %v7831_v21, %v7835_v9  ;;  %7344 = vst.msk [vmem:[#allocation5 + $0x38] sm:$0xff] %vm1568_vm1, %v13666_v14  ;;  %v10022_v2 = vcombine.low %v8262_v50, %v8265_v59  ;;  %v7221_v29 = vsel %vm11325_vm7, %v9942_v42, %v7220_v1  ;;  %v7222_v27 = vrot.slane %v7220_v1, 4  ;;  %v6071_v62 = vld [vmem:[#allocation4 + $0xa4] sm:$0x1]  ;;  %v6536_v39 = vld [vmem:[#allocation4 + $0x34] sm:$0xf]  ;;  %v13885_v9 = vpop.permute.xlu1 %6300 }
 0x34d   : > { %v7846_v26 = vsel %vm11382_vm10, %v7841_v49, %v7845_v22  ;;  %7521 = vst.msk [vmem:[#allocation5 + $0x38] sm:$0xff] %vm1892_vm9, %v13681_v40  ;;  %v5825_v41 = vrot.slane %v5823_v8, 4  ;;  %v5828_v56 = vrot.slane %v5826_v18, 5  ;;  %v5832_v54 = vshll.u32 %v5523_v47, 16  ;;  %v10696_v7 = vld [vmem:[#allocation4 + $0x9c] sm:$0xff]   ;;  %v8373_v18 = vld [vmem:[#allocation5 + $0x30] sm:$0xff] }
 0x34e   : > { %v9988_v33 = vcombine.low %v7836_v28, %v7846_v26  ;;  %8363 = vst.msk [vmem:[#allocation5 + $0x130] sm:$0xff] %vm1020_vm0, %v10022_v2  ;;  %v7224_v14 = vsel %vm11325_vm7, %v7222_v27, %v7223_v34  ;;  %v5836_v51 = vshrl.u32 %v5523_v47, 16  ;;  %v5842_v17 = vshll.u32 %v5524_v0, 16  ;;  %v6537_v20 = vld [vmem:[#allocation4 + $0x38] sm:$0x1]  ;;  %5483 = vst.msk [vmem:[#allocation5 + $0x138] sm:$0xff] %vm1020_vm0, %v10696_v7 }
 0x34f   : > { %v9879_v13 = vrot.slane %v6069_v11, 9  ;;  %8065 = vst.msk [vmem:[#allocation5 + $0x38] sm:$0xff] %vm2070_vm11, %v13773_v6  ;;  %6486 = vrot.lane.b32.xlu1 %v10677_v10, %s11069_s11  ;;  %v9958_v40 = vcombine.low %v7221_v29, %v7224_v14  ;;  %v5829_v35 = vor.u32 %v5828_v56, %v5825_v41  ;;  %v5834_v23 = vrot.slane %v5832_v54, 5  ;;  %v7568_v50 = vld [vmem:[#allocation4 + $0x9c] sm:$0xf]  ;;  %v13901_v11 = vpop.permute.xlu0 %8023  ;;  %v10679_v2 = vld [vmem:[#allocation4 + $0xa8] sm:$0xff]  }
 0x350   : > { %8035 = vrot.lane.b32.xlu0 %v9988_v33, %s11069_s11  ;;  %v6219_v44 = vrot.slane %v6070_v36, 5  ;;  %v5838_v43 = vrot.slane %v5836_v51, 4  ;;  %v5844_v5 = vrot.slane %v5842_v17, 5  ;;  %v6222_v32 = vrot.slane %v6071_v62, 5  ;;  %v7569_v34 = vld [vmem:[#allocation4 + $0xa0] sm:$0xf]  ;;  %v13903_v10 = vpop.permute.xlu1 %6476 }
 0x351   : > { %v6647_v58 = vshrl.u32 %v6535_v48, 16  ;;  %v5830_v6 = vrot.slane %v5829_v35, 4  ;;  %v6650_v37 = vshll.u32 %v6535_v48, 16  ;;  %v6656_v30 = vshll.u32 %v6536_v39, 16  ;;  %v7570_v8 = vld [vmem:[#allocation4 + $0xa4] sm:$0x1] }
 0x352   : > { %v13889_v19 = vsel %vm11325_vm7, %v9879_v13, %v6219_v44  ;;  %v6221_v16 = vrot.slane %v6219_v44, 4  ;;  %v5839_v22 = vor.u32 %v5838_v43, %v5834_v23  ;;  %v6660_v21 = vshrl.u32 %v6536_v39, 16  ;;  %v8118_v14 = vld [vmem:[#allocation4 + $0xb4] sm:$0xe]  ;;  %v8119_v51 = vld [vmem:[#allocation4 + $0xb8] sm:$0xf] }
 0x353   : > { %v6649_v63 = vrot.slane %v6647_v58, 4  ;;  %v5835_v52 = vsel %vm11382_vm10, %v5830_v6, %v5834_v23  ;;  %v6652_v42 = vrot.slane %v6650_v37, 5  ;;  %v6666_v1 = vshll.u32 %v6537_v20, 16  ;;  %v8120_v23 = vld [vmem:[#allocation4 + $0xbc] sm:$0x1] }
 0x354   : > { %7318 = vrot.lane.b32.xlu0 %v9958_v40, %s11070_s12  ;;  %v13897_v49 = vsel %vm11325_vm7, %v6221_v16, %v6222_v32  ;;  %v5840_v47 = vrot.slane %v5839_v22, 4  ;;  %v6658_v59 = vrot.slane %v6656_v30, 5  ;;  %v6662_v0 = vrot.slane %v6660_v21, 4  ;;  %v7077_v32 = vld [vmem:[#allocation4 + $0xa8] sm:$0xe] }
 0x355   : > { %v9895_v28 = vcombine.low %v13889_v19, %v13897_v49  ;;  %v8405_v26 = vld [vmem:[#allocation5 + $0x130] sm:$0xff]  ;;  %v6653_v29 = vor.u32 %v6652_v42, %v6649_v63  ;;  %v6668_v27 = vrot.slane %v6666_v1, 5  ;;  %v7848_v36 = vshrl.u32 %v7568_v50, 16  ;;  %v7079_v16 = vld [vmem:[#allocation4 + $0xb0] sm:$0x1] }
 0x356   : > { %v7851_v48 = vshll.u32 %v7568_v50, 16  ;;  %v8374_v33 = vld [vmem:[#allocation5 + $0x38] sm:$0xff]  ;;  %10509 = vmatprep.mubr.msk.bf16.mxu0 %vm1020_vm0, %v8405_v26  ;;  %v5845_v41 = vsel %vm11382_vm10, %v5840_v47, %v5844_v5  ;;  %v6663_v56 = vor.u32 %v6662_v0, %v6658_v59  ;;  %v7857_v54 = vshll.u32 %v7569_v34, 16  ;;  %v7078_v19 = vld [vmem:[#allocation4 + $0xac] sm:$0xf]  ;;  %v13914_v50 = vpop.permute.xlu0 %7306 }
 0x357   : > { %v7861_v62 = vshrl.u32 %v7569_v34, 16  ;;  %8662 = vmatprep.mubr.bf16.mxu1 %v8374_v33  ;;  %v9862_v17 = vcombine.low %v5835_v52, %v5845_v41  ;;  %v6654_v13 = vrot.slane %v6653_v29, 4  ;;  %v7850_v40 = vrot.slane %v7848_v36, 4  ;;  %v5525_v21 = vld [vmem:[#allocation4 + $0x9c] sm:$0xf]  ;;  %v10697_v47 = vld [vmem:[#allocation4 + $0xa8] sm:$0xff]  }
 0x358   : > { %7495 = vrot.lane.b32.xlu0 %v10679_v2, %s11068_s10  ;;  %v7853_v35 = vrot.slane %v7851_v48, 5  ;;  %8663 = vmatmul.mubr.bf16.gmra.mrb[40].mxu1 %v8373_v18  ;;  %v6664_v44 = vrot.slane %v6663_v56, 4  ;;  %v7859_v39 = vrot.slane %v7857_v54, 5  ;;  %v7867_v43 = vshll.u32 %v7570_v8, 16  ;;  %v5526_v26 = vld [vmem:[#allocation4 + $0xa0] sm:$0xf] }
 0x359   : > { %v7863_v7 = vrot.slane %v7861_v62, 4  ;;  %5990 = vrot.lane.b32.xlu1 %v9862_v17, %s11070_s12  ;;  %v6659_v5 = vsel %vm11382_vm10, %v6654_v13, %v6658_v59  ;;  %v10007_v58 = vrot.slane %v8118_v14, 9  ;;  %v8268_v6 = vrot.slane %v8119_v51, 5  ;;  %v5981_v34 = vpop.permute.xlu1 %5980  ;;  %v6072_v33 = vld [vmem:[#allocation4 + $0xa8] sm:$0xe]  ;;  %5484 = vst.msk [vmem:[#allocation5 + $0x150] sm:$0xff] %vm1020_vm0, %v10697_v47 }
 0x35a   : > { %v7854_v20 = vor.u32 %v7853_v35, %v7850_v40  ;;  %v6669_v37 = vsel %vm11382_vm10, %v6664_v44, %v6668_v27  ;;  %v7869_v63 = vrot.slane %v7867_v43, 5  ;;  %v8271_v30 = vrot.slane %v8120_v23, 5  ;;  %6021 = vst.msk [vmem:[#allocation5 + $0xa8] sm:$0xff] %vm1568_vm1, %v5981_v34  ;;  %v5527_v27 = vld [vmem:[#allocation4 + $0xa4] sm:$0x1] }
 0x35b   : > { %v7864_v22 = vor.u32 %v7863_v7, %v7859_v39  ;;  %v9917_v52 = vcombine.low %v6659_v5, %v6669_v37  ;;  %v8269_v42 = vsel %vm11325_vm7, %v10007_v58, %v8268_v6  ;;  %v8270_v1 = vrot.slane %v8268_v6, 4  ;;  %6341 = vst.msk [vmem:[#allocation5 + $0xa8] sm:$0xff] %vm1892_vm9, %v13885_v9  ;;  %v6073_v62 = vld [vmem:[#allocation4 + $0xac] sm:$0xf]  ;;  %v6538_v14 = vld [vmem:[#allocation4 + $0x3c] sm:$0xf] }
 0x35c   : > { %v7855_v49 = vrot.slane %v7854_v20, 4  ;;  %v9943_v0 = vrot.slane %v7077_v32, 9  ;;  %v7227_v8 = vrot.slane %v7078_v19, 5  ;;  %v7230_v18 = vrot.slane %v7079_v16, 5  ;;  %6517 = vst.msk [vmem:[#allocation5 + $0xa8] sm:$0xff] %vm2070_vm11, %v13903_v10  ;;  %v10681_v9 = vld [vmem:[#allocation4 + $0xa8] sm:$0xff]   ;;  %v13943_v10 = vpop.permute.xlu0 %7483 }
 0x35d   : > { %v7865_v59 = vrot.slane %v7864_v22, 4  ;;  %6312 = vrot.lane.b32.xlu1 %v9895_v28, %s11068_s10  ;;  %7025 = vst.msk [vmem:[#allocation5 + $0x50] sm:$0xff] %vm1020_vm0, %v9917_v52  ;;  %v8272_v29 = vsel %vm11325_vm7, %v8270_v1, %v8271_v30  ;;  %v5847_v36 = vshrl.u32 %v5525_v21, 16  ;;  %v5850_v48 = vshll.u32 %v5525_v21, 16  ;;  %v6074_v40 = vld [vmem:[#allocation4 + $0xb0] sm:$0x1] }
 0x35e   : > { %v7860_v2 = vsel %vm11382_vm10, %v7855_v49, %v7859_v39  ;;  %7345 = vst.msk [vmem:[#allocation5 + $0x50] sm:$0xff] %vm1568_vm1, %v13722_v61  ;;  %v10023_v41 = vcombine.low %v8269_v42, %v8272_v29  ;;  %v7228_v56 = vsel %vm11325_vm7, %v9943_v0, %v7227_v8  ;;  %v7229_v54 = vrot.slane %v7227_v8, 4  ;;  %v6539_v5 = vld [vmem:[#allocation4 + $0x40] sm:$0xf]  ;;  %v6540_v19 = vld [vmem:[#allocation4 + $0x44] sm:$0x1]  ;;  %v13956_v8 = vpop.permute.xlu1 %6302 }
 0x35f   : > { %v7870_v28 = vsel %vm11382_vm10, %v7865_v59, %v7869_v63  ;;  %7522 = vst.msk [vmem:[#allocation5 + $0x50] sm:$0xff] %vm1892_vm9, %v13743_v45  ;;  %v5849_v17 = vrot.slane %v5847_v36, 4  ;;  %v5852_v61 = vrot.slane %v5850_v48, 5  ;;  %v5856_v13 = vshll.u32 %v5526_v26, 16  ;;  %v7571_v42 = vld [vmem:[#allocation4 + $0xa8] sm:$0xf] }
 0x360   : > { %v9989_v51 = vcombine.low %v7860_v2, %v7870_v28  ;;  %8364 = vst.msk [vmem:[#allocation5 + $0x148] sm:$0xff] %vm1020_vm0, %v10023_v41  ;;  %v7231_v35 = vsel %vm11325_vm7, %v7229_v54, %v7230_v18  ;;  %v5860_v23 = vshrl.u32 %v5526_v26, 16  ;;  %v5866_v44 = vshll.u32 %v5527_v27, 16  ;;  %v7572_v0 = vld [vmem:[#allocation4 + $0xac] sm:$0xf]  ;;  %v10682_v26 = vld [vmem:[#allocation4 + $0xb4] sm:$0xff]  }
 0x361   : > { %v9880_v39 = vrot.slane %v6072_v33, 9  ;;  %8066 = vst.msk [vmem:[#allocation5 + $0x50] sm:$0xff] %vm2070_vm11, %v13841_v55  ;;  %6488 = vrot.lane.b32.xlu1 %v10681_v9, %s11069_s11  ;;  %v9959_v45 = vcombine.low %v7228_v56, %v7231_v35  ;;  %v5853_v7 = vor.u32 %v5852_v61, %v5849_v17  ;;  %v5858_v43 = vrot.slane %v5856_v13, 5  ;;  %v7573_v36 = vld [vmem:[#allocation4 + $0xb0] sm:$0x1]  ;;  %v8376_v48 = vld [vmem:[#allocation5 + $0x48] sm:$0xff]  ;;  %v13959_v33 = vpop.permute.xlu0 %8025 }
 0x362   : > { %8037 = vrot.lane.b32.xlu0 %v9989_v51, %s11069_s11  ;;  %v6226_v32 = vrot.slane %v6073_v62, 5  ;;  %v5862_v20 = vrot.slane %v5860_v23, 4  ;;  %v5868_v58 = vrot.slane %v5866_v44, 5  ;;  %v6229_v6 = vrot.slane %v6074_v40, 5  ;;  %v10698_v51 = vld [vmem:[#allocation4 + $0xb4] sm:$0xff]  }
 0x363   : > { %v6671_v16 = vshrl.u32 %v6538_v14, 16  ;;  %v5854_v37 = vrot.slane %v5853_v7, 4  ;;  %v6674_v63 = vshll.u32 %v6538_v14, 16  ;;  %v6680_v52 = vshll.u32 %v6539_v5, 16  ;;  %v7080_v40 = vld [vmem:[#allocation4 + $0xb4] sm:$0xe] }
 0x364   : > { %v13949_v55 = vsel %vm11325_vm7, %v9880_v39, %v6226_v32  ;;  %v6228_v22 = vrot.slane %v6226_v32, 4  ;;  %v5863_v30 = vor.u32 %v5862_v20, %v5858_v43  ;;  %v6684_v49 = vshrl.u32 %v6539_v5, 16  ;;  %v7081_v35 = vld [vmem:[#allocation4 + $0xb8] sm:$0xf]  ;;  %v7082_v7 = vld [vmem:[#allocation4 + $0xbc] sm:$0x1] }
 0x365   : > { %v6673_v21 = vrot.slane %v6671_v16, 4  ;;  %v5859_v1 = vsel %vm11382_vm10, %v5854_v37, %v5858_v43  ;;  %v6676_v47 = vrot.slane %v6674_v63, 5  ;;  %v6690_v59 = vshll.u32 %v6540_v19, 16  ;;  %5485 = vst.msk [vmem:[#allocation5 + $0x168] sm:$0xff] %vm1020_vm0, %v10698_v51  ;;  %v5528_v37 = vld [vmem:[#allocation4 + $0xa8] sm:$0xf] }
 0x366   : > { %7320 = vrot.lane.b32.xlu0 %v9959_v45, %s11070_s12  ;;  %v6230_v34 = vsel %vm11325_vm7, %v6228_v22, %v6229_v6  ;;  %v5864_v18 = vrot.slane %v5863_v30, 4  ;;  %v6682_v29 = vrot.slane %v6680_v52, 5  ;;  %v6686_v27 = vrot.slane %v6684_v49, 4  ;;  %v6479_v22 = vpop.permute.xlu1 %6478  ;;  %v5530_v49 = vld [vmem:[#allocation4 + $0xb0] sm:$0x1] }
 0x367   : > { %v9896_v2 = vcombine.low %v13949_v55, %v6230_v34  ;;  %v8408_v28 = vld [vmem:[#allocation5 + $0x148] sm:$0xff]  ;;  %v6677_v41 = vor.u32 %v6676_v47, %v6673_v21  ;;  %v6692_v56 = vrot.slane %v6690_v59, 5  ;;  %v7872_v54 = vshrl.u32 %v7571_v42, 16  ;;  %v5529_v55 = vld [vmem:[#allocation4 + $0xac] sm:$0xf] }
 0x368   : > { %v7875_v62 = vshll.u32 %v7571_v42, 16  ;;  %v8377_v14 = vld [vmem:[#allocation5 + $0x50] sm:$0xff]  ;;  %10510 = vmatmul.mubr.msk.bf16.gmra.mrb[88].mxu0 %vm1020_vm0, %v8408_v28  ;;  %v5869_v9 = vsel %vm11382_vm10, %v5864_v18, %v5868_v58  ;;  %v6687_v17 = vor.u32 %v6686_v27, %v6682_v29  ;;  %v7881_v61 = vshll.u32 %v7572_v0, 16  ;;  %v13971_v42 = vpop.permute.xlu0 %7308  ;;  %v5533_v51 = vld [vmem:[#allocation4 + $0xbc] sm:$0x1] }
 0x369   : > { %v7885_v13 = vshrl.u32 %v7572_v0, 16  ;;  %8670 = vmatprep.mubr.bf16.mxu1 %v8377_v14  ;;  %v9863_v23 = vcombine.low %v5859_v1, %v5869_v9  ;;  %v6678_v44 = vrot.slane %v6677_v41, 4  ;;  %v7874_v39 = vrot.slane %v7872_v54, 4  ;;  %v5531_v41 = vld [vmem:[#allocation4 + $0xb4] sm:$0xf] }
 0x36a   : > { %7497 = vrot.lane.b32.xlu0 %v10682_v26, %s11068_s10  ;;  %v7877_v45 = vrot.slane %v7875_v62, 5  ;;  %8671 = vmatmul.mubr.bf16.gmra.mrb[44].mxu1 %v8376_v48  ;;  %v6688_v43 = vrot.slane %v6687_v17, 4  ;;  %v7883_v32 = vrot.slane %v7881_v61, 5  ;;  %v7891_v20 = vshll.u32 %v7573_v36, 16  ;;  %v6541_v9 = vld [vmem:[#allocation4 + $0x48] sm:$0xf] }
 0x36b   : > { %v7887_v5 = vrot.slane %v7885_v13, 4  ;;  %5992 = vrot.lane.b32.xlu1 %v9863_v23, %s11070_s12  ;;  %v6683_v58 = vsel %vm11382_vm10, %v6678_v44, %v6682_v29  ;;  %v9944_v19 = vrot.slane %v7080_v40, 9  ;;  %v7234_v16 = vrot.slane %v7081_v35, 5  ;;  %v10684_v61 = vld [vmem:[#allocation4 + $0xb4] sm:$0xff]  }
 0x36c   : > { %v7878_v6 = vor.u32 %v7877_v45, %v7874_v39  ;;  %v6693_v63 = vsel %vm11382_vm10, %v6688_v43, %v6692_v56  ;;  %v7893_v21 = vrot.slane %v7891_v20, 5  ;;  %v7237_v52 = vrot.slane %v7082_v7, 5  ;;  %v5532_v56 = vld [vmem:[#allocation4 + $0xb8] sm:$0xf]  ;;  %v6542_v7 = vld [vmem:[#allocation4 + $0x4c] sm:$0xf]  ;;  %v13989_v43 = vpop.permute.xlu0 %7485 }
 0x36d   : > { %v7888_v30 = vor.u32 %v7887_v5, %v7883_v32  ;;  %v9918_v1 = vcombine.low %v6683_v58, %v6693_v63  ;;  %v7235_v47 = vsel %vm11325_vm7, %v9944_v19, %v7234_v16  ;;  %v7236_v59 = vrot.slane %v7234_v16, 4  ;;  %v6543_v58 = vld [vmem:[#allocation4 + $0x50] sm:$0x1] }
 0x36e   : > { %v7879_v34 = vrot.slane %v7878_v6, 4  ;;  %v5871_v18 = vshrl.u32 %v5528_v37, 16  ;;  %v5874_v26 = vshll.u32 %v5528_v37, 16  ;;  %v5880_v29 = vshll.u32 %v5529_v55, 16 }
 0x36f   : > { %v7889_v0 = vrot.slane %v7888_v30, 4  ;;  %6314 = vrot.lane.b32.xlu1 %v9896_v2, %s11068_s10  ;;  %7026 = vst.msk [vmem:[#allocation5 + $0x68] sm:$0xff] %vm1020_vm0, %v9918_v1  ;;  %v7238_v36 = vsel %vm11325_vm7, %v7236_v59, %v7237_v52  ;;  %v5884_v48 = vshrl.u32 %v5529_v55, 16  ;;  %v5890_v28 = vshll.u32 %v5530_v49, 16 }
 0x370   : > { %v7884_v27 = vsel %vm11382_vm10, %v7879_v34, %v7883_v32  ;;  %7346 = vst.msk [vmem:[#allocation5 + $0x68] sm:$0xff] %vm1568_vm1, %v13783_v31  ;;  %v9960_v62 = vcombine.low %v7235_v47, %v7238_v36  ;;  %v5873_v2 = vrot.slane %v5871_v18, 4  ;;  %v5876_v14 = vrot.slane %v5874_v26, 5  ;;  %v5983_v23 = vpop.permute.xlu1 %5982  ;;  %v13992_v32 = vpop.f32.mrb[68].mxu0 }
 0x371   : > { %v7894_v54 = vsel %vm11382_vm10, %v7889_v0, %v7893_v21  ;;  %7523 = vst.msk [vmem:[#allocation5 + $0x68] sm:$0xff] %vm1892_vm9, %v13815_v53  ;;  %v5882_v13 = vrot.slane %v5880_v29, 5  ;;  %v5886_v40 = vrot.slane %v5884_v48, 4  ;;  %v5892_v35 = vrot.slane %v5890_v28, 5  ;;  %v13998_v19 = vpop.f32.mrb[69].mxu0 }
 0x372   : > { %v9990_v17 = vcombine.low %v7884_v27, %v7894_v54  ;;  %v5877_v44 = vor.u32 %v5876_v14, %v5873_v2  ;;  %v5895_v39 = vshrl.u32 %v5531_v41, 16  ;;  %v5898_v31 = vshll.u32 %v5531_v41, 16  ;;  %8067 = vst.msk [vmem:[#allocation5 + $0x68] sm:$0xff] %vm2070_vm11, %v13901_v11  ;;  %v14001_v63 = vpop.f32.mrb[70].mxu0  ;;  %v7574_v0 = vld [vmem:[#allocation4 + $0xb4] sm:$0xf]  ;;  %v14010_v54 = vpop.permute.xlu0 %8027 }
 0x373   : > { %v5904_v45 = vshll.u32 %v5532_v56, 16  ;;  %6022 = vst.msk [vmem:[#allocation5 + $0xc0] sm:$0xff] %vm1568_vm1, %v5983_v23  ;;  %6490 = vrot.lane.b32.xlu1 %v10684_v61, %s11069_s11  ;;  %v5887_v53 = vor.u32 %v5886_v40, %v5882_v13  ;;  %v5908_v5 = vshrl.u32 %v5532_v56, 16  ;;  %v5914_v20 = vshll.u32 %v5533_v51, 16  ;;  %v14003_v1 = vpop.f32.mrb[71].mxu0  ;;  %v8379_v56 = vld [vmem:[#allocation5 + $0x60] sm:$0xff] }
 0x374   : > { %8039 = vrot.lane.b32.xlu0 %v9990_v17, %s11069_s11  ;;  %v6695_v6 = vshrl.u32 %v6541_v9, 16  ;;  %6342 = vst.msk [vmem:[#allocation5 + $0xc0] sm:$0xff] %vm1892_vm9, %v13956_v8  ;;  %v5878_v11 = vrot.slane %v5877_v44, 4  ;;  %v5897_v16 = vrot.slane %v5895_v39, 4  ;;  %v5900_v37 = vrot.slane %v5898_v31, 5  ;;  %v10685_v2 = vld [vmem:[#allocation4 + $0xc0] sm:$0xff]  }
 0x375   : > { %v5906_v55 = vrot.slane %v5904_v45, 5  ;;  %6518 = vst.msk [vmem:[#allocation5 + $0xc0] sm:$0xff] %vm2070_vm11, %v6479_v22  ;;  %v5888_v30 = vrot.slane %v5887_v53, 4  ;;  %v5910_v21 = vrot.slane %v5908_v5, 4  ;;  %v5916_v52 = vrot.slane %v5914_v20, 5  ;;  %v14018_v20 = vpop.permute.xlu1 %6304 }
 0x376   : > { %v6697_v49 = vrot.slane %v6695_v6, 4  ;;  %v5883_v34 = vsel %vm11382_vm10, %v5878_v11, %v5882_v13  ;;  %v5901_v8 = vor.u32 %v5900_v37, %v5897_v16  ;;  %v6698_v47 = vshll.u32 %v6541_v9, 16  ;;  %v7575_v27 = vld [vmem:[#allocation4 + $0xb8] sm:$0xf]  ;;  %v7576_v40 = vld [vmem:[#allocation4 + $0xbc] sm:$0x1] }
 0x377   : > { %v6704_v59 = vshll.u32 %v6542_v7, 16  ;;  %v5893_v22 = vsel %vm11382_vm10, %v5888_v30, %v5892_v35  ;;  %v5911_v18 = vor.u32 %v5910_v21, %v5906_v55  ;;  %v6708_v26 = vshrl.u32 %v6542_v7, 16  ;;  %v6075_v44 = vld [vmem:[#allocation4 + $0xb4] sm:$0xe]  ;;  %v6076_v53 = vld [vmem:[#allocation4 + $0xb8] sm:$0xf] }
 0x378   : > { %7322 = vrot.lane.b32.xlu0 %v9960_v62, %s11070_s12  ;;  %v6714_v29 = vshll.u32 %v6543_v58, 16  ;;  %v9864_v36 = vcombine.low %v5883_v34, %v5893_v22  ;;  %v5902_v48 = vrot.slane %v5901_v8, 4  ;;  %v6700_v28 = vrot.slane %v6698_v47, 5  ;;  %v6077_v5 = vld [vmem:[#allocation4 + $0xbc] sm:$0x1] }
 0x379   : > { %v6706_v41 = vrot.slane %v6704_v59, 5  ;;  %v5912_v14 = vrot.slane %v5911_v18, 4  ;;  %v6710_v51 = vrot.slane %v6708_v26, 4  ;;  %v7896_v17 = vshrl.u32 %v7574_v0, 16  ;;  %v8380_v62 = vld [vmem:[#allocation5 + $0x68] sm:$0xff]  ;;  %v14023_v18 = vpop.permute.xlu0 %7310 }
 0x37a   : > { %v6716_v9 = vrot.slane %v6714_v29, 5  ;;  %5994 = vrot.lane.b32.xlu1 %v9864_v36, %s11070_s12  ;;  %v5907_v61 = vsel %vm11382_vm10, %v5902_v48, %v5906_v55  ;;  %v6701_v13 = vor.u32 %v6700_v28, %v6697_v49  ;;  %v7899_v35 = vshll.u32 %v7574_v0, 16  ;;  %8678 = vmatprep.mubr.bf16.mxu1 %v8380_v62  ;;  %v7083_v37 = vld [vmem:[#allocation4 + $0xc0] sm:$0xe]  ;;  %v7084_v34 = vld [vmem:[#allocation4 + $0xc4] sm:$0xf] }
 0x37b   : > { %v7905_v23 = vshll.u32 %v7575_v27, 16  ;;  %v5917_v39 = vsel %vm11382_vm10, %v5912_v14, %v5916_v52  ;;  %v6711_v31 = vor.u32 %v6710_v51, %v6706_v41  ;;  %v7898_v45 = vrot.slane %v7896_v17, 4  ;;  %8679 = vmatmul.mubr.bf16.gmra.mrb[48].mxu1 %v8379_v56  ;;  %v7085_v0 = vld [vmem:[#allocation4 + $0xc8] sm:$0x1]  ;;  %v7577_v22 = vld [vmem:[#allocation4 + $0xc0] sm:$0xf] }
 0x37c   : > { %7499 = vrot.lane.b32.xlu0 %v10685_v2, %s11068_s10  ;;  %v7909_v7 = vshrl.u32 %v7575_v27, 16  ;;  %v9865_v58 = vcombine.low %v5907_v61, %v5917_v39  ;;  %v6702_v6 = vrot.slane %v6701_v13, 4  ;;  %v7901_v11 = vrot.slane %v7899_v35, 5  ;;  %v7578_v48 = vld [vmem:[#allocation4 + $0xc4] sm:$0xf]  ;;  %v14029_v61 = vpop.permute.xlu1 %6480 }
 0x37d   : > { %v7907_v16 = vrot.slane %v7905_v23, 5  ;;  %v6712_v55 = vrot.slane %v6711_v31, 4  ;;  %v7915_v21 = vshll.u32 %v7576_v40, 16  ;;  %v9881_v49 = vrot.slane %v6075_v44, 9  ;;  %v7579_v40 = vld [vmem:[#allocation4 + $0xc8] sm:$0x1] }
 0x37e   : > { %v7911_v30 = vrot.slane %v7909_v7, 4  ;;  %5996 = vrot.lane.b32.xlu1 %v9865_v58, %s11070_s12  ;;  %v6707_v52 = vsel %vm11382_vm10, %v6702_v6, %v6706_v41  ;;  %v7902_v8 = vor.u32 %v7901_v11, %v7898_v45  ;;  %v6233_v47 = vrot.slane %v6076_v53, 5  ;;  %v6544_v44 = vld [vmem:[#allocation4 + $0x54] sm:$0xf]  ;;  %v6545_v53 = vld [vmem:[#allocation4 + $0x58] sm:$0xf] }
 0x37f   : > { %v6236_v59 = vrot.slane %v6077_v5, 5  ;;  %v6717_v26 = vsel %vm11382_vm10, %v6712_v55, %v6716_v9  ;;  %v7917_v27 = vrot.slane %v7915_v21, 5  ;;  %v9945_v36 = vrot.slane %v7083_v37, 9  ;;  %v14046_v37 = vpop.permute.xlu0 %7487 }
 0x380   : > { %v7912_v29 = vor.u32 %v7911_v30, %v7907_v16  ;;  %v9919_v28 = vcombine.low %v6707_v52, %v6717_v26  ;;  %v7903_v56 = vrot.slane %v7902_v8, 4  ;;  %v6234_v2 = vsel %vm11325_vm7, %v9881_v49, %v6233_v47  ;;  %v4558_v49 = vld [vmem:[#allocation4 + $0xcc] sm:$0x1] }
 0x381   : > { %v6235_v41 = vrot.slane %v6233_v47, 4  ;;  %v7241_v51 = vrot.slane %v7084_v34, 5  ;;  %v7244_v17 = vrot.slane %v7085_v0, 5  ;;  %v7920_v62 = vshrl.u32 %v7577_v22, 16  ;;  %v4614_v47 = vld [vmem:[#allocation4 + $0xd4] sm:$0x1] }
 0x382   : > { %v7913_v14 = vrot.slane %v7912_v29, 4  ;;  %7027 = vst.msk [vmem:[#allocation5 + $0x80] sm:$0xff] %vm1020_vm0, %v9919_v28  ;;  %v7908_v9 = vsel %vm11382_vm10, %v7903_v56, %v7907_v16  ;;  %v7923_v35 = vshll.u32 %v7577_v22, 16  ;;  %v7929_v23 = vshll.u32 %v7578_v48, 16  ;;  %v6546_v16 = vld [vmem:[#allocation4 + $0x5c] sm:$0x1] }
 0x383   : > { %v6237_v13 = vsel %vm11325_vm7, %v6235_v41, %v6236_v59  ;;  %7347 = vst.msk [vmem:[#allocation5 + $0x80] sm:$0xff] %vm1568_vm1, %v13856_v24  ;;  %v7242_v45 = vsel %vm11325_vm7, %v9945_v36, %v7241_v51  ;;  %v7243_v7 = vrot.slane %v7241_v51, 4  ;;  %v7922_v58 = vrot.slane %v7920_v62, 4  ;;  %v7581_v59 = vld [vmem:[#allocation4 + $0xd0] sm:$0xf]  ;;  %v10687_v0 = vld [vmem:[#allocation4 + $0xc0] sm:$0xff]  }
 0x384   : > { %v7918_v39 = vsel %vm11382_vm10, %v7913_v14, %v7917_v27  ;;  %v9897_v31 = vcombine.low %v6234_v2, %v6237_v13  ;;  %7524 = vst.msk [vmem:[#allocation5 + $0x80] sm:$0xff] %vm1892_vm9, %v13881_v3  ;;  %v7925_v6 = vrot.slane %v7923_v35, 5  ;;  %v14044_v11 = vrot.slane %v7929_v23, 5  ;;  %v6547_v41 = vld [vmem:[#allocation4 + $0x60] sm:$0xf]  ;;  %v14067_v23 = vpop.permute.xlu0 %8029 }
 0x385   : > { %v9991_v5 = vcombine.low %v7908_v9, %v7918_v39  ;;  %v7245_v24 = vsel %vm11325_vm7, %v7243_v7, %v7244_v17  ;;  %v7933_v55 = vshrl.u32 %v7578_v48, 16  ;;  %v7939_v30 = vshll.u32 %v7579_v40, 16  ;;  %8068 = vst.msk [vmem:[#allocation5 + $0x80] sm:$0xff] %vm2070_vm11, %v13959_v33  ;;  %v6548_v62 = vld [vmem:[#allocation4 + $0x64] sm:$0xf] }
 0x386   : > { %6316 = vrot.lane.b32.xlu1 %v9897_v31, %s11068_s10  ;;  %v6719_v21 = vshrl.u32 %v6544_v44, 16  ;;  %v9961_v3 = vcombine.low %v7242_v45, %v7245_v24  ;;  %v7926_v34 = vor.u32 %v7925_v6, %v7922_v58  ;;  %v6722_v52 = vshll.u32 %v6544_v44, 16  ;;  %v6550_v31 = vld [vmem:[#allocation4 + $0x6c] sm:$0xf] }
 0x387   : > { %8041 = vrot.lane.b32.xlu0 %v9991_v5, %s11069_s11  ;;  %v6728_v8 = vshll.u32 %v6545_v53, 16  ;;  %v7935_v22 = vrot.slane %v7933_v55, 4  ;;  %v7941_v26 = vrot.slane %v7939_v30, 5  ;;  %v6732_v27 = vshrl.u32 %v6545_v53, 16  ;;  %v5985_v36 = vpop.permute.xlu1 %5984 }
 0x388   : > { %v6721_v29 = vrot.slane %v6719_v21, 4  ;;  %v7927_v48 = vrot.slane %v7926_v34, 4  ;;  %v6724_v28 = vrot.slane %v6722_v52, 5  ;;  %v6738_v2 = vshll.u32 %v6546_v16, 16  ;;  %6023 = vst.msk [vmem:[#allocation5 + $0xd8] sm:$0xff] %vm1568_vm1, %v5985_v36 }
 0x389   : > { %v6730_v56 = vrot.slane %v6728_v8, 5  ;;  %v7936_v33 = vor.u32 %v7935_v22, %v14044_v11  ;;  %v6734_v14 = vrot.slane %v6732_v27, 4  ;;  %v4559_v51 = vsel %vm12631_vm14, 0, %v4558_v49  ;;  %6343 = vst.msk [vmem:[#allocation5 + $0xd8] sm:$0xff] %vm1892_vm9, %v14018_v20  ;;  %v6551_v27 = vld [vmem:[#allocation4 + $0x70] sm:$0xf] }
 0x38a   : > { %6492 = vrot.lane.b32.xlu1 %v10687_v0, %s11069_s11  ;;  %v4615_v17 = vsel %vm12639_vm15, 0, %v4614_v47  ;;  %v7932_v9 = vsel %vm11382_vm10, %v7927_v48, %v14044_v11  ;;  %v6725_v13 = vor.u32 %v6724_v28, %v6721_v29  ;;  %v6740_v40 = vrot.slane %v6738_v2, 5  ;;  %4560 = vst [vmem:[#allocation4 + $0xcc] sm:$0x1] %v4559_v51  ;;  %6519 = vst.msk [vmem:[#allocation5 + $0xd8] sm:$0xff] %vm2070_vm11, %v14029_v61  ;;  %v14073_v6 = vpop.f32.mrb[72].mxu0  ;;  %v14089_v28 = vpop.permute.xlu0 %7312 }
 0x38b   : > { %7324 = vrot.lane.b32.xlu0 %v9961_v3, %s11070_s12  ;;  %4616 = vst [vmem:[#allocation4 + $0xd4] sm:$0x1] %v4615_v17  ;;  %v7953_v35 = vshll.u32 %v7581_v59, 16  ;;  %v7937_v46 = vrot.slane %v7936_v33, 4  ;;  %v6735_v44 = vor.u32 %v6734_v14, %v6730_v56  ;;  %v7957_v20 = vshrl.u32 %v7581_v59, 16  ;;  %v8382_v61 = vld [vmem:[#allocation5 + $0x78] sm:$0xff] }
 0x38c   : > { %v6743_v39 = vshrl.u32 %v6547_v41, 16  ;;  %v6726_v45 = vrot.slane %v6725_v13, 4  ;;  %v6746_v53 = vshll.u32 %v6547_v41, 16  ;;  %v6752_v5 = vshll.u32 %v6548_v62, 16  ;;  %v8383_v58 = vld [vmem:[#allocation5 + $0x80] sm:$0xff]  ;;  %v14077_v30 = vpop.f32.mrb[73].mxu0 }
 0x38d   : > { %v14071_v7 = vrot.slane %v7953_v35, 5  ;;  %v7942_v11 = vsel %vm11382_vm10, %v7937_v46, %v7941_v26  ;;  %v6736_v16 = vrot.slane %v6735_v44, 4  ;;  %v7959_v24 = vrot.slane %v7957_v20, 4  ;;  %8686 = vmatprep.mubr.bf16.mxu1 %v8383_v58  ;;  %v14081_v52 = vpop.f32.mrb[74].mxu0  ;;  %v6552_v33 = vld [vmem:[#allocation4 + $0x74] sm:$0x1] }
 0x38e   : > { %v6745_v55 = vrot.slane %v6743_v39, 4  ;;  %v9992_v21 = vcombine.low %v7932_v9, %v7942_v11  ;;  %v6731_v49 = vsel %vm11382_vm10, %v6726_v45, %v6730_v56  ;;  %v6748_v3 = vrot.slane %v6746_v53, 5  ;;  %8687 = vmatmul.mubr.bf16.gmra.mrb[52].mxu1 %v8382_v61  ;;  %v14086_v22 = vpop.f32.mrb[75].mxu0  ;;  %v6553_v46 = vld [vmem:[#allocation4 + $0x78] sm:$0xf]  ;;  %v14101_v61 = vpop.permute.xlu0 %7489 }
 0x38f   : > { %v6754_v34 = vrot.slane %v6752_v5, 5  ;;  %v6741_v8 = vsel %vm11382_vm10, %v6736_v16, %v6740_v40  ;;  %v7960_v47 = vor.u32 %v7959_v24, %v14071_v7  ;;  %v6756_v59 = vshrl.u32 %v6548_v62, 16  ;;  %v6554_v24 = vld [vmem:[#allocation4 + $0x7c] sm:$0xf] }
 0x390   : > { %v6762_v0 = vshll.u32 %v6549_v4, 16  ;;  %8043 = vrot.lane.b32.xlu0 %v9992_v21, %s11069_s11  ;;  %v9920_v26 = vcombine.low %v6731_v49, %v6741_v8  ;;  %v6749_v29 = vor.u32 %v6748_v3, %v6745_v55  ;;  %v6767_v36 = vshrl.u32 %v6550_v31, 16 }
 0x391   : > { %v6770_v48 = vshll.u32 %v6550_v31, 16  ;;  %v10689_v56 = vld [vmem:[#allocation4 + $0xcc] sm:$0xff]   ;;  %v7961_v41 = vrot.slane %v7960_v47, 4  ;;  %v6758_v9 = vrot.slane %v6756_v59, 4  ;;  %v6776_v53 = vshll.u32 %v6551_v27, 16 }
 0x392   : > { %v7580_v2 = vld [vmem:[#allocation4 + $0xcc] sm:$0xf]  ;;  %7028 = vst.msk [vmem:[#allocation5 + $0x98] sm:$0xff] %vm1020_vm0, %v9920_v26  ;;  %v7582_v14 = vld [vmem:[#allocation4 + $0xd4] sm:$0x1]  ;;  %v6750_v62 = vrot.slane %v6749_v29, 4 }
 0x393   : > { %v7944_v51 = vshrl.u32 %v7580_v2, 16  ;;  %v7947_v17 = vshll.u32 %v7580_v2, 16  ;;  %7348 = vst.msk [vmem:[#allocation5 + $0x98] sm:$0xff] %vm1568_vm1, %v13914_v50  ;;  %v7963_v13 = vshll.u32 %v7582_v14, 16  ;;  %v6764_v40 = vrot.slane %v6762_v0, 5 }
 0x394   : > { %v6769_v35 = vrot.slane %v6767_v36, 4  ;;  %v6772_v4 = vrot.slane %v6770_v48, 5  ;;  %7501 = vrot.lane.b32.xlu0 %v10689_v56, %s11068_s10  ;;  %7525 = vst.msk [vmem:[#allocation5 + $0x98] sm:$0xff] %vm1892_vm9, %v13943_v10  ;;  %v6755_v39 = vsel %vm11382_vm10, %v6750_v62, %v6754_v34  ;;  %v6759_v31 = vor.u32 %v6758_v9, %v6754_v34  ;;  %v6555_v34 = vld [vmem:[#allocation4 + $0x80] sm:$0x1]  ;;  %v14109_v48 = vpop.permute.xlu1 %6306 }
 0x395   : > { %v7946_v44 = vrot.slane %v7944_v51, 4  ;;  %v7949_v20 = vrot.slane %v7947_v17, 5  ;;  %v7965_v45 = vrot.slane %v7963_v13, 5  ;;  %8069 = vst.msk [vmem:[#allocation5 + $0x98] sm:$0xff] %vm2070_vm11, %v14010_v54  ;;  %v6780_v5 = vshrl.u32 %v6551_v27, 16 }
 0x396   : > { %v6773_v50 = vor.u32 %v6772_v4, %v6769_v35  ;;  %v6760_v11 = vrot.slane %v6759_v31, 4  ;;  %v6786_v16 = vshll.u32 %v6552_v33, 16  ;;  %v6791_v55 = vshrl.u32 %v6553_v46, 16  ;;  %v6556_v0 = vld [vmem:[#allocation4 + $0x84] sm:$0xf]  ;;  %v8385_v31 = vld [vmem:[#allocation5 + $0x90] sm:$0xff] }
 0x397   : > { %v7950_v58 = vor.u32 %v7949_v20, %v7946_v44  ;;  %v7966_v10 = vsel %vm11382_vm10, %v7961_v41, %v7965_v45  ;;  %v6778_v49 = vrot.slane %v6776_v53, 5  ;;  %v6782_v3 = vrot.slane %v6780_v5, 4  ;;  %v6557_v56 = vld [vmem:[#allocation4 + $0x88] sm:$0xf]  ;;  %v6558_v51 = vld [vmem:[#allocation4 + $0x8c] sm:$0x1]  ;;  %v8032_v20 = vpop.permute.xlu0 %8031 }
 0x398   : > { %v6774_v21 = vrot.slane %v6773_v50, 4  ;;  %v6765_v54 = vsel %vm11382_vm10, %v6760_v11, %v6764_v40  ;;  %v6788_v47 = vrot.slane %v6786_v16, 5  ;;  %v6793_v59 = vrot.slane %v6791_v55, 4  ;;  %v6559_v40 = vld [vmem:[#allocation4 + $0x90] sm:$0xf]  ;;  %v6483_v55 = vpop.permute.xlu1 %6482 }
 0x399   : > { %v7951_v8 = vrot.slane %v7950_v58, 4  ;;  %v9921_v26 = vcombine.low %v6755_v39, %v6765_v54  ;;  %v6783_v27 = vor.u32 %v6782_v3, %v6778_v49  ;;  %v6794_v36 = vshll.u32 %v6553_v46, 16  ;;  %v6560_v16 = vld [vmem:[#allocation4 + $0x94] sm:$0xf] }
 0x39a   : > { %v6779_v29 = vsel %vm11382_vm10, %v6774_v21, %v6778_v49  ;;  %v6800_v41 = vshll.u32 %v6554_v24, 16  ;;  %v6804_v33 = vshrl.u32 %v6554_v24, 16  ;;  %v6810_v14 = vshll.u32 %v6555_v34, 16 }
 0x39b   : > { %v7956_v2 = vsel %vm11382_vm10, %v7951_v8, %v14071_v7  ;;  %7029 = vst.msk [vmem:[#allocation5 + $0xb0] sm:$0xff] %vm1020_vm0, %v9921_v26  ;;  %v6784_v62 = vrot.slane %v6783_v27, 4  ;;  %v6796_v9 = vrot.slane %v6794_v36, 5  ;;  %v6815_v13 = vshrl.u32 %v6556_v0, 16  ;;  %v6561_v8 = vld [vmem:[#allocation4 + $0x98] sm:$0x1] }
 0x39c   : > { %v9993_v17 = vcombine.low %v7956_v2, %v7966_v10  ;;  %7349 = vst.msk [vmem:[#allocation5 + $0xb0] sm:$0xff] %vm1568_vm1, %v13971_v42  ;;  %v8386_v35 = vld [vmem:[#allocation5 + $0x98] sm:$0xff]  ;;  %v6802_v4 = vrot.slane %v6800_v41, 5  ;;  %v6806_v46 = vrot.slane %v6804_v33, 4  ;;  %v6812_v44 = vrot.slane %v6810_v14, 5 }
 0x39d   : > { %v6818_v7 = vshll.u32 %v6556_v0, 16  ;;  %7526 = vst.msk [vmem:[#allocation5 + $0xb0] sm:$0xff] %vm1892_vm9, %v13989_v43  ;;  %v6789_v39 = vsel %vm11382_vm10, %v6784_v62, %v6788_v47  ;;  %8694 = vmatprep.mubr.bf16.mxu1 %v8386_v35  ;;  %v6797_v45 = vor.u32 %v6796_v9, %v6793_v59  ;;  %v6817_v50 = vrot.slane %v6815_v13, 4  ;;  %v6562_v26 = vld [vmem:[#allocation4 + $0x9c] sm:$0xf] }
 0x39e   : > { %8045 = vrot.lane.b32.xlu0 %v9993_v17, %s11069_s11  ;;  %v6824_v53 = vshll.u32 %v6557_v56, 16  ;;  %v9922_v42 = vcombine.low %v6779_v29, %v6789_v39  ;;  %8695 = vmatmul.mubr.bf16.gmra.mrb[56].mxu1 %v8385_v31  ;;  %8070 = vst.msk [vmem:[#allocation5 + $0xb0] sm:$0xff] %vm2070_vm11, %v14067_v23  ;;  %v6807_v5 = vor.u32 %v6806_v46, %v6802_v4  ;;  %v6828_v11 = vshrl.u32 %v6557_v56, 16  ;;  %v7315_v56 = vpop.permute.xlu0 %7314  ;;  %v6563_v41 = vld [vmem:[#allocation4 + $0xa0] sm:$0xf] }
 0x39f   : > { %v6820_v58 = vrot.slane %v6818_v7, 5  ;;  %v6798_v24 = vrot.slane %v6797_v45, 4  ;;  %v6834_v10 = vshll.u32 %v6558_v51, 16  ;;  %v6839_v21 = vshrl.u32 %v6559_v40, 16 }
 0x3a0   : > { %v6826_v43 = vrot.slane %v6824_v53, 5  ;;  %7030 = vst.msk [vmem:[#allocation5 + $0xc8] sm:$0xff] %vm1020_vm0, %v9922_v42  ;;  %v6808_v49 = vrot.slane %v6807_v5, 4  ;;  %v6830_v34 = vrot.slane %v6828_v11, 4  ;;  %v6842_v54 = vshll.u32 %v6559_v40, 16 }
 0x3a1   : > { %v6821_v3 = vor.u32 %v6820_v58, %v6817_v50  ;;  %7350 = vst.msk [vmem:[#allocation5 + $0xc8] sm:$0xff] %vm1568_vm1, %v14023_v18  ;;  %v6803_v23 = vsel %vm11382_vm10, %v6798_v24, %v6802_v4  ;;  %v6836_v47 = vrot.slane %v6834_v10, 5  ;;  %v6841_v59 = vrot.slane %v6839_v21, 4  ;;  %v6565_v40 = vld [vmem:[#allocation4 + $0xa8] sm:$0xf] }
 0x3a2   : > { %v6848_v0 = vshll.u32 %v6560_v16, 16  ;;  %7527 = vst.msk [vmem:[#allocation5 + $0xc8] sm:$0xff] %vm1892_vm9, %v14046_v37  ;;  %v6813_v29 = vsel %vm11382_vm10, %v6808_v49, %v6812_v44  ;;  %v6831_v36 = vor.u32 %v6830_v34, %v6826_v43  ;;  %v6844_v2 = vrot.slane %v6842_v54, 5  ;;  %v6564_v37 = vld [vmem:[#allocation4 + $0xa4] sm:$0x1] }
 0x3a3   : > { %v6822_v27 = vrot.slane %v6821_v3, 4  ;;  %v9923_v33 = vcombine.low %v6803_v23, %v6813_v29  ;;  %8071 = vst.msk [vmem:[#allocation5 + $0xc8] sm:$0xff] %vm2070_vm11, %v8032_v20  ;;  %v6852_v14 = vshrl.u32 %v6560_v16, 16  ;;  %v6858_v51 = vshll.u32 %v6561_v8, 16  ;;  %v8388_v20 = vld [vmem:[#allocation5 + $0xa8] sm:$0xff]  ;;  %v7492_v16 = vpop.permute.xlu0 %7491 }
 0x3a4   : > { %v6850_v18 = vrot.slane %v6848_v0, 5  ;;  %v6832_v62 = vrot.slane %v6831_v36, 4  ;;  %v6845_v9 = vor.u32 %v6844_v2, %v6841_v59  ;;  %v6863_v13 = vshrl.u32 %v6562_v26, 16  ;;  %v6566_v42 = vld [vmem:[#allocation4 + $0xac] sm:$0xf] }
 0x3a5   : > { %v6827_v17 = vsel %vm11382_vm10, %v6822_v27, %v6826_v43  ;;  %7031 = vst.msk [vmem:[#allocation5 + $0xe0] sm:$0xff] %vm1020_vm0, %v9923_v33  ;;  %v8389_v35 = vld [vmem:[#allocation5 + $0xb0] sm:$0xff]  ;;  %v5987_v4 = vpop.permute.xlu1 %5986  ;;  %v6854_v46 = vrot.slane %v6852_v14, 4  ;;  %v6860_v44 = vrot.slane %v6858_v51, 5  ;;  %v6866_v7 = vshll.u32 %v6562_v26, 16 }
 0x3a6   : > { %v6872_v39 = vshll.u32 %v6563_v41, 16  ;;  %7351 = vst.msk [vmem:[#allocation5 + $0xe0] sm:$0xff] %vm1568_vm1, %v14089_v28  ;;  %8702 = vmatprep.mubr.bf16.mxu1 %v8389_v35  ;;  %v6837_v31 = vsel %vm11382_vm10, %v6832_v62, %v6836_v47  ;;  %6024 = vst.msk [vmem:[#allocation5 + $0xf0] sm:$0xff] %vm1568_vm1, %v5987_v4  ;;  %v6846_v45 = vrot.slane %v6845_v9, 4  ;;  %v6865_v50 = vrot.slane %v6863_v13, 4  ;;  %v8391_v62 = vld [vmem:[#allocation5 + $0xc0] sm:$0xff] }
 0x3a7   : > { %v6876_v53 = vshrl.u32 %v6563_v41, 16  ;;  %7528 = vst.msk [vmem:[#allocation5 + $0xe0] sm:$0xff] %vm1892_vm9, %v14101_v61  ;;  %8703 = vmatmul.mubr.bf16.gmra.mrb[60].mxu1 %v8388_v20  ;;  %v9924_v5 = vcombine.low %v6827_v17, %v6837_v31  ;;  %6344 = vst.msk [vmem:[#allocation5 + $0xf0] sm:$0xff] %vm1892_vm9, %v14109_v48  ;;  %v6855_v28 = vor.u32 %v6854_v46, %v6850_v18  ;;  %v6868_v58 = vrot.slane %v6866_v7, 5  ;;  %v6567_v3 = vld [vmem:[#allocation4 + $0xb0] sm:$0x1] }
 0x3a8   : > { %v6874_v11 = vrot.slane %v6872_v39, 5  ;;  %6520 = vst.msk [vmem:[#allocation5 + $0xf0] sm:$0xff] %vm2070_vm11, %v6483_v55  ;;  %v6851_v24 = vsel %vm11382_vm10, %v6846_v45, %v6850_v18  ;;  %v6882_v10 = vshll.u32 %v6564_v37, 16  ;;  %v6887_v21 = vshrl.u32 %v6565_v40, 16  ;;  %v6568_v59 = vld [vmem:[#allocation4 + $0xb4] sm:$0xf] }
 0x3a9   : > { %v6878_v43 = vrot.slane %v6876_v53, 4  ;;  %7032 = vst.msk [vmem:[#allocation5 + $0xf8] sm:$0xff] %vm1020_vm0, %v9924_v5  ;;  %v6856_v61 = vrot.slane %v6855_v28, 4  ;;  %v6869_v49 = vor.u32 %v6868_v58, %v6865_v50  ;;  %v6890_v34 = vshll.u32 %v6565_v40, 16  ;;  %v6569_v36 = vld [vmem:[#allocation4 + $0xb8] sm:$0xf]  ;;  %v14154_v18 = vpop.permute.xlu1 %6308 }
 0x3aa   : > { %v6896_v8 = vshll.u32 %v6566_v42, 16  ;;  %7352 = vst.msk [vmem:[#allocation5 + $0xf8] sm:$0xff] %vm1568_vm1, %v7315_v56  ;;  %v8392_v48 = vld [vmem:[#allocation5 + $0xc8] sm:$0xff]  ;;  %v6884_v23 = vrot.slane %v6882_v10, 5  ;;  %v6889_v55 = vrot.slane %v6887_v21, 4  ;;  %v6900_v47 = vshrl.u32 %v6566_v42, 16 }
 0x3ab   : > { %v6879_v54 = vor.u32 %v6878_v43, %v6874_v11  ;;  %7529 = vst.msk [vmem:[#allocation5 + $0xf8] sm:$0xff] %vm1892_vm9, %v7492_v16  ;;  %8710 = vmatprep.mubr.bf16.mxu1 %v8392_v48  ;;  %v6861_v0 = vsel %vm11382_vm10, %v6856_v61, %v6860_v44  ;;  %v6870_v26 = vrot.slane %v6869_v49, 4  ;;  %v6892_v29 = vrot.slane %v6890_v34, 5  ;;  %v6570_v40 = vld [vmem:[#allocation4 + $0xbc] sm:$0x1] }
 0x3ac   : > { %v6898_v27 = vrot.slane %v6896_v8, 5  ;;  %v9925_v2 = vcombine.low %v6851_v24, %v6861_v0  ;;  %v6902_v33 = vrot.slane %v6900_v47, 4  ;;  %v6906_v56 = vshll.u32 %v6567_v3, 16  ;;  %v6571_v4 = vld [vmem:[#allocation4 + $0xc0] sm:$0xf] }
 0x3ad   : > { %v6880_v41 = vrot.slane %v6879_v54, 4  ;;  %v6893_v14 = vor.u32 %v6892_v29, %v6889_v55  ;;  %v6911_v51 = vshrl.u32 %v6568_v59, 16  ;;  %v6914_v17 = vshll.u32 %v6568_v59, 16  ;;  %v6572_v31 = vld [vmem:[#allocation4 + $0xc4] sm:$0xf]  ;;  %v6485_v3 = vpop.permute.xlu1 %6484 }
 0x3ae   : > { %7033 = vst.msk [vmem:[#allocation5 + $0x110] sm:$0xff] %vm1020_vm0, %v9925_v2  ;;  %v6875_v9 = vsel %vm11382_vm10, %v6870_v26, %v6874_v11  ;;  %v6903_v13 = vor.u32 %v6902_v33, %v6898_v27  ;;  %v6920_v35 = vshll.u32 %v6569_v36, 16  ;;  %v6908_v50 = vrot.slane %v6906_v56, 5  ;;  %v8121_v16 = vld [vmem:[#allocation4 + $0xc0] sm:$0xe] }
 0x3af   : > { %v6885_v37 = vsel %vm11382_vm10, %v6880_v41, %v6884_v23  ;;  %8711 = vmatmul.mubr.bf16.gmra.mrb[64].mxu1 %v8391_v62  ;;  %v8034_v46 = vpop.permute.xlu0 %8033  ;;  %v6894_v7 = vrot.slane %v6893_v14, 4  ;;  %v6913_v39 = vrot.slane %v6911_v51, 4  ;;  %v6916_v20 = vrot.slane %v6914_v17, 5  ;;  %v6573_v21 = vld [vmem:[#allocation4 + $0xc8] sm:$0x1] }
 0x3b0   : > { %v9926_v44 = vcombine.low %v6875_v9, %v6885_v37  ;;  %8072 = vst.msk [vmem:[#allocation5 + $0xe0] sm:$0xff] %vm2070_vm11, %v8034_v46  ;;  %v6904_v45 = vrot.slane %v6903_v13, 4  ;;  %v6922_v53 = vrot.slane %v6920_v35, 5  ;;  %v6924_v42 = vshrl.u32 %v6569_v36, 16  ;;  %v8122_v49 = vld [vmem:[#allocation4 + $0xc4] sm:$0xf] }
 0x3b1   : > { %v6917_v5 = vor.u32 %v6916_v20, %v6913_v39  ;;  %v6930_v28 = vshll.u32 %v6570_v40, 16  ;;  %v6935_v58 = vshrl.u32 %v6571_v4, 16  ;;  %v6938_v11 = vshll.u32 %v6571_v4, 16  ;;  %v8123_v55 = vld [vmem:[#allocation4 + $0xc8] sm:$0x1]  ;;  %v8394_v4 = vld [vmem:[#allocation5 + $0xd8] sm:$0xff] }
 0x3b2   : > { %7034 = vst.msk [vmem:[#allocation5 + $0x128] sm:$0xff] %vm1020_vm0, %v9926_v44  ;;  %v6899_v24 = vsel %vm11382_vm10, %v6894_v7, %v6898_v27  ;;  %v6909_v43 = vsel %vm11382_vm10, %v6904_v45, %v6908_v50  ;;  %v6926_v10 = vrot.slane %v6924_v42, 4  ;;  %v6944_v61 = vshll.u32 %v6572_v31, 16  ;;  %v8124_v26 = vld [vmem:[#allocation4 + $0xcc] sm:$0xe] }
 0x3b3   : > { %v7317_v34 = vpop.permute.xlu0 %7316  ;;  %v9927_v8 = vcombine.low %v6899_v24, %v6909_v43  ;;  %v6918_v48 = vrot.slane %v6917_v5, 4  ;;  %v6937_v54 = vrot.slane %v6935_v58, 4  ;;  %v6940_v23 = vrot.slane %v6938_v11, 5  ;;  %v8125_v29 = vld [vmem:[#allocation4 + $0xd0] sm:$0xf]  ;;  %v8397_v15 = vld [vmem:[#allocation5 + $0xf0] sm:$0xff] }
 0x3b4   : > { %7353 = vst.msk [vmem:[#allocation5 + $0x110] sm:$0xff] %vm1568_vm1, %v7317_v34  ;;  %v6927_v47 = vor.u32 %v6926_v10, %v6922_v53  ;;  %v6946_v59 = vrot.slane %v6944_v61, 5  ;;  %v6948_v0 = vshrl.u32 %v6572_v31, 16  ;;  %v6932_v27 = vrot.slane %v6930_v28, 5  ;;  %v8126_v33 = vld [vmem:[#allocation4 + $0xd4] sm:$0x1] }
 0x3b5   : > { %7035 = vst.msk [vmem:[#allocation5 + $0x140] sm:$0xff] %vm1020_vm0, %v9927_v8  ;;  %v6941_v36 = vor.u32 %v6940_v23, %v6937_v54  ;;  %v6954_v2 = vshll.u32 %v6573_v21, 16  ;;  %v8275_v41 = vrot.slane %v8122_v49, 5  ;;  %v6923_v56 = vsel %vm11382_vm10, %v6918_v48, %v6922_v53 }
 0x3b6   : > { %v6928_v14 = vrot.slane %v6927_v47, 4  ;;  %v6950_v51 = vrot.slane %v6948_v0, 4  ;;  %v10008_v17 = vrot.slane %v8121_v16, 9  ;;  %v8278_v40 = vrot.slane %v8123_v55, 5 }
 0x3b7   : > { %v7494_v62 = vpop.permute.xlu0 %7493  ;;  %v8395_v9 = vld [vmem:[#allocation5 + $0xe0] sm:$0xff]  ;;  %v6942_v37 = vrot.slane %v6941_v36, 4  ;;  %v8277_v13 = vrot.slane %v8275_v41, 4  ;;  %v10009_v35 = vrot.slane %v8124_v26, 9  ;;  %v8282_v7 = vrot.slane %v8125_v29, 5 }
 0x3b8   : > { %7530 = vst.msk [vmem:[#allocation5 + $0x110] sm:$0xff] %vm1892_vm9, %v7494_v62  ;;  %8718 = vmatprep.mubr.bf16.mxu1 %v8395_v9  ;;  %v6933_v46 = vsel %vm11382_vm10, %v6928_v14, %v6932_v27  ;;  %v6951_v44 = vor.u32 %v6950_v51, %v6946_v59  ;;  %v8285_v39 = vrot.slane %v8126_v33, 5  ;;  %v6956_v45 = vrot.slane %v6954_v2, 5  ;;  %v14174_v50 = vpop.f32.mrb[76].mxu0 }
 0x3b9   : > { %v5989_v20 = vpop.permute.xlu1 %5988  ;;  %8719 = vmatmul.mubr.bf16.gmra.mrb[68].mxu1 %v8394_v4  ;;  %v9928_v31 = vcombine.low %v6923_v56, %v6933_v46  ;;  %v8276_v53 = vsel %vm11325_vm7, %v10008_v17, %v8275_v41  ;;  %v8279_v42 = vsel %vm11325_vm7, %v8277_v13, %v8278_v40  ;;  %v14181_v28 = vpop.f32.mrb[77].mxu0  ;;  %v8283_v11 = vsel %vm11325_vm7, %v10009_v35, %v8282_v7 }
 0x3ba   : > { %6025 = vst.msk [vmem:[#allocation5 + $0x108] sm:$0xff] %vm1568_vm1, %v5989_v20  ;;  %v6952_v5 = vrot.slane %v6951_v44, 4  ;;  %v10024_v58 = vcombine.low %v8276_v53, %v8279_v42  ;;  %v8284_v16 = vrot.slane %v8282_v7, 4  ;;  %v14188_v24 = vpop.f32.mrb[78].mxu0  ;;  %v6947_v43 = vsel %vm11382_vm10, %v6942_v37, %v6946_v59  ;;  %v14238_v42 = vld [vmem:[%s14636_s4] ss:$0 sm:$0xff] }
 0x3bb   : > { %6345 = vst.msk [vmem:[#allocation5 + $0x108] sm:$0xff] %vm1892_vm9, %v14154_v18  ;;  %v14195_v21 = vpop.f32.mrb[79].mxu0 }
 0x3bc   : > { %7036 = vst.msk [vmem:[#allocation5 + $0x158] sm:$0xff] %vm1020_vm0, %v9928_v31  ;;  %v6957_v10 = vsel %vm11382_vm10, %v6952_v5, %v6956_v45  ;;  %8365 = vst.msk [vmem:[#allocation5 + $0x160] sm:$0xff] %vm1020_vm0, %v10024_v58  ;;  %v8286_v61 = vsel %vm11325_vm7, %v8284_v16, %v8285_v39 }
 0x3bd   : > { %6521 = vst.msk [vmem:[#allocation5 + $0x108] sm:$0xff] %vm2070_vm11, %v6485_v3  ;;  %v9929_v18 = vcombine.low %v6947_v43, %v6957_v10  ;;  %v10025_v49 = vcombine.low %v8283_v11, %v8286_v61  ;;  %v6311_v34 = vpop.permute.xlu1 %6310 }
 0x3bf   : > { %7037 = vst.msk [vmem:[#allocation5 + $0x170] sm:$0xff] %vm1020_vm0, %v9929_v18  ;;  %8366 = vst.msk [vmem:[#allocation5 + $0x178] sm:$0xff] %vm1020_vm0, %v10025_v49 }
 0x3c1   : > { %v6487_v8 = vpop.permute.xlu1 %6486 }
 0x3c2   : > { %v8036_v3 = vpop.permute.xlu0 %8035 }
 0x3c3   : > { %8073 = vst.msk [vmem:[#allocation5 + $0xf8] sm:$0xff] %vm2070_vm11, %v8036_v3 }
 0x3c4   : > { %v8400_v27 = vld [vmem:[#allocation5 + $0x108] sm:$0xff] }
 0x3c6   : > { %v7319_v57 = vpop.permute.xlu0 %7318 }
 0x3c7   : > { %7354 = vst.msk [vmem:[#allocation5 + $0x128] sm:$0xff] %vm1568_vm1, %v7319_v57 }
 0x3ca   : > { %v7496_v48 = vpop.permute.xlu0 %7495  ;;  %v8398_v54 = vld [vmem:[#allocation5 + $0xf8] sm:$0xff] }
 0x3cb   : > { %7531 = vst.msk [vmem:[#allocation5 + $0x128] sm:$0xff] %vm1892_vm9, %v7496_v48  ;;  %8726 = vmatprep.mubr.bf16.mxu1 %v8398_v54  ;;  %v5991_v23 = vpop.permute.xlu1 %5990 }
 0x3cc   : > { %8727 = vmatmul.mubr.bf16.gmra.mrb[72].mxu1 %v8397_v15  ;;  %6026 = vst.msk [vmem:[#allocation5 + $0x120] sm:$0xff] %vm1568_vm1, %v5991_v23 }
 0x3cd   : > { %6346 = vst.msk [vmem:[#allocation5 + $0x120] sm:$0xff] %vm1892_vm9, %v6311_v34 }
 0x3ce   : > { %6522 = vst.msk [vmem:[#allocation5 + $0x120] sm:$0xff] %vm2070_vm11, %v6487_v8 }
 0x3cf   : > { %v6313_v55 = vpop.permute.xlu1 %6312 }
 0x3d3   : > { %v6489_v59 = vpop.permute.xlu1 %6488 }
 0x3d4   : > { %v8038_v47 = vpop.permute.xlu0 %8037 }
 0x3d5   : > { %8074 = vst.msk [vmem:[#allocation5 + $0x110] sm:$0xff] %vm2070_vm11, %v8038_v47  ;;  %v8403_v40 = vld [vmem:[#allocation5 + $0x120] sm:$0xff] }
 0x3d8   : > { %v7321_v0 = vpop.permute.xlu0 %7320 }
 0x3d9   : > { %7355 = vst.msk [vmem:[#allocation5 + $0x140] sm:$0xff] %vm1568_vm1, %v7321_v0 }
 0x3dc   : > { %v7498_v26 = vpop.permute.xlu0 %7497  ;;  %v8401_v29 = vld [vmem:[#allocation5 + $0x110] sm:$0xff] }
 0x3dd   : > { %7532 = vst.msk [vmem:[#allocation5 + $0x140] sm:$0xff] %vm1892_vm9, %v7498_v26  ;;  %8734 = vmatprep.mubr.bf16.mxu1 %v8401_v29  ;;  %v5993_v36 = vpop.permute.xlu1 %5992 }
 0x3de   : > { %8735 = vmatmul.mubr.bf16.gmra.mrb[76].mxu1 %v8400_v27  ;;  %6027 = vst.msk [vmem:[#allocation5 + $0x138] sm:$0xff] %vm1568_vm1, %v5993_v36 }
 0x3df   : > { %6347 = vst.msk [vmem:[#allocation5 + $0x138] sm:$0xff] %vm1892_vm9, %v6313_v55 }
 0x3e0   : > { %6523 = vst.msk [vmem:[#allocation5 + $0x138] sm:$0xff] %vm2070_vm11, %v6489_v59  ;;  %v8411_v59 = vld [vmem:[#allocation5 + $0x160] sm:$0xff] }
 0x3e1   : > { %v6315_v2 = vpop.permute.xlu1 %6314 }
 0x3e5   : > { %v6491_v33 = vpop.permute.xlu1 %6490  ;;  %v14215_v56 = vpop.f32.mrb[80].mxu0 }
 0x3e6   : > { %v8040_v41 = vpop.permute.xlu0 %8039  ;;  %v14217_v14 = vpop.f32.mrb[81].mxu0 }
 0x3e7   : > { %8075 = vst.msk [vmem:[#allocation5 + $0x128] sm:$0xff] %vm2070_vm11, %v8040_v41  ;;  %v14219_v51 = vpop.f32.mrb[82].mxu0  ;;  %v8406_v20 = vld [vmem:[#allocation5 + $0x138] sm:$0xff] }
 0x3e8   : > { %v14221_v62 = vpop.f32.mrb[83].mxu0 }
 0x3ea   : > { %v7323_v17 = vpop.permute.xlu0 %7322 }
 0x3eb   : > { %7356 = vst.msk [vmem:[#allocation5 + $0x158] sm:$0xff] %vm1568_vm1, %v7323_v17 }
 0x3ec   : > { %v5995_v9 = vpop.permute.xlu1 %5994 }
 0x3ed   : > { %6028 = vst.msk [vmem:[#allocation5 + $0x150] sm:$0xff] %vm1568_vm1, %v5995_v9  ;;  %v8414_v9 = vld [vmem:[#allocation5 + $0x178] sm:$0xff] }
 0x3ee   : > { %v7500_v37 = vpop.permute.xlu0 %7499  ;;  %v8404_v13 = vld [vmem:[#allocation5 + $0x128] sm:$0xff]  ;;  %6348 = vst.msk [vmem:[#allocation5 + $0x150] sm:$0xff] %vm1892_vm9, %v6315_v2 }
 0x3ef   : > { %7533 = vst.msk [vmem:[#allocation5 + $0x158] sm:$0xff] %vm1892_vm9, %v7500_v37  ;;  %8742 = vmatprep.mubr.bf16.mxu1 %v8404_v13 }
 0x3f0   : > { %6524 = vst.msk [vmem:[#allocation5 + $0x150] sm:$0xff] %vm2070_vm11, %v6491_v33  ;;  %8743 = vmatmul.mubr.bf16.gmra.mrb[80].mxu1 %v8403_v40  ;;  %v5997_v35 = vpop.permute.xlu1 %5996 }
 0x3f1   : > { %6029 = vst.msk [vmem:[#allocation5 + $0x168] sm:$0xff] %vm1568_vm1, %v5997_v35 }
 0x3f7   : > { %v8409_v10 = vld [vmem:[#allocation5 + $0x150] sm:$0xff] }
 0x3f8   : > { %v6317_v4 = vpop.permute.xlu1 %6316 }
 0x3f9   : > { %v8042_v46 = vpop.permute.xlu0 %8041  ;;  %6349 = vst.msk [vmem:[#allocation5 + $0x168] sm:$0xff] %vm1892_vm9, %v6317_v4 }
 0x3fa   : > { %8076 = vst.msk [vmem:[#allocation5 + $0x140] sm:$0xff] %vm2070_vm11, %v8042_v46 }
 0x3fc   : > { %v6493_v44 = vpop.permute.xlu1 %6492 }
 0x3fd   : > { %v7325_v7 = vpop.permute.xlu0 %7324  ;;  %6525 = vst.msk [vmem:[#allocation5 + $0x168] sm:$0xff] %vm2070_vm11, %v6493_v44 }
 0x3fe   : > { %7357 = vst.msk [vmem:[#allocation5 + $0x170] sm:$0xff] %vm1568_vm1, %v7325_v7 }
 0x401   : > { %v8407_v39 = vld [vmem:[#allocation5 + $0x140] sm:$0xff] }
 0x402   : > { %8750 = vmatprep.mubr.bf16.mxu1 %v8407_v39  ;;  %v8044_v31 = vpop.permute.xlu0 %8043 }
 0x403   : > { %8751 = vmatmul.mubr.bf16.gmra.mrb[84].mxu1 %v8406_v20  ;;  %8077 = vst.msk [vmem:[#allocation5 + $0x158] sm:$0xff] %vm2070_vm11, %v8044_v31 }
 0x406   : > { %v7502_v45 = vpop.permute.xlu0 %7501 }
 0x407   : > { %7534 = vst.msk [vmem:[#allocation5 + $0x170] sm:$0xff] %vm1892_vm9, %v7502_v45  ;;  %v10331_v53 = vpop.f32.mrb[32].mxu1 }
 0x408   : > { %v10332_v5 = vpop.f32.mrb[33].mxu1 }
 0x409   : > { %v10333_v58 = vadd.f32 %v10332_v5, %v10331_v53  ;;  %v10334_v11 = vpop.f32.mrb[34].mxu1 }
 0x40a   : > { %v8410_v16 = vld [vmem:[#allocation5 + $0x158] sm:$0xff]  ;;  %v10335_v43 = vpop.f32.mrb[35].mxu1 }
 0x40b   : > { %8758 = vmatprep.mubr.bf16.mxu1 %v8410_v16  ;;  %v8649_v61 = vadd.f32 %v10333_v58, %v14238_v42  ;;  %v10336_v18 = vadd.f32 %v10335_v43, %v10334_v11 }
 0x40c   : > { %8759 = vmatmul.mubr.bf16.gmra.mrb[88].mxu1 %v8409_v10 }
 0x40d   : > { %v14242_v49 = vadd.f32 %v13817_v12, %v8649_v61  ;;  %v8652_v34 = vadd.f32 %v10336_v18, %v14238_v42  ;;  %v8412_v12 = vld [vmem:[#allocation5 + $0x168] sm:$0xff] }
 0x40f   : > { %v8936_v8 = vsub.f32 0.0, %v14242_v49  ;;  %v14247_v57 = vadd.f32 %v13830_v25, %v8652_v34 }
 0x410   : > { %v8046_v3 = vpop.permute.xlu0 %8045 }
 0x411   : > { %8078 = vst.msk [vmem:[#allocation5 + $0x170] sm:$0xff] %vm2070_vm11, %v8046_v3  ;;  %v8968_v48 = vmul.f32 1.442695, %v8936_v8  ;;  %v8937_v54 = vsub.f32 0.0, %v14247_v57 }
 0x413   : > { %10871 = vpow2.f32 %v8968_v48  ;;  %v8970_v15 = vmul.f32 1.442695, %v8937_v54 }
 0x415   : > { %10873 = vpow2.f32 %v8970_v15 }
 0x418   : > { %v8413_v23 = vld [vmem:[#allocation5 + $0x170] sm:$0xff] }
 0x419   : > { %v14251_v55 = vpop.f32.mrb[84].mxu0  ;;  %8766 = vmatprep.mubr.bf16.mxu1 %v8413_v23 }
 0x41a   : > { %v14253_v47 = vpop.f32.mrb[85].mxu0  ;;  %8767 = vmatmul.mubr.bf16.gmra.mrb[92].mxu1 %v8412_v12 }
 0x41b   : > { %v14255_v0 = vpop.f32.mrb[86].mxu0  ;;  %v10337_v25 = vpop.f32.mrb[36].mxu1  ;;  %10513 = vmatprep.mubr.msk.bf16.mxu1 %vm1020_vm0, %v8411_v59 }
 0x41c   : > { %v14258_v26 = vpop.f32.mrb[87].mxu0  ;;  %v10338_v29 = vpop.f32.mrb[37].mxu1 }
 0x41d   : > { %v10339_v27 = vadd.f32 %v10338_v29, %v10337_v25  ;;  %v10340_v36 = vpop.f32.mrb[38].mxu1  ;;  %v10872_v41 = vpop.eup %10871 }
 0x41e   : > { %v10341_v2 = vpop.f32.mrb[39].mxu1  ;;  %v9032_v37 = vadd.f32 1.0, %v10872_v41 }
 0x41f   : > { %v8657_v33 = vadd.f32 %v10339_v27, %v14238_v42  ;;  %v10342_v17 = vadd.f32 %v10341_v2, %v10340_v36  ;;  %v10874_v13 = vpop.eup %10873 }
 0x420   : > { %10875 = vrcp.f32 %v9032_v37  ;;  %v9033_v4 = vadd.f32 1.0, %v10874_v13 }
 0x421   : > { %v14262_v40 = vadd.f32 %v13805_v38, %v8657_v33  ;;  %v8660_v35 = vadd.f32 %v10342_v17, %v14238_v42 }
 0x422   : > { %10514 = vmatmul.mubr.msk.bf16.vlgmr.msra.gmra.mrb[96].mxu1 %vm1020_vm0, %v8414_v9  ;;  %10877 = vrcp.f32 %v9033_v4 }
 0x423   : > { %v8938_v46 = vsub.f32 0.0, %v14262_v40  ;;  %v14268_v44 = vadd.f32 %v13822_v60, %v8660_v35 }
 0x425   : > { %v8972_v7 = vmul.f32 1.442695, %v8938_v46  ;;  %v8939_v39 = vsub.f32 0.0, %v14268_v44 }
 0x427   : > { %10879 = vpow2.f32 %v8972_v7  ;;  %v8974_v20 = vmul.f32 1.442695, %v8939_v39 }
 0x429   : > { %10881 = vpow2.f32 %v8974_v20 }
 0x42a   : > { %v10876_v38 = vpop.eup %10875 }
 0x42b   : > { %v10343_v31 = vpop.f32.mrb[40].mxu1  ;;  %9161 = vrot.lane.b32.xlu0 %v10876_v38, %s11069_s11 }
 0x42c   : > { %v10344_v45 = vpop.f32.mrb[41].mxu1  ;;  %v10878_v53 = vpop.eup %10877 }
 0x42d   : > { %v10345_v5 = vadd.f32 %v10344_v45, %v10343_v31  ;;  %v10346_v58 = vpop.f32.mrb[42].mxu1  ;;  %9163 = vrot.lane.b32.xlu1 %v10878_v53, %s11069_s11 }
 0x42e   : > { %v10347_v11 = vpop.f32.mrb[43].mxu1 }
 0x42f   : > { %v8665_v60 = vadd.f32 %v10345_v5, %v14238_v42  ;;  %v10348_v16 = vadd.f32 %v10347_v11, %v10346_v58 }
 0x431   : > { %v10880_v43 = vpop.eup %10879  ;;  %v14275_v61 = vadd.f32 %v13998_v19, %v8665_v60  ;;  %v8668_v18 = vadd.f32 %v10348_v16, %v14238_v42 }
 0x432   : > { %v9034_v10 = vadd.f32 1.0, %v10880_v43 }
 0x433   : > { %v10882_v34 = vpop.eup %10881  ;;  %v8940_v8 = vsub.f32 0.0, %v14275_v61  ;;  %v14280_v48 = vadd.f32 %v14003_v1, %v8668_v18 }
 0x434   : > { %10883 = vrcp.f32 %v9034_v10  ;;  %v9035_v3 = vadd.f32 1.0, %v10882_v34 }
 0x435   : > { %v8976_v54 = vmul.f32 1.442695, %v8940_v8  ;;  %v8941_v15 = vsub.f32 0.0, %v14280_v48 }
 0x436   : > { %10885 = vrcp.f32 %v9035_v3 }
 0x437   : > { %10887 = vpow2.f32 %v8976_v54  ;;  %v8978_v23 = vmul.f32 1.442695, %v8941_v15 }
 0x439   : > { %10889 = vpow2.f32 %v8978_v23 }
 0x43b   : > { %v14283_v12 = vpop.f32.mrb[88].mxu0 }
 0x43c   : > { %v14285_v59 = vpop.f32.mrb[89].mxu0 }
 0x43d   : > { %v10349_v25 = vpop.f32.mrb[44].mxu1  ;;  %v14287_v29 = vpop.f32.mrb[90].mxu0 }
 0x43e   : > { %v10884_v19 = vpop.eup %10883  ;;  %v10350_v27 = vpop.f32.mrb[45].mxu1 }
 0x43f   : > { %9165 = vrot.lane.b32.xlu0 %v10884_v19, %s11069_s11  ;;  %v14290_v36 = vpop.f32.mrb[91].mxu0  ;;  %v10351_v2 = vadd.f32 %v10350_v27, %v10349_v25  ;;  %v10352_v41 = vpop.f32.mrb[46].mxu1 }
 0x440   : > { %v10886_v1 = vpop.eup %10885  ;;  %v10353_v33 = vpop.f32.mrb[47].mxu1 }
 0x441   : > { %9167 = vrot.lane.b32.xlu1 %v10886_v1, %s11069_s11  ;;  %v10888_v17 = vpop.eup %10887  ;;  %v8673_v9 = vadd.f32 %v10351_v2, %v14238_v42  ;;  %v10354_v37 = vadd.f32 %v10353_v33, %v10352_v41 }
 0x442   : > { %v9036_v13 = vadd.f32 1.0, %v10888_v17 }
 0x443   : > { %v10890_v35 = vpop.eup %10889  ;;  %v14295_v4 = vadd.f32 %v13992_v32, %v8673_v9  ;;  %v8676_v46 = vadd.f32 %v10354_v37, %v14238_v42 }
 0x444   : > { %10891 = vrcp.f32 %v9036_v13  ;;  %v9037_v7 = vadd.f32 1.0, %v10890_v35 }
 0x445   : > { %v8942_v39 = vsub.f32 0.0, %v14295_v4  ;;  %v14300_v20 = vadd.f32 %v14001_v63, %v8676_v46 }
 0x446   : > { %10893 = vrcp.f32 %v9037_v7 }
 0x447   : > { %v8980_v38 = vmul.f32 1.442695, %v8942_v39  ;;  %v8943_v31 = vsub.f32 0.0, %v14300_v20 }
 0x449   : > { %10895 = vpow2.f32 %v8980_v38  ;;  %v8982_v45 = vmul.f32 1.442695, %v8943_v31 }
 0x44b   : > { %10897 = vpow2.f32 %v8982_v45 }
 0x44e   : > { %v10892_v53 = vpop.eup %10891  ;;  %v10355_v5 = vpop.f32.mrb[48].mxu1 }
 0x44f   : > { %9169 = vrot.lane.b32.xlu0 %v10892_v53, %s11069_s11  ;;  %v10356_v58 = vpop.f32.mrb[49].mxu1 }
 0x450   : > { %v10894_v32 = vpop.eup %10893  ;;  %v10357_v11 = vadd.f32 %v10356_v58, %v10355_v5  ;;  %v10358_v60 = vpop.f32.mrb[50].mxu1 }
 0x451   : > { %9171 = vrot.lane.b32.xlu1 %v10894_v32, %s11069_s11  ;;  %v10359_v16 = vpop.f32.mrb[51].mxu1 }
 0x452   : > { %v8681_v43 = vadd.f32 %v10357_v11, %v14238_v42  ;;  %v10360_v10 = vadd.f32 %v10359_v16, %v10358_v60 }
 0x453   : > { %v10896_v63 = vpop.eup %10895 }
 0x454   : > { %v9038_v18 = vadd.f32 1.0, %v10896_v63  ;;  %v14307_v3 = vadd.f32 %v14077_v30, %v8681_v43  ;;  %v8684_v8 = vadd.f32 %v10360_v10, %v14238_v42 }
 0x455   : > { %v10898_v34 = vpop.eup %10897 }
 0x456   : > { %10899 = vrcp.f32 %v9038_v18  ;;  %v9039_v54 = vadd.f32 1.0, %v10898_v34  ;;  %v8944_v15 = vsub.f32 0.0, %v14307_v3  ;;  %v14312_v23 = vadd.f32 %v14086_v22, %v8684_v8 }
 0x458   : > { %10901 = vrcp.f32 %v9039_v54  ;;  %v8984_v19 = vmul.f32 1.442695, %v8944_v15  ;;  %v8945_v25 = vsub.f32 0.0, %v14312_v23 }
 0x45a   : > { %10903 = vpow2.f32 %v8984_v19  ;;  %v8986_v27 = vmul.f32 1.442695, %v8945_v25 }
 0x45c   : > { %10905 = vpow2.f32 %v8986_v27 }
 0x460   : > { %v10900_v1 = vpop.eup %10899 }
 0x461   : > { %9173 = vrot.lane.b32.xlu0 %v10900_v1, %s11069_s11  ;;  %v10361_v2 = vpop.f32.mrb[52].mxu1 }
 0x462   : > { %v10902_v30 = vpop.eup %10901  ;;  %v10362_v41 = vpop.f32.mrb[53].mxu1 }
 0x463   : > { %9175 = vrot.lane.b32.xlu1 %v10902_v30, %s11069_s11  ;;  %v10363_v33 = vadd.f32 %v10362_v41, %v10361_v2  ;;  %v10364_v17 = vpop.f32.mrb[54].mxu1 }
 0x464   : > { %v10904_v9 = vpop.eup %10903  ;;  %v10365_v22 = vpop.f32.mrb[55].mxu1 }
 0x465   : > { %v9040_v37 = vadd.f32 1.0, %v10904_v9  ;;  %v8689_v13 = vadd.f32 %v10363_v33, %v14238_v42  ;;  %v10366_v35 = vadd.f32 %v10365_v22, %v10364_v17 }
 0x466   : > { %v10906_v46 = vpop.eup %10905 }
 0x467   : > { %10907 = vrcp.f32 %v9040_v37  ;;  %v9041_v7 = vadd.f32 1.0, %v10906_v46  ;;  %v14319_v39 = vadd.f32 %v14073_v6, %v8689_v13  ;;  %v8692_v38 = vadd.f32 %v10366_v35, %v14238_v42 }
 0x469   : > { %10909 = vrcp.f32 %v9041_v7  ;;  %v8946_v31 = vsub.f32 0.0, %v14319_v39  ;;  %v14324_v45 = vadd.f32 %v14081_v52, %v8692_v38 }
 0x46b   : > { %v8988_v53 = vmul.f32 1.442695, %v8946_v31  ;;  %v8947_v5 = vsub.f32 0.0, %v14324_v45 }
 0x46d   : > { %10911 = vpow2.f32 %v8988_v53  ;;  %v8990_v32 = vmul.f32 1.442695, %v8947_v5 }
 0x46f   : > { %10913 = vpow2.f32 %v8990_v32 }
 0x471   : > { %v10908_v58 = vpop.eup %10907  ;;  %v10367_v11 = vpop.f32.mrb[56].mxu1 }
 0x472   : > { %v10368_v60 = vpop.f32.mrb[57].mxu1  ;;  %9177 = vrot.lane.b32.xlu0 %v10908_v58, %s11069_s11 }
 0x473   : > { %v10910_v6 = vpop.eup %10909  ;;  %v10369_v16 = vadd.f32 %v10368_v60, %v10367_v11  ;;  %v10370_v63 = vpop.f32.mrb[58].mxu1 }
 0x474   : > { %v10371_v43 = vpop.f32.mrb[59].mxu1  ;;  %9179 = vrot.lane.b32.xlu1 %v10910_v6, %s11069_s11 }
 0x475   : > { %v8697_v52 = vadd.f32 %v10369_v16, %v14238_v42  ;;  %v10372_v10 = vadd.f32 %v10371_v43, %v10370_v63 }
 0x477   : > { %v10912_v18 = vpop.eup %10911  ;;  %v14331_v34 = vadd.f32 %v14181_v28, %v8697_v52  ;;  %v8700_v8 = vadd.f32 %v10372_v10, %v14238_v42 }
 0x478   : > { %v9042_v54 = vadd.f32 1.0, %v10912_v18 }
 0x479   : > { %v10914_v15 = vpop.eup %10913  ;;  %v8948_v19 = vsub.f32 0.0, %v14331_v34  ;;  %v14336_v25 = vadd.f32 %v14195_v21, %v8700_v8 }
 0x47a   : > { %10915 = vrcp.f32 %v9042_v54  ;;  %v9043_v27 = vadd.f32 1.0, %v10914_v15  ;;  %v10373_v1 = vpop.f32.mrb[60].mxu1 }
 0x47b   : > { %v8992_v30 = vmul.f32 1.442695, %v8948_v19  ;;  %v8949_v2 = vsub.f32 0.0, %v14336_v25  ;;  %v10374_v41 = vpop.f32.mrb[61].mxu1 }
 0x47c   : > { %10917 = vrcp.f32 %v9043_v27  ;;  %v10375_v33 = vadd.f32 %v10374_v41, %v10373_v1  ;;  %v10376_v28 = vpop.f32.mrb[62].mxu1 }
 0x47d   : > { %10919 = vpow2.f32 %v8992_v30  ;;  %v8994_v17 = vmul.f32 1.442695, %v8949_v2  ;;  %v10377_v9 = vpop.f32.mrb[63].mxu1 }
 0x47e   : > { %v8705_v22 = vadd.f32 %v10375_v33, %v14238_v42  ;;  %v10378_v37 = vadd.f32 %v10377_v9, %v10376_v28 }
 0x47f   : > { %10921 = vpow2.f32 %v8994_v17 }
 0x480   : > { %v14341_v21 = vadd.f32 %v14174_v50, %v8705_v22  ;;  %v8708_v13 = vadd.f32 %v10378_v37, %v14238_v42 }
 0x482   : > { %v8950_v35 = vsub.f32 0.0, %v14341_v21  ;;  %v14346_v46 = vadd.f32 %v14188_v24, %v8708_v13  ;;  %v10379_v7 = vpop.f32.mrb[64].mxu1 }
 0x483   : > { %v10380_v38 = vpop.f32.mrb[65].mxu1 }
 0x484   : > { %v10916_v31 = vpop.eup %10915  ;;  %v8996_v53 = vmul.f32 1.442695, %v8950_v35  ;;  %v8951_v5 = vsub.f32 0.0, %v14346_v46  ;;  %v10381_v32 = vadd.f32 %v10380_v38, %v10379_v7  ;;  %v10382_v58 = vpop.f32.mrb[66].mxu1 }
 0x485   : > { %9181 = vrot.lane.b32.xlu0 %v10916_v31, %s11069_s11  ;;  %v10383_v11 = vpop.f32.mrb[67].mxu1 }
 0x486   : > { %v10918_v50 = vpop.eup %10917  ;;  %10923 = vpow2.f32 %v8996_v53  ;;  %v8998_v60 = vmul.f32 1.442695, %v8951_v5  ;;  %v8713_v6 = vadd.f32 %v10381_v32, %v14238_v42  ;;  %v10384_v16 = vadd.f32 %v10383_v11, %v10382_v58 }
 0x487   : > { %v10920_v63 = vpop.eup %10919  ;;  %9183 = vrot.lane.b32.xlu1 %v10918_v50, %s11069_s11 }
 0x488   : > { %v9044_v24 = vadd.f32 1.0, %v10920_v63  ;;  %10925 = vpow2.f32 %v8998_v60  ;;  %v14353_v43 = vadd.f32 %v14217_v14, %v8713_v6  ;;  %v8716_v52 = vadd.f32 %v10384_v16, %v14238_v42  ;;  %v10061_v60 = vld [vmem:[%s11158_s9 + $0x19] sm:$0xff] }
 0x489   : > { %v10922_v10 = vpop.eup %10921 }
 0x48a   : > { %10927 = vrcp.f32 %v9044_v24  ;;  %v9045_v18 = vadd.f32 1.0, %v10922_v10  ;;  %v8952_v8 = vsub.f32 0.0, %v14353_v43  ;;  %v14358_v54 = vadd.f32 %v14221_v62, %v8716_v52  ;;  %v10062_v10 = vld [vmem:[%s11158_s9 + $0x21] sm:$0xff] }
 0x48c   : > { %10929 = vrcp.f32 %v9045_v18  ;;  %v9000_v15 = vmul.f32 1.442695, %v8952_v8  ;;  %v8953_v19 = vsub.f32 0.0, %v14358_v54  ;;  %v10385_v27 = vpop.f32.mrb[68].mxu1 }
 0x48d   : > { %v10386_v1 = vpop.f32.mrb[69].mxu1 }
 0x48e   : > { %10931 = vpow2.f32 %v9000_v15  ;;  %v9002_v30 = vmul.f32 1.442695, %v8953_v19  ;;  %v10387_v14 = vadd.f32 %v10386_v1, %v10385_v27  ;;  %v10388_v2 = vpop.f32.mrb[70].mxu1 }
 0x48f   : > { %v10389_v41 = vpop.f32.mrb[71].mxu1 }
 0x490   : > { %v10924_v33 = vpop.eup %10923  ;;  %10933 = vpow2.f32 %v9002_v30  ;;  %v8721_v28 = vadd.f32 %v10387_v14, %v14238_v42  ;;  %v10390_v17 = vadd.f32 %v10389_v41, %v10388_v2 }
 0x491   : > { %v9046_v9 = vadd.f32 1.0, %v10924_v33 }
 0x492   : > { %v10926_v22 = vpop.eup %10925  ;;  %v14363_v62 = vadd.f32 %v14215_v56, %v8721_v28  ;;  %v8724_v37 = vadd.f32 %v10390_v17, %v14238_v42 }
 0x493   : > { %10935 = vrcp.f32 %v9046_v9  ;;  %v9047_v13 = vadd.f32 1.0, %v10926_v22 }
 0x494   : > { %v10928_v35 = vpop.eup %10927  ;;  %v8954_v7 = vsub.f32 0.0, %v14363_v62  ;;  %v14368_v38 = vadd.f32 %v14219_v51, %v8724_v37 }
 0x495   : > { %10937 = vrcp.f32 %v9047_v13  ;;  %9185 = vrot.lane.b32.xlu0 %v10928_v35, %s11069_s11 }
 0x496   : > { %v10930_v31 = vpop.eup %10929  ;;  %v9004_v53 = vmul.f32 1.442695, %v8954_v7  ;;  %v8955_v56 = vsub.f32 0.0, %v14368_v38 }
 0x497   : > { %9187 = vrot.lane.b32.xlu1 %v10930_v31, %s11069_s11 }
 0x498   : > { %v10932_v5 = vpop.eup %10931  ;;  %10939 = vpow2.f32 %v9004_v53  ;;  %v9006_v32 = vmul.f32 1.442695, %v8955_v56  ;;  %v10063_v53 = vld [vmem:[%s11158_s9 + $0x31] sm:$0xff] }
 0x499   : > { %v9048_v58 = vadd.f32 1.0, %v10932_v5 }
 0x49a   : > { %v10934_v11 = vpop.eup %10933  ;;  %10941 = vpow2.f32 %v9006_v32 }
 0x49b   : > { %10943 = vrcp.f32 %v9048_v58  ;;  %v9049_v51 = vadd.f32 1.0, %v10934_v11  ;;  %v10064_v11 = vld [vmem:[%s11158_s9 + $0x39] sm:$0xff] }
 0x49d   : > { %v10936_v50 = vpop.eup %10935  ;;  %10945 = vrcp.f32 %v9049_v51  ;;  %v9162_v6 = vpop.permute.xlu0 %9161 }
 0x49e   : > { %9189 = vrot.lane.b32.xlu0 %v10936_v50, %s11069_s11  ;;  %v9257_v63 = vmul.f32 %v9162_v6, %v14242_v49 }
 0x49f   : > { %v10391_v16 = vpop.f32.mrb[72].mxu1  ;;  %v10938_v24 = vpop.eup %10937 }
 0x4a0   : > { %v10392_v52 = vpop.f32.mrb[73].mxu1  ;;  %v9164_v18 = vpop.permute.xlu1 %9163  ;;  %9191 = vrot.lane.b32.xlu1 %v10938_v24, %s11069_s11  ;;  %v9289_v19 = vadd.f32 %v10061_v60, %v9257_v63 }
 0x4a1   : > { %v10393_v8 = vadd.f32 %v10392_v52, %v10391_v16  ;;  %v10394_v15 = vpop.f32.mrb[74].mxu1  ;;  %v9258_v27 = vmul.f32 %v9164_v18, %v14247_v57 }
 0x4a2   : > { %v10395_v1 = vpop.f32.mrb[75].mxu1  ;;  %v10940_v30 = vpop.eup %10939  ;;  %9321 = vst.msk [vmem:[%s14383_s15] sm:$0xff] %vm1020_vm0, %v9289_v19 }
 0x4a3   : > { %v8729_v14 = vadd.f32 %v10393_v8, %v14238_v42  ;;  %v10396_v2 = vadd.f32 %v10395_v1, %v10394_v15  ;;  %v9290_v49 = vadd.f32 %v10062_v10, %v9258_v27  ;;  %v9050_v41 = vadd.f32 1.0, %v10940_v30 }
 0x4a4   : > { %v10942_v33 = vpop.eup %10941 }
 0x4a5   : > { %v14388_v28 = vadd.f32 %v14253_v47, %v8729_v14  ;;  %v8732_v17 = vadd.f32 %v10396_v2, %v14238_v42  ;;  %9322 = vst.msk [vmem:[%s14383_s15 + $0x8] sm:$0xff] %vm1020_vm0, %v9290_v49  ;;  %v10944_v57 = vpop.eup %10943  ;;  %10947 = vrcp.f32 %v9050_v41  ;;  %v9051_v9 = vadd.f32 1.0, %v10942_v33 }
 0x4a6   : > { %9193 = vrot.lane.b32.xlu0 %v10944_v57, %s11069_s11  ;;  %v10066_v57 = vld [vmem:[%s11158_s9 + $0x51] sm:$0xff] }
 0x4a7   : > { %v8956_v22 = vsub.f32 0.0, %v14388_v28  ;;  %v14395_v37 = vadd.f32 %v14258_v26, %v8732_v17  ;;  %v10946_v13 = vpop.eup %10945  ;;  %10949 = vrcp.f32 %v9051_v9 }
 0x4a8   : > { %9195 = vrot.lane.b32.xlu1 %v10946_v13, %s11069_s11 }
 0x4a9   : > { %v9008_v47 = vmul.f32 1.442695, %v8956_v22  ;;  %v8957_v35 = vsub.f32 0.0, %v14395_v37 }
 0x4ab   : > { %10951 = vpow2.f32 %v9008_v47  ;;  %v9010_v7 = vmul.f32 1.442695, %v8957_v35 }
 0x4ad   : > { %10953 = vpow2.f32 %v9010_v7 }
 0x4af   : > { %v10948_v31 = vpop.eup %10947 }
 0x4b0   : > { %9197 = vrot.lane.b32.xlu0 %v10948_v31, %s11069_s11 }
 0x4b1   : > { %v9166_v56 = vpop.permute.xlu0 %9165  ;;  %v10397_v5 = vpop.f32.mrb[76].mxu1 }
 0x4b2   : > { %v9259_v26 = vmul.f32 %v9166_v56, %v14262_v40  ;;  %v10950_v32 = vpop.eup %10949  ;;  %v10398_v58 = vpop.f32.mrb[77].mxu1 }
 0x4b3   : > { %v9168_v51 = vpop.permute.xlu1 %9167  ;;  %v10399_v50 = vadd.f32 %v10398_v58, %v10397_v5  ;;  %v10400_v60 = vpop.f32.mrb[78].mxu1  ;;  %9199 = vrot.lane.b32.xlu1 %v10950_v32, %s11069_s11 }
 0x4b4   : > { %v9291_v6 = vadd.f32 %v10063_v53, %v9259_v26  ;;  %v9260_v16 = vmul.f32 %v9168_v51, %v14268_v44  ;;  %v10401_v63 = vpop.f32.mrb[79].mxu1 }
 0x4b5   : > { %v10952_v24 = vpop.eup %10951  ;;  %v8737_v52 = vadd.f32 %v10399_v50, %v14238_v42  ;;  %v10402_v10 = vadd.f32 %v10401_v63, %v10400_v60 }
 0x4b6   : > { %9323 = vst.msk [vmem:[%s14383_s15 + $0x10] sm:$0xff] %vm1020_vm0, %v9291_v6  ;;  %v9292_v40 = vadd.f32 %v10064_v11, %v9260_v16  ;;  %v9052_v18 = vadd.f32 1.0, %v10952_v24 }
 0x4b7   : > { %v10954_v8 = vpop.eup %10953  ;;  %v14410_v15 = vadd.f32 %v14251_v55, %v8737_v52  ;;  %v8740_v19 = vadd.f32 %v10402_v10, %v14238_v42  ;;  %v10065_v55 = vld [vmem:[%s11158_s9 + $0x49] sm:$0xff] }
 0x4b8   : > { %9324 = vst.msk [vmem:[%s14383_s15 + $0x18] sm:$0xff] %vm1020_vm0, %v9292_v40  ;;  %10955 = vrcp.f32 %v9052_v18  ;;  %v9053_v44 = vadd.f32 1.0, %v10954_v8  ;;  %v10068_v10 = vld [vmem:[%s11158_s9 + $0x69] sm:$0xff] }
 0x4b9   : > { %v8958_v27 = vsub.f32 0.0, %v14410_v15  ;;  %v14417_v1 = vadd.f32 %v14255_v0, %v8740_v19 }
 0x4ba   : > { %10957 = vrcp.f32 %v9053_v44 }
 0x4bb   : > { %v9012_v30 = vmul.f32 1.442695, %v8958_v27  ;;  %v8959_v14 = vsub.f32 0.0, %v14417_v1 }
 0x4bd   : > { %10959 = vpow2.f32 %v9012_v30  ;;  %v9014_v2 = vmul.f32 1.442695, %v8959_v14 }
 0x4bf   : > { %10961 = vpow2.f32 %v9014_v2 }
 0x4c1   : > { %v9170_v49 = vpop.permute.xlu0 %9169 }
 0x4c2   : > { %v10956_v41 = vpop.eup %10955  ;;  %v9261_v33 = vmul.f32 %v9170_v49, %v14275_v61 }
 0x4c3   : > { %v10403_v17 = vpop.f32.mrb[80].mxu1  ;;  %9201 = vrot.lane.b32.xlu0 %v10956_v41, %s11069_s11  ;;  %v9172_v0 = vpop.permute.xlu1 %9171 }
 0x4c4   : > { %v10958_v9 = vpop.eup %10957  ;;  %v10404_v22 = vpop.f32.mrb[81].mxu1  ;;  %v9293_v13 = vadd.f32 %v10065_v55, %v9261_v33  ;;  %v9262_v47 = vmul.f32 %v9172_v0, %v14280_v48 }
 0x4c5   : > { %v10405_v35 = vadd.f32 %v10404_v22, %v10403_v17  ;;  %v10406_v7 = vpop.f32.mrb[82].mxu1  ;;  %9203 = vrot.lane.b32.xlu1 %v10958_v9, %s11069_s11 }
 0x4c6   : > { %v10407_v31 = vpop.f32.mrb[83].mxu1  ;;  %9325 = vst.msk [vmem:[%s14383_s15 + $0x20] sm:$0xff] %vm1020_vm0, %v9293_v13  ;;  %v9294_v53 = vadd.f32 %v10066_v57, %v9262_v47 }
 0x4c7   : > { %v10960_v61 = vpop.eup %10959  ;;  %v8745_v56 = vadd.f32 %v10405_v35, %v14238_v42  ;;  %v10408_v5 = vadd.f32 %v10407_v31, %v10406_v7 }
 0x4c8   : > { %v9054_v26 = vadd.f32 1.0, %v10960_v61  ;;  %9326 = vst.msk [vmem:[%s14383_s15 + $0x28] sm:$0xff] %vm1020_vm0, %v9294_v53 }
 0x4c9   : > { %v10962_v32 = vpop.eup %10961  ;;  %v14432_v58 = vadd.f32 %v14285_v59, %v8745_v56  ;;  %v8748_v48 = vadd.f32 %v10408_v5, %v14238_v42  ;;  %v10067_v59 = vld [vmem:[%s11158_s9 + $0x61] sm:$0xff]  ;;  %v10069_v56 = vld [vmem:[%s11158_s9 + $0x79] sm:$0xff] }
 0x4ca   : > { %10963 = vrcp.f32 %v9054_v26  ;;  %v9055_v11 = vadd.f32 1.0, %v10962_v32  ;;  %v10070_v32 = vld [vmem:[%s11158_s9 + $0x81] sm:$0xff] }
 0x4cb   : > { %v8960_v51 = vsub.f32 0.0, %v14432_v58  ;;  %v14437_v50 = vadd.f32 %v14290_v36, %v8748_v48 }
 0x4cc   : > { %10965 = vrcp.f32 %v9055_v11 }
 0x4cd   : > { %v9016_v60 = vmul.f32 1.442695, %v8960_v51  ;;  %v8961_v6 = vsub.f32 0.0, %v14437_v50 }
 0x4cf   : > { %10967 = vpow2.f32 %v9016_v60  ;;  %v9018_v16 = vmul.f32 1.442695, %v8961_v6 }
 0x4d1   : > { %10969 = vpow2.f32 %v9018_v16 }
 0x4d3   : > { %v9174_v63 = vpop.permute.xlu0 %9173 }
 0x4d4   : > { %v10964_v24 = vpop.eup %10963  ;;  %v9263_v52 = vmul.f32 %v9174_v63, %v14295_v4 }
 0x4d5   : > { %9205 = vrot.lane.b32.xlu0 %v10964_v24, %s11069_s11  ;;  %v9176_v40 = vpop.permute.xlu1 %9175 }
 0x4d6   : > { %v10966_v36 = vpop.eup %10965  ;;  %v10409_v18 = vpop.f32.mrb[84].mxu1  ;;  %v9295_v8 = vadd.f32 %v10067_v59, %v9263_v52  ;;  %v9264_v19 = vmul.f32 %v9176_v40, %v14300_v20 }
 0x4d7   : > { %v10410_v44 = vpop.f32.mrb[85].mxu1  ;;  %9207 = vrot.lane.b32.xlu1 %v10966_v36, %s11069_s11 }
 0x4d8   : > { %v10411_v27 = vadd.f32 %v10410_v44, %v10409_v18  ;;  %v10412_v30 = vpop.f32.mrb[86].mxu1  ;;  %9327 = vst.msk [vmem:[%s14383_s15 + $0x30] sm:$0xff] %vm1020_vm0, %v9295_v8  ;;  %v9296_v14 = vadd.f32 %v10068_v10, %v9264_v19 }
 0x4d9   : > { %v10968_v2 = vpop.eup %10967  ;;  %v10413_v4 = vpop.f32.mrb[87].mxu1 }
 0x4da   : > { %v9056_v55 = vadd.f32 1.0, %v10968_v2  ;;  %v8753_v49 = vadd.f32 %v10411_v27, %v14238_v42  ;;  %v10414_v41 = vadd.f32 %v10413_v4, %v10412_v30  ;;  %9328 = vst.msk [vmem:[%s14383_s15 + $0x38] sm:$0xff] %vm1020_vm0, %v9296_v14 }
 0x4db   : > { %v10970_v33 = vpop.eup %10969 }
 0x4dc   : > { %10971 = vrcp.f32 %v9056_v55  ;;  %v9057_v17 = vadd.f32 1.0, %v10970_v33  ;;  %v14452_v20 = vadd.f32 %v14283_v12, %v8753_v49  ;;  %v8756_v57 = vadd.f32 %v10414_v41, %v14238_v42  ;;  %v10071_v33 = vld [vmem:[%s11158_s9 + $0x91] sm:$0xff] }
 0x4de   : > { %10973 = vrcp.f32 %v9057_v17  ;;  %v8962_v0 = vsub.f32 0.0, %v14452_v20  ;;  %v14457_v9 = vadd.f32 %v14287_v29, %v8756_v57 }
 0x4df   : > { %v10415_v47 = vpop.f32.mrb[88].mxu1 }
 0x4e0   : > { %v9020_v22 = vmul.f32 1.442695, %v8962_v0  ;;  %v8963_v13 = vsub.f32 0.0, %v14457_v9  ;;  %v10416_v35 = vpop.f32.mrb[89].mxu1 }
 0x4e1   : > { %v10417_v31 = vadd.f32 %v10416_v35, %v10415_v47  ;;  %v10418_v12 = vpop.f32.mrb[90].mxu1 }
 0x4e2   : > { %10975 = vpow2.f32 %v9020_v22  ;;  %v9022_v7 = vmul.f32 1.442695, %v8963_v13  ;;  %v10419_v53 = vpop.f32.mrb[91].mxu1 }
 0x4e3   : > { %v10420_v61 = vadd.f32 %v10419_v53, %v10418_v12  ;;  %v8761_v19 = vadd.f32 %v10417_v31, %v14238_v42 }
 0x4e4   : > { %10977 = vpow2.f32 %v9022_v7  ;;  %v9178_v5 = vpop.permute.xlu0 %9177 }
 0x4e5   : > { %v9265_v29 = vmul.f32 %v9178_v5, %v14307_v3  ;;  %v8764_v4 = vadd.f32 %v10420_v61, %v14238_v42 }
 0x4e6   : > { %v10972_v26 = vpop.eup %10971  ;;  %v9180_v48 = vpop.permute.xlu1 %9179 }
 0x4e7   : > { %9209 = vrot.lane.b32.xlu0 %v10972_v26, %s11069_s11  ;;  %v9297_v51 = vadd.f32 %v10069_v56, %v9265_v29  ;;  %v9266_v60 = vmul.f32 %v9180_v48, %v14312_v23 }
 0x4e8   : > { %v10974_v11 = vpop.eup %10973 }
 0x4e9   : > { %9211 = vrot.lane.b32.xlu1 %v10974_v11, %s11069_s11  ;;  %9329 = vst.msk [vmem:[%s14383_s15 + $0x40] sm:$0xff] %vm1020_vm0, %v9297_v51  ;;  %v9298_v6 = vadd.f32 %v10070_v32, %v9266_v60 }
 0x4eb   : > { %9330 = vst.msk [vmem:[%s14383_s15 + $0x48] sm:$0xff] %vm1020_vm0, %v9298_v6 }
 0x4ec   : > { %v10976_v16 = vpop.eup %10975 }
 0x4ed   : > { %v9058_v59 = vadd.f32 1.0, %v10976_v16  ;;  %v10421_v63 = vpop.f32.mrb[92].mxu1 }
 0x4ee   : > { %v10978_v24 = vpop.eup %10977  ;;  %v10422_v3 = vpop.f32.mrb[93].mxu1 }
 0x4ef   : > { %10979 = vrcp.f32 %v9058_v59  ;;  %v9059_v52 = vadd.f32 1.0, %v10978_v24  ;;  %v10423_v10 = vadd.f32 %v10422_v3, %v10421_v63  ;;  %v10424_v40 = vpop.f32.mrb[94].mxu1  ;;  %v10074_v63 = vld [vmem:[%s11158_s9 + $0xb1] sm:$0xff] }
 0x4f0   : > { %v10425_v36 = vpop.f32.mrb[95].mxu1 }
 0x4f1   : > { %10981 = vrcp.f32 %v9059_v52  ;;  %v10426_v23 = vadd.f32 %v10425_v36, %v10424_v40  ;;  %v8769_v18 = vadd.f32 %v10423_v10, %v14238_v42 }
 0x4f3   : > { %v8772_v30 = vadd.f32 %v10426_v23, %v14238_v42  ;;  %v10072_v42 = vld [vmem:[%s11158_s9 + $0x99] sm:$0xff] }
 0x4f5   : > { %v10515_v8 = vpop.f32.mrb[96].mxu1 }
 0x4f6   : > { %v14472_v44 = vadd.f32 %v10515_v8, %v8769_v18  ;;  %v8921_v27 = vpop.f32.mrb[97].mxu1  ;;  %v10076_v18 = vld [vmem:[%s11158_s9 + $0xc9] sm:$0xff] }
 0x4f7   : > { %v14475_v14 = vadd.f32 %v8921_v27, %v8761_v19  ;;  %v10516_v2 = vpop.f32.mrb[98].mxu1  ;;  %v9182_v17 = vpop.permute.xlu0 %9181 }
 0x4f8   : > { %v8966_v55 = vsub.f32 0.0, %v14472_v44  ;;  %v14479_v49 = vadd.f32 %v10516_v2, %v8772_v30  ;;  %v8924_v41 = vpop.f32.mrb[99].mxu1  ;;  %v9267_v13 = vmul.f32 %v9182_v17, %v14319_v39 }
 0x4f9   : > { %v10980_v57 = vpop.eup %10979  ;;  %v8964_v0 = vsub.f32 0.0, %v14475_v14  ;;  %v14483_v22 = vadd.f32 %v8924_v41, %v8764_v4  ;;  %v9184_v7 = vpop.permute.xlu1 %9183 }
 0x4fa   : > { %v9028_v47 = vmul.f32 1.442695, %v8966_v55  ;;  %v8967_v35 = vsub.f32 0.0, %v14479_v49  ;;  %9213 = vrot.lane.b32.xlu0 %v10980_v57, %s11069_s11  ;;  %v9299_v61 = vadd.f32 %v10071_v33, %v9267_v13  ;;  %v9268_v56 = vmul.f32 %v9184_v7, %v14324_v45  ;;  %v10073_v45 = vld [vmem:[%s11158_s9 + $0xa9] sm:$0xff]  ;;  %v10078_v33 = vld [vmem:[%s11158_s9 + $0xe1] sm:$0xff] }
 0x4fb   : > { %v10982_v31 = vpop.eup %10981  ;;  %v9024_v12 = vmul.f32 1.442695, %v8964_v0  ;;  %v8965_v53 = vsub.f32 0.0, %v14483_v22 }
 0x4fc   : > { %10983 = vpow2.f32 %v9028_v47  ;;  %v9030_v5 = vmul.f32 1.442695, %v8967_v35  ;;  %9215 = vrot.lane.b32.xlu1 %v10982_v31, %s11069_s11  ;;  %9331 = vst.msk [vmem:[%s14383_s15 + $0x50] sm:$0xff] %vm1020_vm0, %v9299_v61  ;;  %v9300_v26 = vadd.f32 %v10072_v42, %v9268_v56  ;;  %v10079_v47 = vld [vmem:[%s11158_s9 + $0xf1] sm:$0xff]  ;;  %v10080_v42 = vld [vmem:[%s11158_s9 + $0xf9] sm:$0xff] }
 0x4fd   : > { %10985 = vpow2.f32 %v9024_v12  ;;  %v9026_v39 = vmul.f32 1.442695, %v8965_v53  ;;  %v10081_v53 = vld [vmem:[%s11158_s9 + $0x109] sm:$0xff] }
 0x4fe   : > { %10987 = vpow2.f32 %v9030_v5  ;;  %9332 = vst.msk [vmem:[%s14383_s15 + $0x58] sm:$0xff] %vm1020_vm0, %v9300_v26  ;;  %v10082_v5 = vld [vmem:[%s11158_s9 + $0x111] sm:$0xff] }
 0x4ff   : > { %10989 = vpow2.f32 %v9026_v39 }
 0x506   : > { %v10984_v29 = vpop.eup %10983 }
 0x507   : > { %v10986_v32 = vpop.eup %10985  ;;  %v9186_v51 = vpop.permute.xlu0 %9185  ;;  %v9062_v16 = vadd.f32 1.0, %v10984_v29  ;;  %v10083_v29 = vld [vmem:[%s11158_s9 + $0x121] sm:$0xff] }
 0x508   : > { %v10988_v48 = vpop.eup %10987  ;;  %v9060_v11 = vadd.f32 1.0, %v10986_v32  ;;  %v9269_v6 = vmul.f32 %v9186_v51, %v14331_v34  ;;  %v10075_v34 = vld [vmem:[%s11158_s9 + $0xc1] sm:$0xff] }
 0x509   : > { %v10990_v60 = vpop.eup %10989  ;;  %v9188_v24 = vpop.permute.xlu1 %9187  ;;  %v9063_v10 = vadd.f32 1.0, %v10988_v48 }
 0x50a   : > { %10991 = vrcp.f32 %v9060_v11  ;;  %v9061_v59 = vadd.f32 1.0, %v10990_v60  ;;  %v9301_v3 = vadd.f32 %v10073_v45, %v9269_v6  ;;  %v9270_v52 = vmul.f32 %v9188_v24, %v14336_v25  ;;  %v10084_v11 = vld [vmem:[%s11158_s9 + $0x129] sm:$0xff]  ;;  %v10085_v60 = vld [vmem:[%s11158_s9 + $0x139] sm:$0xff] }
 0x50c   : > { %10993 = vrcp.f32 %v9061_v59  ;;  %9333 = vst.msk [vmem:[%s14383_s15 + $0x60] sm:$0xff] %vm1020_vm0, %v9301_v3  ;;  %v9302_v40 = vadd.f32 %v10074_v63, %v9270_v52  ;;  %v10086_v59 = vld [vmem:[%s11158_s9 + $0x141] sm:$0xff]  ;;  %v10087_v3 = vld [vmem:[%s11158_s9 + $0x151] sm:$0xff] }
 0x50d   : > { %10995 = vrcp.f32 %v9062_v16 }
 0x50e   : > { %9334 = vst.msk [vmem:[%s14383_s15 + $0x68] sm:$0xff] %vm1020_vm0, %v9302_v40  ;;  %10997 = vrcp.f32 %v9063_v10  ;;  %v10088_v40 = vld [vmem:[%s11158_s9 + $0x159] sm:$0xff] }
 0x510   : > { %v9190_v36 = vpop.permute.xlu0 %9189 }
 0x511   : > { %v9271_v23 = vmul.f32 %v9190_v36, %v14341_v21  ;;  %v10077_v21 = vld [vmem:[%s11158_s9 + $0xd9] sm:$0xff] }
 0x512   : > { %v9192_v8 = vpop.permute.xlu1 %9191 }
 0x513   : > { %v9303_v25 = vadd.f32 %v10075_v34, %v9271_v23  ;;  %v9272_v27 = vmul.f32 %v9192_v8, %v14346_v46  ;;  %v10089_v23 = vld [vmem:[%s11158_s9 + $0x169] sm:$0xff] }
 0x514   : > { %v10992_v19 = vpop.eup %10991 }
 0x515   : > { %9217 = vrot.lane.b32.xlu0 %v10992_v19, %s11069_s11  ;;  %9335 = vst.msk [vmem:[%s14383_s15 + $0x70] sm:$0xff] %vm1020_vm0, %v9303_v25  ;;  %v9304_v2 = vadd.f32 %v10076_v18, %v9272_v27 }
 0x516   : > { %v10994_v30 = vpop.eup %10993 }
 0x517   : > { %9219 = vrot.lane.b32.xlu1 %v10994_v30, %s11069_s11  ;;  %v10996_v4 = vpop.eup %10995  ;;  %9336 = vst.msk [vmem:[%s14383_s15 + $0x78] sm:$0xff] %vm1020_vm0, %v9304_v2 }
 0x518   : > { %v9194_v55 = vpop.permute.xlu0 %9193  ;;  %v10998_v46 = vpop.eup %10997 }
 0x519   : > { %9221 = vrot.lane.b32.xlu0 %v10996_v4, %s11069_s11  ;;  %v9273_v41 = vmul.f32 %v9194_v55, %v14353_v43 }
 0x51a   : > { %v9196_v17 = vpop.permute.xlu1 %9195 }
 0x51b   : > { %9223 = vrot.lane.b32.xlu1 %v10998_v46, %s11069_s11  ;;  %v9305_v57 = vadd.f32 %v10077_v21, %v9273_v41  ;;  %v9274_v0 = vmul.f32 %v9196_v17, %v14358_v54  ;;  %s10184_s11 = sshll.u32 %s11126_s22, 12  ;;  %v10092_v21 = vld [vmem:[%s11158_s9 + $0x189] sm:$0xff]  ;;  %s14591_s22 = scalar_lea.sflag [#allocation7], %s215_s13 }
 0x51c   : > { %s14581_s25 = scalar_lea.hbm %s14637_s5, %s10184_s11 }
 0x51d   : > { %9337 = vst.msk [vmem:[%s14383_s15 + $0x80] sm:$0xff] %vm1020_vm0, %v9305_v57  ;;  %v9306_v13 = vadd.f32 %v10078_v33, %v9274_v0 }
 0x51f   : > { %9338 = vst.msk [vmem:[%s14383_s15 + $0x88] sm:$0xff] %vm1020_vm0, %v9306_v13 }
 0x522   : > { %v9198_v35 = vpop.permute.xlu0 %9197 }
 0x523   : > { %v9275_v43 = vmul.f32 %v9198_v35, %v14363_v62 }
 0x525   : > { %v9200_v7 = vpop.permute.xlu1 %9199  ;;  %v9307_v31 = vadd.f32 %v10079_v47, %v9275_v43 }
 0x526   : > { %v9276_v12 = vmul.f32 %v9200_v7, %v14368_v38 }
 0x527   : > { %9339 = vst.msk [vmem:[%s14383_s15 + $0x90] sm:$0xff] %vm1020_vm0, %v9307_v31 }
 0x528   : > { %v9308_v54 = vadd.f32 %v10080_v42, %v9276_v12 }
 0x52a   : > { %9340 = vst.msk [vmem:[%s14383_s15 + $0x98] sm:$0xff] %vm1020_vm0, %v9308_v54 }
 0x535   : > { %v9202_v61 = vpop.permute.xlu0 %9201 }
 0x536   : > { %v9277_v56 = vmul.f32 %v9202_v61, %v14388_v28 }
 0x537   : > { %v9204_v62 = vpop.permute.xlu1 %9203 }
 0x538   : > { %v9309_v39 = vadd.f32 %v10081_v53, %v9277_v56  ;;  %v9278_v26 = vmul.f32 %v9204_v62, %v14395_v37 }
 0x53a   : > { %9341 = vst.msk [vmem:[%s14383_s15 + $0xa0] sm:$0xff] %vm1020_vm0, %v9309_v39  ;;  %v9310_v38 = vadd.f32 %v10082_v5, %v9278_v26 }
 0x53c   : > { %9342 = vst.msk [vmem:[%s14383_s15 + $0xa8] sm:$0xff] %vm1020_vm0, %v9310_v38 }
 0x547   : > { %v9206_v32 = vpop.permute.xlu0 %9205 }
 0x548   : > { %v9279_v48 = vmul.f32 %v9206_v32, %v14410_v15 }
 0x549   : > { %v9208_v28 = vpop.permute.xlu1 %9207 }
 0x54a   : > { %v9311_v45 = vadd.f32 %v10083_v29, %v9279_v48  ;;  %v9280_v51 = vmul.f32 %v9208_v28, %v14417_v1 }
 0x54c   : > { %9343 = vst.msk [vmem:[%s14383_s15 + $0xb0] sm:$0xff] %vm1020_vm0, %v9311_v45  ;;  %v9312_v37 = vadd.f32 %v10084_v11, %v9280_v51 }
 0x54e   : > { %9344 = vst.msk [vmem:[%s14383_s15 + $0xb8] sm:$0xff] %vm1020_vm0, %v9312_v37 }
 0x559   : > { %v9210_v6 = vpop.permute.xlu0 %9209 }
 0x55a   : > { %v9281_v16 = vmul.f32 %v9210_v6, %v14432_v58 }
 0x55b   : > { %v9212_v15 = vpop.permute.xlu1 %9211 }
 0x55c   : > { %v9313_v63 = vadd.f32 %v10085_v60, %v9281_v16  ;;  %v9282_v24 = vmul.f32 %v9212_v15, %v14437_v50 }
 0x55e   : > { %9345 = vst.msk [vmem:[%s14383_s15 + $0xc0] sm:$0xff] %vm1020_vm0, %v9313_v63  ;;  %v9314_v1 = vadd.f32 %v10086_v59, %v9282_v24 }
 0x560   : > { %9346 = vst.msk [vmem:[%s14383_s15 + $0xc8] sm:$0xff] %vm1020_vm0, %v9314_v1 }
 0x56c   : > { %v9214_v52 = vpop.permute.xlu0 %9213 }
 0x56d   : > { %v9283_v10 = vmul.f32 %v9214_v52, %v14452_v20  ;;  %v10090_v20 = vld [vmem:[%s11158_s9 + $0x171] sm:$0xff] }
 0x56e   : > { %v9216_v58 = vpop.permute.xlu1 %9215 }
 0x56f   : > { %v9315_v34 = vadd.f32 %v10087_v3, %v9283_v10  ;;  %v9284_v36 = vmul.f32 %v9216_v58, %v14457_v9  ;;  %v10091_v9 = vld [vmem:[%s11158_s9 + $0x181] sm:$0xff]  ;;  %s11004_s9 = scalar_lea.vmem %s14583_s16, 4096 }
 0x570   : > { %p11005_p11 = scmp.ne.s32.totalorder %s14583_s16, %s11004_s9  ;;  %p11012_p1 = scmp.lt.s32.totalorder %s11010_s6, %s11004_s9 }
 0x571   : > { %9347 = vst.msk [vmem:[%s14383_s15 + $0xd0] sm:$0xff] %vm1020_vm0, %v9315_v34  ;;  %v9316_v50 = vadd.f32 %v10088_v40, %v9284_v36 }
 0x572   : > { %p11006_p12 = pnand %p11005_p11, %p11143_p5  ;;  %p11013_p2 = por %p11012_p1, %p11011_p0 }
 0x573   : > { %9348 = vst.msk [vmem:[%s14383_s15 + $0xd8] sm:$0xff] %vm1020_vm0, %v9316_v50 }
 0x574   : > { %p11007_p13 = pneg %p11006_p12 }
 0x576   : > { %p11014_p3 = pnand %p11013_p2, %p11007_p13 }
 0x587   : > { %v9218_v18 = vpop.permute.xlu0 %9217 }
 0x588   : > { %v9285_v8 = vmul.f32 %v9218_v18, %v14475_v14 }
 0x589   : > { %v9220_v19 = vpop.permute.xlu1 %9219 }
 0x58a   : > { %v9317_v25 = vadd.f32 %v10089_v23, %v9285_v8  ;;  %v9286_v27 = vmul.f32 %v9220_v19, %v14483_v22 }
 0x58b   : > { %v9222_v30 = vpop.permute.xlu0 %9221 }
 0x58c   : > { %9349 = vst.msk [vmem:[%s14383_s15 + $0xe0] sm:$0xff] %vm1020_vm0, %v9317_v25  ;;  %v9318_v2 = vadd.f32 %v10090_v20, %v9286_v27  ;;  %v9287_v4 = vmul.f32 %v9222_v30, %v14472_v44 }
 0x58d   : > { %v9224_v14 = vpop.permute.xlu1 %9223 }
 0x58e   : > { %9350 = vst.msk [vmem:[%s14383_s15 + $0xe8] sm:$0xff] %vm1020_vm0, %v9318_v2  ;;  %v9319_v55 = vadd.f32 %v10091_v9, %v9287_v4  ;;  %v9288_v46 = vmul.f32 %v9224_v14, %v14479_v49 }
 0x590   : > { %9351 = vst.msk [vmem:[%s14383_s15 + $0xf0] sm:$0xff] %vm1020_vm0, %v9319_v55  ;;  %v9320_v44 = vadd.f32 %v10092_v21, %v9288_v46 }
 0x592   : > { %9352 = vst.msk [vmem:[%s14383_s15 + $0xf8] sm:$0xff] %vm1020_vm0, %v9320_v44 }
 0x593   : > { %11017 = shalt.err (!%p11014_p3)
}
 0x594   : > { %s11018_s7 = scalar_lea.hbm %s14581_s25, 4096  ;;  %s11022_s12 = scalar_lea.hbm %s14637_s5, 8192 }
 0x595   : > { %p11019_p4 = scmp.ne.s32.totalorder %s14581_s25, %s11018_s7  ;;  %p11023_p9 = scmp.lt.u32.totalorder %s14581_s25, %s14637_s5 }
 0x596   : > { %p11024_p10 = scmp.lt.u32.totalorder %s11022_s12, %s11018_s7  ;;  %p11026_p12 = scmp.lt.u32.totalorder %s11018_s7, %s14581_s25 }
 0x597   : > { %p11020_p7 = pnand %p11019_p4, %p11143_p5 }
 0x598   : > { %p11025_p11 = por %p11024_p10, %p11023_p9 }
 0x599   : > { %p11021_p8 = pneg %p11020_p7 }
 0x59a   : > { %p11027_p13 = por %p11026_p12, %p11025_p11 }
 0x59c   : > { %p11028_p0 = pnand %p11027_p13, %p11021_p8 }
 0x59e   : > { %11031 = shalt.err (!%p11028_p0)
}
 0x59f   : > { %s11073_s15 = smov 128   ;;  %s11074_s11 = smov 8  }
 0x5a0   : > { %10522 = dma.vmem_to_hbm [thread:$0]  (%p11143_p5), %s14583_s16, 4096, %s14581_s25, %s14591_s22, %s11073_s15, %s11073_s15, %s11074_s11  }
 0x5a1 PF: > { %p10528_p1 = scmp.ge.s32.totalorder %s11066_s21, 2  ;;  %s9382_s17 = sand.u32 1, %s11054_s18  }
 0x5a2   : > { %s9383_s23 = scalar_lea.sflag [#allocation7], %s9382_s17 }
 0x5a3   : > { %p10525_p2 = pnand %p10528_p1, %p11147_p6 }
 0x5a5   : > { %11049 = dma.done.wait (!%p10525_p2), %s9383_s23, 4096  }
 0x5a6   : > { %11051 = vsyncadd (!%p10525_p2), %s9383_s23, 4294963200  ;;  %p15_p3 = scmp.ge.s32.totalorder %s11130_s24, 4   ;;  %s14652_s18 = smov %s11058_s19 }
 0x5a7   : > { %s14653_s19 = smov %s11062_s20  ;;  %s14654_s20 = smov %s11141_s27 }
 0x5a8   : > { %s14655_s21 = smov %s11130_s24  ;;  %17 = sbr.rel (!%p15_p3) target bundleno = 3 (0x3), region = 81 }
 0x5af   :  { %9388 = vsyncpa [#allocation7], 1 }
 0x5b0   :  { %9390 = vsyncpa [#allocation7 + $0x1], 1 }

</bundles_post_ra>
